<compile_context>
chip_gen: v5e
topology: v5e:2x2
jax: 0.10.0
libtpu: 0.0.40
codegen_flags: <defaults>
</compile_context>

<pallas_src>
import functools

import jax
import jax.numpy as jnp
from jax.experimental import pallas as pl
from jax.experimental.pallas import tpu as pltpu


def _round_up(x, m):
    return (x + m - 1) // m * m


# ----------------------------------------------------------------------------
# Fused BasicBlock kernel: one batch image per grid step.
# ----------------------------------------------------------------------------
def _basic_block_kernel(x_ref, w1_ref, b1_ref, w2_ref, b2_ref, m_ref,
                        o_ref, p1_ref, *, Wpp, M1, M2, Copad):
    # x_ref : (1, R1, Cpad)   bf16  input, zero-padded by 2 spatially,
    #                               rows flattened as (h * Wpp + w).
    # w*_ref: (9, Cpad, Copad) bf16 per-tap weights (BN scale folded in).
    # b*_ref: (1, Copad)       f32  folded BN bias.
    # m_ref : (M1, 1)          f32  conv2 zero-padding mask for conv1's act.
    # o_ref : (1, M2, Copad)   f32  output on the (H, W+4) grid.
    # p1_ref: (M1 + 8, Copad)  bf16 VMEM scratch for conv1's activation.
    xv = x_ref[0]                                        # (R1, Cpad) bf16

    # ---- conv1 + BN1 + ReLU over the (H+2, W+4) shifted-flat grid ----------
    acc1 = jnp.zeros((M1, Copad), jnp.float32)
    for kh in range(3):
        for kw in range(3):
            off = kh * Wpp + kw
            acc1 = acc1 + jnp.dot(xv[off:off + M1, :],
                                  w1_ref[kh * 3 + kw],
                                  preferred_element_type=jnp.float32)
    act1 = jnp.maximum(acc1 + b1_ref[...], 0.0)
    # Zero the border ring (this *is* conv2's zero padding) plus the two
    # wrap-around garbage columns of the widened grid; keep result in VMEM.
    p1_ref[0:M1, :] = (act1 * m_ref[...]).astype(p1_ref.dtype)
    p1_ref[M1:, :] = jnp.zeros((p1_ref.shape[0] - M1, Copad), p1_ref.dtype)

    # ---- conv2 + BN2 + identity residual over the (H, W+4) grid ------------
    acc2 = jnp.zeros((M2, Copad), jnp.float32)
    for kh in range(3):
        for kw in range(3):
            off = kh * Wpp + kw
            acc2 = acc2 + jnp.dot(p1_ref[off:off + M2, :],
                                  w2_ref[kh * 3 + kw],
                                  preferred_element_type=jnp.float32)
    res = xv[2 * Wpp + 2:2 * Wpp + 2 + M2, :].astype(jnp.float32)
    o_ref[0] = (acc2 + b2_ref[...] + res).astype(o_ref.dtype)


# ----------------------------------------------------------------------------
# Wrapper glue (layout prep is plain JAX; all compute is inside the kernel).
# ----------------------------------------------------------------------------
def _fold_bn(gamma, beta, mean, var, eps=1e-5):
    scale = gamma / jnp.sqrt(var + eps)
    bias = beta - mean * scale
    return scale, bias


def _pack_weights(w_oihw, scale, cin_pad, cout_pad):
    """OIHW conv weight -> (tap=kh*3+kw, Cin_pad, Cout_pad) bf16, BN folded."""
    co, ci, kh, kw = w_oihw.shape
    wf = w_oihw * scale[:, None, None, None]                  # fold BN scale
    wf = jnp.transpose(wf, (2, 3, 1, 0)).reshape(kh * kw, ci, co)
    wf = jnp.pad(wf, ((0, 0), (0, cin_pad - ci), (0, cout_pad - co)))
    return wf.astype(jnp.bfloat16)


def basic_block_forward(x_nchw, params, *, stride=1, pad=1, dilation=1):
    assert stride == 1 and pad == 1 and dilation == 1, (
        "only the stride=1, pad=1, dilation=1, downsample=None config is "
        "implemented")  # TODO(synk): general stride/dilation/downsample.
    N, Ci, H, W = x_nchw.shape
    Co = params["w1"].shape[0]
    assert Ci == Co, "identity residual requires inplanes == planes"

    Cpad = _round_up(Ci, 128)
    Copad = _round_up(Co, 128)
    Hp, Wpp = H + 2, W + 4                  # conv1 grid height / common width
    M1 = Hp * Wpp                           # conv1 output rows (incl. ring)
    M2 = H * Wpp                            # conv2 output rows
    R1 = (H + 4) * Wpp + 8                  # flattened double-padded input rows
    R2 = M1 + 8                             # conv1-activation scratch rows

    # NCHW -> NHWC, zero-pad spatially by 2 and channels to Cpad, flatten.
    x_nhwc = jnp.transpose(x_nchw, (0, 2, 3, 1))
    xpp = jnp.pad(x_nhwc, ((0, 0), (2, 2), (2, 2), (0, Cpad - Ci)))
    xflat = xpp.reshape(N, (H + 4) * Wpp, Cpad)
    xflat = jnp.pad(xflat, ((0, 0), (0, R1 - (H + 4) * Wpp), (0, 0)))
    xflat = xflat.astype(jnp.bfloat16)

    # Fold BatchNorm (eval mode) into weights / bias.
    s1, b1 = _fold_bn(params["g1"], params["b1"], params["m1"], params["v1"])
    s2, b2 = _fold_bn(params["g2"], params["b2"], params["m2"], params["v2"])
    w1 = _pack_weights(params["w1"], s1, Cpad, Copad)         # (9,Cpad,Copad)
    w2 = _pack_weights(params["w2"], s2, Copad, Copad)        # (9,Copad,Copad)
    b1p = jnp.pad(b1, (0, Copad - Co)).reshape(1, Copad).astype(jnp.float32)
    b2p = jnp.pad(b2, (0, Copad - Co)).reshape(1, Copad).astype(jnp.float32)

    # Mask that zeroes conv1's border ring (emulates conv2's zero padding)
    # and the 2 wrap-around garbage columns of the widened grid.
    hh = jnp.arange(Hp)
    ww = jnp.arange(Wpp)
    mask = ((hh[:, None] >= 1) & (hh[:, None] <= H) &
            (ww[None, :] >= 1) & (ww[None, :] <= W))
    mask = mask.astype(jnp.float32).reshape(M1, 1)

    kernel = functools.partial(_basic_block_kernel, Wpp=Wpp, M1=M1, M2=M2,
                               Copad=Copad)

    flops = 2 * N * (M1 + M2) * 9 * Cpad * Copad
    bytes_accessed = (xflat.size * 2 + w1.size * 2 + w2.size * 2
                      + b1p.size * 4 + b2p.size * 4 + mask.size * 4
                      + N * M2 * Copad * 4)

    out = pl.pallas_call(
        kernel,
        out_shape=jax.ShapeDtypeStruct((N, M2, Copad), jnp.float32),
        grid_spec=pltpu.PrefetchScalarGridSpec(
            num_scalar_prefetch=0,
            grid=(N,),
            in_specs=[
                pl.BlockSpec((1, R1, Cpad), lambda b: (b, 0, 0)),    # x
                pl.BlockSpec((9, Cpad, Copad), lambda b: (0, 0, 0)),  # w1
                pl.BlockSpec((1, Copad), lambda b: (0, 0)),           # b1
                pl.BlockSpec((9, Copad, Copad), lambda b: (0, 0, 0)),  # w2
                pl.BlockSpec((1, Copad), lambda b: (0, 0)),           # b2
                pl.BlockSpec((M1, 1), lambda b: (0, 0)),              # mask
            ],
            out_specs=pl.BlockSpec((1, M2, Copad), lambda b: (b, 0, 0)),
            scratch_shapes=[pltpu.VMEM((R2, Copad), jnp.bfloat16)],
        ),
        compiler_params=pltpu.CompilerParams(
            dimension_semantics=("parallel",),
            vmem_limit_bytes=32 * 1024 * 1024),
        cost_estimate=pl.CostEstimate(flops=flops, transcendentals=0,
                                      bytes_accessed=bytes_accessed),
    )(xflat, w1, b1p, w2, b2p, mask)

    # (N, H*Wpp, Copad) -> crop the widened columns / padded channels -> NCHW.
    out = out.reshape(N, H, Wpp, Copad)[:, :, :W, :Co]
    return jnp.transpose(out, (0, 3, 1, 2))


# ----------------------------------------------------------------------------
# Pure-JAX reference (same semantics) for correctness checking.
# ----------------------------------------------------------------------------
def _ref_convbn(x, w, g, b, m, v, stride, pad, dilation, eps=1e-5):
    y = jax.lax.conv_general_dilated(
        x, w, window_strides=(stride, stride),
        padding=[(pad, pad), (pad, pad)],
        rhs_dilation=(dilation, dilation),
        dimension_numbers=("NCHW", "OIHW", "NCHW"))
    scale = (g / jnp.sqrt(v + eps)).reshape(1, -1, 1, 1)
    bias = (b - m * g / jnp.sqrt(v + eps)).reshape(1, -1, 1, 1)
    return y * scale + bias


def basic_block_reference(x, params, *, stride=1, pad=1, dilation=1):
    out = _ref_convbn(x, params["w1"], params["g1"], params["b1"],
                      params["m1"], params["v1"], stride, pad, dilation)
    out = jnp.maximum(out, 0.0)
    out = _ref_convbn(out, params["w2"], params["g2"], params["b2"],
                      params["m2"], params["v2"], 1, pad, dilation)
    return out + x


# ----------------------------------------------------------------------------
if __name__ == "__main__":
    key = jax.random.PRNGKey(0)
    inplanes = planes = 8            # downsample=None requires inplanes==planes
    Nb, H, W = 2, 16, 16

    ks = jax.random.split(key, 12)
    params = {
        "w1": 0.1 * jax.random.normal(ks[0], (planes, inplanes, 3, 3), jnp.float32),
        "g1": 1.0 + 0.1 * jax.random.normal(ks[1], (planes,), jnp.float32),
        "b1": 0.1 * jax.random.normal(ks[2], (planes,), jnp.float32),
        "m1": 0.05 * jax.random.normal(ks[3], (planes,), jnp.float32),
        "v1": 0.5 + jnp.abs(jax.random.normal(ks[4], (planes,), jnp.float32)),
        "w2": 0.1 * jax.random.normal(ks[5], (planes, planes, 3, 3), jnp.float32),
        "g2": 1.0 + 0.1 * jax.random.normal(ks[6], (planes,), jnp.float32),
        "b2": 0.1 * jax.random.normal(ks[7], (planes,), jnp.float32),
        "m2": 0.05 * jax.random.normal(ks[8], (planes,), jnp.float32),
        "v2": 0.5 + jnp.abs(jax.random.normal(ks[9], (planes,), jnp.float32)),
    }
    x = jax.random.normal(ks[10], (Nb, inplanes, H, W), jnp.float32)

    fwd = jax.jit(basic_block_forward)
    out = jax.block_until_ready(fwd(x, params))

    ref = jax.block_until_ready(basic_block_reference(x, params))

    assert out.shape == (Nb, planes, H, W), out.shape
    # bf16 activations/weights inside the kernel -> loosened tolerance.
    assert jnp.allclose(out, ref, rtol=5e-2, atol=5e-2), \
        float(jnp.max(jnp.abs(out - ref)))

    print("KERNEL_OK")
</pallas_src>

<mosaic_0001>
module attributes {stable_mosaic.version = 11 : i64} {
  func.func @_basic_block_kernel(%arg0: i32, %arg1: memref<1x408x128xbf16, #tpu.memory_space<vmem>>, %arg2: memref<9x128x128xbf16, #tpu.memory_space<vmem>>, %arg3: memref<1x128xf32, #tpu.memory_space<vmem>>, %arg4: memref<9x128x128xbf16, #tpu.memory_space<vmem>>, %arg5: memref<1x128xf32, #tpu.memory_space<vmem>>, %arg6: memref<360x1xf32, #tpu.memory_space<vmem>>, %arg7: memref<1x320x128xf32, #tpu.memory_space<vmem>>, %arg8: memref<368x128xbf16, #tpu.memory_space<vmem>>) attributes {dimension_semantics = [#tpu.dimension_semantics<parallel>], iteration_bounds = array<i64: 2>, scalar_prefetch = 0 : i64, scratch_operands = 1 : i64, tpu.core_type = #tpu.core_type<tc>, window_params = [{transform_indices = @transform_0, window_bounds = array<i64: 1, 408, 128>}, {pipeline_mode = #tpu.pipeline_mode<synchronous>, transform_indices = @transform_1, window_bounds = array<i64: 9, 128, 128>}, {pipeline_mode = #tpu.pipeline_mode<synchronous>, transform_indices = @transform_2, window_bounds = array<i64: 1, 128>}, {pipeline_mode = #tpu.pipeline_mode<synchronous>, transform_indices = @transform_3, window_bounds = array<i64: 9, 128, 128>}, {pipeline_mode = #tpu.pipeline_mode<synchronous>, transform_indices = @transform_4, window_bounds = array<i64: 1, 128>}, {pipeline_mode = #tpu.pipeline_mode<synchronous>, transform_indices = @transform_5, window_bounds = array<i64: 360, 1>}, {transform_indices = @transform_6, window_bounds = array<i64: 1, 320, 128>}]} {
    %c0 = arith.constant 0 : index
    %c0_0 = arith.constant 0 : index
    %c0_1 = arith.constant 0 : index
    %0 = vector.load %arg1[%c0, %c0_0, %c0_1] : memref<1x408x128xbf16, #tpu.memory_space<vmem>>, vector<1x408x128xbf16>
    %1 = vector.shape_cast %0 : vector<1x408x128xbf16> to vector<408x128xbf16>
    %cst = arith.constant 0.000000e+00 : f32
    %2 = vector.broadcast %cst : f32 to vector<360x128xf32>
    %3 = vector.extract_strided_slice %1 {offsets = [0, 0], sizes = [360, 128], strides = [1, 1]} : vector<408x128xbf16> to vector<360x128xbf16>
    %c0_2 = arith.constant 0 : index
    %c0_3 = arith.constant 0 : index
    %c0_4 = arith.constant 0 : index
    %4 = vector.load %arg2[%c0_2, %c0_3, %c0_4] : memref<9x128x128xbf16, #tpu.memory_space<vmem>>, vector<1x128x128xbf16>
    %5 = vector.shape_cast %4 : vector<1x128x128xbf16> to vector<128x128xbf16>
    %cst_5 = arith.constant dense<0.000000e+00> : vector<360x128xf32>
    %6 = tpu.matmul %3, %5, %cst_5 {dimension_numbers = #tpu.dot_dimension_numbers<[1], [0], [0], [1], [0, 0, 1, 1], [], []>} : vector<360x128xbf16>, vector<128x128xbf16>, vector<360x128xf32> -> vector<360x128xf32>
    %7 = arith.addf %2, %6 : vector<360x128xf32>
    %8 = vector.extract_strided_slice %1 {offsets = [1, 0], sizes = [360, 128], strides = [1, 1]} : vector<408x128xbf16> to vector<360x128xbf16>
    %c1 = arith.constant 1 : index
    %c0_6 = arith.constant 0 : index
    %c0_7 = arith.constant 0 : index
    %9 = vector.load %arg2[%c1, %c0_6, %c0_7] : memref<9x128x128xbf16, #tpu.memory_space<vmem>>, vector<1x128x128xbf16>
    %10 = vector.shape_cast %9 : vector<1x128x128xbf16> to vector<128x128xbf16>
    %cst_8 = arith.constant dense<0.000000e+00> : vector<360x128xf32>
    %11 = tpu.matmul %8, %10, %cst_8 {dimension_numbers = #tpu.dot_dimension_numbers<[1], [0], [0], [1], [0, 0, 1, 1], [], []>} : vector<360x128xbf16>, vector<128x128xbf16>, vector<360x128xf32> -> vector<360x128xf32>
    %12 = arith.addf %7, %11 : vector<360x128xf32>
    %13 = vector.extract_strided_slice %1 {offsets = [2, 0], sizes = [360, 128], strides = [1, 1]} : vector<408x128xbf16> to vector<360x128xbf16>
    %c2 = arith.constant 2 : index
    %c0_9 = arith.constant 0 : index
    %c0_10 = arith.constant 0 : index
    %14 = vector.load %arg2[%c2, %c0_9, %c0_10] : memref<9x128x128xbf16, #tpu.memory_space<vmem>>, vector<1x128x128xbf16>
    %15 = vector.shape_cast %14 : vector<1x128x128xbf16> to vector<128x128xbf16>
    %cst_11 = arith.constant dense<0.000000e+00> : vector<360x128xf32>
    %16 = tpu.matmul %13, %15, %cst_11 {dimension_numbers = #tpu.dot_dimension_numbers<[1], [0], [0], [1], [0, 0, 1, 1], [], []>} : vector<360x128xbf16>, vector<128x128xbf16>, vector<360x128xf32> -> vector<360x128xf32>
    %17 = arith.addf %12, %16 : vector<360x128xf32>
    %18 = vector.extract_strided_slice %1 {offsets = [20, 0], sizes = [360, 128], strides = [1, 1]} : vector<408x128xbf16> to vector<360x128xbf16>
    %c3 = arith.constant 3 : index
    %c0_12 = arith.constant 0 : index
    %c0_13 = arith.constant 0 : index
    %19 = vector.load %arg2[%c3, %c0_12, %c0_13] : memref<9x128x128xbf16, #tpu.memory_space<vmem>>, vector<1x128x128xbf16>
    %20 = vector.shape_cast %19 : vector<1x128x128xbf16> to vector<128x128xbf16>
    %cst_14 = arith.constant dense<0.000000e+00> : vector<360x128xf32>
    %21 = tpu.matmul %18, %20, %cst_14 {dimension_numbers = #tpu.dot_dimension_numbers<[1], [0], [0], [1], [0, 0, 1, 1], [], []>} : vector<360x128xbf16>, vector<128x128xbf16>, vector<360x128xf32> -> vector<360x128xf32>
    %22 = arith.addf %17, %21 : vector<360x128xf32>
    %23 = vector.extract_strided_slice %1 {offsets = [21, 0], sizes = [360, 128], strides = [1, 1]} : vector<408x128xbf16> to vector<360x128xbf16>
    %c4 = arith.constant 4 : index
    %c0_15 = arith.constant 0 : index
    %c0_16 = arith.constant 0 : index
    %24 = vector.load %arg2[%c4, %c0_15, %c0_16] : memref<9x128x128xbf16, #tpu.memory_space<vmem>>, vector<1x128x128xbf16>
    %25 = vector.shape_cast %24 : vector<1x128x128xbf16> to vector<128x128xbf16>
    %cst_17 = arith.constant dense<0.000000e+00> : vector<360x128xf32>
    %26 = tpu.matmul %23, %25, %cst_17 {dimension_numbers = #tpu.dot_dimension_numbers<[1], [0], [0], [1], [0, 0, 1, 1], [], []>} : vector<360x128xbf16>, vector<128x128xbf16>, vector<360x128xf32> -> vector<360x128xf32>
    %27 = arith.addf %22, %26 : vector<360x128xf32>
    %28 = vector.extract_strided_slice %1 {offsets = [22, 0], sizes = [360, 128], strides = [1, 1]} : vector<408x128xbf16> to vector<360x128xbf16>
    %c5 = arith.constant 5 : index
    %c0_18 = arith.constant 0 : index
    %c0_19 = arith.constant 0 : index
    %29 = vector.load %arg2[%c5, %c0_18, %c0_19] : memref<9x128x128xbf16, #tpu.memory_space<vmem>>, vector<1x128x128xbf16>
    %30 = vector.shape_cast %29 : vector<1x128x128xbf16> to vector<128x128xbf16>
    %cst_20 = arith.constant dense<0.000000e+00> : vector<360x128xf32>
    %31 = tpu.matmul %28, %30, %cst_20 {dimension_numbers = #tpu.dot_dimension_numbers<[1], [0], [0], [1], [0, 0, 1, 1], [], []>} : vector<360x128xbf16>, vector<128x128xbf16>, vector<360x128xf32> -> vector<360x128xf32>
    %32 = arith.addf %27, %31 : vector<360x128xf32>
    %33 = vector.extract_strided_slice %1 {offsets = [40, 0], sizes = [360, 128], strides = [1, 1]} : vector<408x128xbf16> to vector<360x128xbf16>
    %c6 = arith.constant 6 : index
    %c0_21 = arith.constant 0 : index
    %c0_22 = arith.constant 0 : index
    %34 = vector.load %arg2[%c6, %c0_21, %c0_22] : memref<9x128x128xbf16, #tpu.memory_space<vmem>>, vector<1x128x128xbf16>
    %35 = vector.shape_cast %34 : vector<1x128x128xbf16> to vector<128x128xbf16>
    %cst_23 = arith.constant dense<0.000000e+00> : vector<360x128xf32>
    %36 = tpu.matmul %33, %35, %cst_23 {dimension_numbers = #tpu.dot_dimension_numbers<[1], [0], [0], [1], [0, 0, 1, 1], [], []>} : vector<360x128xbf16>, vector<128x128xbf16>, vector<360x128xf32> -> vector<360x128xf32>
    %37 = arith.addf %32, %36 : vector<360x128xf32>
    %38 = vector.extract_strided_slice %1 {offsets = [41, 0], sizes = [360, 128], strides = [1, 1]} : vector<408x128xbf16> to vector<360x128xbf16>
    %c7 = arith.constant 7 : index
    %c0_24 = arith.constant 0 : index
    %c0_25 = arith.constant 0 : index
    %39 = vector.load %arg2[%c7, %c0_24, %c0_25] : memref<9x128x128xbf16, #tpu.memory_space<vmem>>, vector<1x128x128xbf16>
    %40 = vector.shape_cast %39 : vector<1x128x128xbf16> to vector<128x128xbf16>
    %cst_26 = arith.constant dense<0.000000e+00> : vector<360x128xf32>
    %41 = tpu.matmul %38, %40, %cst_26 {dimension_numbers = #tpu.dot_dimension_numbers<[1], [0], [0], [1], [0, 0, 1, 1], [], []>} : vector<360x128xbf16>, vector<128x128xbf16>, vector<360x128xf32> -> vector<360x128xf32>
    %42 = arith.addf %37, %41 : vector<360x128xf32>
    %43 = vector.extract_strided_slice %1 {offsets = [42, 0], sizes = [360, 128], strides = [1, 1]} : vector<408x128xbf16> to vector<360x128xbf16>
    %c8 = arith.constant 8 : index
    %c0_27 = arith.constant 0 : index
    %c0_28 = arith.constant 0 : index
    %44 = vector.load %arg2[%c8, %c0_27, %c0_28] : memref<9x128x128xbf16, #tpu.memory_space<vmem>>, vector<1x128x128xbf16>
    %45 = vector.shape_cast %44 : vector<1x128x128xbf16> to vector<128x128xbf16>
    %cst_29 = arith.constant dense<0.000000e+00> : vector<360x128xf32>
    %46 = tpu.matmul %43, %45, %cst_29 {dimension_numbers = #tpu.dot_dimension_numbers<[1], [0], [0], [1], [0, 0, 1, 1], [], []>} : vector<360x128xbf16>, vector<128x128xbf16>, vector<360x128xf32> -> vector<360x128xf32>
    %47 = arith.addf %42, %46 : vector<360x128xf32>
    %c0_30 = arith.constant 0 : index
    %c0_31 = arith.constant 0 : index
    %48 = vector.load %arg3[%c0_30, %c0_31] : memref<1x128xf32, #tpu.memory_space<vmem>>, vector<1x128xf32>
    %49 = vector.broadcast %48 : vector<1x128xf32> to vector<360x128xf32>
    %50 = arith.addf %47, %49 : vector<360x128xf32>
    %cst_32 = arith.constant 0.000000e+00 : f32
    %51 = vector.broadcast %cst_32 : f32 to vector<360x128xf32>
    %52 = arith.maximumf %50, %51 : vector<360x128xf32>
    %c0_33 = arith.constant 0 : index
    %c0_34 = arith.constant 0 : index
    %53 = vector.load %arg6[%c0_33, %c0_34] : memref<360x1xf32, #tpu.memory_space<vmem>>, vector<360x1xf32>
    %54 = vector.broadcast %53 : vector<360x1xf32> to vector<360x128xf32>
    %55 = arith.mulf %52, %54 : vector<360x128xf32>
    %56 = arith.truncf %55 : vector<360x128xf32> to vector<360x128xbf16>
    %c0_35 = arith.constant 0 : index
    %c0_36 = arith.constant 0 : index
    %57 = vector.load %arg8[%c0_35, %c0_36] : memref<368x128xbf16, #tpu.memory_space<vmem>>, vector<360x128xbf16>
    tpu.vector_store %arg8[%c0_35, %c0_36], %56 {strides = array<i32>} : memref<368x128xbf16, #tpu.memory_space<vmem>>, vector<360x128xbf16>,
    %cst_37 = arith.constant 0.000000e+00 : bf16
    %58 = vector.broadcast %cst_37 : bf16 to vector<8x128xbf16>
    %c360 = arith.constant 360 : index
    %c0_38 = arith.constant 0 : index
    %59 = vector.load %arg8[%c360, %c0_38] : memref<368x128xbf16, #tpu.memory_space<vmem>>, vector<8x128xbf16>
    tpu.vector_store %arg8[%c360, %c0_38], %58 {strides = array<i32>} : memref<368x128xbf16, #tpu.memory_space<vmem>>, vector<8x128xbf16>,
    %cst_39 = arith.constant 0.000000e+00 : f32
    %60 = vector.broadcast %cst_39 : f32 to vector<320x128xf32>
    %c0_40 = arith.constant 0 : index
    %c0_41 = arith.constant 0 : index
    %61 = vector.load %arg8[%c0_40, %c0_41] : memref<368x128xbf16, #tpu.memory_space<vmem>>, vector<320x128xbf16>
    %c0_42 = arith.constant 0 : index
    %c0_43 = arith.constant 0 : index
    %c0_44 = arith.constant 0 : index
    %62 = vector.load %arg4[%c0_42, %c0_43, %c0_44] : memref<9x128x128xbf16, #tpu.memory_space<vmem>>, vector<1x128x128xbf16>
    %63 = vector.shape_cast %62 : vector<1x128x128xbf16> to vector<128x128xbf16>
    %cst_45 = arith.constant dense<0.000000e+00> : vector<320x128xf32>
    %64 = tpu.matmul %61, %63, %cst_45 {dimension_numbers = #tpu.dot_dimension_numbers<[1], [0], [0], [1], [0, 0, 1, 1], [], []>} : vector<320x128xbf16>, vector<128x128xbf16>, vector<320x128xf32> -> vector<320x128xf32>
    %65 = arith.addf %60, %64 : vector<320x128xf32>
    %c1_46 = arith.constant 1 : index
    %c0_47 = arith.constant 0 : index
    %66 = vector.load %arg8[%c1_46, %c0_47] : memref<368x128xbf16, #tpu.memory_space<vmem>>, vector<320x128xbf16>
    %c1_48 = arith.constant 1 : index
    %c0_49 = arith.constant 0 : index
    %c0_50 = arith.constant 0 : index
    %67 = vector.load %arg4[%c1_48, %c0_49, %c0_50] : memref<9x128x128xbf16, #tpu.memory_space<vmem>>, vector<1x128x128xbf16>
    %68 = vector.shape_cast %67 : vector<1x128x128xbf16> to vector<128x128xbf16>
    %cst_51 = arith.constant dense<0.000000e+00> : vector<320x128xf32>
    %69 = tpu.matmul %66, %68, %cst_51 {dimension_numbers = #tpu.dot_dimension_numbers<[1], [0], [0], [1], [0, 0, 1, 1], [], []>} : vector<320x128xbf16>, vector<128x128xbf16>, vector<320x128xf32> -> vector<320x128xf32>
    %70 = arith.addf %65, %69 : vector<320x128xf32>
    %c2_52 = arith.constant 2 : index
    %c0_53 = arith.constant 0 : index
    %71 = vector.load %arg8[%c2_52, %c0_53] : memref<368x128xbf16, #tpu.memory_space<vmem>>, vector<320x128xbf16>
    %c2_54 = arith.constant 2 : index
    %c0_55 = arith.constant 0 : index
    %c0_56 = arith.constant 0 : index
    %72 = vector.load %arg4[%c2_54, %c0_55, %c0_56] : memref<9x128x128xbf16, #tpu.memory_space<vmem>>, vector<1x128x128xbf16>
    %73 = vector.shape_cast %72 : vector<1x128x128xbf16> to vector<128x128xbf16>
    %cst_57 = arith.constant dense<0.000000e+00> : vector<320x128xf32>
    %74 = tpu.matmul %71, %73, %cst_57 {dimension_numbers = #tpu.dot_dimension_numbers<[1], [0], [0], [1], [0, 0, 1, 1], [], []>} : vector<320x128xbf16>, vector<128x128xbf16>, vector<320x128xf32> -> vector<320x128xf32>
    %75 = arith.addf %70, %74 : vector<320x128xf32>
    %c20 = arith.constant 20 : index
    %c0_58 = arith.constant 0 : index
    %76 = vector.load %arg8[%c20, %c0_58] : memref<368x128xbf16, #tpu.memory_space<vmem>>, vector<320x128xbf16>
    %c3_59 = arith.constant 3 : index
    %c0_60 = arith.constant 0 : index
    %c0_61 = arith.constant 0 : index
    %77 = vector.load %arg4[%c3_59, %c0_60, %c0_61] : memref<9x128x128xbf16, #tpu.memory_space<vmem>>, vector<1x128x128xbf16>
    %78 = vector.shape_cast %77 : vector<1x128x128xbf16> to vector<128x128xbf16>
    %cst_62 = arith.constant dense<0.000000e+00> : vector<320x128xf32>
    %79 = tpu.matmul %76, %78, %cst_62 {dimension_numbers = #tpu.dot_dimension_numbers<[1], [0], [0], [1], [0, 0, 1, 1], [], []>} : vector<320x128xbf16>, vector<128x128xbf16>, vector<320x128xf32> -> vector<320x128xf32>
    %80 = arith.addf %75, %79 : vector<320x128xf32>
    %c21 = arith.constant 21 : index
    %c0_63 = arith.constant 0 : index
    %81 = vector.load %arg8[%c21, %c0_63] : memref<368x128xbf16, #tpu.memory_space<vmem>>, vector<320x128xbf16>
    %c4_64 = arith.constant 4 : index
    %c0_65 = arith.constant 0 : index
    %c0_66 = arith.constant 0 : index
    %82 = vector.load %arg4[%c4_64, %c0_65, %c0_66] : memref<9x128x128xbf16, #tpu.memory_space<vmem>>, vector<1x128x128xbf16>
    %83 = vector.shape_cast %82 : vector<1x128x128xbf16> to vector<128x128xbf16>
    %cst_67 = arith.constant dense<0.000000e+00> : vector<320x128xf32>
    %84 = tpu.matmul %81, %83, %cst_67 {dimension_numbers = #tpu.dot_dimension_numbers<[1], [0], [0], [1], [0, 0, 1, 1], [], []>} : vector<320x128xbf16>, vector<128x128xbf16>, vector<320x128xf32> -> vector<320x128xf32>
    %85 = arith.addf %80, %84 : vector<320x128xf32>
    %c22 = arith.constant 22 : index
    %c0_68 = arith.constant 0 : index
    %86 = vector.load %arg8[%c22, %c0_68] : memref<368x128xbf16, #tpu.memory_space<vmem>>, vector<320x128xbf16>
    %c5_69 = arith.constant 5 : index
    %c0_70 = arith.constant 0 : index
    %c0_71 = arith.constant 0 : index
    %87 = vector.load %arg4[%c5_69, %c0_70, %c0_71] : memref<9x128x128xbf16, #tpu.memory_space<vmem>>, vector<1x128x128xbf16>
    %88 = vector.shape_cast %87 : vector<1x128x128xbf16> to vector<128x128xbf16>
    %cst_72 = arith.constant dense<0.000000e+00> : vector<320x128xf32>
    %89 = tpu.matmul %86, %88, %cst_72 {dimension_numbers = #tpu.dot_dimension_numbers<[1], [0], [0], [1], [0, 0, 1, 1], [], []>} : vector<320x128xbf16>, vector<128x128xbf16>, vector<320x128xf32> -> vector<320x128xf32>
    %90 = arith.addf %85, %89 : vector<320x128xf32>
    %c40 = arith.constant 40 : index
    %c0_73 = arith.constant 0 : index
    %91 = vector.load %arg8[%c40, %c0_73] : memref<368x128xbf16, #tpu.memory_space<vmem>>, vector<320x128xbf16>
    %c6_74 = arith.constant 6 : index
    %c0_75 = arith.constant 0 : index
    %c0_76 = arith.constant 0 : index
    %92 = vector.load %arg4[%c6_74, %c0_75, %c0_76] : memref<9x128x128xbf16, #tpu.memory_space<vmem>>, vector<1x128x128xbf16>
    %93 = vector.shape_cast %92 : vector<1x128x128xbf16> to vector<128x128xbf16>
    %cst_77 = arith.constant dense<0.000000e+00> : vector<320x128xf32>
    %94 = tpu.matmul %91, %93, %cst_77 {dimension_numbers = #tpu.dot_dimension_numbers<[1], [0], [0], [1], [0, 0, 1, 1], [], []>} : vector<320x128xbf16>, vector<128x128xbf16>, vector<320x128xf32> -> vector<320x128xf32>
    %95 = arith.addf %90, %94 : vector<320x128xf32>
    %c41 = arith.constant 41 : index
    %c0_78 = arith.constant 0 : index
    %96 = vector.load %arg8[%c41, %c0_78] : memref<368x128xbf16, #tpu.memory_space<vmem>>, vector<320x128xbf16>
    %c7_79 = arith.constant 7 : index
    %c0_80 = arith.constant 0 : index
    %c0_81 = arith.constant 0 : index
    %97 = vector.load %arg4[%c7_79, %c0_80, %c0_81] : memref<9x128x128xbf16, #tpu.memory_space<vmem>>, vector<1x128x128xbf16>
    %98 = vector.shape_cast %97 : vector<1x128x128xbf16> to vector<128x128xbf16>
    %cst_82 = arith.constant dense<0.000000e+00> : vector<320x128xf32>
    %99 = tpu.matmul %96, %98, %cst_82 {dimension_numbers = #tpu.dot_dimension_numbers<[1], [0], [0], [1], [0, 0, 1, 1], [], []>} : vector<320x128xbf16>, vector<128x128xbf16>, vector<320x128xf32> -> vector<320x128xf32>
    %100 = arith.addf %95, %99 : vector<320x128xf32>
    %c42 = arith.constant 42 : index
    %c0_83 = arith.constant 0 : index
    %101 = vector.load %arg8[%c42, %c0_83] : memref<368x128xbf16, #tpu.memory_space<vmem>>, vector<320x128xbf16>
    %c8_84 = arith.constant 8 : index
    %c0_85 = arith.constant 0 : index
    %c0_86 = arith.constant 0 : index
    %102 = vector.load %arg4[%c8_84, %c0_85, %c0_86] : memref<9x128x128xbf16, #tpu.memory_space<vmem>>, vector<1x128x128xbf16>
    %103 = vector.shape_cast %102 : vector<1x128x128xbf16> to vector<128x128xbf16>
    %cst_87 = arith.constant dense<0.000000e+00> : vector<320x128xf32>
    %104 = tpu.matmul %101, %103, %cst_87 {dimension_numbers = #tpu.dot_dimension_numbers<[1], [0], [0], [1], [0, 0, 1, 1], [], []>} : vector<320x128xbf16>, vector<128x128xbf16>, vector<320x128xf32> -> vector<320x128xf32>
    %105 = arith.addf %100, %104 : vector<320x128xf32>
    %106 = vector.extract_strided_slice %1 {offsets = [42, 0], sizes = [320, 128], strides = [1, 1]} : vector<408x128xbf16> to vector<320x128xbf16>
    %107 = arith.extf %106 : vector<320x128xbf16> to vector<320x128xf32>
    %c0_88 = arith.constant 0 : index
    %c0_89 = arith.constant 0 : index
    %108 = vector.load %arg5[%c0_88, %c0_89] : memref<1x128xf32, #tpu.memory_space<vmem>>, vector<1x128xf32>
    %109 = vector.broadcast %108 : vector<1x128xf32> to vector<320x128xf32>
    %110 = arith.addf %105, %109 : vector<320x128xf32>
    %111 = arith.addf %110, %107 : vector<320x128xf32>
    %c0_90 = arith.constant 0 : index
    %c0_91 = arith.constant 0 : index
    %c0_92 = arith.constant 0 : index
    %112 = vector.load %arg7[%c0_90, %c0_91, %c0_92] : memref<1x320x128xf32, #tpu.memory_space<vmem>>, vector<1x320x128xf32>
    %113 = vector.shape_cast %112 : vector<1x320x128xf32> to vector<320x128xf32>
    %114 = vector.shape_cast %111 : vector<320x128xf32> to vector<1x320x128xf32>
    tpu.vector_store %arg7[%c0_90, %c0_91, %c0_92], %114 {strides = array<i32>} : memref<1x320x128xf32, #tpu.memory_space<vmem>>, vector<1x320x128xf32>,
    return
  }
  func.func @transform_0(%arg0: i32) -> (i32, i32, i32) {
    %c0_i32 = arith.constant 0 : i32
    %c0_i32_0 = arith.constant 0 : i32
    %c0_i32_1 = arith.constant 0 : i32
    return %arg0, %c0_i32, %c0_i32_0 : i32, i32, i32
  }
  func.func @transform_1(%arg0: i32) -> (i32, i32, i32) {
    %c0_i32 = arith.constant 0 : i32
    %c0_i32_0 = arith.constant 0 : i32
    %c0_i32_1 = arith.constant 0 : i32
    %c0_i32_2 = arith.constant 0 : i32
    return %c0_i32, %c0_i32_0, %c0_i32_1 : i32, i32, i32
  }
  func.func @transform_2(%arg0: i32) -> (i32, i32) {
    %c0_i32 = arith.constant 0 : i32
    %c0_i32_0 = arith.constant 0 : i32
    %c0_i32_1 = arith.constant 0 : i32
    return %c0_i32, %c0_i32_0 : i32, i32
  }
  func.func @transform_3(%arg0: i32) -> (i32, i32, i32) {
    %c0_i32 = arith.constant 0 : i32
    %c0_i32_0 = arith.constant 0 : i32
    %c0_i32_1 = arith.constant 0 : i32
    %c0_i32_2 = arith.constant 0 : i32
    return %c0_i32, %c0_i32_0, %c0_i32_1 : i32, i32, i32
  }
  func.func @transform_4(%arg0: i32) -> (i32, i32) {
    %c0_i32 = arith.constant 0 : i32
    %c0_i32_0 = arith.constant 0 : i32
    %c0_i32_1 = arith.constant 0 : i32
    return %c0_i32, %c0_i32_0 : i32, i32
  }
  func.func @transform_5(%arg0: i32) -> (i32, i32) {
    %c0_i32 = arith.constant 0 : i32
    %c0_i32_0 = arith.constant 0 : i32
    %c0_i32_1 = arith.constant 0 : i32
    return %c0_i32, %c0_i32_0 : i32, i32
  }
  func.func @transform_6(%arg0: i32) -> (i32, i32, i32) {
    %c0_i32 = arith.constant 0 : i32
    %c0_i32_0 = arith.constant 0 : i32
    %c0_i32_1 = arith.constant 0 : i32
    return %arg0, %c0_i32, %c0_i32_0 : i32, i32, i32
  }
}

</mosaic_0001>

<bundles_post_ra>
// kernel: basic_block_forward.1
= control target key start
LH: loop header
LB: loop body
LE: loop exit
PB: predicated region body
PF: predicated region fallthrough
CT: control target
= control target key end

     0   :  { %s9160_s21 = smov 0   ;;  %s12554_s0 = inlined_call_operand.vmem [shape: bf16[2,408,128], index: 0, kind: input, shape index: {}]   ;;  %s12555_s1 = inlined_call_operand.vmem [shape: bf16[9,128,128], index: 1, kind: input, shape index: {}]   ;;  %s12556_s2 = inlined_call_operand.vmem [shape: f32[1,128], index: 2, kind: input, shape index: {}]   ;;  %s12557_s3 = inlined_call_operand.vmem [shape: bf16[9,128,128], index: 3, kind: input, shape index: {}]   ;;  %s12558_s4 = inlined_call_operand.vmem [shape: f32[1,128], index: 4, kind: input, shape index: {}]   ;;  %s12559_s5 = inlined_call_operand.vmem [shape: f32[360,1], index: 5, kind: input, shape index: {}]   ;;  %s12560_s6 = inlined_call_operand.vmem [shape: f32[2,320,128], index: 6, kind: output, shape index: {}]  }
   0x1 LB: > { %s7491_s22 = sadd.s32 4294967295, %s9122_s21   ;;  %p7495_p0 = scmp.ge.s32.totalorder %s9122_s21, 1  ;;  %s9122_s21 = sphi %s9160_s21, %s16_s21  }
   0x2   : > { %p212_p1 = scmp.lt.s32.totalorder %s9122_s21, 3 }
   0x4   : > { %p213_p2 = pnand %p7495_p0, %p212_p1 }
   0x6   : > { %216 = sbr.rel (%p213_p2) target bundleno = 2188 (0x88c), region = 44 }
   0xb   : > { %v8665_v0 = vld [vmem:[%s12555_s1 + $0x78] sm:$0xff]  ;;  %p242_p3 = scmp.lt.s32.totalorder %s7491_s22, 1  ;;  %v8664_v2 = vld [vmem:[%s12555_s1 + $0x70] sm:$0xff]  ;;  %v8663_v5 = vld [vmem:[%s12555_s1 + $0x68] sm:$0xff]  ;;  %vm452_vm0 = vsmask.f32 7424 }
   0xc   : > { %v8657_v1 = vld [vmem:[%s12555_s1 + $0x38] sm:$0xff]  ;;  %707 = vmatpush.bf16.msra.mxu0 %v8665_v0  ;;  %v8656_v3 = vld [vmem:[%s12555_s1 + $0x30] sm:$0xff]  ;;  %v8655_v6 = vld [vmem:[%s12555_s1 + $0x28] sm:$0xff]  ;;  %vm1042_vm1 = vcmask 1046528   ;;  %vm1349_vm2 = vcmask 1045504   ;;  %vm2004_vm4 = vcmask 1044480  }
   0xd   : > { %902 = vmatpush.bf16.msra.mxu1 %v8657_v1  ;;  %9026 = vmatpush.bf16.msra.mxu3 %v8657_v1  ;;  %s13173_s22 = smov (!%p242_p3, %s7491_s22), 1  ;;  %v8673_v4 = vld [vmem:[%s12555_s1 + $0xb8] sm:$0xff]  ;;  %v8662_v7 = vld [vmem:[%s12555_s1 + $0x60] sm:$0xff]  ;;  %v8660_v12 = vld [vmem:[%s12555_s1 + $0x50] sm:$0xff]  ;;  %vm1651_vm3 = vsmask.f32 5376 }
   0xe   : > { %s9050_s13 = smul.u32 204, %s13173_s22  ;;  %9034 = vmatpush.bf16.msra.mxu2 %v8673_v4  ;;  %v8654_v8 = vld [vmem:[%s12555_s1 + $0x20] sm:$0xff]  ;;  %v8661_v9 = vld [vmem:[%s12555_s1 + $0x58] sm:$0xff]  ;;  %v8652_v13 = vld [vmem:[%s12555_s1 + $0x10] sm:$0xff] }
   0xf   : > { %v8653_v10 = vld [vmem:[%s12555_s1 + $0x18] sm:$0xff]  ;;  %v8659_v16 = vld [vmem:[%s12555_s1 + $0x48] sm:$0xff]  ;;  %v8658_v23 = vld [vmem:[%s12555_s1 + $0x40] sm:$0xff]  ;;  %s9051_s8 = smul.u32 320, %s13173_s22 }
  0x10   : > { %708 = vmatpush.bf16.msra.mxu0 %v8664_v2  ;;  %s9201_s20 = scalar_lea.vmem %s12554_s0, %s9050_s13  ;;  %v8651_v17 = vld [vmem:[%s12555_s1 + $0x8] sm:$0xff]  ;;  %v8650_v24 = vld [vmem:[%s12555_s1] sm:$0xff]  ;;  %v8672_v36 = vld [vmem:[%s12555_s1 + $0xb0] sm:$0xff] }
  0x11   : > { %903 = vmatpush.bf16.msra.mxu1 %v8656_v3  ;;  %9027 = vmatpush.bf16.msra.mxu3 %v8656_v3  ;;  %v8648_v11 = vld [vmem:[%s9201_s20] sm:$0xff]  ;;  %v9217_v14 = vld [vmem:[%s9201_s20 + $0x8] sm:$0xff]  ;;  %v9227_v21 = vld [vmem:[%s9201_s20 + $0x70] sm:$0xf]  ;;  %s12193_s11 = scalar_lea.vmem %s12560_s6, %s9051_s8 }
  0x12   : > { %v456_v15 = vshll.u32 %v8648_v11, 16  ;;  %v454_v18 = vshrl.u32 %v8648_v11, 16  ;;  %v12600_v20 = vshll.u32 %v9217_v14, 16  ;;  %12710 = vst [vmem:[#allocation3_spill] sm:$0xff] %v9227_v21  ;;  %v9230_v22 = vld [vmem:[%s9201_s20 + $0x74] sm:$0xf]  ;;  %v12572_v27 = vunpack.c.l.b16 %v9227_v21  ;;  %9035 = vmatpush.bf16.msra.mxu2 %v8672_v36 }
  0x13   : > { %12711 = vst [vmem:[#allocation4_spill] sm:$0xff] %v9230_v22  ;;  %v12569_v28 = vunpack.c.l.b16 %v9230_v22  ;;  %v257_v29 = vld [vmem:[%s9201_s20 + $0x10] sm:$0xf]  ;;  %v9244_v30 = vld [vmem:[%s9201_s20 + $0x14] sm:$0xf]  ;;  %v12599_v37 = vshrl.u32 %v9217_v14, 16 }
  0x14   : > { %709 = vmatpush.bf16.msra.mxu0 %v8663_v5  ;;  %v458_v19 = vrot.slane %v456_v15, 1  ;;  %v463_v26 = vrot.slane %v12600_v20, 1  ;;  %v387_v33 = vunpack.c.l.b16 %v257_v29  ;;  %v12596_v34 = vunpack.c.l.b16 %v9244_v30  ;;  %v9265_v39 = vld [vmem:[%s9201_s20 + $0x78] sm:$0xf]  ;;  %v9268_v40 = vld [vmem:[%s9201_s20 + $0x7c] sm:$0xf] }
  0x15   : > { %904 = vmatpush.bf16.msra.mxu1 %v8655_v6  ;;  %9028 = vmatpush.bf16.msra.mxu3 %v8655_v6  ;;  %v9251_v32 = vpack.c.b16 %v12569_v28, %v12572_v27  ;;  %12713 = vst [vmem:[#allocation6_spill] sm:$0xff] %v9265_v39  ;;  %v12568_v43 = vunpack.c.l.b16 %v9265_v39  ;;  %v12567_v44 = vunpack.c.l.b16 %v9268_v40  ;;  %v9277_v45 = vld [vmem:[%s9201_s20 + $0x18] sm:$0xf]  ;;  %v9280_v46 = vld [vmem:[%s9201_s20 + $0x1c] sm:$0xf] }
  0x16   : > { %v459_v25 = vor.u32 %v458_v19, %v454_v18  ;;  %v9257_v35 = vpack.c.b16 %v12596_v34, %v387_v33  ;;  %12714 = vst [vmem:[#allocation7_spill] sm:$0xff] %v9268_v40  ;;  %v467_v41 = vor.u32 %v12599_v37, %v463_v26  ;;  %v12595_v49 = vunpack.c.l.b16 %v9277_v45  ;;  %v9302_v54 = vld [vmem:[%s9201_s20 + $0x80] sm:$0xf]  ;;  %v9305_v55 = vld [vmem:[%s9201_s20 + $0x84] sm:$0xf]  ;;  %v8671_v19 = vld [vmem:[%s12555_s1 + $0xa8] sm:$0xff] }
  0x17   : > { %12712 = vst [vmem:[#allocation5_spill] sm:$0xff] %v9251_v32  ;;  %v9287_v48 = vpack.c.b16 %v12567_v44, %v12568_v43  ;;  %v12594_v50 = vunpack.c.l.b16 %v9280_v46  ;;  %v12566_v58 = vunpack.c.l.b16 %v9302_v54  ;;  %v12565_v59 = vunpack.c.l.b16 %v9305_v55  ;;  %v9314_v60 = vld [vmem:[%s9201_s20 + $0x20] sm:$0xf]  ;;  %v9317_v61 = vld [vmem:[%s9201_s20 + $0x24] sm:$0xf]  ;;  %9036 = vmatpush.bf16.msra.mxu2 %v8671_v19  ;;  %v8681_v28 = vld [vmem:[%s12555_s1 + $0xf8] sm:$0xff] }
  0x18   : > { %710 = vmatpush.bf16.msra.mxu0 %v8662_v7  ;;  %v464_v31 = vsel %vm452_vm0, %v459_v25, %v463_v26  ;;  %v12598_v38 = vshll.u32 %v9257_v35, 16  ;;  %v12597_v52 = vshrl.u32 %v9257_v35, 16  ;;  %12716 = vst [vmem:[#allocation9_spill] sm:$0xff] %v9302_v54  ;;  %v12593_v0 = vunpack.c.l.b16 %v9314_v60  ;;  %v9339_v5 = vld [vmem:[%s9201_s20 + $0x88] sm:$0xf] }
  0x19   : > { %905 = vmatpush.bf16.msra.mxu1 %v8654_v8  ;;  %9029 = vmatpush.bf16.msra.mxu3 %v8654_v8  ;;  %12715 = vst [vmem:[#allocation8_spill] sm:$0xff] %v9287_v48  ;;  %v9297_v51 = vpack.c.b16 %v12594_v50, %v12595_v49  ;;  %v9324_v63 = vpack.c.b16 %v12565_v59, %v12566_v58  ;;  %v12592_v1 = vunpack.c.l.b16 %v9317_v61  ;;  %v9342_v6 = vld [vmem:[%s9201_s20 + $0x8c] sm:$0xf]  ;;  %v9379_v25 = vld [vmem:[%s9201_s20 + $0x90] sm:$0xf]  ;;  %v8666_v50 = vld [vmem:[%s12555_s1 + $0x80] sm:$0xff] }
  0x1a   : > { %v471_v42 = vrot.slane %v12598_v38, 1  ;;  %12717 = vst [vmem:[#allocation10_spill] sm:$0xff] %v9305_v55  ;;  %v9382_v26 = vld [vmem:[%s9201_s20 + $0x94] sm:$0xf]  ;;  %v12562_v33 = vunpack.c.l.b16 %v9379_v25  ;;  %v9431_v59 = vld [vmem:[%s9201_s20 + $0x3c] sm:$0xf] }
  0x1b   : > { %v12585_v53 = vshll.u32 %v9297_v51, 16  ;;  %12718 = vst [vmem:[#allocation11_spill] sm:$0xff] %v9317_v61  ;;  %v9334_v2 = vpack.c.b16 %v12592_v1, %v12593_v0  ;;  %v12586_v3 = vshrl.u32 %v9297_v51, 16  ;;  %v12574_v43 = vunpack.c.l.b16 %v9431_v59  ;;  %v9535_v0 = vld [vmem:[%s9201_s20 + $0x50] sm:$0xf]  ;;  %v8675_v49 = vld [vmem:[%s12555_s1 + $0xc8] sm:$0xff] }
  0x1c   : > { %711 = vmatpush.bf16.msra.mxu0 %v8661_v9  ;;  %v472_v47 = vsel %vm452_vm0, %v467_v41, %v471_v42  ;;  %v475_v56 = vor.u32 %v12597_v52, %v471_v42  ;;  %12719 = vst [vmem:[#allocation12_spill] sm:$0xff] %v9324_v63  ;;  %v12564_v9 = vunpack.c.l.b16 %v9339_v5  ;;  %v9391_v41 = vld [vmem:[%s9201_s20 + $0x30] sm:$0xf]  ;;  %v9394_v42 = vld [vmem:[%s9201_s20 + $0x34] sm:$0xf]  ;;  %v12605_v34 = vunpack.c.l.b16 %v9535_v0 }
  0x1d   : > { %906 = vmatpush.bf16.msra.mxu1 %v8653_v10  ;;  %9030 = vmatpush.bf16.msra.mxu3 %v8653_v10  ;;  %v479_v57 = vrot.slane %v12585_v53, 1  ;;  %12720 = vst [vmem:[#allocation13_spill] sm:$0xff] %v9339_v5  ;;  %v12563_v10 = vunpack.c.l.b16 %v9342_v6  ;;  %v9651_v22 = vld [vmem:[%s9201_s20 + $0x68] sm:$0xf]  ;;  %v1353_v21 = vrot.slane %v9297_v51, 2 }
  0x1e   : > { %12721 = vst [vmem:[#allocation14_spill] sm:$0xff] %v9342_v6 }
  0x1f   : > { %v480_v62 = vsel %vm452_vm0, %v475_v56, %v479_v57  ;;  %v483_v7 = vor.u32 %v12586_v3, %v479_v57  ;;  %v9361_v15 = vpack.c.b16 %v12563_v10, %v12564_v9  ;;  %12725 = vst [vmem:[#allocation18_spill] sm:$0xff] %v9379_v25  ;;  %v12583_v57 = vunpack.c.l.b16 %v9391_v41  ;;  %v9428_v9 = vld [vmem:[%s9201_s20 + $0x38] sm:$0xf] }
  0x20   : > { %712 = vmatpush.bf16.msra.mxu0 %v8660_v12  ;;  %v9354_v12 = vld [vmem:[%s9201_s20 + $0x2c] sm:$0xf]  ;;  %12726 = vst [vmem:[#allocation19_spill] sm:$0xff] %v9382_v26  ;;  %v1350_v25 = vrot.slane %v9217_v14, 2 }
  0x21   : > { %907 = vmatpush.bf16.msra.mxu1 %v8652_v13  ;;  %9031 = vmatpush.bf16.msra.mxu3 %v8652_v13  ;;  %12723 = vst [vmem:[#allocation16_spill] sm:$0xff] %v9354_v12 }
  0x22   : > { %12724 = vst [vmem:[#allocation17_spill] sm:$0xff] %v9361_v15 }
  0x23   : > { %12727 = vst [vmem:[#allocation20_spill] sm:$0xff] %v9391_v41 }
  0x24   : > { %713 = vmatpush.bf16.msra.mxu0 %v8659_v16  ;;  %12728 = vst [vmem:[#allocation21_spill] sm:$0xff] %v9394_v42 }
  0x25   : > { %908 = vmatpush.bf16.msra.mxu1 %v8651_v17  ;;  %9032 = vmatpush.bf16.msra.mxu3 %v8651_v17  ;;  %v12584_v17 = vunpack.c.l.b16 %v9354_v12  ;;  %12732 = vst [vmem:[#allocation25_spill] sm:$0xff] %v9428_v9 }
  0x26   : > { %12733 = vst [vmem:[#allocation26_spill] sm:$0xff] %v9431_v59 }
  0x27   : > { %12742 = vst [vmem:[#allocation35_spill] sm:$0xff] %v9535_v0 }
  0x28   : > { %714 = vmatpush.bf16.msra.mxu0 %v8658_v23  ;;  %v12580_v23 = vshrl.u32 %v9334_v2, 16  ;;  %12753 = vst [vmem:[#allocation46_spill] sm:$0xff] %v9651_v22 }
  0x29   : > { %909 = vmatpush.bf16.msra.mxu1 %v8650_v24  ;;  %9033 = vmatpush.bf16.msra.mxu3 %v8650_v24 }
  0x2b   : > { %715 = vmatmul.bf16.vlgmr.msra.gmra.mxu0 %v464_v31 }
  0x2c   : > { %1159 = vmatpush.bf16.msrb.mxu0 %v8673_v4  ;;  %910 = vmatmul.bf16.vlgmr.msra.gmra.mxu1 %v8648_v11  ;;  %v12579_v4 = vshll.u32 %v9334_v2, 16  ;;  %v9351_v11 = vld [vmem:[%s9201_s20 + $0x28] sm:$0xf] }
  0x2d   : > { %980 = vmatmul.bf16.vlgmr.msra.gmra.mxu3 %v9251_v32  ;;  %12722 = vst [vmem:[#allocation15_spill] sm:$0xff] %v9351_v11  ;;  %v12589_v16 = vunpack.c.l.b16 %v9351_v11 }
  0x2e   : > { %v487_v8 = vrot.slane %v12579_v4, 1  ;;  %1466 = vmatpush.bf16.msrb.mxu3 %v8681_v28  ;;  %v8679_v28 = vld [vmem:[%s12555_s1 + $0xe8] sm:$0xff]  ;;  %v9480_v4 = vld [vmem:[%s9201_s20 + $0x44] sm:$0xf] }
  0x2f   : > { %v9371_v18 = vpack.c.b16 %v12584_v17, %v12589_v16  ;;  %12738 = vst [vmem:[#allocation31_spill] sm:$0xff] %v9480_v4  ;;  %v12590_v17 = vunpack.c.l.b16 %v9480_v4  ;;  %v8667_v16 = vld [vmem:[%s12555_s1 + $0x88] sm:$0xff] }
  0x30   : > { %1160 = vmatpush.bf16.msrb.mxu0 %v8672_v36  ;;  %v488_v13 = vsel %vm452_vm0, %v483_v7, %v487_v8  ;;  %v491_v29 = vor.u32 %v12580_v23, %v487_v8  ;;  %v12561_v36 = vunpack.c.l.b16 %v9382_v26  ;;  %v8669_v23 = vld [vmem:[%s12555_s1 + $0x98] sm:$0xff] }
  0x31   : > { %v12575_v24 = vshll.u32 %v9371_v18, 16  ;;  %v12576_v8 = vshrl.u32 %v9371_v18, 16 }
  0x32   : > { %v9401_v56 = vpack.c.b16 %v12561_v36, %v12562_v33 }
  0x33   : > { %v495_v31 = vrot.slane %v12575_v24, 1 }
  0x34   : > { %1161 = vmatpush.bf16.msrb.mxu0 %v8671_v19  ;;  %12729 = vst [vmem:[#allocation22_spill] sm:$0xff] %v9401_v56  ;;  %v9416_v19 = vld [vmem:[%s9201_s20 + $0x98] sm:$0xf] }
  0x35   : > { %12730 = vst [vmem:[#allocation23_spill] sm:$0xff] %v9416_v19  ;;  %v12571_v33 = vunpack.c.l.b16 %v9416_v19  ;;  %v9616_v19 = vld [vmem:[%s9201_s20 + $0x60] sm:$0xf] }
  0x36   : > { %12749 = vst [vmem:[#allocation42_spill] sm:$0xff] %v9616_v19 }
  0x3b   : > { %720 = vmatmul.bf16.gmra.mxu0 %v472_v47  ;;  %v496_v47 = vsel %vm452_vm0, %v491_v29, %v495_v31  ;;  %v9419_v29 = vld [vmem:[%s9201_s20 + $0x9c] sm:$0xf] }
  0x3c   : > { %915 = vmatmul.bf16.gmra.mxu1 %v9217_v14  ;;  %12731 = vst [vmem:[#allocation24_spill] sm:$0xff] %v9419_v29  ;;  %v12570_v10 = vunpack.c.l.b16 %v9419_v29 }
  0x3d   : > { %985 = vmatmul.bf16.gmra.mxu3 %v9287_v48 }
  0x3e   : > { %v9438_v44 = vpack.c.b16 %v12570_v10, %v12571_v33  ;;  %v8670_v10 = vld [vmem:[%s12555_s1 + $0xa0] sm:$0xff] }
  0x3f   : > { %9037 = vmatpush.bf16.msra.mxu2 %v8670_v10  ;;  %1162 = vmatpush.bf16.msrb.mxu0 %v8670_v10 }
  0x40   : > { %12734 = vst [vmem:[#allocation27_spill] sm:$0xff] %v9438_v44 }
  0x43   : > { %9038 = vmatpush.bf16.msra.mxu2 %v8669_v23  ;;  %1163 = vmatpush.bf16.msrb.mxu0 %v8669_v23  ;;  %v9516_v23 = vld [vmem:[%s9201_s20 + $0x48] sm:$0xf] }
  0x44   : > { %12739 = vst [vmem:[#allocation32_spill] sm:$0xff] %v9516_v23 }
  0x4b   : > { %725 = vmatmul.bf16.gmra.mxu0 %v480_v62  ;;  %v12578_v62 = vunpack.c.l.b16 %v9394_v42 }
  0x4c   : > { %920 = vmatmul.bf16.gmra.mxu1 %v9257_v35 }
  0x4d   : > { %990 = vmatmul.bf16.gmra.mxu3 %v9324_v63  ;;  %v9411_v7 = vpack.c.b16 %v12578_v62, %v12583_v57  ;;  %v9477_v62 = vld [vmem:[%s9201_s20 + $0x40] sm:$0xf] }
  0x4e   : > { %12737 = vst [vmem:[#allocation30_spill] sm:$0xff] %v9477_v62 }
  0x4f   : > { %v12581_v33 = vshrl.u32 %v9411_v7, 16 }
  0x5b   : > { %730 = vmatmul.bf16.gmra.mxu0 %v488_v13  ;;  %v12573_v13 = vshll.u32 %v9411_v7, 16 }
  0x5c   : > { %925 = vmatmul.bf16.gmra.mxu1 %v9297_v51 }
  0x5d   : > { %995 = vmatmul.bf16.gmra.mxu3 %v9361_v15  ;;  %v503_v36 = vrot.slane %v12573_v13, 1  ;;  %v9462_v13 = vld [vmem:[%s9201_s20 + $0xa0] sm:$0xf] }
  0x5e   : > { %12735 = vst [vmem:[#allocation28_spill] sm:$0xff] %v9462_v13 }
  0x5f   : > { %v507_v24 = vor.u32 %v12581_v33, %v503_v36  ;;  %v297_v33 = vld [vmem:[%s9201_s20 + $0xb0] sm:$0xf] }
  0x60   : > { %v9499_v3 = vunpack.c.l.b16 %v297_v33  ;;  %v9519_v33 = vld [vmem:[%s9201_s20 + $0x4c] sm:$0xf] }
  0x61   : > { %12740 = vst [vmem:[#allocation33_spill] sm:$0xff] %v9519_v33 }
  0x6b   : > { %735 = vmatmul.bf16.gmra.mxu0 %v496_v47  ;;  %v499_v47 = vor.u32 %v12576_v8, %v495_v31  ;;  %v12577_v31 = vunpack.c.l.b16 %v9428_v9  ;;  %v12588_v8 = vunpack.c.l.b16 %v9462_v13 }
  0x6c   : > { %930 = vmatmul.bf16.gmra.mxu1 %v9334_v2 }
  0x6d   : > { %1000 = vmatmul.bf16.gmra.mxu3 %v9401_v56  ;;  %v504_v58 = vsel %vm452_vm0, %v499_v47, %v503_v36  ;;  %v9451_v47 = vpack.c.b16 %v12574_v43, %v12577_v31  ;;  %v9465_v43 = vld [vmem:[%s9201_s20 + $0xa4] sm:$0xf] }
  0x6e   : > { %12736 = vst [vmem:[#allocation29_spill] sm:$0xff] %v9465_v43  ;;  %v12587_v31 = vunpack.c.l.b16 %v9465_v43  ;;  %v8678_v36 = vld [vmem:[%s12555_s1 + $0xe0] sm:$0xff] }
  0x6f   : > { %v12582_v27 = vshll.u32 %v9451_v47, 16 }
  0x70   : > { %v9495_v57 = vpack.c.b16 %v12587_v31, %v12588_v8  ;;  %v8677_v31 = vld [vmem:[%s12555_s1 + $0xd8] sm:$0xff]  ;;  %v12601_v8 = vunpack.c.l.b16 %v9519_v33 }
  0x71   : > { %v511_v10 = vrot.slane %v12582_v27, 1 }
  0x73   : > { %v512_v27 = vsel %vm452_vm0, %v507_v24, %v511_v10  ;;  %v8668_v24 = vld [vmem:[%s12555_s1 + $0x90] sm:$0xff] }
  0x74   : > { %9039 = vmatpush.bf16.msra.mxu2 %v8668_v24  ;;  %1164 = vmatpush.bf16.msrb.mxu0 %v8668_v24  ;;  %v9541_v24 = vld [vmem:[%s9201_s20 + $0xa8] sm:$0xf] }
  0x75   : > { %12744 = vst [vmem:[#allocation37_spill] sm:$0xff] %v9541_v24 }
  0x78   : > { %9040 = vmatpush.bf16.msra.mxu2 %v8667_v16  ;;  %1165 = vmatpush.bf16.msrb.mxu0 %v8667_v16  ;;  %v12608_v16 = vunpack.c.l.b16 %v9541_v24 }
  0x7b   : > { %740 = vmatmul.bf16.gmra.mxu0 %v504_v58  ;;  %v8680_v58 = vld [vmem:[%s12555_s1 + $0xf0] sm:$0xff] }
  0x7c   : > { %935 = vmatmul.bf16.gmra.mxu1 %v9371_v18  ;;  %1467 = vmatpush.bf16.msrb.mxu3 %v8680_v58  ;;  %v296_v58 = vld [vmem:[%s9201_s20 + $0xac] sm:$0xf] }
  0x7d   : > { %1005 = vmatmul.bf16.gmra.mxu3 %v9438_v44  ;;  %v426_v53 = vunpack.c.l.b16 %v296_v58  ;;  %9041 = vmatpush.bf16.msra.mxu2 %v8666_v50 }
  0x7e   : > { %1166 = vmatpush.bf16.msrb.mxu0 %v8666_v50 }
  0x7f   : > { %v9522_v58 = vpack.c.b16 %v9499_v3, %v426_v53 }
  0x80   : > { %1468 = vmatpush.bf16.msrb.mxu3 %v8679_v28  ;;  %v12591_v28 = vunpack.c.l.b16 %v9477_v62 }
  0x81   : > { %12741 = vst [vmem:[#allocation34_spill] sm:$0xff] %v9522_v58 }
  0x84   : > { %1469 = vmatpush.bf16.msrb.mxu3 %v8678_v36  ;;  %v12602_v36 = vunpack.c.l.b16 %v9516_v23 }
  0x86   : > { %v9555_v38 = vpack.c.b16 %v12601_v8, %v12602_v36 }
  0x88   : > { %1470 = vmatpush.bf16.msrb.mxu3 %v8677_v31  ;;  %v9538_v31 = vld [vmem:[%s9201_s20 + $0x54] sm:$0xf]  ;;  %v12607_v8 = vrot.slane %v9555_v38, 1 }
  0x89   : > { %12743 = vst [vmem:[#allocation36_spill] sm:$0xff] %v9538_v31  ;;  %v12603_v52 = vunpack.c.l.b16 %v9538_v31 }
  0x8b   : > { %745 = vmatmul.bf16.gmra.mxu0 %v512_v27  ;;  %v9513_v27 = vpack.c.b16 %v12590_v17, %v12591_v28  ;;  %v8676_v17 = vld [vmem:[%s12555_s1 + $0xd0] sm:$0xff]  ;;  %v12606_v28 = vshrl.u32 %v9451_v47, 16 }
  0x8c   : > { %940 = vmatmul.bf16.gmra.mxu1 %v9411_v7  ;;  %1471 = vmatpush.bf16.msrb.mxu3 %v8676_v17  ;;  %v9561_v17 = vpack.c.b16 %v12603_v52, %v12605_v34  ;;  %v12615_v34 = vshll.u32 %v9555_v38, 16 }
  0x8d   : > { %1010 = vmatmul.bf16.gmra.mxu3 %v9495_v57  ;;  %v12604_v1 = vshll.u32 %v9513_v27, 16  ;;  %v515_v37 = vor.u32 %v12606_v28, %v511_v10  ;;  %v8674_v10 = vld [vmem:[%s12555_s1 + $0xc0] sm:$0xff]  ;;  %v12616_v50 = vshrl.u32 %v9513_v27, 16  ;;  %v9586_v28 = vld [vmem:[%s9201_s20 + $0x58] sm:$0xf] }
  0x8e   : > { %12745 = vst [vmem:[#allocation38_spill] sm:$0xff] %v9561_v17  ;;  %v1062_v36 = vrot.slane %v9561_v17, 1  ;;  %v12626_v29 = vshll.u32 %v9561_v17, 16 }
  0x8f   : > { %v519_v20 = vrot.slane %v12604_v1, 1  ;;  %12746 = vst [vmem:[#allocation39_spill] sm:$0xff] %v9586_v28 }
  0x90   : > { %1472 = vmatpush.bf16.msrb.mxu3 %v8675_v49  ;;  %v1063_v52 = vsel %vm1042_vm1, %v12607_v8, %v1062_v36  ;;  %v9579_v49 = vpack.c.b16 %v426_v53, %v12608_v16  ;;  %v9589_v8 = vld [vmem:[%s9201_s20 + $0x5c] sm:$0xf] }
  0x91   : > { %v520_v1 = vsel %vm452_vm0, %v515_v37, %v519_v20  ;;  %1212 = vmatmul.bf16.vlgmr.msra.gmra.mxu2 %v1063_v52  ;;  %12747 = vst [vmem:[#allocation40_spill] sm:$0xff] %v9589_v8  ;;  %v12614_v37 = vunpack.c.l.b16 %v9586_v28  ;;  %v12613_v53 = vunpack.c.l.b16 %v9589_v8 }
  0x93   : > { %v9597_v52 = vpack.c.b16 %v12613_v53, %v12614_v37  ;;  %v830_v53 = vpack.c.b16 %v9499_v3, %v9499_v3 }
  0x94   : > { %1473 = vmatpush.bf16.msrb.mxu3 %v8674_v10  ;;  %v527_v10 = vrot.slane %v12615_v34, 1 }
  0x95   : > { %12748 = vst [vmem:[#allocation41_spill] sm:$0xff] %v9597_v52  ;;  %v1064_v16 = vrot.slane %v9597_v52, 1  ;;  %v12638_v39 = vshll.u32 %v9597_v52, 16 }
  0x97   : > { %v1065_v58 = vsel %vm1042_vm1, %v1062_v36, %v1064_v16  ;;  %v12625_v36 = vshrl.u32 %v9555_v38, 16 }
  0x9b   : > { %750 = vmatmul.bf16.gmra.mxu0 %v520_v1  ;;  %v523_v1 = vor.u32 %v12616_v50, %v519_v20 }
  0x9c   : > { %945 = vmatmul.bf16.gmra.mxu1 %v9451_v47 }
  0x9d   : > { %1015 = vmatmul.bf16.gmra.mxu3 %v9579_v49  ;;  %v528_v13 = vsel %vm452_vm0, %v523_v1, %v527_v10  ;;  %v9619_v1 = vld [vmem:[%s9201_s20 + $0x64] sm:$0xf] }
  0x9e   : > { %12750 = vst [vmem:[#allocation43_spill] sm:$0xff] %v9619_v1 }
  0xa1   : > { %1217 = vmatmul.bf16.gmra.mxu2 %v1065_v58 }
  0xa8   : > { %v716_v24 = vpop.f32.mrf.mxu0 }
  0xa9   : > { %v911_v43 = vpop.f32.mrf.mxu1 }
  0xaa   : > { %v9608_v37 = vadd.f32 %v911_v43, %v716_v24  ;;  %v12624_v43 = vunpack.c.l.b16 %v9616_v19  ;;  %v531_v24 = vor.u32 %v12625_v36, %v527_v10 }
  0xab   : > { %755 = vmatmul.bf16.gmra.mxu0 %v528_v13  ;;  %v12623_v13 = vunpack.c.l.b16 %v9619_v1 }
  0xac   : > { %950 = vmatmul.bf16.gmra.mxu1 %v9513_v27 }
  0xad   : > { %1020 = vmatmul.bf16.gmra.mxu3 %v830_v53  ;;  %v9629_v58 = vpack.c.b16 %v12623_v13, %v12624_v43  ;;  %v535_v53 = vrot.slane %v12626_v29, 1 }
  0xaf   : > { %12751 = vst [vmem:[#allocation44_spill] sm:$0xff] %v9629_v58  ;;  %v536_v10 = vsel %vm452_vm0, %v531_v24, %v535_v53  ;;  %v9654_v24 = vld [vmem:[%s9201_s20 + $0x6c] sm:$0xf]  ;;  %v12645_v8 = vshll.u32 %v9629_v58, 16 }
  0xb0   : > { %v9611_v20 = vpop.f32.mrf.mxu3  ;;  %v718_v34 = vpop.f32.mrf.mxu0  ;;  %12754 = vst [vmem:[#allocation47_spill] sm:$0xff] %v9654_v24 }
  0xb1   : > { %v913_v50 = vpop.f32.mrf.mxu1 }
  0xb2   : > { %v9621_v26 = vadd.f32 %v913_v50, %v718_v34  ;;  %v1351_v34 = vrot.slane %v9257_v35, 2  ;;  %v1066_v50 = vrot.slane %v9629_v58, 1 }
  0xb4   : > { %v1067_v5 = vsel %vm1042_vm1, %v1064_v16, %v1066_v50  ;;  %v1352_v29 = vsel %vm1349_vm2, %v1350_v25, %v1351_v34  ;;  %v12640_v16 = vshrl.u32 %v9561_v17, 16  ;;  %v12639_v25 = vunpack.c.l.b16 %v9651_v22 }
  0xb5   : > { %1222 = vmatmul.bf16.gmra.mxu2 %v1067_v5 }
  0xb8   : > { %v9638_v6 = vpop.f32.mrf.mxu3  ;;  %v721_v13 = vpop.f32.mrf.mxu0 }
  0xb9   : > { %v916_v43 = vpop.f32.mrf.mxu1 }
  0xba   : > { %v9642_v36 = vadd.f32 %v916_v43, %v721_v13  ;;  %v12637_v43 = vunpack.c.l.b16 %v9654_v24  ;;  %v539_v13 = vor.u32 %v12640_v16, %v535_v53  ;;  %v1354_v53 = vsel %vm1349_vm2, %v1351_v34, %v1353_v21 }
  0xbb   : > { %760 = vmatmul.bf16.gmra.mxu0 %v536_v10  ;;  %v543_v10 = vrot.slane %v12638_v39, 1  ;;  %v1070_v34 = vrot.slane %v9251_v32, 1 }
  0xbc   : > { %12752 = vst [vmem:[#allocation45_spill] sm:$0xff] %v9642_v36  ;;  %955 = vmatmul.bf16.gmra.mxu1 %v9555_v38 }
  0xbd   : > { %1474 = vmatmul.bf16.vlgmr.msrb.gmra.mxu3 %v1352_v29  ;;  %v9664_v29 = vpack.c.b16 %v12637_v43, %v12639_v25  ;;  %v544_v24 = vsel %vm452_vm0, %v539_v13, %v543_v10 }
  0xbf   : > { %12756 = vst [vmem:[#allocation49_spill] sm:$0xff] %v9664_v29  ;;  %v12652_v23 = vshll.u32 %v9664_v29, 16 }
  0xc0   : > { %v9646_v55 = vpop.f32.mrf.mxu3  ;;  %v723_v54 = vpop.f32.mrf.mxu0 }
  0xc1   : > { %v918_v40 = vpop.f32.mrf.mxu1 }
  0xc2   : > { %v9656_v5 = vadd.f32 %v918_v40, %v723_v54  ;;  %v1068_v40 = vrot.slane %v9664_v29, 1 }
  0xc4   : > { %12755 = vst [vmem:[#allocation48_spill] sm:$0xff] %v9656_v5  ;;  %v1069_v1 = vsel %vm1042_vm1, %v1066_v50, %v1068_v40  ;;  %v12646_v50 = vshrl.u32 %v9597_v52, 16  ;;  %v1071_v13 = vsel %vm1042_vm1, %v1068_v40, %v1070_v34  ;;  %v12653_v40 = vshrl.u32 %v9629_v58, 16 }
  0xc5   : > { %1227 = vmatmul.bf16.gmra.mxu2 %v1069_v1  ;;  %v1355_v1 = vrot.slane %v9334_v2, 2  ;;  %v12676_v5 = vshrl.u32 %v9438_v44, 16 }
  0xc8   : > { %v9672_v54 = vpop.f32.mrf.mxu3  ;;  %v726_v19 = vpop.f32.mrf.mxu0 }
  0xc9   : > { %12757 = vst [vmem:[#allocation50_spill] sm:$0xff] %v9672_v54  ;;  %v921_v22 = vpop.f32.mrf.mxu1 }
  0xca   : > { %v9676_v43 = vadd.f32 %v921_v22, %v726_v19  ;;  %v547_v22 = vor.u32 %v12646_v50, %v543_v10  ;;  %v551_v19 = vrot.slane %v12645_v8, 1  ;;  %v1356_v10 = vsel %vm1349_vm2, %v1353_v21, %v1355_v1 }
  0xcb   : > { %765 = vmatmul.bf16.gmra.mxu0 %v544_v24  ;;  %v559_v21 = vrot.slane %v12652_v23, 1 }
  0xcc   : > { %12758 = vst [vmem:[#allocation51_spill] sm:$0xff] %v9676_v43  ;;  %960 = vmatmul.bf16.gmra.mxu1 %v9561_v17  ;;  %v552_v31 = vsel %vm452_vm0, %v547_v22, %v551_v19  ;;  %v1072_v22 = vrot.slane %v9287_v48, 1 }
  0xcd   : > { %1479 = vmatmul.bf16.gmra.mxu3 %v1354_v53 }
  0xd0   : > { %v9680_v39 = vpop.f32.mrf.mxu3  ;;  %v9682_v25 = vpop.f32.mrf.mxu0 }
  0xd1   : > { %12759 = vst [vmem:[#allocation52_spill] sm:$0xff] %v9682_v25  ;;  %v9684_v16 = vpop.f32.mrf.mxu1 }
  0xd2   : > { %12760 = vst [vmem:[#allocation53_spill] sm:$0xff] %v9684_v16 }
  0xd5   : > { %1232 = vmatmul.bf16.gmra.mxu2 %v1071_v13 }
  0xd8   : > { %v9694_v24 = vpop.f32.mrf.mxu3  ;;  %v731_v53 = vpop.f32.mrf.mxu0 }
  0xd9   : > { %12761 = vst [vmem:[#allocation54_spill] sm:$0xff] %v9694_v24  ;;  %v926_v28 = vpop.f32.mrf.mxu1 }
  0xda   : > { %v9698_v0 = vadd.f32 %v926_v28, %v731_v53  ;;  %v555_v28 = vor.u32 %v12653_v40, %v551_v19  ;;  %v1073_v53 = vsel %vm1042_vm1, %v1070_v34, %v1072_v22  ;;  %v12655_v34 = vshrl.u32 %v9664_v29, 16 }
  0xdb   : > { %770 = vmatmul.bf16.gmra.mxu0 %v552_v31  ;;  %v1357_v31 = vrot.slane %v9371_v18, 2 }
  0xdc   : > { %12762 = vst [vmem:[#allocation55_spill] sm:$0xff] %v9698_v0  ;;  %965 = vmatmul.bf16.gmra.mxu1 %v9597_v52  ;;  %v560_v62 = vsel %vm452_vm0, %v555_v28, %v559_v21  ;;  %v1074_v28 = vrot.slane %v9324_v63, 1 }
  0xdd   : > { %1484 = vmatmul.bf16.gmra.mxu3 %v1356_v10  ;;  %v1358_v19 = vsel %vm1349_vm2, %v1355_v1, %v1357_v31 }
  0xe0   : > { %v9702_v8 = vpop.f32.mrf.mxu3  ;;  %v9704_v50 = vpop.f32.mrf.mxu0 }
  0xe1   : > { %12763 = vst [vmem:[#allocation56_spill] sm:$0xff] %v9704_v50  ;;  %v9706_v33 = vpop.f32.mrf.mxu1  ;;  %v12656_v50 = vshll.u32 %v9287_v48, 16 }
  0xe2   : > { %12764 = vst [vmem:[#allocation57_spill] sm:$0xff] %v9706_v33  ;;  %v12654_v33 = vshll.u32 %v9251_v32, 16 }
  0xe4   : > { %v567_v1 = vrot.slane %v12654_v33, 1 }
  0xe5   : > { %1237 = vmatmul.bf16.gmra.mxu2 %v1073_v53 }
  0xe8   : > { %v9716_v13 = vpop.f32.mrf.mxu3  ;;  %v736_v10 = vpop.f32.mrf.mxu0 }
  0xe9   : > { %12765 = vst [vmem:[#allocation58_spill] sm:$0xff] %v9716_v13  ;;  %v931_v4 = vpop.f32.mrf.mxu1 }
  0xea   : > { %v9720_v59 = vadd.f32 %v931_v4, %v736_v10  ;;  %v563_v4 = vor.u32 %v12655_v34, %v559_v21  ;;  %v1075_v10 = vsel %vm1042_vm1, %v1072_v22, %v1074_v28  ;;  %v12657_v22 = vshrl.u32 %v9251_v32, 16 }
  0xeb   : > { %775 = vmatmul.bf16.gmra.mxu0 %v560_v62  ;;  %v1359_v62 = vrot.slane %v9411_v7, 2 }
  0xec   : > { %12766 = vst [vmem:[#allocation59_spill] sm:$0xff] %v9720_v59  ;;  %970 = vmatmul.bf16.gmra.mxu1 %v9629_v58 }
  0xed   : > { %1489 = vmatmul.bf16.gmra.mxu3 %v1358_v19  ;;  %v1360_v21 = vsel %vm1349_vm2, %v1357_v31, %v1359_v62  ;;  %v575_v31 = vrot.slane %v12656_v50, 1 }
  0xf0   : > { %v9724_v23 = vpop.f32.mrf.mxu3  ;;  %v9726_v40 = vpop.f32.mrf.mxu0 }
  0xf1   : > { %12767 = vst [vmem:[#allocation60_spill] sm:$0xff] %v9726_v40  ;;  %v9728_v13 = vpop.f32.mrf.mxu1  ;;  %v568_v40 = vsel %vm452_vm0, %v563_v4, %v567_v1  ;;  %v1076_v4 = vrot.slane %v9361_v15, 1 }
  0xf2   : > { %12768 = vst [vmem:[#allocation61_spill] sm:$0xff] %v9728_v13 }
  0xf5   : > { %1242 = vmatmul.bf16.gmra.mxu2 %v1075_v10 }
  0xf8   : > { %v9738_v53 = vpop.f32.mrf.mxu3  ;;  %v741_v19 = vpop.f32.mrf.mxu0 }
  0xf9   : > { %12769 = vst [vmem:[#allocation62_spill] sm:$0xff] %v9738_v53  ;;  %v936_v13 = vpop.f32.mrf.mxu1 }
  0xfa   : > { %v9742_v59 = vadd.f32 %v936_v13, %v741_v19  ;;  %v571_v13 = vor.u32 %v12657_v22, %v567_v1  ;;  %v1077_v19 = vsel %vm1042_vm1, %v1074_v28, %v1076_v4  ;;  %v12660_v28 = vshll.u32 %v9324_v63, 16 }
  0xfb   : > { %780 = vmatmul.bf16.gmra.mxu0 %v568_v40  ;;  %v1361_v40 = vrot.slane %v9451_v47, 2 }
  0xfc   : > { %12770 = vst [vmem:[#allocation63_spill] sm:$0xff] %v9742_v59  ;;  %975 = vmatmul.bf16.gmra.mxu1 %v9664_v29 }
  0xfd   : > { %1494 = vmatmul.bf16.gmra.mxu3 %v1360_v21  ;;  %v1362_v1 = vsel %vm1349_vm2, %v1359_v62, %v1361_v40  ;;  %v1363_v62 = vrot.slane %v9513_v27, 2 }
 0x100   : > { %v9746_v33 = vpop.f32.mrf.mxu3  ;;  %v9748_v34 = vpop.f32.mrf.mxu0 }
 0x101   : > { %12771 = vst [vmem:[#allocation64_spill] sm:$0xff] %v9748_v34  ;;  %v9750_v53 = vpop.f32.mrf.mxu1  ;;  %v576_v34 = vsel %vm452_vm0, %v571_v13, %v575_v31 }
 0x102   : > { %12772 = vst [vmem:[#allocation65_spill] sm:$0xff] %v9750_v53 }
 0x105   : > { %1247 = vmatmul.bf16.gmra.mxu2 %v1077_v19 }
 0x108   : > { %v9760_v10 = vpop.f32.mrf.mxu3  ;;  %v746_v21 = vpop.f32.mrf.mxu0 }
 0x109   : > { %12773 = vst [vmem:[#allocation66_spill] sm:$0xff] %v9760_v10  ;;  %v941_v53 = vpop.f32.mrf.mxu1  ;;  %v12659_v10 = vshrl.u32 %v9287_v48, 16 }
 0x10a   : > { %v9764_v59 = vadd.f32 %v941_v53, %v746_v21  ;;  %v583_v53 = vrot.slane %v12660_v28, 1 }
 0x10b   : > { %785 = vmatmul.bf16.gmra.mxu0 %v576_v34  ;;  %v579_v13 = vor.u32 %v12659_v10, %v575_v31  ;;  %v1078_v34 = vrot.slane %v9401_v56, 1  ;;  %v1364_v31 = vsel %vm1349_vm2, %v1361_v40, %v1363_v62 }
 0x10c   : > { %12774 = vst [vmem:[#allocation67_spill] sm:$0xff] %v9764_v59 }
 0x10d   : > { %1499 = vmatmul.bf16.gmra.mxu3 %v1362_v1  ;;  %v1079_v21 = vsel %vm1042_vm1, %v1076_v4, %v1078_v34  ;;  %v12662_v4 = vshrl.u32 %v9324_v63, 16 }
 0x110   : > { %v9767_v50 = vpop.f32.mrf.mxu3  ;;  %v9769_v22 = vpop.f32.mrf.mxu0 }
 0x111   : > { %12775 = vst [vmem:[#allocation68_spill] sm:$0xff] %v9769_v22  ;;  %v9771_v9 = vpop.f32.mrf.mxu1  ;;  %v584_v22 = vsel %vm452_vm0, %v579_v13, %v583_v53  ;;  %v1080_v13 = vrot.slane %v9438_v44, 1 }
 0x112   : > { %12776 = vst [vmem:[#allocation69_spill] sm:$0xff] %v9771_v9 }
 0x114   : > { %v1213_v10 = vpop.f32.mrf.mxu2 }
 0x115   : > { %1252 = vmatmul.bf16.gmra.mxu2 %v1079_v21 }
 0x118   : > { %v9781_v19 = vpop.f32.mrf.mxu3  ;;  %v751_v1 = vpop.f32.mrf.mxu0 }
 0x119   : > { %12777 = vst [vmem:[#allocation70_spill] sm:$0xff] %v9781_v19  ;;  %v946_v9 = vpop.f32.mrf.mxu1  ;;  %v12663_v19 = vshll.u32 %v9361_v15, 16 }
 0x11a   : > { %v9785_v59 = vadd.f32 %v946_v9, %v751_v1  ;;  %v587_v9 = vor.u32 %v12662_v4, %v583_v53  ;;  %v1081_v1 = vsel %vm1042_vm1, %v1078_v34, %v1080_v13  ;;  %v12667_v34 = vshrl.u32 %v9361_v15, 16 }
 0x11b   : > { %790 = vmatmul.bf16.gmra.mxu0 %v584_v22  ;;  %v591_v40 = vrot.slane %v12663_v19, 1  ;;  %v1365_v22 = vrot.slane %v9555_v38, 2 }
 0x11c   : > { %12778 = vst [vmem:[#allocation71_spill] sm:$0xff] %v9785_v59  ;;  %v1215_v24 = vpop.f32.mrf.mxu2 }
 0x11d   : > { %1504 = vmatmul.bf16.gmra.mxu3 %v1364_v31  ;;  %v1366_v53 = vsel %vm1349_vm2, %v1363_v62, %v1365_v22 }
 0x120   : > { %v9788_v28 = vpop.f32.mrf.mxu3  ;;  %v9790_v42 = vpop.f32.mrf.mxu0 }
 0x121   : > { %12779 = vst [vmem:[#allocation72_spill] sm:$0xff] %v9790_v42  ;;  %v9792_v0 = vpop.f32.mrf.mxu1  ;;  %v592_v42 = vsel %vm452_vm0, %v587_v9, %v591_v40  ;;  %v1082_v9 = vrot.slane %v9495_v57, 1 }
 0x122   : > { %12780 = vst [vmem:[#allocation73_spill] sm:$0xff] %v9792_v0 }
 0x124   : > { %v1218_v4 = vpop.f32.mrf.mxu2 }
 0x125   : > { %1257 = vmatmul.bf16.gmra.mxu2 %v1081_v1 }
 0x128   : > { %v9802_v21 = vpop.f32.mrf.mxu3  ;;  %v756_v31 = vpop.f32.mrf.mxu0 }
 0x129   : > { %12781 = vst [vmem:[#allocation74_spill] sm:$0xff] %v9802_v21  ;;  %v951_v0 = vpop.f32.mrf.mxu1  ;;  %v12666_v21 = vshll.u32 %v9401_v56, 16 }
 0x12a   : > { %v9806_v59 = vadd.f32 %v951_v0, %v756_v31  ;;  %v595_v0 = vor.u32 %v12667_v34, %v591_v40  ;;  %v1083_v31 = vsel %vm1042_vm1, %v1080_v13, %v1082_v9  ;;  %v12671_v13 = vshll.u32 %v9438_v44, 16 }
 0x12b   : > { %795 = vmatmul.bf16.gmra.mxu0 %v592_v42  ;;  %v599_v62 = vrot.slane %v12666_v21, 1  ;;  %v1367_v42 = vrot.slane %v9561_v17, 2 }
 0x12c   : > { %12782 = vst [vmem:[#allocation75_spill] sm:$0xff] %v9806_v59  ;;  %v1220_v41 = vpop.f32.mrf.mxu2 }
 0x12d   : > { %1509 = vmatmul.bf16.gmra.mxu3 %v1366_v53  ;;  %v1368_v12 = vsel %vm1349_vm2, %v1365_v22, %v1367_v42 }
 0x130   : > { %v9809_v19 = vpop.f32.mrf.mxu3  ;;  %v9811_v16 = vpop.f32.mrf.mxu0 }
 0x131   : > { %12783 = vst [vmem:[#allocation76_spill] sm:$0xff] %v9811_v16  ;;  %v9813_v25 = vpop.f32.mrf.mxu1  ;;  %v600_v16 = vsel %vm452_vm0, %v595_v0, %v599_v62 }
 0x132   : > { %12784 = vst [vmem:[#allocation77_spill] sm:$0xff] %v9813_v25 }
 0x135   : > { %1262 = vmatmul.bf16.gmra.mxu2 %v1083_v31 }
 0x138   : > { %v1023_v1 = vpop.f32.mrf.mxu3  ;;  %v761_v53 = vpop.f32.mrf.mxu0 }
 0x139   : > { %v956_v25 = vpop.f32.mrf.mxu1  ;;  %v1223_v40 = vpop.f32.mrf.mxu2  ;;  %v12670_v1 = vshrl.u32 %v9401_v56, 16 }
 0x13a   : > { %v957_v59 = vadd.f32 %v956_v25, %v761_v53 }
 0x13b   : > { %800 = vmatmul.bf16.gmra.mxu0 %v600_v16  ;;  %v1369_v16 = vrot.slane %v9597_v52, 2 }
 0x13c   : > { %v9826_v43 = vadd.f32 %v1213_v10, %v957_v59  ;;  %v603_v59 = vor.u32 %v12670_v1, %v599_v62  ;;  %v1084_v10 = vrot.slane %v9579_v49, 1  ;;  %v9848_v62 = vld [vmem:[%s9201_s20 + $0xb4] sm:$0xf] }
 0x13d   : > { %1514 = vmatmul.bf16.gmra.mxu3 %v1368_v12  ;;  %v607_v12 = vrot.slane %v12671_v13, 1  ;;  %12787 = vst [vmem:[#allocation80_spill] sm:$0xff] %v9848_v62 }
 0x13e   : > { %v1085_v31 = vsel %vm1042_vm1, %v1082_v9, %v1084_v10 }
 0x140   : > { %v9828_v21 = vpop.f32.mrf.mxu3  ;;  %v763_v34 = vpop.f32.mrf.mxu0 }
 0x141   : > { %12785 = vst [vmem:[#allocation78_spill] sm:$0xff] %v9828_v21  ;;  %v958_v17 = vpop.f32.mrf.mxu1  ;;  %v9834_v25 = vpop.f32.mrf.mxu2  ;;  %v12674_v21 = vunpack.c.l.b16 %v9848_v62 }
 0x142   : > { %v959_v54 = vadd.f32 %v958_v17, %v763_v34  ;;  %v1370_v34 = vsel %vm1349_vm2, %v1367_v42, %v1369_v16 }
 0x143   : > { %v9860_v42 = vpack.c.b16 %v12674_v21, %v9499_v3 }
 0x144   : > { %v9832_v0 = vadd.f32 %v1215_v24, %v959_v54  ;;  %v608_v54 = vsel %vm452_vm0, %v603_v59, %v607_v12  ;;  %v12675_v59 = vshll.u32 %v9495_v57, 16 }
 0x145   : > { %1267 = vmatmul.bf16.gmra.mxu2 %v1085_v31 }
 0x148   : > { %v9842_v22 = vpop.f32.mrf.mxu3  ;;  %v766_v53 = vpop.f32.mrf.mxu0 }
 0x149   : > { %12786 = vst [vmem:[#allocation79_spill] sm:$0xff] %v9842_v22  ;;  %v961_v17 = vpop.f32.mrf.mxu1  ;;  %v1228_v13 = vpop.f32.mrf.mxu2 }
 0x14a   : > { %v962_v24 = vadd.f32 %v961_v17, %v766_v53  ;;  %v611_v17 = vor.u32 %v12676_v5, %v607_v12 }
 0x14b   : > { %805 = vmatmul.bf16.gmra.mxu0 %v608_v54  ;;  %v615_v54 = vrot.slane %v12675_v59, 1 }
 0x14c   : > { %v9850_v1 = vadd.f32 %v1218_v4, %v962_v24  ;;  %v1371_v24 = vrot.slane %v9629_v58, 2  ;;  %v12682_v58 = vshll.u32 %v9579_v49, 16 }
 0x14d   : > { %1519 = vmatmul.bf16.gmra.mxu3 %v1370_v34  ;;  %v1086_v34 = vrot.slane %v9860_v42, 1 }
 0x14f   : > { %v1087_v3 = vsel %vm1042_vm1, %v1084_v10, %v1086_v34  ;;  %v12683_v10 = vshrl.u32 %v9495_v57, 16 }
 0x150   : > { %v9853_v22 = vpop.f32.mrf.mxu3  ;;  %v768_v9 = vpop.f32.mrf.mxu0 }
 0x151   : > { %12788 = vst [vmem:[#allocation81_spill] sm:$0xff] %v9853_v22  ;;  %v963_v52 = vpop.f32.mrf.mxu1  ;;  %v9864_v53 = vpop.f32.mrf.mxu2 }
 0x152   : > { %v964_v4 = vadd.f32 %v963_v52, %v768_v9 }
 0x154   : > { %v9862_v31 = vadd.f32 %v1220_v41, %v964_v4  ;;  %v616_v41 = vsel %vm452_vm0, %v611_v17, %v615_v54  ;;  %v1372_v4 = vsel %vm1349_vm2, %v1369_v16, %v1371_v24  ;;  %v1373_v16 = vrot.slane %v9664_v29, 2 }
 0x155   : > { %1272 = vmatmul.bf16.gmra.mxu2 %v1087_v3  ;;  %v12686_v29 = vshll.u32 %v9860_v42, 16 }
 0x158   : > { %v9872_v22 = vpop.f32.mrf.mxu3  ;;  %v771_v21 = vpop.f32.mrf.mxu0 }
 0x159   : > { %12789 = vst [vmem:[#allocation82_spill] sm:$0xff] %v9872_v22  ;;  %v966_v52 = vpop.f32.mrf.mxu1  ;;  %v1233_v59 = vpop.f32.mrf.mxu2 }
 0x15a   : > { %v967_v9 = vadd.f32 %v966_v52, %v771_v21  ;;  %v619_v21 = vor.u32 %v12683_v10, %v615_v54 }
 0x15b   : > { %810 = vmatmul.bf16.gmra.mxu0 %v616_v41 }
 0x15c   : > { %v9877_v12 = vadd.f32 %v1223_v40, %v967_v9  ;;  %v623_v40 = vrot.slane %v12682_v58, 1 }
 0x15d   : > { %1524 = vmatmul.bf16.gmra.mxu3 %v1372_v4 }
 0x15e   : > { %v624_v9 = vsel %vm452_vm0, %v619_v21, %v623_v40 }
 0x160   : > { %v9879_v5 = vpop.f32.mrf.mxu3  ;;  %v9881_v62 = vpop.f32.mrf.mxu0 }
 0x161   : > { %12790 = vst [vmem:[#allocation83_spill] sm:$0xff] %v9879_v5  ;;  %v9883_v22 = vpop.f32.mrf.mxu1  ;;  %v9887_v17 = vpop.f32.mrf.mxu2  ;;  %v1374_v5 = vsel %vm1349_vm2, %v1371_v24, %v1373_v16 }
 0x165   : > { %1277 = vmatmul.bf16.gmra.mxu2 %v1086_v34 }
 0x168   : > { %v9894_v3 = vpop.f32.mrf.mxu3  ;;  %v776_v52 = vpop.f32.mrf.mxu0 }
 0x169   : > { %12791 = vst [vmem:[#allocation84_spill] sm:$0xff] %v9894_v3  ;;  %v971_v41 = vpop.f32.mrf.mxu1  ;;  %v1238_v61 = vpop.f32.mrf.mxu2  ;;  %v12687_v3 = vshrl.u32 %v9579_v49, 16 }
 0x16a   : > { %v972_v4 = vadd.f32 %v971_v41, %v776_v52 }
 0x16b   : > { %815 = vmatmul.bf16.gmra.mxu0 %v624_v9  ;;  %v627_v24 = vor.u32 %v12687_v3, %v623_v40  ;;  %v8689_v40 = vld [vmem:[%s12555_s1 + $0x138] sm:$0xff] }
 0x16c   : > { %v9898_v11 = vadd.f32 %v1228_v13, %v972_v4  ;;  %v631_v13 = vrot.slane %v12686_v29, 1  ;;  %1819 = vmatpush.bf16.msra.mxu0 %v8689_v40 }
 0x16d   : > { %1529 = vmatmul.bf16.gmra.mxu3 %v1374_v5  ;;  %v1375_v5 = vrot.slane %v9251_v32, 2 }
 0x16e   : > { %v632_v9 = vsel %vm452_vm0, %v627_v24, %v631_v13 }
 0x170   : > { %v9900_v54 = vpop.f32.mrf.mxu3  ;;  %v9902_v58 = vpop.f32.mrf.mxu0 }
 0x171   : > { %12792 = vst [vmem:[#allocation85_spill] sm:$0xff] %v9900_v54  ;;  %v9904_v10 = vpop.f32.mrf.mxu1  ;;  %v9908_v21 = vpop.f32.mrf.mxu2  ;;  %v1376_v54 = vsel %vm1349_vm2, %v1373_v16, %v1375_v5 }
 0x172   : > { %12793 = vst [vmem:[#allocation86_spill] sm:$0xff] %v9908_v21 }
 0x178   : > { %v9915_v34 = vpop.f32.mrf.mxu3  ;;  %v781_v52 = vpop.f32.mrf.mxu0 }
 0x179   : > { %12794 = vst [vmem:[#allocation87_spill] sm:$0xff] %v9915_v34  ;;  %v976_v41 = vpop.f32.mrf.mxu1  ;;  %v1243_v21 = vpop.f32.mrf.mxu2  ;;  %v12690_v34 = vshrl.u32 %v9860_v42, 16 }
 0x17a   : > { %v977_v4 = vadd.f32 %v976_v41, %v781_v52 }
 0x17b   : > { %820 = vmatmul.bf16.gmra.mxu0 %v632_v9 }
 0x17c   : > { %v9919_v36 = vadd.f32 %v1233_v59, %v977_v4  ;;  %v1377_v59 = vrot.slane %v9287_v48, 2 }
 0x17d   : > { %1534 = vmatmul.bf16.gmra.mxu3 %v1376_v54  ;;  %v635_v54 = vor.u32 %v12690_v34, %v631_v13  ;;  %v9066_v34 = vld [vmem:[%s9201_s20] sm:$0xff] }
 0x17e   : > { %v1378_v9 = vsel %vm1349_vm2, %v1375_v5, %v1377_v59  ;;  %v1379_v5 = vrot.slane %v9324_v63, 2  ;;  %v8687_v63 = vld [vmem:[%s12555_s1 + $0x128] sm:$0xff] }
 0x180   : > { %v9924_v29 = vpop.f32.mrf.mxu3  ;;  %v9926_v3 = vpop.f32.mrf.mxu0 }
 0x181   : > { %12795 = vst [vmem:[#allocation88_spill] sm:$0xff] %v9924_v29  ;;  %v9929_v24 = vpop.f32.mrf.mxu2  ;;  %v8688_v29 = vld [vmem:[%s12555_s1 + $0x130] sm:$0xff] }
 0x182   : > { %12796 = vst [vmem:[#allocation89_spill] sm:$0xff] %v9929_v24  ;;  %1820 = vmatpush.bf16.msra.mxu0 %v8688_v29 }
 0x186   : > { %1821 = vmatpush.bf16.msra.mxu0 %v8687_v63 }
 0x188   : > { %v9932_v16 = vpop.f32.mrf.mxu3  ;;  %v786_v52 = vpop.f32.mrf.mxu0 }
 0x189   : > { %12797 = vst [vmem:[#allocation90_spill] sm:$0xff] %v9932_v16  ;;  %v982_v41 = vadd.f32 %v9611_v20, %v786_v52  ;;  %v1248_v40 = vpop.f32.mrf.mxu2  ;;  %v1043_v20 = vrot.slane %v9066_v34, 1  ;;  %v9951_v52 = vld [vmem:[%s9201_s20 + $0x8] sm:$0xff] }
 0x18b   : > { %v9938_v4 = vadd.f32 %v1238_v61, %v982_v41  ;;  %825 = vmatmul.bf16.gmra.mxu0 %v635_v54  ;;  %v1044_v61 = vrot.slane %v9951_v52, 1 }
 0x18d   : > { %1539 = vmatmul.bf16.gmra.mxu3 %v1378_v9  ;;  %v1045_v9 = vsel %vm1042_vm1, %v1043_v20, %v1044_v61 }
 0x190   : > { %v9943_v16 = vpop.f32.mrf.mxu3  ;;  %v9945_v48 = vpop.f32.mrf.mxu0 }
 0x191   : > { %12798 = vst [vmem:[#allocation91_spill] sm:$0xff] %v9943_v16  ;;  %v9947_v13 = vpop.f32.mrf.mxu2  ;;  %v1380_v16 = vsel %vm1349_vm2, %v1377_v59, %v1379_v5  ;;  %v1381_v59 = vrot.slane %v9361_v15, 2 }
 0x192   : > { %12799 = vst [vmem:[#allocation92_spill] sm:$0xff] %v9947_v13 }
 0x198   : > { %v9955_v54 = vpop.f32.mrf.mxu3  ;;  %v791_v41 = vpop.f32.mrf.mxu0 }
 0x199   : > { %12800 = vst [vmem:[#allocation93_spill] sm:$0xff] %v9955_v54  ;;  %v987_v29 = vadd.f32 %v9646_v55, %v791_v41  ;;  %v1253_v13 = vpop.f32.mrf.mxu2  ;;  %v1046_v55 = vrot.slane %v9257_v35, 1 }
 0x19b   : > { %v9960_v32 = vadd.f32 %v1243_v21, %v987_v29  ;;  %1167 = vmatmul.bf16.vlgmr.msrb.gmra.mxu0 %v1045_v9  ;;  %v1382_v9 = vsel %vm1349_vm2, %v1379_v5, %v1381_v59 }
 0x19d   : > { %1544 = vmatmul.bf16.gmra.mxu3 %v1380_v16  ;;  %v1047_v16 = vsel %vm1042_vm1, %v1044_v61, %v1046_v55  ;;  %v1383_v61 = vrot.slane %v9401_v56, 2 }
 0x1a0   : > { %v9962_v34 = vpop.f32.mrf.mxu3  ;;  %v9967_v24 = vpop.f32.mrf.mxu0 }
 0x1a1   : > { %12801 = vst [vmem:[#allocation94_spill] sm:$0xff] %v9962_v34  ;;  %v9969_v54 = vpop.f32.mrf.mxu2 }
 0x1a2   : > { %12802 = vst [vmem:[#allocation95_spill] sm:$0xff] %v9969_v54 }
 0x1a8   : > { %v9973_v21 = vpop.f32.mrf.mxu3  ;;  %v796_v20 = vpop.f32.mrf.mxu0 }
 0x1a9   : > { %12803 = vst [vmem:[#allocation96_spill] sm:$0xff] %v9973_v21  ;;  %v992_v41 = vadd.f32 %v9680_v39, %v796_v20  ;;  %v1258_v34 = vpop.f32.mrf.mxu2  ;;  %v8686_v21 = vld [vmem:[%s12555_s1 + $0x120] sm:$0xff]  ;;  %v1048_v39 = vrot.slane %v9297_v51, 1 }
 0x1aa   : > { %1822 = vmatpush.bf16.msra.mxu0 %v8686_v21 }
 0x1ab   : > { %v9978_v29 = vadd.f32 %v1248_v40, %v992_v41  ;;  %1172 = vmatmul.bf16.gmra.mxu0 %v1047_v16  ;;  %v1049_v20 = vsel %vm1042_vm1, %v1046_v55, %v1048_v39  ;;  %v1384_v41 = vsel %vm1349_vm2, %v1381_v59, %v1383_v61  ;;  %v1050_v55 = vrot.slane %v9334_v2, 1 }
 0x1ad   : > { %1549 = vmatmul.bf16.gmra.mxu3 %v1382_v9 }
 0x1b0   : > { %v9980_v63 = vpop.f32.mrf.mxu3  ;;  %v9982_v54 = vpop.f32.mrf.mxu0 }
 0x1b1   : > { %12804 = vst [vmem:[#allocation97_spill] sm:$0xff] %v9980_v63  ;;  %v9987_v15 = vpop.f32.mrf.mxu2 }
 0x1b2   : > { %12805 = vst [vmem:[#allocation98_spill] sm:$0xff] %v9982_v54 }
 0x1b3   : > { %12806 = vst [vmem:[#allocation99_spill] sm:$0xff] %v9987_v15 }
 0x1b8   : > { %v9991_v40 = vpop.f32.mrf.mxu3  ;;  %v801_v5 = vpop.f32.mrf.mxu0 }
 0x1b9   : > { %12807 = vst [vmem:[#allocation100_spill] sm:$0xff] %v9991_v40  ;;  %v997_v16 = vadd.f32 %v9702_v8, %v801_v5  ;;  %v1263_v63 = vpop.f32.mrf.mxu2  ;;  %v8685_v40 = vld [vmem:[%s12555_s1 + $0x118] sm:$0xff]  ;;  %v1385_v8 = vrot.slane %v9438_v44, 2  ;;  %v1051_v5 = vsel %vm1042_vm1, %v1048_v39, %v1050_v55  ;;  %v8684_v39 = vld [vmem:[%s12555_s1 + $0x110] sm:$0xff] }
 0x1ba   : > { %1823 = vmatpush.bf16.msra.mxu0 %v8685_v40 }
 0x1bb   : > { %v9996_v9 = vadd.f32 %v1253_v13, %v997_v16  ;;  %1177 = vmatmul.bf16.gmra.mxu0 %v1049_v20  ;;  %v1386_v16 = vsel %vm1349_vm2, %v1383_v61, %v1385_v8 }
 0x1bd   : > { %1554 = vmatmul.bf16.gmra.mxu3 %v1384_v41 }
 0x1be   : > { %1824 = vmatpush.bf16.msra.mxu0 %v8684_v39 }
 0x1c0   : > { %v9998_v21 = vpop.f32.mrf.mxu3  ;;  %v10000_v15 = vpop.f32.mrf.mxu0 }
 0x1c1   : > { %12808 = vst [vmem:[#allocation101_spill] sm:$0xff] %v9998_v21  ;;  %v10002_v54 = vpop.f32.mrf.mxu2 }
 0x1c2   : > { %12809 = vst [vmem:[#allocation102_spill] sm:$0xff] %v10002_v54 }
 0x1c8   : > { %v10009_v13 = vpop.f32.mrf.mxu3  ;;  %v806_v59 = vpop.f32.mrf.mxu0 }
 0x1c9   : > { %v1002_v20 = vadd.f32 %v9724_v23, %v806_v59  ;;  %v1268_v21 = vpop.f32.mrf.mxu2  ;;  %v1052_v23 = vrot.slane %v9371_v18, 1 }
 0x1cb   : > { %v10014_v41 = vadd.f32 %v1258_v34, %v1002_v20  ;;  %1182 = vmatmul.bf16.gmra.mxu0 %v1051_v5  ;;  %v1387_v34 = vrot.slane %v9495_v57, 2 }
 0x1cd   : > { %1559 = vmatmul.bf16.gmra.mxu3 %v1386_v16  ;;  %v1388_v20 = vsel %vm1349_vm2, %v1385_v8, %v1387_v34  ;;  %v8705_v16 = vld [vmem:[%s12555_s1 + $0x1b8] sm:$0xff] }
 0x1ce   : > { %2404 = vmatpush.bf16.msrb.mxu2 %v8705_v16 }
 0x1d0   : > { %v1520_v56 = vpop.f32.mrf.mxu3  ;;  %v10019_v44 = vpop.f32.mrf.mxu0 }
 0x1d1   : > { %v10017_v54 = vadd.f32 %v1520_v56, %v9826_v43  ;;  %v10021_v40 = vpop.f32.mrf.mxu2  ;;  %v1053_v56 = vsel %vm1042_vm1, %v1050_v55, %v1052_v23 }
 0x1d3   : > { %12810 = vst [vmem:[#allocation103_spill] sm:$0xff] %v10017_v54 }
 0x1d8   : > { %v1522_v61 = vpop.f32.mrf.mxu3  ;;  %v811_v5 = vpop.f32.mrf.mxu0 }
 0x1d9   : > { %v10029_v59 = vadd.f32 %v1522_v61, %v9832_v0  ;;  %v1007_v43 = vadd.f32 %v9746_v33, %v811_v5  ;;  %v1273_v39 = vpop.f32.mrf.mxu2  ;;  %v8697_v0 = vld [vmem:[%s12555_s1 + $0x178] sm:$0xff]  ;;  %v1389_v5 = vrot.slane %v9579_v49, 2 }
 0x1da   : > { %2121 = vmatpush.bf16.msrb.mxu1 %v8697_v0 }
 0x1db   : > { %12811 = vst [vmem:[#allocation104_spill] sm:$0xff] %v10029_v59  ;;  %v10037_v54 = vadd.f32 %v1263_v63, %v1007_v43  ;;  %1187 = vmatmul.bf16.gmra.mxu0 %v1053_v56  ;;  %v1054_v63 = vrot.slane %v9411_v7, 1 }
 0x1dd   : > { %1564 = vmatmul.bf16.gmra.mxu3 %v1388_v20  ;;  %v1055_v16 = vsel %vm1042_vm1, %v1052_v23, %v1054_v63  ;;  %v8704_v23 = vld [vmem:[%s12555_s1 + $0x1b0] sm:$0xff] }
 0x1de   : > { %2405 = vmatpush.bf16.msrb.mxu2 %v8704_v23  ;;  %v8695_v23 = vld [vmem:[%s12555_s1 + $0x168] sm:$0xff] }
 0x1e0   : > { %v1525_v55 = vpop.f32.mrf.mxu3  ;;  %v10045_v8 = vpop.f32.mrf.mxu0 }
 0x1e1   : > { %v10043_v33 = vadd.f32 %v1525_v55, %v9850_v1  ;;  %v10047_v61 = vpop.f32.mrf.mxu2  ;;  %v8683_v1 = vld [vmem:[%s12555_s1 + $0x108] sm:$0xff]  ;;  %v1390_v55 = vsel %vm1349_vm2, %v1387_v34, %v1389_v5 }
 0x1e2   : > { %1825 = vmatpush.bf16.msra.mxu0 %v8683_v1  ;;  %v8711_v1 = vld [vmem:[%s12555_s1 + $0x1e8] sm:$0xff] }
 0x1e3   : > { %12812 = vst [vmem:[#allocation105_spill] sm:$0xff] %v10043_v33 }
 0x1e8   : > { %v1527_v56 = vpop.f32.mrf.mxu3  ;;  %v816_v20 = vpop.f32.mrf.mxu0 }
 0x1e9   : > { %v10052_v43 = vadd.f32 %v1527_v56, %v9862_v31  ;;  %v1012_v0 = vadd.f32 %v9767_v50, %v816_v20  ;;  %v10062_v59 = vpop.f32.mrf.mxu2  ;;  %v8713_v31 = vld [vmem:[%s12555_s1 + $0x1f8] sm:$0xff]  ;;  %v8712_v50 = vld [vmem:[%s12555_s1 + $0x1f0] sm:$0xff] }
 0x1ea   : > { %2846 = vmatpush.bf16.msra.mxu3 %v8713_v31  ;;  %v8696_v20 = vld [vmem:[%s12555_s1 + $0x170] sm:$0xff]  ;;  %v1391_v31 = vrot.slane %v9860_v42, 2 }
 0x1eb   : > { %v10060_v33 = vadd.f32 %v1268_v21, %v1012_v0  ;;  %1192 = vmatmul.bf16.gmra.mxu0 %v1055_v16  ;;  %v8703_v16 = vld [vmem:[%s12555_s1 + $0x1a8] sm:$0xff]  ;;  %v969_v0 = vadd.f32 %v9883_v22, %v9881_v62  ;;  %2122 = vmatpush.bf16.msrb.mxu1 %v8696_v20  ;;  %v8710_v22 = vld [vmem:[%s12555_s1 + $0x1e0] sm:$0xff] }
 0x1ec   : > { %2406 = vmatpush.bf16.msrb.mxu2 %v8703_v16 }
 0x1ed   : > { %1569 = vmatmul.bf16.gmra.mxu3 %v1390_v55  ;;  %v1056_v55 = vrot.slane %v9451_v47, 1 }
 0x1ee   : > { %2847 = vmatpush.bf16.msra.mxu3 %v8712_v50  ;;  %v1305_v50 = vadd.f32 %v9834_v25, %v969_v0  ;;  %v8682_v25 = vld [vmem:[%s12555_s1 + $0x100] sm:$0xff] }
 0x1ef   : > { %2123 = vmatpush.bf16.msrb.mxu1 %v8695_v23  ;;  %v1057_v16 = vsel %vm1042_vm1, %v1054_v63, %v1056_v55  ;;  %v8694_v0 = vld [vmem:[%s12555_s1 + $0x160] sm:$0xff]  ;;  %1826 = vmatpush.bf16.msra.mxu0 %v8682_v25  ;;  %v8693_v63 = vld [vmem:[%s12555_s1 + $0x158] sm:$0xff]  ;;  %v1058_v25 = vrot.slane %v9513_v27, 1 }
 0x1f0   : > { %v1530_v56 = vpop.f32.mrf.mxu3  ;;  %v10076_v34 = vpop.f32.mrf.mxu0 }
 0x1f1   : > { %v10074_v21 = vadd.f32 %v1530_v56, %v9877_v12  ;;  %v1280_v12 = vpop.f32.mrf.mxu2  ;;  %v8702_v56 = vld [vmem:[%s12555_s1 + $0x1a0] sm:$0xff] }
 0x1f2   : > { %2848 = vmatpush.bf16.msra.mxu3 %v8711_v1  ;;  %2407 = vmatpush.bf16.msrb.mxu2 %v8702_v56  ;;  %v1392_v12 = vsel %vm1349_vm2, %v1389_v5, %v1391_v31  ;;  %v8700_v5 = vld [vmem:[%s12555_s1 + $0x190] sm:$0xff] }
 0x1f3   : > { %12813 = vst [vmem:[#allocation106_spill] sm:$0xff] %v10074_v21  ;;  %2124 = vmatpush.bf16.msrb.mxu1 %v8694_v0  ;;  %v8708_v56 = vld [vmem:[%s12555_s1 + $0x1d0] sm:$0xff] }
 0x1f6   : > { %2849 = vmatpush.bf16.msra.mxu3 %v8710_v22 }
 0x1f7   : > { %2125 = vmatpush.bf16.msrb.mxu1 %v8693_v63  ;;  %v12817_v63 = vshrl.u32 %v9217_v14, 16 }
 0x1f8   : > { %v1532_v21 = vpop.f32.mrf.mxu3  ;;  %v821_v20 = vpop.f32.mrf.mxu0 }
 0x1f9   : > { %v10101_v62 = vadd.f32 %v1532_v21, %v1305_v50  ;;  %v1017_v1 = vadd.f32 %v9788_v28, %v821_v20  ;;  %v8701_v21 = vld [vmem:[%s12555_s1 + $0x198] sm:$0xff] }
 0x1fa   : > { %v8709_v28 = vld [vmem:[%s12555_s1 + $0x1d8] sm:$0xff]  ;;  %2408 = vmatpush.bf16.msrb.mxu2 %v8701_v21  ;;  %v12816_v21 = vshll.u32 %v9217_v14, 16 }
 0x1fb   : > { %12814 = vst [vmem:[#allocation107_spill] sm:$0xff] %v10101_v62  ;;  %v10115_v23 = vadd.f32 %v1273_v39, %v1017_v1  ;;  %1197 = vmatmul.bf16.gmra.mxu0 %v1057_v16  ;;  %2850 = vmatpush.bf16.msra.mxu3 %v8709_v28  ;;  %v8993_v20 = vld [vmem:[%s9201_s20 + $0xb8] sm:$0xff]   ;;  %v8692_v16 = vld [vmem:[%s12555_s1 + $0x150] sm:$0xff]  ;;  %v8699_v1 = vld [vmem:[%s12555_s1 + $0x188] sm:$0xff] }
 0x1fc   : > { %2126 = vmatpush.bf16.msrb.mxu1 %v8692_v16  ;;  %v1393_v0 = vrot.slane %v8993_v20, 2  ;;  %v1653_v28 = vrot.slane %v12816_v21, 3  ;;  %v8706_v16 = vld [vmem:[%s12555_s1 + $0x1c0] sm:$0xff] }
 0x1fd   : > { %1574 = vmatmul.bf16.gmra.mxu3 %v1392_v12  ;;  %v8707_v12 = vld [vmem:[%s12555_s1 + $0x1c8] sm:$0xff] }
 0x1fe   : > { %2409 = vmatpush.bf16.msrb.mxu2 %v8700_v5  ;;  %v1652_v5 = vrot.slane %v12817_v63, 2 }
 0x1ff   : > { %2851 = vmatpush.bf16.msra.mxu3 %v8708_v56 }
 0x200   : > { %v1535_v39 = vpop.f32.mrf.mxu3  ;;  %v10132_v22 = vpop.f32.mrf.mxu0 }
 0x201   : > { %v10130_v50 = vadd.f32 %v1535_v39, %v9898_v11  ;;  %v974_v11 = vadd.f32 %v9904_v10, %v9902_v58  ;;  %v12818_v39 = vshll.u32 %v9257_v35, 16  ;;  %v8691_v58 = vld [vmem:[%s12555_s1 + $0x148] sm:$0xff]  ;;  %v8698_v10 = vld [vmem:[%s12555_s1 + $0x180] sm:$0xff] }
 0x202   : > { %2410 = vmatpush.bf16.msrb.mxu2 %v8699_v1  ;;  %2127 = vmatpush.bf16.msrb.mxu1 %v8691_v58  ;;  %v1059_v1 = vsel %vm1042_vm1, %v1056_v55, %v1058_v25  ;;  %v12820_v58 = vunpack.c.l.b16 %v9244_v30  ;;  %v8721_v30 = vld [vmem:[%s12555_s1 + $0x238] sm:$0xff] }
 0x203   : > { %12815 = vst [vmem:[#allocation108_spill] sm:$0xff] %v10130_v50  ;;  %v1656_v56 = vrot.slane %v12818_v39, 3  ;;  %v12819_v50 = vshrl.u32 %v9257_v35, 16  ;;  %2852 = vmatpush.bf16.msra.mxu3 %v8707_v12  ;;  %v1307_v20 = vadd.f32 %v9864_v53, %v974_v11  ;;  %v1394_v12 = vsel %vm1349_vm2, %v1391_v31, %v1393_v0  ;;  %v8690_v53 = vld [vmem:[%s12555_s1 + $0x140] sm:$0xff]  ;;  %3147 = vmatpush.bf16.msrb.mxu0 %v8721_v30 }
 0x204   : > { %v1654_v11 = vor.u32 %v1653_v28, %v1652_v5  ;;  %v2005_v31 = vrot.slane %v9951_v52, 3  ;;  %v2006_v28 = vrot.slane %v9257_v35, 3  ;;  %v984_v30 = vadd.f32 %v9638_v6, %v9945_v48 }
 0x205   : > { %v1655_v62 = vrot.slane %v12819_v50, 2  ;;  %v2010_v48 = vrot.slane %v9334_v2, 3 }
 0x206   : > { %2411 = vmatpush.bf16.msrb.mxu2 %v8698_v10  ;;  %2128 = vmatpush.bf16.msrb.mxu1 %v8690_v53  ;;  %v12823_v53 = vunpack.c.l.b16 %v9280_v46 }
 0x207   : > { %2853 = vmatpush.bf16.msra.mxu3 %v8706_v16  ;;  %v10173_v39 = vor.u32 %v1656_v56, %v1655_v62 }
 0x208   : > { %v1537_v14 = vpop.f32.mrf.mxu3  ;;  %v826_v50 = vpop.f32.mrf.mxu0 }
 0x209   : > { %v10165_v21 = vadd.f32 %v1537_v14, %v1307_v20  ;;  %v1022_v63 = vadd.f32 %v9809_v19, %v826_v50  ;;  %v12821_v20 = vunpack.c.l.b16 %v9277_v45  ;;  %v1658_v19 = vsel %vm1651_vm3, %v1654_v11, %v10173_v39 }
 0x20a   : > { %v2007_v45 = vsel %vm2004_vm4, %v2005_v31, %v2006_v28 }
 0x20b   : > { %v10179_v14 = vpack.c.b16 %v12821_v20, %v12820_v58  ;;  %v10182_v55 = vadd.f32 %v10062_v59, %v1022_v63  ;;  %1202 = vmatmul.bf16.gmra.mxu0 %v1059_v1  ;;  %2129 = vmatmul.bf16.vlgmr.msrb.gmra.mxu1 %v2007_v45  ;;  %v978_v59 = vpop.f32.mrf.mxu1  ;;  %v12822_v1 = vrot.slane %v9555_v38, 1 }
 0x20c   : > { %v979_v35 = vadd.f32 %v978_v59, %v9926_v3 }
 0x20d   : > { %1579 = vmatmul.bf16.gmra.mxu3 %v1394_v12  ;;  %2412 = vmatmul.bf16.vlgmr.msrb.gmra.mxu2 %v10179_v14  ;;  %v1061_v12 = vsel %vm1042_vm1, %v1058_v25, %v12822_v1  ;;  %v2595_v3 = vshll.u32 %v10179_v14, 16  ;;  %v2593_v20 = vshrl.u32 %v10179_v14, 16 }
 0x20e   : > { %v1309_v56 = vadd.f32 %v9887_v17, %v979_v35  ;;  %v2008_v17 = vrot.slane %v9297_v51, 3 }
 0x20f   : > { %v2597_v31 = vrot.slane %v2595_v3, 1 }
 0x210   : > { %v1540_v62 = vpop.f32.mrf.mxu3  ;;  %v828_v52 = vpop.f32.mrf.mxu0  ;;  %v2009_v58 = vsel %vm2004_vm4, %v2006_v28, %v2008_v17  ;;  %v12825_v28 = vld [vmem:[#allocation86_spill] sm:$0xff]  ;;  %v2011_v6 = vsel %vm2004_vm4, %v2008_v17, %v2010_v48 }
 0x211   : > { %v10194_v5 = vadd.f32 %v1540_v62, %v9919_v36  ;;  %v12824_v36 = vunpack.c.l.b16 %v9314_v60  ;;  %v2598_v45 = vor.u32 %v2597_v31, %v2593_v20  ;;  %v1311_v62 = vadd.f32 %v12825_v28, %v984_v30  ;;  %v12835_v17 = vld [vmem:[#allocation50_spill] sm:$0xff] }
 0x212   : > { %v12833_v31 = vshll.u32 %v9297_v51, 16 }
 0x213   : > { %v10210_v11 = vpack.c.b16 %v12824_v36, %v12823_v53 }
 0x218   : > { %v1542_v10 = vpop.f32.mrf.mxu3  ;;  %v1168_v50 = vpop.f32.mrf.mxu0 }
 0x219   : > { %v10198_v16 = vadd.f32 %v1542_v10, %v1309_v56  ;;  %v10204_v63 = vadd.f32 %v1168_v50, %v9608_v37  ;;  %v12826_v56 = vld [vmem:[#allocation45_spill] sm:$0xff]  ;;  %v12827_v50 = vld [vmem:[#allocation11_spill] sm:$0xff] }
 0x21a   : > { %v12828_v1 = vunpack.c.l.b16 %v12827_v50 }
 0x21b   : > { %1207 = vmatmul.bf16.gmra.mxu0 %v1061_v12  ;;  %2134 = vmatmul.bf16.gmra.mxu1 %v2009_v58  ;;  %v12829_v12 = vld [vmem:[#allocation15_spill] sm:$0xff] }
 0x21c   : > { %v12830_v53 = vunpack.c.l.b16 %v12829_v12 }
 0x21d   : > { %1584 = vmatmul.bf16.gmra.mxu3 %v1393_v0  ;;  %2417 = vmatmul.bf16.gmra.mxu2 %v10210_v11  ;;  %v2600_v0 = vshll.u32 %v10210_v11, 16 }
 0x21e   : > { %v10237_v36 = vpack.c.b16 %v12830_v53, %v12828_v1  ;;  %v12837_v53 = vld [vmem:[#allocation51_spill] sm:$0xff] }
 0x21f   : > { %v2602_v59 = vrot.slane %v2600_v0, 1  ;;  %v1660_v0 = vrot.slane %v12833_v31, 3 }
 0x220   : > { %v1545_v25 = vpop.f32.mrf.mxu3  ;;  %v1170_v46 = vpop.f32.mrf.mxu0  ;;  %12831 = vst [vmem:[#allocation86_spill] sm:$0xff] %v10237_v36  ;;  %v2608_v28 = vshll.u32 %v10237_v36, 16 }
 0x221   : > { %v10217_v37 = vadd.f32 %v1545_v25, %v9938_v4  ;;  %v10220_v60 = vadd.f32 %v1170_v46, %v9621_v26  ;;  %v2603_v26 = vsel %vm452_vm0, %v2598_v45, %v2602_v59  ;;  %v12832_v46 = vshrl.u32 %v9297_v51, 16 }
 0x222   : > { %v2604_v45 = vshrl.u32 %v10210_v11, 16 }
 0x223   : > { %v1659_v20 = vrot.slane %v12832_v46, 2  ;;  %v12840_v46 = vld [vmem:[#allocation20_spill] sm:$0xff] }
 0x228   : > { %v1547_v52 = vpop.f32.mrf.mxu3  ;;  %v1173_v4 = vpop.f32.mrf.mxu0 }
 0x229   : > { %v10227_v35 = vadd.f32 %v1547_v52, %v1311_v62  ;;  %v10230_v10 = vadd.f32 %v1173_v4, %v12826_v56  ;;  %v989_v62 = vadd.f32 %v12835_v17, %v9967_v24  ;;  %v1661_v52 = vor.u32 %v1660_v0, %v1659_v20  ;;  %v12836_v56 = vld [vmem:[#allocation89_spill] sm:$0xff]  ;;  %v8720_v24 = vld [vmem:[%s12555_s1 + $0x230] sm:$0xff] }
 0x22a   : > { %v2610_v4 = vrot.slane %v2608_v28, 1  ;;  %v12841_v20 = vunpack.c.l.b16 %v12840_v46  ;;  %v2012_v0 = vrot.slane %v9371_v18, 3  ;;  %3148 = vmatpush.bf16.msrb.mxu0 %v8720_v24  ;;  %v12849_v24 = vld [vmem:[#allocation54_spill] sm:$0xff] }
 0x22b   : > { %1827 = vmatmul.bf16.vlgmr.msra.gmra.mxu0 %v1658_v19  ;;  %2139 = vmatmul.bf16.gmra.mxu1 %v2011_v6  ;;  %v12834_v19 = vld [vmem:[#allocation48_spill] sm:$0xff]  ;;  %v1662_v12 = vsel %vm1651_vm3, %v10173_v39, %v1661_v52 }
 0x22c   : > { %v2013_v39 = vsel %vm2004_vm4, %v2010_v48, %v2012_v0 }
 0x22d   : > { %2854 = vmatmul.bf16.vlgmr.msra.gmra.mxu3 %v2603_v26  ;;  %2422 = vmatmul.bf16.gmra.mxu2 %v10237_v36  ;;  %v1313_v26 = vadd.f32 %v12836_v56, %v989_v62  ;;  %v12846_v56 = vshrl.u32 %v9334_v2, 16 }
 0x230   : > { %v1550_v3 = vpop.f32.mrf.mxu3  ;;  %v1175_v25 = vpop.f32.mrf.mxu0 }
 0x231   : > { %v10243_v58 = vadd.f32 %v1550_v3, %v9960_v32  ;;  %v10250_v30 = vadd.f32 %v1175_v25, %v12834_v19  ;;  %v2606_v32 = vor.u32 %v2604_v45, %v2602_v59  ;;  %v12838_v59 = vld [vmem:[#allocation16_spill] sm:$0xff]  ;;  %v12844_v45 = vld [vmem:[#allocation53_spill] sm:$0xff] }
 0x232   : > { %v12839_v25 = vunpack.c.l.b16 %v12838_v59  ;;  %v12843_v19 = vld [vmem:[#allocation52_spill] sm:$0xff] }
 0x233   : > { %v2611_v3 = vsel %vm452_vm0, %v2606_v32, %v2610_v4  ;;  %v924_v28 = vadd.f32 %v12844_v45, %v12843_v19 }
 0x234   : > { %v10272_v31 = vpack.c.b16 %v12841_v20, %v12839_v25  ;;  %v12850_v20 = vld [vmem:[#allocation92_spill] sm:$0xff] }
 0x236   : > { %12842 = vst [vmem:[#allocation45_spill] sm:$0xff] %v10272_v31  ;;  %v2616_v48 = vshll.u32 %v10272_v31, 16 }
 0x238   : > { %v1552_v50 = vpop.f32.mrf.mxu3  ;;  %v1178_v51 = vpop.f32.mrf.mxu0 }
 0x239   : > { %v10257_v1 = vadd.f32 %v1552_v50, %v1313_v26  ;;  %v10262_v6 = vadd.f32 %v1178_v51, %v12837_v53  ;;  %v1663_v26 = vrot.slane %v12846_v56, 2  ;;  %v12847_v50 = vshll.u32 %v9334_v2, 16 }
 0x23a   : > { %v2612_v53 = vshrl.u32 %v10237_v36, 16  ;;  %v12855_v36 = vld [vmem:[#allocation25_spill] sm:$0xff] }
 0x23b   : > { %1832 = vmatmul.bf16.gmra.mxu0 %v1662_v12  ;;  %2144 = vmatmul.bf16.gmra.mxu1 %v2013_v39  ;;  %v1664_v51 = vrot.slane %v12847_v50, 3  ;;  %v12853_v50 = vld [vmem:[#allocation21_spill] sm:$0xff] }
 0x23c   : > { %v2614_v46 = vor.u32 %v2612_v53, %v2610_v4  ;;  %v2014_v4 = vrot.slane %v9411_v7, 3  ;;  %v12859_v53 = vld [vmem:[#allocation57_spill] sm:$0xff] }
 0x23d   : > { %2859 = vmatmul.bf16.gmra.mxu3 %v2611_v3  ;;  %2427 = vmatmul.bf16.gmra.mxu2 %v10272_v31  ;;  %v12848_v3 = vld [vmem:[#allocation98_spill] sm:$0xff]  ;;  %v1665_v25 = vor.u32 %v1664_v51, %v1663_v26 }
 0x23e   : > { %v994_v59 = vadd.f32 %v12849_v24, %v12848_v3  ;;  %v12856_v3 = vunpack.c.l.b16 %v12855_v36  ;;  %v2015_v51 = vsel %vm2004_vm4, %v2012_v0, %v2014_v4  ;;  %v12861_v36 = vshrl.u32 %v9371_v18, 16 }
 0x23f   : > { %v1666_v2 = vsel %vm1651_vm3, %v1661_v52, %v1665_v25  ;;  %v12858_v52 = vld [vmem:[#allocation56_spill] sm:$0xff] }
 0x240   : > { %v1555_v17 = vpop.f32.mrf.mxu3  ;;  %v1180_v32 = vpop.f32.mrf.mxu0  ;;  %v1315_v39 = vadd.f32 %v12850_v20, %v994_v59  ;;  %v12862_v20 = vshll.u32 %v9371_v18, 16 }
 0x241   : > { %v10280_v62 = vadd.f32 %v1555_v17, %v9978_v29  ;;  %v10286_v12 = vadd.f32 %v1180_v32, %v924_v28  ;;  %v2618_v29 = vrot.slane %v2616_v48, 1  ;;  %v12852_v28 = vld [vmem:[#allocation55_spill] sm:$0xff]  ;;  %v929_v48 = vadd.f32 %v12859_v53, %v12858_v52 }
 0x243   : > { %12845 = vst [vmem:[#allocation11_spill] sm:$0xff] %v10280_v62  ;;  %v2619_v56 = vsel %vm452_vm0, %v2614_v46, %v2618_v29  ;;  %v12854_v62 = vunpack.c.l.b16 %v12853_v50 }
 0x245   : > { %v10304_v26 = vpack.c.b16 %v12856_v3, %v12854_v62  ;;  %v1667_v62 = vrot.slane %v12861_v36, 2  ;;  %v12864_v3 = vld [vmem:[#allocation95_spill] sm:$0xff] }
 0x247   : > { %12857 = vst [vmem:[#allocation48_spill] sm:$0xff] %v10304_v26  ;;  %v2624_v0 = vshll.u32 %v10304_v26, 16 }
 0x248   : > { %v1557_v19 = vpop.f32.mrf.mxu3  ;;  %v1183_v17 = vpop.f32.mrf.mxu0 }
 0x249   : > { %v10293_v45 = vadd.f32 %v1557_v19, %v1315_v39  ;;  %v10297_v32 = vadd.f32 %v1183_v17, %v12852_v28  ;;  %v1668_v39 = vrot.slane %v12862_v20, 3  ;;  %v2620_v17 = vshrl.u32 %v10272_v31, 16  ;;  %v12867_v20 = vld [vmem:[#allocation26_spill] sm:$0xff] }
 0x24a   : > { %v12869_v31 = vld [vmem:[#allocation30_spill] sm:$0xff] }
 0x24b   : > { %12851 = vst [vmem:[#allocation15_spill] sm:$0xff] %v10293_v45  ;;  %1837 = vmatmul.bf16.gmra.mxu0 %v1666_v2  ;;  %2149 = vmatmul.bf16.gmra.mxu1 %v2015_v51  ;;  %v12863_v2 = vld [vmem:[#allocation58_spill] sm:$0xff]  ;;  %v2622_v50 = vor.u32 %v2620_v17, %v2618_v29  ;;  %v2016_v29 = vrot.slane %v9451_v47, 3  ;;  %v12873_v17 = vld [vmem:[#allocation61_spill] sm:$0xff] }
 0x24c   : > { %v999_v28 = vadd.f32 %v12863_v2, %v10000_v15  ;;  %v12870_v15 = vunpack.c.l.b16 %v12869_v31  ;;  %v12875_v31 = vshrl.u32 %v9411_v7, 16 }
 0x24d   : > { %2864 = vmatmul.bf16.gmra.mxu3 %v2619_v56  ;;  %2432 = vmatmul.bf16.gmra.mxu2 %v10304_v26  ;;  %v1669_v56 = vor.u32 %v1668_v39, %v1667_v62  ;;  %v2017_v39 = vsel %vm2004_vm4, %v2014_v4, %v2016_v29 }
 0x24e   : > { %v1317_v51 = vadd.f32 %v12864_v3, %v999_v28  ;;  %v12876_v3 = vshll.u32 %v9411_v7, 16 }
 0x24f   : > { %v1670_v18 = vsel %vm1651_vm3, %v1665_v25, %v1669_v56  ;;  %v12872_v25 = vld [vmem:[#allocation60_spill] sm:$0xff] }
 0x250   : > { %v1560_v24 = vpop.f32.mrf.mxu3  ;;  %v1185_v46 = vpop.f32.mrf.mxu0 }
 0x251   : > { %v10312_v59 = vadd.f32 %v1560_v24, %v9996_v9  ;;  %v10318_v19 = vadd.f32 %v1185_v46, %v929_v48  ;;  %v2626_v9 = vrot.slane %v2624_v0, 1  ;;  %v12866_v48 = vld [vmem:[#allocation59_spill] sm:$0xff]  ;;  %v934_v0 = vadd.f32 %v12873_v17, %v12872_v25 }
 0x253   : > { %12860 = vst [vmem:[#allocation50_spill] sm:$0xff] %v10312_v59  ;;  %v2627_v36 = vsel %vm452_vm0, %v2622_v50, %v2626_v9  ;;  %v12868_v59 = vunpack.c.l.b16 %v12867_v20 }
 0x255   : > { %v10336_v62 = vpack.c.b16 %v12870_v15, %v12868_v59  ;;  %v1671_v59 = vrot.slane %v12875_v31, 2  ;;  %v12878_v15 = vld [vmem:[#allocation99_spill] sm:$0xff] }
 0x257   : > { %12871 = vst [vmem:[#allocation51_spill] sm:$0xff] %v10336_v62  ;;  %v2632_v4 = vshll.u32 %v10336_v62, 16 }
 0x258   : > { %v1562_v52 = vpop.f32.mrf.mxu3  ;;  %v1188_v24 = vpop.f32.mrf.mxu0 }
 0x259   : > { %v10325_v53 = vadd.f32 %v1562_v52, %v1317_v51  ;;  %v10329_v46 = vadd.f32 %v1188_v24, %v12866_v48  ;;  %v1672_v51 = vrot.slane %v12876_v3, 3  ;;  %v2628_v24 = vshrl.u32 %v10304_v26, 16  ;;  %v12883_v3 = vld [vmem:[#allocation32_spill] sm:$0xff]  ;;  %v12935_v26 = vld [vmem:[#allocation46_spill] sm:$0xff] }
 0x25b   : > { %12865 = vst [vmem:[#allocation89_spill] sm:$0xff] %v10325_v53  ;;  %1842 = vmatmul.bf16.gmra.mxu0 %v1670_v18  ;;  %2154 = vmatmul.bf16.gmra.mxu1 %v2017_v39  ;;  %v12877_v18 = vld [vmem:[#allocation62_spill] sm:$0xff]  ;;  %v2630_v20 = vor.u32 %v2628_v24, %v2626_v9  ;;  %v12936_v53 = vunpack.c.l.b16 %v12935_v26 }
 0x25c   : > { %v1004_v48 = vadd.f32 %v12877_v18, %v10019_v44  ;;  %v12886_v18 = vld [vmem:[#allocation64_spill] sm:$0xff] }
 0x25d   : > { %2869 = vmatmul.bf16.gmra.mxu3 %v2627_v36  ;;  %2437 = vmatmul.bf16.gmra.mxu2 %v10336_v62  ;;  %v1673_v36 = vor.u32 %v1672_v51, %v1671_v59  ;;  %v12881_v59 = vld [vmem:[#allocation31_spill] sm:$0xff]  ;;  %v12884_v51 = vunpack.c.l.b16 %v12883_v3 }
 0x25e   : > { %v1319_v39 = vadd.f32 %v12878_v15, %v1004_v48  ;;  %v12882_v9 = vunpack.c.l.b16 %v12881_v59  ;;  %v12887_v48 = vld [vmem:[#allocation65_spill] sm:$0xff]  ;;  %v2636_v59 = vshrl.u32 %v10336_v62, 16 }
 0x25f   : > { %v1674_v7 = vsel %vm1651_vm3, %v1669_v56, %v1673_v36  ;;  %v939_v15 = vadd.f32 %v12887_v48, %v12886_v18  ;;  %v12892_v18 = vld [vmem:[#allocation102_spill] sm:$0xff]  ;;  %v12895_v62 = vld [vmem:[#allocation33_spill] sm:$0xff] }
 0x260   : > { %v1565_v2 = vpop.f32.mrf.mxu3  ;;  %v1190_v50 = vpop.f32.mrf.mxu0  ;;  %v10371_v24 = vpack.c.b16 %v12884_v51, %v12882_v9  ;;  %v12891_v9 = vld [vmem:[#allocation66_spill] sm:$0xff] }
 0x261   : > { %v10344_v28 = vadd.f32 %v1565_v2, %v10014_v41  ;;  %v10350_v52 = vadd.f32 %v1190_v50, %v934_v0  ;;  %v2634_v41 = vrot.slane %v2632_v4, 1  ;;  %v8719_v0 = vld [vmem:[%s12555_s1 + $0x228] sm:$0xff]  ;;  %v12880_v50 = vld [vmem:[#allocation63_spill] sm:$0xff]  ;;  %v2018_v4 = vrot.slane %v9513_v27, 3 }
 0x262   : > { %12885 = vst [vmem:[#allocation52_spill] sm:$0xff] %v10371_v24  ;;  %3149 = vmatpush.bf16.msrb.mxu0 %v8719_v0  ;;  %v1009_v3 = vadd.f32 %v12891_v9, %v10045_v8 }
 0x263   : > { %12874 = vst [vmem:[#allocation16_spill] sm:$0xff] %v10344_v28  ;;  %v2635_v44 = vsel %vm452_vm0, %v2630_v20, %v2634_v41  ;;  %v2019_v56 = vsel %vm2004_vm4, %v2016_v29, %v2018_v4  ;;  %v2640_v29 = vshll.u32 %v10371_v24, 16  ;;  %v12897_v28 = vld [vmem:[#allocation35_spill] sm:$0xff] }
 0x264   : > { %v1321_v48 = vadd.f32 %v12892_v18, %v1009_v3  ;;  %v12898_v8 = vunpack.c.l.b16 %v12897_v28  ;;  %v12903_v28 = vshrl.u32 %v9513_v27, 16 }
 0x268   : > { %v1567_v25 = vpop.f32.mrf.mxu3  ;;  %v1193_v2 = vpop.f32.mrf.mxu0 }
 0x269   : > { %v10357_v17 = vadd.f32 %v1567_v25, %v1319_v39  ;;  %v10364_v31 = vadd.f32 %v1193_v2, %v12880_v50  ;;  %v12889_v2 = vshrl.u32 %v9451_v47, 16 }
 0x26b   : > { %12879 = vst [vmem:[#allocation20_spill] sm:$0xff] %v10357_v17  ;;  %1847 = vmatmul.bf16.gmra.mxu0 %v1674_v7  ;;  %2159 = vmatmul.bf16.gmra.mxu1 %v2019_v56  ;;  %v1675_v0 = vrot.slane %v12889_v2, 2  ;;  %v12890_v7 = vshll.u32 %v9451_v47, 16  ;;  %v2638_v56 = vor.u32 %v2636_v59, %v2634_v41  ;;  %v12896_v17 = vunpack.c.l.b16 %v12895_v62  ;;  %v12901_v59 = vld [vmem:[#allocation69_spill] sm:$0xff] }
 0x26c   : > { %v2020_v41 = vrot.slane %v9555_v38, 3 }
 0x26d   : > { %2874 = vmatmul.bf16.gmra.mxu3 %v2635_v44  ;;  %2442 = vmatmul.bf16.gmra.mxu2 %v10371_v24  ;;  %v1676_v50 = vrot.slane %v12890_v7, 3 }
 0x26f   : > { %v1677_v51 = vor.u32 %v1676_v50, %v1675_v0  ;;  %v10403_v0 = vpack.c.b16 %v12898_v8, %v12896_v17  ;;  %v2021_v50 = vsel %vm2004_vm4, %v2018_v4, %v2020_v41  ;;  %v1679_v17 = vrot.slane %v12903_v28, 2  ;;  %v12908_v28 = vld [vmem:[#allocation36_spill] sm:$0xff] }
 0x270   : > { %v1570_v20 = vpop.f32.mrf.mxu3  ;;  %v1195_v25 = vpop.f32.mrf.mxu0 }
 0x271   : > { %v10379_v39 = vadd.f32 %v1570_v20, %v10037_v54  ;;  %v10385_v44 = vadd.f32 %v1195_v25, %v939_v15  ;;  %v2642_v54 = vrot.slane %v2640_v29, 1  ;;  %v1678_v47 = vsel %vm1651_vm3, %v1673_v36, %v1677_v51  ;;  %v12894_v15 = vld [vmem:[#allocation67_spill] sm:$0xff]  ;;  %12899 = vst [vmem:[#allocation54_spill] sm:$0xff] %v10403_v0  ;;  %v12900_v36 = vld [vmem:[#allocation68_spill] sm:$0xff] }
 0x272   : > { %v944_v29 = vadd.f32 %v12901_v59, %v12900_v36  ;;  %v2648_v4 = vshll.u32 %v10403_v0, 16 }
 0x273   : > { %12888 = vst [vmem:[#allocation53_spill] sm:$0xff] %v10379_v39  ;;  %v2643_v7 = vsel %vm452_vm0, %v2638_v56, %v2642_v54  ;;  %v12904_v56 = vshll.u32 %v9513_v27, 16 }
 0x275   : > { %v1680_v18 = vrot.slane %v12904_v56, 3  ;;  %v12909_v56 = vunpack.c.l.b16 %v12908_v28 }
 0x278   : > { %v1572_v20 = vpop.f32.mrf.mxu3  ;;  %v1198_v2 = vpop.f32.mrf.mxu0 }
 0x279   : > { %v10392_v39 = vadd.f32 %v1572_v20, %v1321_v48  ;;  %v10396_v25 = vadd.f32 %v1198_v2, %v12894_v15  ;;  %v2644_v20 = vshrl.u32 %v10371_v24, 16  ;;  %v12905_v2 = vld [vmem:[#allocation70_spill] sm:$0xff]  ;;  %v1681_v15 = vor.u32 %v1680_v18, %v1679_v17 }
 0x27b   : > { %12893 = vst [vmem:[#allocation98_spill] sm:$0xff] %v10392_v39  ;;  %1852 = vmatmul.bf16.gmra.mxu0 %v1678_v47  ;;  %2164 = vmatmul.bf16.gmra.mxu1 %v2021_v50  ;;  %v1014_v47 = vadd.f32 %v12905_v2, %v10076_v34  ;;  %v1682_v27 = vsel %vm1651_vm3, %v1677_v51, %v1681_v15 }
 0x27d   : > { %2879 = vmatmul.bf16.gmra.mxu3 %v2643_v7  ;;  %2447 = vmatmul.bf16.gmra.mxu2 %v10403_v0  ;;  %v2646_v7 = vor.u32 %v2644_v20, %v2642_v54  ;;  %v1323_v8 = vadd.f32 %v10021_v40, %v1014_v47  ;;  %v12913_v40 = vld [vmem:[#allocation38_spill] sm:$0xff]  ;;  %v12914_v20 = vld [vmem:[#allocation72_spill] sm:$0xff] }
 0x27e   : > { %v2022_v18 = vrot.slane %v12913_v40, 3 }
 0x280   : > { %v1575_v9 = vpop.f32.mrf.mxu3  ;;  %v1200_v62 = vpop.f32.mrf.mxu0  ;;  %v2023_v51 = vsel %vm2004_vm4, %v2020_v41, %v2022_v18  ;;  %v2652_v41 = vshrl.u32 %v10403_v0, 16 }
 0x281   : > { %v10411_v3 = vadd.f32 %v1575_v9, %v10060_v33  ;;  %v10417_v48 = vadd.f32 %v1200_v62, %v944_v29  ;;  %v2650_v33 = vrot.slane %v2648_v4, 1  ;;  %v12907_v29 = vld [vmem:[#allocation71_spill] sm:$0xff]  ;;  %v12915_v4 = vld [vmem:[#allocation73_spill] sm:$0xff] }
 0x282   : > { %v949_v2 = vadd.f32 %v12915_v4, %v12914_v20 }
 0x283   : > { %12902 = vst [vmem:[#allocation92_spill] sm:$0xff] %v10411_v3  ;;  %v2651_v62 = vsel %vm452_vm0, %v2646_v7, %v2650_v33  ;;  %v12910_v3 = vld [vmem:[#allocation39_spill] sm:$0xff]  ;;  %v2654_v20 = vor.u32 %v2652_v41, %v2650_v33  ;;  %v12924_v41 = vld [vmem:[#allocation42_spill] sm:$0xff] }
 0x284   : > { %v12911_v34 = vunpack.c.l.b16 %v12910_v3 }
 0x286   : > { %v10435_v17 = vpack.c.b16 %v12911_v34, %v12909_v56  ;;  %v12919_v56 = vld [vmem:[#allocation74_spill] sm:$0xff] }
 0x287   : > { %v1019_v34 = vadd.f32 %v12919_v56, %v10132_v22  ;;  %v12921_v22 = vld [vmem:[#allocation75_spill] sm:$0xff] }
 0x288   : > { %v1577_v50 = vpop.f32.mrf.mxu3  ;;  %v1203_v59 = vpop.f32.mrf.mxu0  ;;  %12912 = vst [vmem:[#allocation21_spill] sm:$0xff] %v10435_v17  ;;  %v2656_v28 = vshll.u32 %v10435_v17, 16 }
 0x289   : > { %v10424_v36 = vadd.f32 %v1577_v50, %v1323_v8  ;;  %v10428_v9 = vadd.f32 %v1203_v59, %v12907_v29  ;;  %v2130_v54 = vpop.f32.mrf.mxu1  ;;  %v12917_v50 = vshrl.u32 %v9555_v38, 16 }
 0x28a   : > { %v2658_v4 = vrot.slane %v2656_v28, 1  ;;  %v12925_v28 = vunpack.c.l.b16 %v12924_v41 }
 0x28b   : > { %12906 = vst [vmem:[#allocation55_spill] sm:$0xff] %v10424_v36  ;;  %1857 = vmatmul.bf16.gmra.mxu0 %v1682_v27  ;;  %2169 = vmatmul.bf16.gmra.mxu1 %v2023_v51  ;;  %v1683_v59 = vrot.slane %v12917_v50, 2  ;;  %v12918_v27 = vshll.u32 %v9555_v38, 16  ;;  %v1325_v38 = vadd.f32 %v10047_v61, %v1019_v34  ;;  %v12926_v34 = vld [vmem:[#allocation41_spill] sm:$0xff] }
 0x28c   : > { %v2659_v33 = vsel %vm452_vm0, %v2654_v20, %v2658_v4 }
 0x28d   : > { %2884 = vmatmul.bf16.gmra.mxu3 %v2651_v62  ;;  %2452 = vmatmul.bf16.gmra.mxu2 %v10435_v17  ;;  %v1684_v29 = vrot.slane %v12918_v27, 3 }
 0x290   : > { %v1580_v47 = vpop.f32.mrf.mxu3  ;;  %v2413_v7 = vpop.f32.mrf.mxu2 }
 0x291   : > { %v10443_v8 = vadd.f32 %v1580_v47, %v10115_v23  ;;  %v1205_v3 = vpop.f32.mrf.mxu0  ;;  %v10455_v51 = vpop.f32.mrf.mxu1  ;;  %v1685_v23 = vor.u32 %v1684_v29, %v1683_v59  ;;  %v8718_v47 = vld [vmem:[%s12555_s1 + $0x220] sm:$0xff] }
 0x292   : > { %v10449_v62 = vadd.f32 %v1205_v3, %v949_v2  ;;  %3150 = vmatpush.bf16.msrb.mxu0 %v8718_v47  ;;  %v12922_v59 = vld [vmem:[#allocation40_spill] sm:$0xff]  ;;  %v2024_v47 = vrot.slane %v12926_v34, 3 }
 0x293   : > { %12916 = vst [vmem:[#allocation25_spill] sm:$0xff] %v10443_v8  ;;  %v1686_v8 = vsel %vm1651_vm3, %v1681_v15, %v1685_v23  ;;  %v12923_v29 = vunpack.c.l.b16 %v12922_v59 }
 0x294   : > { %v2025_v15 = vsel %vm2004_vm4, %v2022_v18, %v2024_v47  ;;  %v2660_v18 = vshrl.u32 %v10435_v17, 16 }
 0x295   : > { %v10472_v0 = vpack.c.b16 %v12925_v28, %v12923_v29  ;;  %v12931_v28 = vshll.u32 %v12913_v40, 16 }
 0x298   : > { %v1582_v2 = vpop.f32.mrf.mxu3  ;;  %v2415_v3 = vpop.f32.mrf.mxu2 }
 0x299   : > { %v10461_v50 = vadd.f32 %v1582_v2, %v1325_v38  ;;  %v1208_v27 = vpop.f32.mrf.mxu0  ;;  %v10474_v61 = vpop.f32.mrf.mxu1  ;;  %v12927_v38 = vld [vmem:[#allocation76_spill] sm:$0xff]  ;;  %v12928_v2 = vld [vmem:[#allocation77_spill] sm:$0xff] }
 0x29a   : > { %v10465_v56 = vadd.f32 %v1208_v27, %v12921_v22  ;;  %v954_v20 = vadd.f32 %v12928_v2, %v12927_v38  ;;  %v2662_v2 = vor.u32 %v2660_v18, %v2658_v4 }
 0x29b   : > { %12920 = vst [vmem:[#allocation56_spill] sm:$0xff] %v10461_v50  ;;  %1862 = vmatmul.bf16.gmra.mxu0 %v1686_v8  ;;  %2174 = vmatmul.bf16.gmra.mxu1 %v2025_v15  ;;  %v12930_v8 = vshrl.u32 %v12913_v40, 16  ;;  %v2664_v15 = vshll.u32 %v10472_v0, 16 }
 0x29d   : > { %2889 = vmatmul.bf16.gmra.mxu3 %v2659_v33  ;;  %2457 = vmatmul.bf16.gmra.mxu2 %v10472_v0  ;;  %v1687_v41 = vrot.slane %v12930_v8, 2  ;;  %v1688_v33 = vrot.slane %v12931_v28, 3  ;;  %v2666_v24 = vrot.slane %v2664_v15, 1  ;;  %v12933_v28 = vld [vmem:[#allocation43_spill] sm:$0xff] }
 0x29e   : > { %v12934_v17 = vunpack.c.l.b16 %v12933_v28  ;;  %v12938_v15 = vld [vmem:[#allocation79_spill] sm:$0xff] }
 0x29f   : > { %v1689_v38 = vor.u32 %v1688_v33, %v1687_v41  ;;  %v12937_v33 = vld [vmem:[#allocation44_spill] sm:$0xff] }
 0x2a0   : > { %v1585_v27 = vpop.f32.mrf.mxu3  ;;  %v2418_v22 = vpop.f32.mrf.mxu2  ;;  %v10504_v45 = vpack.c.b16 %v12936_v53, %v12934_v17 }
 0x2a1   : > { %v10482_v59 = vadd.f32 %v1585_v27, %v10182_v55  ;;  %v1210_v29 = vpop.f32.mrf.mxu0  ;;  %v10492_v36 = vpop.f32.mrf.mxu1  ;;  %v12932_v27 = vld [vmem:[#allocation78_spill] sm:$0xff]  ;;  %v1690_v40 = vsel %vm1651_vm3, %v1685_v23, %v1689_v38 }
 0x2a2   : > { %v10488_v50 = vadd.f32 %v1210_v29, %v954_v20  ;;  %v2667_v29 = vsel %vm452_vm0, %v2662_v2, %v2666_v24  ;;  %v1590_v2 = vadd.f32 %v12938_v15, %v10220_v60 }
 0x2a3   : > { %12929 = vst [vmem:[#allocation57_spill] sm:$0xff] %v10482_v59  ;;  %v1589_v59 = vadd.f32 %v12932_v27, %v10204_v63  ;;  %v2026_v63 = vrot.slane %v12937_v33, 3  ;;  %v12940_v27 = vshll.u32 %v12926_v34, 16 }
 0x2a5   : > { %v2027_v23 = vsel %vm2004_vm4, %v2024_v47, %v2026_v63  ;;  %v2672_v47 = vshll.u32 %v10504_v45, 16 }
 0x2a8   : > { %v1587_v55 = vpop.f32.mrf.mxu3  ;;  %v10496_v39 = vpop.f32.mrf.mxu2 }
 0x2a9   : > { %v1828_v8 = vpop.f32.mrf.mxu0  ;;  %v10506_v41 = vpop.f32.mrf.mxu1 }
 0x2aa   : > { %v1942_v20 = vadd.f32 %v1828_v8, %v1589_v59  ;;  %v1692_v8 = vrot.slane %v12940_v27, 3 }
 0x2ab   : > { %1867 = vmatmul.bf16.gmra.mxu0 %v1690_v40  ;;  %2179 = vmatmul.bf16.gmra.mxu1 %v2027_v23 }
 0x2ac   : > { %v2244_v4 = vadd.f32 %v2130_v54, %v1942_v20  ;;  %v12939_v54 = vshrl.u32 %v12926_v34, 16 }
 0x2ad   : > { %2894 = vmatmul.bf16.gmra.mxu3 %v2667_v29  ;;  %2462 = vmatmul.bf16.gmra.mxu2 %v10504_v45 }
 0x2ae   : > { %v2527_v18 = vadd.f32 %v2413_v7, %v2244_v4  ;;  %v1691_v55 = vrot.slane %v12939_v54, 2  ;;  %v2668_v7 = vshrl.u32 %v10472_v0, 16 }
 0x2b0   : > { %v2855_v59 = vpop.f32.mrf.mxu3  ;;  %v10513_v26 = vpop.f32.mrf.mxu2  ;;  %v1693_v60 = vor.u32 %v1692_v8, %v1691_v55  ;;  %v2670_v4 = vor.u32 %v2668_v7, %v2666_v24  ;;  %v12942_v24 = vld [vmem:[#allocation47_spill] sm:$0xff] }
 0x2b1   : > { %v10515_v53 = vadd.f32 %v2855_v59, %v2527_v18  ;;  %v1830_v17 = vpop.f32.mrf.mxu0  ;;  %v10524_v29 = vpop.f32.mrf.mxu1  ;;  %v2674_v18 = vrot.slane %v2672_v47, 1  ;;  %v12941_v59 = vld [vmem:[#allocation81_spill] sm:$0xff]  ;;  %v12943_v55 = vunpack.c.l.b16 %v12942_v24  ;;  %v12944_v8 = vld [vmem:[#allocation3_spill] sm:$0xff] }
 0x2b2   : > { %v1943_v40 = vadd.f32 %v1830_v17, %v1590_v2  ;;  %v1591_v15 = vadd.f32 %v12941_v59, %v10230_v10  ;;  %v1694_v17 = vsel %vm1651_vm3, %v1689_v38, %v1693_v60  ;;  %v12946_v38 = vld [vmem:[#allocation49_spill] sm:$0xff] }
 0x2b4   : > { %v2245_v20 = vadd.f32 %v10455_v51, %v1943_v40  ;;  %v2675_v51 = vsel %vm452_vm0, %v2670_v4, %v2674_v18  ;;  %v12945_v40 = vunpack.c.l.b16 %v12944_v8  ;;  %v8756_v4 = vld [vmem:[%s12557_s3 + $0x78] sm:$0xff] }
 0x2b5   : > { %4224 = vmatpush.bf16.msra.mxu1 %v8756_v4 }
 0x2b6   : > { %v2528_v28 = vadd.f32 %v2415_v3, %v2245_v20  ;;  %v8748_v3 = vld [vmem:[%s12557_s3 + $0x38] sm:$0xff]  ;;  %v10541_v7 = vpack.c.b16 %v12945_v40, %v12943_v55  ;;  %v2028_v20 = vrot.slane %v12946_v38, 3 }
 0x2b7   : > { %4401 = vmatpush.bf16.msra.mxu2 %v8748_v3  ;;  %v12950_v3 = vshll.u32 %v12937_v33, 16 }
 0x2b8   : > { %v2857_v23 = vpop.f32.mrf.mxu3  ;;  %v10528_v54 = vpop.f32.mrf.mxu2  ;;  %v2680_v8 = vshll.u32 %v10541_v7, 16 }
 0x2b9   : > { %v10530_v34 = vadd.f32 %v2857_v23, %v2528_v28  ;;  %v1833_v2 = vpop.f32.mrf.mxu0  ;;  %v10544_v47 = vpop.f32.mrf.mxu1  ;;  %v2029_v23 = vsel %vm2004_vm4, %v2026_v63, %v2028_v20  ;;  %v1696_v24 = vrot.slane %v12950_v3, 3  ;;  %v2676_v63 = vshrl.u32 %v10504_v45, 16 }
 0x2ba   : > { %v1944_v27 = vadd.f32 %v1833_v2, %v1591_v15 }
 0x2bb   : > { %1872 = vmatmul.bf16.gmra.mxu0 %v1694_v17  ;;  %2184 = vmatmul.bf16.gmra.mxu1 %v2029_v23  ;;  %v2678_v23 = vor.u32 %v2676_v63, %v2674_v18 }
 0x2bc   : > { %v2246_v10 = vadd.f32 %v10474_v61, %v1944_v27  ;;  %v12947_v61 = vld [vmem:[#allocation82_spill] sm:$0xff] }
 0x2bd   : > { %2899 = vmatmul.bf16.gmra.mxu3 %v2675_v51  ;;  %2467 = vmatmul.bf16.gmra.mxu2 %v10541_v7  ;;  %v1592_v15 = vadd.f32 %v12947_v61, %v10250_v30  ;;  %v12949_v51 = vshrl.u32 %v12937_v33, 16  ;;  %v12951_v61 = vld [vmem:[#allocation83_spill] sm:$0xff] }
 0x2be   : > { %v2529_v28 = vadd.f32 %v2418_v22, %v2246_v10  ;;  %v8717_v10 = vld [vmem:[%s12555_s1 + $0x218] sm:$0xff] }
 0x2bf   : > { %v1695_v22 = vrot.slane %v12949_v51, 2  ;;  %3151 = vmatpush.bf16.msrb.mxu0 %v8717_v10 }
 0x2c0   : > { %v2860_v59 = vpop.f32.mrf.mxu3  ;;  %v10554_v2 = vpop.f32.mrf.mxu2 }
 0x2c1   : > { %v10556_v17 = vadd.f32 %v2860_v59, %v2529_v28  ;;  %v1835_v27 = vpop.f32.mrf.mxu0  ;;  %v10565_v30 = vpop.f32.mrf.mxu1  ;;  %v1697_v28 = vor.u32 %v1696_v24, %v1695_v22  ;;  %v2682_v59 = vrot.slane %v2680_v8, 1  ;;  %v12952_v22 = vld [vmem:[#allocation4_spill] sm:$0xff] }
 0x2c2   : > { %v1945_v55 = vadd.f32 %v1835_v27, %v1592_v15  ;;  %v1593_v15 = vadd.f32 %v12951_v61, %v10262_v6  ;;  %v12953_v24 = vunpack.c.l.b16 %v12952_v22 }
 0x2c3   : > { %12948 = vst [vmem:[#allocation58_spill] sm:$0xff] %v10556_v17  ;;  %v1698_v3 = vsel %vm1651_vm3, %v1693_v60, %v1697_v28  ;;  %v2683_v17 = vsel %vm452_vm0, %v2678_v23, %v2682_v59 }
 0x2c4   : > { %v2247_v40 = vadd.f32 %v10492_v36, %v1945_v55 }
 0x2c6   : > { %v2530_v4 = vadd.f32 %v10496_v39, %v2247_v40  ;;  %v12954_v39 = vld [vmem:[#allocation6_spill] sm:$0xff]  ;;  %v12956_v40 = vld [vmem:[#allocation5_spill] sm:$0xff] }
 0x2c7   : > { %v12955_v18 = vunpack.c.l.b16 %v12954_v39  ;;  %v2030_v10 = vrot.slane %v12956_v40, 3 }
 0x2c8   : > { %v2862_v33 = vpop.f32.mrf.mxu3  ;;  %v10573_v27 = vpop.f32.mrf.mxu2 }
 0x2c9   : > { %v10575_v51 = vadd.f32 %v2862_v33, %v2530_v4  ;;  %v1838_v36 = vpop.f32.mrf.mxu0  ;;  %v10583_v63 = vpack.c.b16 %v12955_v18, %v12953_v24  ;;  %v10586_v6 = vpop.f32.mrf.mxu1  ;;  %v2031_v4 = vsel %vm2004_vm4, %v2028_v20, %v2030_v10  ;;  %v12957_v33 = vld [vmem:[#allocation84_spill] sm:$0xff] }
 0x2ca   : > { %v1946_v55 = vadd.f32 %v1838_v36, %v1593_v15  ;;  %v1594_v61 = vadd.f32 %v12957_v33, %v10286_v12  ;;  %v12961_v33 = vld [vmem:[#allocation85_spill] sm:$0xff] }
 0x2cb   : > { %1877 = vmatmul.bf16.gmra.mxu0 %v1698_v3  ;;  %2189 = vmatmul.bf16.gmra.mxu1 %v2031_v4  ;;  %v12959_v3 = vshrl.u32 %v12946_v38, 16  ;;  %v2688_v20 = vshll.u32 %v10583_v63, 16 }
 0x2cc   : > { %v2248_v8 = vadd.f32 %v10506_v41, %v1946_v55 }
 0x2cd   : > { %2904 = vmatmul.bf16.gmra.mxu3 %v2683_v17  ;;  %2472 = vmatmul.bf16.gmra.mxu2 %v10583_v63  ;;  %v1699_v55 = vrot.slane %v12959_v3, 2  ;;  %v12960_v17 = vshll.u32 %v12946_v38, 16  ;;  %v2690_v4 = vrot.slane %v2688_v20, 1  ;;  %v1595_v3 = vadd.f32 %v12961_v33, %v10297_v32  ;;  %v12967_v20 = vld [vmem:[#allocation8_spill] sm:$0xff] }
 0x2ce   : > { %v2531_v60 = vadd.f32 %v10513_v26, %v2248_v8  ;;  %v2684_v26 = vshrl.u32 %v10541_v7, 16 }
 0x2cf   : > { %v1700_v22 = vrot.slane %v12960_v17, 3 }
 0x2d0   : > { %v2865_v23 = vpop.f32.mrf.mxu3  ;;  %v10594_v15 = vpop.f32.mrf.mxu2 }
 0x2d1   : > { %v10596_v41 = vadd.f32 %v2865_v23, %v2531_v60  ;;  %v1840_v36 = vpop.f32.mrf.mxu0  ;;  %v10605_v18 = vpop.f32.mrf.mxu1  ;;  %v1701_v12 = vor.u32 %v1700_v22, %v1699_v55  ;;  %v2686_v60 = vor.u32 %v2684_v26, %v2682_v59  ;;  %v12964_v22 = vld [vmem:[#allocation9_spill] sm:$0xff] }
 0x2d2   : > { %v1947_v24 = vadd.f32 %v1840_v36, %v1594_v61 }
 0x2d3   : > { %12958 = vst [vmem:[#allocation95_spill] sm:$0xff] %v10596_v41  ;;  %v1702_v17 = vsel %vm1651_vm3, %v1697_v28, %v1701_v12 }
 0x2d4   : > { %v2249_v39 = vadd.f32 %v10524_v29, %v1947_v24  ;;  %v2691_v29 = vsel %vm452_vm0, %v2686_v60, %v2690_v4  ;;  %v12962_v24 = vld [vmem:[#allocation7_spill] sm:$0xff] }
 0x2d5   : > { %v12963_v55 = vunpack.c.l.b16 %v12962_v24 }
 0x2d6   : > { %v2532_v8 = vadd.f32 %v10528_v54, %v2249_v39  ;;  %v12965_v54 = vunpack.c.l.b16 %v12964_v22  ;;  %v2032_v39 = vrot.slane %v12967_v20, 3 }
 0x2d8   : > { %v2867_v23 = vpop.f32.mrf.mxu3  ;;  %v10610_v38 = vpop.f32.mrf.mxu2  ;;  %v10620_v59 = vpack.c.b16 %v12965_v54, %v12963_v55 }
 0x2d9   : > { %v10612_v61 = vadd.f32 %v2867_v23, %v2532_v8  ;;  %v1843_v36 = vpop.f32.mrf.mxu0  ;;  %v10623_v32 = vpop.f32.mrf.mxu1  ;;  %v2033_v8 = vsel %vm2004_vm4, %v2030_v10, %v2032_v39  ;;  %v12968_v23 = vld [vmem:[#allocation87_spill] sm:$0xff] }
 0x2da   : > { %v1948_v41 = vadd.f32 %v1843_v36, %v1595_v3  ;;  %12966 = vst [vmem:[#allocation59_spill] sm:$0xff] %v10620_v59  ;;  %v1596_v33 = vadd.f32 %v12968_v23, %v10318_v19  ;;  %v12969_v36 = vshrl.u32 %v12956_v40, 16  ;;  %v2696_v10 = vshll.u32 %v10620_v59, 16  ;;  %v12971_v23 = vld [vmem:[#allocation88_spill] sm:$0xff] }
 0x2db   : > { %1882 = vmatmul.bf16.gmra.mxu0 %v1702_v17  ;;  %2194 = vmatmul.bf16.gmra.mxu1 %v2033_v8 }
 0x2dc   : > { %v2250_v26 = vadd.f32 %v10544_v47, %v1948_v41  ;;  %v1703_v17 = vrot.slane %v12969_v36, 2  ;;  %v2698_v8 = vrot.slane %v2696_v10, 1  ;;  %v1597_v36 = vadd.f32 %v12971_v23, %v10329_v46 }
 0x2dd   : > { %2909 = vmatmul.bf16.gmra.mxu3 %v2691_v29  ;;  %2477 = vmatmul.bf16.gmra.mxu2 %v10620_v59  ;;  %v12970_v29 = vshll.u32 %v12956_v40, 16 }
 0x2de   : > { %v2533_v28 = vadd.f32 %v10554_v2, %v2250_v26  ;;  %v2692_v2 = vshrl.u32 %v10583_v63, 16 }
 0x2df   : > { %v1704_v24 = vrot.slane %v12970_v29, 3 }
 0x2e0   : > { %v2870_v60 = vpop.f32.mrf.mxu3  ;;  %v10631_v3 = vpop.f32.mrf.mxu2 }
 0x2e1   : > { %v10633_v47 = vadd.f32 %v2870_v60, %v2533_v28  ;;  %v1845_v41 = vpop.f32.mrf.mxu0  ;;  %v10642_v54 = vpop.f32.mrf.mxu1  ;;  %v1705_v19 = vor.u32 %v1704_v24, %v1703_v17  ;;  %v2694_v28 = vor.u32 %v2692_v2, %v2690_v4  ;;  %v12972_v4 = vld [vmem:[#allocation10_spill] sm:$0xff] }
 0x2e2   : > { %v1949_v55 = vadd.f32 %v1845_v41, %v1596_v33  ;;  %v12973_v24 = vunpack.c.l.b16 %v12972_v4  ;;  %v12979_v4 = vshrl.u32 %v12967_v20, 16 }
 0x2e3   : > { %v1706_v29 = vsel %vm1651_vm3, %v1701_v12, %v1705_v19  ;;  %v8755_v12 = vld [vmem:[%s12557_s3 + $0x70] sm:$0xff] }
 0x2e4   : > { %v2251_v22 = vadd.f32 %v10565_v30, %v1949_v55  ;;  %v8747_v30 = vld [vmem:[%s12557_s3 + $0x30] sm:$0xff]  ;;  %v12974_v55 = vld [vmem:[#allocation13_spill] sm:$0xff]  ;;  %4225 = vmatpush.bf16.msra.mxu1 %v8755_v12 }
 0x2e5   : > { %v12975_v2 = vunpack.c.l.b16 %v12974_v55  ;;  %4402 = vmatpush.bf16.msra.mxu2 %v8747_v30 }
 0x2e6   : > { %v2534_v26 = vadd.f32 %v10573_v27, %v2251_v22  ;;  %v2699_v27 = vsel %vm452_vm0, %v2694_v28, %v2698_v8 }
 0x2e7   : > { %v10660_v10 = vpack.c.b16 %v12975_v2, %v12973_v24  ;;  %v12980_v24 = vshll.u32 %v12967_v20, 16  ;;  %v2700_v2 = vshrl.u32 %v10620_v59, 16 }
 0x2e8   : > { %v2872_v60 = vpop.f32.mrf.mxu3  ;;  %v10647_v40 = vpop.f32.mrf.mxu2 }
 0x2e9   : > { %v10649_v33 = vadd.f32 %v2872_v60, %v2534_v26  ;;  %v1848_v41 = vpop.f32.mrf.mxu0  ;;  %v10663_v22 = vpop.f32.mrf.mxu1  ;;  %v12976_v26 = vld [vmem:[#allocation12_spill] sm:$0xff]  ;;  %v1708_v55 = vrot.slane %v12980_v24, 3 }
 0x2ea   : > { %v1950_v17 = vadd.f32 %v1848_v41, %v1597_v36  ;;  %v2034_v60 = vrot.slane %v12976_v26, 3 }
 0x2eb   : > { %1887 = vmatmul.bf16.gmra.mxu0 %v1706_v29 }
 0x2ec   : > { %v2252_v46 = vadd.f32 %v10586_v6, %v1950_v17  ;;  %v2035_v23 = vsel %vm2004_vm4, %v2032_v39, %v2034_v60  ;;  %v12977_v6 = vld [vmem:[#allocation90_spill] sm:$0xff]  ;;  %v2704_v39 = vshll.u32 %v10660_v10, 16 }
 0x2ed   : > { %2914 = vmatmul.bf16.gmra.mxu3 %v2699_v27  ;;  %2482 = vmatmul.bf16.gmra.mxu2 %v10660_v10  ;;  %v1598_v41 = vadd.f32 %v12977_v6, %v10350_v52  ;;  %v1707_v27 = vrot.slane %v12979_v4, 2  ;;  %v8716_v52 = vld [vmem:[%s12555_s1 + $0x210] sm:$0xff] }
 0x2ee   : > { %v2535_v28 = vadd.f32 %v10594_v15, %v2252_v46  ;;  %2199 = vmatmul.bf16.gmra.mxu1 %v2035_v23  ;;  %3152 = vmatpush.bf16.msrb.mxu0 %v8716_v52  ;;  %v2706_v20 = vrot.slane %v2704_v39, 1  ;;  %v12982_v52 = vld [vmem:[#allocation14_spill] sm:$0xff]  ;;  %v12986_v39 = vld [vmem:[#allocation17_spill] sm:$0xff] }
 0x2f0   : > { %v2875_v36 = vpop.f32.mrf.mxu3  ;;  %v10674_v29 = vpop.f32.mrf.mxu2 }
 0x2f1   : > { %v10676_v30 = vadd.f32 %v2875_v36, %v2535_v28  ;;  %v1850_v17 = vpop.f32.mrf.mxu0  ;;  %v10688_v12 = vpop.f32.mrf.mxu1  ;;  %v1709_v28 = vor.u32 %v1708_v55, %v1707_v27  ;;  %v2702_v36 = vor.u32 %v2700_v2, %v2698_v8  ;;  %v12983_v27 = vunpack.c.l.b16 %v12982_v52  ;;  %v12984_v55 = vld [vmem:[#allocation18_spill] sm:$0xff] }
 0x2f2   : > { %v1951_v15 = vadd.f32 %v1850_v17, %v1598_v41  ;;  %v12981_v41 = vld [vmem:[#allocation91_spill] sm:$0xff] }
 0x2f3   : > { %12978 = vst [vmem:[#allocation26_spill] sm:$0xff] %v10676_v30  ;;  %v1599_v17 = vadd.f32 %v12981_v41, %v10364_v31  ;;  %v1710_v59 = vsel %vm1651_vm3, %v1705_v19, %v1709_v28 }
 0x2f4   : > { %v2253_v46 = vadd.f32 %v10605_v18, %v1951_v15  ;;  %v2707_v15 = vsel %vm452_vm0, %v2702_v36, %v2706_v20  ;;  %v12987_v36 = vld [vmem:[#allocation93_spill] sm:$0xff] }
 0x2f6   : > { %v2536_v23 = vadd.f32 %v10610_v38, %v2253_v46  ;;  %v12985_v38 = vunpack.c.l.b16 %v12984_v55  ;;  %v2036_v46 = vrot.slane %v12986_v39, 3 }
 0x2f8   : > { %v2877_v6 = vpop.f32.mrf.mxu3  ;;  %v10693_v4 = vpop.f32.mrf.mxu2  ;;  %v10703_v8 = vpack.c.b16 %v12985_v38, %v12983_v27 }
 0x2f9   : > { %v10695_v24 = vadd.f32 %v2877_v6, %v2536_v23  ;;  %v1853_v30 = vpop.f32.mrf.mxu0  ;;  %v10706_v31 = vpop.f32.mrf.mxu1  ;;  %v1600_v6 = vadd.f32 %v12987_v36, %v10385_v44  ;;  %v12991_v36 = vld [vmem:[#allocation94_spill] sm:$0xff] }
 0x2fa   : > { %v1952_v18 = vadd.f32 %v1853_v30, %v1599_v17  ;;  %v2037_v30 = vsel %vm2004_vm4, %v2034_v60, %v2036_v46  ;;  %v12989_v17 = vshrl.u32 %v12976_v26, 16  ;;  %v2712_v60 = vshll.u32 %v10703_v8, 16 }
 0x2fb   : > { %1892 = vmatmul.bf16.gmra.mxu0 %v1710_v59 }
 0x2fc   : > { %v2254_v2 = vadd.f32 %v10623_v32, %v1952_v18  ;;  %v1711_v18 = vrot.slane %v12989_v17, 2  ;;  %v1601_v17 = vadd.f32 %v12991_v36, %v10396_v25 }
 0x2fd   : > { %2919 = vmatmul.bf16.gmra.mxu3 %v2707_v15  ;;  %2487 = vmatmul.bf16.gmra.mxu2 %v10703_v8  ;;  %v12990_v15 = vshll.u32 %v12976_v26, 16 }
 0x2fe   : > { %v2537_v19 = vadd.f32 %v10631_v3, %v2254_v2  ;;  %2204 = vmatmul.bf16.gmra.mxu1 %v2037_v30  ;;  %v2708_v3 = vshrl.u32 %v10660_v10, 16  ;;  %v2714_v30 = vrot.slane %v2712_v60, 1  ;;  %v12997_v60 = vld [vmem:[#allocation22_spill] sm:$0xff] }
 0x2ff   : > { %v1712_v52 = vrot.slane %v12990_v15, 3 }
 0x300   : > { %v2880_v23 = vpop.f32.mrf.mxu3  ;;  %v10714_v41 = vpop.f32.mrf.mxu2 }
 0x301   : > { %v10716_v32 = vadd.f32 %v2880_v23, %v2537_v19  ;;  %v1855_v59 = vpop.f32.mrf.mxu0  ;;  %v10725_v38 = vpop.f32.mrf.mxu1  ;;  %v1713_v44 = vor.u32 %v1712_v52, %v1711_v18  ;;  %v2710_v19 = vor.u32 %v2708_v3, %v2706_v20  ;;  %v12994_v52 = vld [vmem:[#allocation23_spill] sm:$0xff] }
 0x302   : > { %v1953_v27 = vadd.f32 %v1855_v59, %v1600_v6 }
 0x303   : > { %12988 = vst [vmem:[#allocation30_spill] sm:$0xff] %v10716_v32  ;;  %v1714_v15 = vsel %vm1651_vm3, %v1709_v28, %v1713_v44 }
 0x304   : > { %v2255_v55 = vadd.f32 %v10642_v54, %v1953_v27  ;;  %v2715_v54 = vsel %vm452_vm0, %v2710_v19, %v2714_v30  ;;  %v12992_v27 = vld [vmem:[#allocation19_spill] sm:$0xff] }
 0x305   : > { %v12993_v18 = vunpack.c.l.b16 %v12992_v27 }
 0x306   : > { %v2538_v2 = vadd.f32 %v10647_v40, %v2255_v55  ;;  %v12995_v40 = vunpack.c.l.b16 %v12994_v52  ;;  %v2038_v55 = vrot.slane %v12997_v60, 3 }
 0x308   : > { %v2882_v23 = vpop.f32.mrf.mxu3  ;;  %v10730_v26 = vpop.f32.mrf.mxu2  ;;  %v10740_v20 = vpack.c.b16 %v12995_v40, %v12993_v18 }
 0x309   : > { %v10732_v6 = vadd.f32 %v2882_v23, %v2538_v2  ;;  %v1858_v59 = vpop.f32.mrf.mxu0  ;;  %v10743_v25 = vpop.f32.mrf.mxu1  ;;  %v2039_v2 = vsel %vm2004_vm4, %v2036_v46, %v2038_v55  ;;  %v12998_v23 = vld [vmem:[#allocation96_spill] sm:$0xff] }
 0x30a   : > { %v1954_v32 = vadd.f32 %v1858_v59, %v1601_v17  ;;  %12996 = vst [vmem:[#allocation60_spill] sm:$0xff] %v10740_v20  ;;  %v1602_v36 = vadd.f32 %v12998_v23, %v10417_v48  ;;  %v12999_v59 = vshrl.u32 %v12986_v39, 16  ;;  %v2720_v46 = vshll.u32 %v10740_v20, 16  ;;  %v13001_v23 = vld [vmem:[#allocation97_spill] sm:$0xff] }
 0x30b   : > { %1897 = vmatmul.bf16.gmra.mxu0 %v1714_v15 }
 0x30c   : > { %v2256_v3 = vadd.f32 %v10663_v22, %v1954_v32  ;;  %v1715_v15 = vrot.slane %v12999_v59, 2 }
 0x30d   : > { %2924 = vmatmul.bf16.gmra.mxu3 %v2715_v54  ;;  %2492 = vmatmul.bf16.gmra.mxu2 %v10740_v20  ;;  %v13000_v54 = vshll.u32 %v12986_v39, 16 }
 0x30e   : > { %v2539_v28 = vadd.f32 %v10674_v29, %v2256_v3  ;;  %2209 = vmatmul.bf16.gmra.mxu1 %v2039_v2  ;;  %v2716_v29 = vshrl.u32 %v10703_v8, 16  ;;  %v2722_v2 = vrot.slane %v2720_v46, 1 }
 0x30f   : > { %v1716_v27 = vrot.slane %v13000_v54, 3 }
 0x310   : > { %v2885_v19 = vpop.f32.mrf.mxu3  ;;  %v10751_v17 = vpop.f32.mrf.mxu2 }
 0x311   : > { %v10753_v22 = vadd.f32 %v2885_v19, %v2539_v28  ;;  %v1860_v32 = vpop.f32.mrf.mxu0  ;;  %v10762_v40 = vpop.f32.mrf.mxu1  ;;  %v1717_v48 = vor.u32 %v1716_v27, %v1715_v15  ;;  %v2718_v28 = vor.u32 %v2716_v29, %v2714_v30  ;;  %v8746_v19 = vld [vmem:[%s12557_s3 + $0x28] sm:$0xff]  ;;  %v13002_v27 = vld [vmem:[#allocation24_spill] sm:$0xff] }
 0x312   : > { %v1955_v18 = vadd.f32 %v1860_v32, %v1602_v36  ;;  %v1603_v36 = vadd.f32 %v13001_v23, %v10428_v9  ;;  %4403 = vmatpush.bf16.msra.mxu2 %v8746_v19  ;;  %v8754_v30 = vld [vmem:[%s12557_s3 + $0x68] sm:$0xff]  ;;  %v13004_v29 = vld [vmem:[#allocation28_spill] sm:$0xff] }
 0x313   : > { %v1718_v15 = vsel %vm1651_vm3, %v1713_v44, %v1717_v48  ;;  %v13005_v46 = vunpack.c.l.b16 %v13004_v29  ;;  %4226 = vmatpush.bf16.msra.mxu1 %v8754_v30  ;;  %v13006_v44 = vld [vmem:[#allocation27_spill] sm:$0xff]  ;;  %v2724_v29 = vshrl.u32 %v10740_v20, 16 }
 0x314   : > { %v2257_v52 = vadd.f32 %v10688_v12, %v1955_v18  ;;  %v13003_v18 = vunpack.c.l.b16 %v13002_v27  ;;  %v2040_v19 = vrot.slane %v13006_v44, 3 }
 0x316   : > { %v2540_v3 = vadd.f32 %v10693_v4, %v2257_v52  ;;  %v2723_v4 = vsel %vm452_vm0, %v2718_v28, %v2722_v2  ;;  %v10783_v9 = vpack.c.b16 %v13005_v46, %v13003_v18 }
 0x318   : > { %v2887_v39 = vpop.f32.mrf.mxu3  ;;  %v10770_v32 = vpop.f32.mrf.mxu2 }
 0x319   : > { %v10772_v59 = vadd.f32 %v2887_v39, %v2540_v3  ;;  %v1863_v12 = vpop.f32.mrf.mxu0  ;;  %v10786_v3 = vpop.f32.mrf.mxu1  ;;  %v2041_v39 = vsel %vm2004_vm4, %v2038_v55, %v2040_v19 }
 0x31a   : > { %v1956_v54 = vadd.f32 %v1863_v12, %v1603_v36  ;;  %v13007_v36 = vld [vmem:[#allocation100_spill] sm:$0xff] }
 0x31b   : > { %1902 = vmatmul.bf16.gmra.mxu0 %v1718_v15  ;;  %v1604_v12 = vadd.f32 %v13007_v36, %v10449_v62  ;;  %v2728_v62 = vshll.u32 %v10783_v9, 16 }
 0x31c   : > { %v2258_v52 = vadd.f32 %v10706_v31, %v1956_v54  ;;  %v13009_v54 = vshrl.u32 %v12997_v60, 16 }
 0x31d   : > { %2929 = vmatmul.bf16.gmra.mxu3 %v2723_v4  ;;  %2497 = vmatmul.bf16.gmra.mxu2 %v10783_v9  ;;  %v13010_v4 = vshll.u32 %v12997_v60, 16  ;;  %v2730_v60 = vrot.slane %v2728_v62, 1  ;;  %v2042_v62 = vrot.slane %v9495_v57, 3 }
 0x31e   : > { %v2541_v28 = vadd.f32 %v10714_v41, %v2258_v52  ;;  %2214 = vmatmul.bf16.gmra.mxu1 %v2041_v39  ;;  %v1719_v30 = vrot.slane %v13009_v54, 2  ;;  %v8715_v41 = vld [vmem:[%s12555_s1 + $0x208] sm:$0xff] }
 0x31f   : > { %v1720_v18 = vrot.slane %v13010_v4, 3  ;;  %3153 = vmatpush.bf16.msrb.mxu0 %v8715_v41  ;;  %v13011_v54 = vld [vmem:[#allocation101_spill] sm:$0xff] }
 0x320   : > { %v2890_v23 = vpop.f32.mrf.mxu3  ;;  %v10794_v27 = vpop.f32.mrf.mxu2  ;;  %v1605_v4 = vadd.f32 %v13011_v54, %v10465_v56 }
 0x321   : > { %v10796_v31 = vadd.f32 %v2890_v23, %v2541_v28  ;;  %v1865_v15 = vpop.f32.mrf.mxu0  ;;  %v10808_v52 = vpop.f32.mrf.mxu1  ;;  %v1721_v28 = vor.u32 %v1720_v18, %v1719_v30  ;;  %v2726_v23 = vor.u32 %v2724_v29, %v2722_v2  ;;  %v13014_v18 = vld [vmem:[#allocation37_spill] sm:$0xff] }
 0x322   : > { %v1957_v55 = vadd.f32 %v1865_v15, %v1604_v12 }
 0x323   : > { %13008 = vst [vmem:[#allocation61_spill] sm:$0xff] %v10796_v31  ;;  %v1722_v41 = vsel %vm1651_vm3, %v1717_v48, %v1721_v28 }
 0x324   : > { %v2259_v46 = vadd.f32 %v10725_v38, %v1957_v55  ;;  %v2731_v38 = vsel %vm452_vm0, %v2726_v23, %v2730_v60  ;;  %v13012_v55 = vld [vmem:[#allocation29_spill] sm:$0xff] }
 0x325   : > { %v13013_v30 = vunpack.c.l.b16 %v13012_v55 }
 0x326   : > { %v2542_v39 = vadd.f32 %v10730_v26, %v2259_v46  ;;  %v13015_v26 = vunpack.c.l.b16 %v13014_v18  ;;  %v2043_v46 = vsel %vm2004_vm4, %v2040_v19, %v2042_v62 }
 0x328   : > { %v2892_v36 = vpop.f32.mrf.mxu3  ;;  %v10813_v31 = vpop.f32.mrf.mxu2  ;;  %v10823_v2 = vpack.c.b16 %v13015_v26, %v13013_v30  ;;  %v2732_v30 = vshrl.u32 %v10783_v9, 16 }
 0x329   : > { %v10815_v12 = vadd.f32 %v2892_v36, %v2542_v39  ;;  %v1868_v15 = vpop.f32.mrf.mxu0  ;;  %v10826_v56 = vpop.f32.mrf.mxu1  ;;  %v3411_v39 = vld [vmem:[%s12559_s5 + $0x10] sm:$0xff]  ;;  %v1606_v36 = vadd.f32 %v10009_v13, %v10488_v50 }
 0x32a   : > { %v1958_v20 = vadd.f32 %v1868_v15, %v1605_v4  ;;  %v13016_v4 = vshrl.u32 %v13006_v44, 16  ;;  %v2736_v13 = vshll.u32 %v10823_v2, 16 }
 0x32b   : > { %1907 = vmatmul.bf16.gmra.mxu0 %v1722_v41  ;;  %v13017_v41 = vshll.u32 %v13006_v44, 16  ;;  %v3412_v44 = vld [vmem:[%s12559_s5 + $0x18] sm:$0xff] }
 0x32c   : > { %v2260_v29 = vadd.f32 %v10743_v25, %v1958_v20  ;;  %v3409_v20 = vld [vmem:[%s12559_s5] sm:$0xff]  ;;  %v9124_v25 = vmov 0   ;;  %v1723_v15 = vrot.slane %v13016_v4, 2 }
 0x32d   : > { %2934 = vmatmul.bf16.gmra.mxu3 %v2731_v38  ;;  %2502 = vmatmul.bf16.gmra.mxu2 %v10823_v2  ;;  %3814 = vst [vmem:[#allocation2 + $0xb4] sm:$0xf] %v9124_v25  ;;  %v1724_v38 = vrot.slane %v13017_v41, 3  ;;  %v2044_v41 = vrot.slane %v9579_v49, 3 }
 0x32e   : > { %v2543_v48 = vadd.f32 %v10751_v17, %v2260_v29  ;;  %9062 = vset.pattern.permute.xlu1 %v9124_v25  ;;  %9061 = vset.pattern.permute.xlu0 %v9124_v25 }
 0x32f   : > { %2219 = vmatmul.bf16.gmra.mxu1 %v2043_v46  ;;  %3466 = vperm.xlu1 %9062, %v3411_v39   ;;  %v1725_v26 = vor.u32 %v1724_v38, %v1723_v15  ;;  %v2738_v46 = vrot.slane %v2736_v13, 1  ;;  %v3410_v39 = vld [vmem:[%s12559_s5 + $0x8] sm:$0xff]  ;;  %v13019_v38 = vld [vmem:[#allocation34_spill] sm:$0xff] }
 0x330   : > { %v2895_v23 = vpop.f32.mrf.mxu3  ;;  %v10840_v54 = vpop.f32.mrf.mxu2  ;;  %3456 = vperm.xlu0 %9061, %v3409_v20   ;;  %9063 = vset.pattern.permute.xlu2 %v9124_v25 }
 0x331   : > { %v10842_v17 = vadd.f32 %v2895_v23, %v2543_v48  ;;  %v1870_v19 = vpop.f32.mrf.mxu0  ;;  %v10851_v18 = vpop.f32.mrf.mxu1  ;;  %v2734_v48 = vor.u32 %v2732_v30, %v2730_v60  ;;  %v2045_v30 = vsel %vm2004_vm4, %v2042_v62, %v2044_v41  ;;  %v13021_v62 = vshll.u32 %v9495_v57, 16 }
 0x332   : > { %v1959_v55 = vadd.f32 %v1870_v19, %v1606_v36  ;;  %v1726_v36 = vsel %vm1651_vm3, %v1721_v28, %v1725_v26  ;;  %v3416_v28 = vld [vmem:[%s12559_s5 + $0x38] sm:$0xff] }
 0x333   : > { %v2739_v19 = vsel %vm452_vm0, %v2734_v48, %v2738_v46 }
 0x334   : > { %v2261_v50 = vadd.f32 %v10762_v40, %v1959_v55 }
 0x336   : > { %v2544_v29 = vadd.f32 %v10770_v32, %v2261_v50  ;;  %v13018_v32 = vld [vmem:[#allocation103_spill] sm:$0xff] }
 0x337   : > { %3471 = vperm.xlu1 %9062, %v3412_v44  }
 0x338   : > { %v2897_v20 = vpop.f32.mrf.mxu3  ;;  %v10860_v25 = vpop.f32.mrf.mxu2  ;;  %3461 = vperm.xlu0 %9061, %v3410_v39   ;;  %v1728_v39 = vrot.slane %v13021_v62, 3 }
 0x339   : > { %v10862_v40 = vadd.f32 %v2897_v20, %v2544_v29  ;;  %v1873_v23 = vpop.f32.mrf.mxu0  ;;  %v10868_v15 = vpop.f32.mrf.mxu1  ;;  %v13022_v20 = vld [vmem:[#allocation104_spill] sm:$0xff] }
 0x33a   : > { %v1960_v60 = vadd.f32 %v1873_v23, %v13018_v32  ;;  %v2744_v32 = vshll.u32 %v13019_v38, 16 }
 0x33b   : > { %1912 = vmatmul.bf16.gmra.mxu0 %v1726_v36  ;;  %v2740_v36 = vshrl.u32 %v10823_v2, 16 }
 0x33c   : > { %v2262_v4 = vadd.f32 %v10786_v3, %v1960_v60  ;;  %v3415_v3 = vld [vmem:[%s12559_s5 + $0x30] sm:$0xff] }
 0x33d   : > { %2939 = vmatmul.bf16.gmra.mxu3 %v2739_v19  ;;  %2507 = vmatmul.bf16.gmra.mxu2 %v13019_v38 }
 0x33e   : > { %v2545_v55 = vadd.f32 %v10794_v27, %v2262_v4  ;;  %v13020_v27 = vshrl.u32 %v9495_v57, 16  ;;  %v8745_v4 = vld [vmem:[%s12557_s3 + $0x20] sm:$0xff] }
 0x33f   : > { %2224 = vmatmul.bf16.gmra.mxu1 %v2045_v30  ;;  %3491 = vperm.xlu1 %9062, %v3416_v28   ;;  %v2742_v30 = vor.u32 %v2740_v36, %v2738_v46  ;;  %v2746_v28 = vrot.slane %v2744_v32, 1  ;;  %v13026_v32 = vld [vmem:[#allocation80_spill] sm:$0xff] }
 0x340   : > { %v2900_v13 = vpop.f32.mrf.mxu3  ;;  %v10880_v50 = vpop.f32.mrf.mxu2  ;;  %v1727_v44 = vrot.slane %v13020_v27, 2  ;;  %3486 = vperm.xlu0 %9061, %v3415_v3   ;;  %4404 = vmatpush.bf16.msra.mxu2 %v8745_v4  ;;  %v3419_v3 = vld [vmem:[%s12559_s5 + $0x50] sm:$0xff] }
 0x341   : > { %v10882_v29 = vadd.f32 %v2900_v13, %v2545_v55  ;;  %v1875_v48 = vpop.f32.mrf.mxu0  ;;  %v10892_v19 = vpop.f32.mrf.mxu1  ;;  %v10905_v13 = vld [vmem:[%s9201_s20 + $0xb8] sm:$0xff]   ;;  %v2747_v36 = vsel %vm452_vm0, %v2742_v30, %v2746_v28  ;;  %v8714_v30 = vld [vmem:[%s12555_s1 + $0x200] sm:$0xff] }
 0x342   : > { %v1961_v23 = vadd.f32 %v1875_v48, %v13022_v20  ;;  %13023 = vst [vmem:[#allocation62_spill] sm:$0xff] %v10892_v19  ;;  %v1729_v55 = vor.u32 %v1728_v39, %v1727_v44  ;;  %v8873_v48 = vunpack.c.l.b16 %v10905_v13  ;;  %v8753_v39 = vld [vmem:[%s12557_s3 + $0x60] sm:$0xff]  ;;  %v13025_v20 = vld [vmem:[#allocation105_spill] sm:$0xff]  ;;  %3154 = vmatpush.bf16.msrb.mxu0 %v8714_v30 }
 0x343   : > { %4227 = vmatpush.bf16.msra.mxu1 %v8753_v39  ;;  %v13028_v39 = vshrl.u32 %v9579_v49, 16 }
 0x344   : > { %v2263_v60 = vadd.f32 %v10808_v52, %v1961_v23  ;;  %v3418_v52 = vld [vmem:[%s12559_s5 + $0x48] sm:$0xff]  ;;  %v1730_v44 = vsel %vm1651_vm3, %v1725_v26, %v1729_v55  ;;  %v2046_v26 = vrot.slane %v9860_v42, 3 }
 0x346   : > { %v2546_v57 = vadd.f32 %v10813_v31, %v2263_v60  ;;  %v13027_v60 = vunpack.c.l.b16 %v13026_v32 }
 0x347   : > { %3506 = vperm.xlu1 %9062, %v3419_v3  }
 0x348   : > { %v2902_v27 = vpop.f32.mrf.mxu3  ;;  %v10908_v62 = vpop.f32.mrf.mxu2  ;;  %3501 = vperm.xlu0 %9061, %v3418_v52   ;;  %v10920_v4 = vpack.c.b16 %v8873_v48, %v13027_v60  ;;  %v3421_v48 = vld [vmem:[%s12559_s5 + $0x60] sm:$0xff]  ;;  %v2748_v60 = vshrl.u32 %v13019_v38, 16 }
 0x349   : > { %13024 = vst [vmem:[#allocation99_spill] sm:$0xff] %v10908_v62  ;;  %v10910_v31 = vadd.f32 %v2902_v27, %v2546_v57  ;;  %v1878_v46 = vpop.f32.mrf.mxu0  ;;  %v10923_v3 = vpop.f32.mrf.mxu1  ;;  %v2047_v27 = vsel %vm2004_vm4, %v2044_v41, %v2046_v26 }
 0x34a   : > { %v1962_v23 = vadd.f32 %v1878_v46, %v13025_v20  ;;  %v1731_v20 = vrot.slane %v13028_v39, 2  ;;  %v2750_v39 = vor.u32 %v2748_v60, %v2746_v28 }
 0x34b   : > { %1917 = vmatmul.bf16.gmra.mxu0 %v1730_v44 }
 0x34c   : > { %v2264_v57 = vadd.f32 %v10826_v56, %v1962_v23  ;;  %v3422_v56 = vld [vmem:[%s12559_s5 + $0x68] sm:$0xff]  ;;  %v13029_v23 = vshll.u32 %v9579_v49, 16  ;;  %v3413_v49 = vld [vmem:[%s12559_s5 + $0x20] sm:$0xff] }
 0x34d   : > { %2944 = vmatmul.bf16.gmra.mxu3 %v2747_v36  ;;  %2512 = vmatmul.bf16.gmra.mxu2 %v10920_v4 }
 0x34e   : > { %v2547_v52 = vadd.f32 %v10840_v54, %v2264_v57  ;;  %v1732_v36 = vrot.slane %v13029_v23, 3  ;;  %v2752_v57 = vshll.u32 %v10920_v4, 16  ;;  %3476 = vperm.xlu2 %9063, %v3413_v49   ;;  %v3427_v49 = vld [vmem:[%s12559_s5 + $0x90] sm:$0xff] }
 0x34f   : > { %2229 = vmatmul.bf16.gmra.mxu1 %v2047_v27  ;;  %3521 = vperm.xlu1 %9062, %v3422_v56  }
 0x350   : > { %v2905_v46 = vpop.f32.mrf.mxu3  ;;  %v10938_v44 = vpop.f32.mrf.mxu2  ;;  %3516 = vperm.xlu0 %9061, %v3421_v48   ;;  %v2754_v62 = vrot.slane %v2752_v57, 1 }
 0x351   : > { %v10940_v54 = vadd.f32 %v2905_v46, %v2547_v52  ;;  %v1880_v41 = vpop.f32.mrf.mxu0  ;;  %v10950_v30 = vpop.f32.mrf.mxu1  ;;  %v1733_v52 = vor.u32 %v1732_v36, %v1731_v20  ;;  %v13032_v20 = vld [vmem:[#allocation106_spill] sm:$0xff] }
 0x352   : > { %v1963_v32 = vadd.f32 %v1880_v41, %v10052_v43  ;;  %13030 = vst [vmem:[#allocation63_spill] sm:$0xff] %v10950_v30  ;;  %v3425_v43 = vld [vmem:[%s12559_s5 + $0x80] sm:$0xff]  ;;  %v2755_v36 = vsel %vm452_vm0, %v2750_v39, %v2754_v62  ;;  %v3414_v39 = vld [vmem:[%s12559_s5 + $0x28] sm:$0xff] }
 0x353   : > { %v1734_v41 = vsel %vm1651_vm3, %v1729_v55, %v1733_v52 }
 0x354   : > { %v2265_v27 = vadd.f32 %v10851_v18, %v1963_v32  ;;  %v3424_v18 = vld [vmem:[%s12559_s5 + $0x78] sm:$0xff] }
 0x355   : > { %v10970_v32 = vld [vmem:[%s9201_s20 + $0xbc] sm:$0xff]  }
 0x356   : > { %v2548_v46 = vadd.f32 %v10860_v25, %v2265_v27  ;;  %v2048_v27 = vrot.slane %v10905_v13, 3  ;;  %3481 = vperm.xlu2 %9063, %v3414_v39   ;;  %v2760_v39 = vshll.u32 %v10970_v32, 16 }
 0x357   : > { %3536 = vperm.xlu1 %9062, %v3425_v43  }
 0x358   : > { %v2907_v56 = vpop.f32.mrf.mxu3  ;;  %v10962_v48 = vpop.f32.mrf.mxu2  ;;  %3531 = vperm.xlu0 %9061, %v3424_v18  }
 0x359   : > { %13031 = vst [vmem:[#allocation31_spill] sm:$0xff] %v10962_v48  ;;  %v10964_v25 = vadd.f32 %v2907_v56, %v2548_v46  ;;  %v1883_v28 = vpop.f32.mrf.mxu0  ;;  %v10973_v57 = vpop.f32.mrf.mxu1  ;;  %v2049_v46 = vsel %vm2004_vm4, %v2046_v26, %v2048_v27 }
 0x35a   : > { %v1964_v23 = vadd.f32 %v1883_v28, %v13032_v20 }
 0x35b   : > { %1922 = vmatmul.bf16.gmra.mxu0 %v1734_v41  ;;  %v13035_v41 = vshll.u32 %v9860_v42, 16 }
 0x35c   : > { %v2266_v60 = vadd.f32 %v10868_v15, %v1964_v23  ;;  %v3428_v15 = vld [vmem:[%s12559_s5 + $0x98] sm:$0xff] }
 0x35d   : > { %2949 = vmatmul.bf16.gmra.mxu3 %v2755_v36  ;;  %2517 = vmatmul.bf16.gmra.mxu2 %v10970_v32  ;;  %v1736_v20 = vrot.slane %v13035_v41, 3  ;;  %v13036_v23 = vld [vmem:[#allocation107_spill] sm:$0xff]  ;;  %v303_v41 = vld [vmem:[%s9201_s20 + $0xc8] sm:$0xf] }
 0x35e   : > { %v2549_v55 = vadd.f32 %v10880_v50, %v2266_v60  ;;  %v13033_v50 = vshrl.u32 %v9860_v42, 16  ;;  %v2756_v60 = vshrl.u32 %v10920_v4, 16  ;;  %v3417_v42 = vld [vmem:[%s12559_s5 + $0x40] sm:$0xff] }
 0x35f   : > { %2234 = vmatmul.bf16.gmra.mxu1 %v2049_v46  ;;  %3551 = vperm.xlu1 %9062, %v3428_v15   ;;  %v8994_v46 = vld [vmem:[%s9201_s20 + $0xc0] sm:$0xff]   ;;  %v3431_v15 = vld [vmem:[%s12559_s5 + $0xb0] sm:$0xff] }
 0x360   : > { %v2910_v43 = vpop.f32.mrf.mxu3  ;;  %v10988_v18 = vpop.f32.mrf.mxu2  ;;  %v1735_v26 = vrot.slane %v13033_v50, 2  ;;  %3546 = vperm.xlu0 %9061, %v3427_v49   ;;  %v3430_v49 = vld [vmem:[%s12559_s5 + $0xa8] sm:$0xff]  ;;  %3496 = vperm.xlu2 %9063, %v3417_v42   ;;  %v1740_v42 = vshrl.u32 %v10905_v13, 16 }
 0x361   : > { %v10992_v56 = vadd.f32 %v2910_v43, %v2549_v55  ;;  %v1885_v28 = vpop.f32.mrf.mxu0  ;;  %v11002_v48 = vpop.f32.mrf.mxu1  ;;  %v2758_v55 = vor.u32 %v2756_v60, %v2754_v62  ;;  %v2762_v43 = vrot.slane %v2760_v39, 1  ;;  %v13039_v39 = vld [vmem:[#allocation108_spill] sm:$0xff] }
 0x362   : > { %v10997_v36 = vadd.f32 %v1885_v28, %v13036_v23  ;;  %13037 = vst [vmem:[#allocation64_spill] sm:$0xff] %v11002_v48  ;;  %v1737_v50 = vor.u32 %v1736_v20, %v1735_v26  ;;  %v8878_v28 = vunpack.c.h.b16 %v8994_v46 }
 0x363   : > { %13034 = vst [vmem:[#allocation32_spill] sm:$0xff] %v10992_v56  ;;  %v2763_v30 = vsel %vm452_vm0, %v2758_v55, %v2762_v43  ;;  %v2590_v56 = vunpack.c.l.b16 %v303_v41  ;;  %v3420_v55 = vld [vmem:[%s12559_s5 + $0x58] sm:$0xff]  ;;  %v2764_v41 = vshrl.u32 %v10970_v32, 16  ;;  %v3437_v32 = vld [vmem:[%s12559_s5 + $0xe0] sm:$0xff] }
 0x364   : > { %v1738_v20 = vsel %vm1651_vm3, %v1733_v52, %v1737_v50  ;;  %v2332_v60 = vpack.c.b16 %v8878_v28, %v8878_v28 }
 0x367   : > { %3566 = vperm.xlu1 %9062, %v3431_v15   ;;  %v11027_v15 = vpack.c.b16 %v2590_v56, %v8878_v28  ;;  %v1742_v56 = vrot.slane %v1740_v42, 2 }
 0x368   : > { %v11014_v23 = vpop.f32.mrf.mxu3  ;;  %v11016_v26 = vpop.f32.mrf.mxu2  ;;  %3561 = vperm.xlu0 %9061, %v3430_v49   ;;  %3511 = vperm.xlu2 %9063, %v3420_v55  }
 0x369   : > { %13038 = vst [vmem:[#allocation65_spill] sm:$0xff] %v11016_v26  ;;  %v1888_v62 = vpop.f32.mrf.mxu0  ;;  %v1743_v26 = vshll.u32 %v10905_v13, 16 }
 0x36a   : > { %v1966_v48 = vadd.f32 %v1888_v62, %v13039_v39  ;;  %v2768_v62 = vshll.u32 %v11027_v15, 16  ;;  %v2766_v39 = vor.u32 %v2764_v41, %v2762_v43 }
 0x36b   : > { %1927 = vmatmul.bf16.gmra.mxu0 %v1738_v20  ;;  %v11022_v46 = vpop.f32.mrf.mxu1  ;;  %v1745_v49 = vrot.slane %v1743_v26, 3  ;;  %v8744_v20 = vld [vmem:[%s12557_s3 + $0x18] sm:$0xff] }
 0x36c   : > { %v2268_v19 = vadd.f32 %v10923_v3, %v1966_v48  ;;  %v3434_v3 = vld [vmem:[%s12559_s5 + $0xc8] sm:$0xff]  ;;  %4405 = vmatpush.bf16.msra.mxu2 %v8744_v20  ;;  %v2770_v42 = vrot.slane %v2768_v62, 1  ;;  %v8752_v26 = vld [vmem:[%s12557_s3 + $0x58] sm:$0xff] }
 0x36d   : > { %2954 = vmatmul.bf16.gmra.mxu3 %v2763_v30  ;;  %2522 = vmatmul.bf16.gmra.mxu2 %v2332_v60  ;;  %v3433_v30 = vld [vmem:[%s12559_s5 + $0xc0] sm:$0xff]  ;;  %v1746_v60 = vor.u32 %v1745_v49, %v1742_v56  ;;  %v3426_v62 = vld [vmem:[%s12559_s5 + $0x88] sm:$0xff] }
 0x36e   : > { %v2551_v52 = vadd.f32 %v10938_v44, %v2268_v19  ;;  %4228 = vmatpush.bf16.msra.mxu1 %v8752_v26 }
 0x36f   : > { %2239 = vmatmul.bf16.gmra.mxu1 %v2048_v27  ;;  %3581 = vperm.xlu1 %9062, %v3434_v3  }
 0x370   : > { %v2915_v48 = vpop.f32.mrf.mxu3  ;;  %v11038_v13 = vpop.f32.mrf.mxu2  ;;  %3576 = vperm.xlu0 %9061, %v3433_v30   ;;  %v1747_v30 = vsel %vm1651_vm3, %v1737_v50, %v1746_v60  ;;  %v3440_v50 = vld [vmem:[%s12559_s5 + $0xf8] sm:$0xff] }
 0x371   : > { %v11040_v19 = vadd.f32 %v2915_v48, %v2551_v52  ;;  %v1890_v44 = vpop.f32.mrf.mxu0  ;;  %v3436_v52 = vld [vmem:[%s12559_s5 + $0xd8] sm:$0xff] }
 0x372   : > { %v11043_v28 = vadd.f32 %v1890_v44, %v10165_v21  ;;  %v3423_v21 = vld [vmem:[%s12559_s5 + $0x70] sm:$0xff]  ;;  %v2771_v44 = vsel %vm452_vm0, %v2766_v39, %v2770_v42 }
 0x373   : > { %v11050_v27 = vpop.f32.mrf.mxu1  ;;  %3526 = vperm.xlu2 %9063, %v3423_v21  }
 0x377   : > { %3596 = vperm.xlu1 %9062, %v3437_v32   ;;  %v2772_v32 = vshrl.u32 %v11027_v15, 16 }
 0x378   : > { %v11064_v55 = vpop.f32.mrf.mxu3  ;;  %v11066_v43 = vpop.f32.mrf.mxu2  ;;  %3591 = vperm.xlu0 %9061, %v3436_v52   ;;  %v3429_v52 = vld [vmem:[%s12559_s5 + $0xa0] sm:$0xff] }
 0x379   : > { %v1893_v3 = vpop.f32.mrf.mxu0 }
 0x37a   : > { %v1968_v48 = vadd.f32 %v1893_v3, %v10194_v5  ;;  %v3439_v5 = vld [vmem:[%s12559_s5 + $0xf0] sm:$0xff] }
 0x37b   : > { %1932 = vmatmul.bf16.gmra.mxu0 %v1747_v30  ;;  %v2205_v49 = vpop.f32.mrf.mxu1  ;;  %3541 = vperm.xlu2 %9063, %v3426_v62   ;;  %v3443_v3 = vld [vmem:[%s12559_s5 + $0x110] sm:$0xff]  ;;  %v3442_v30 = vld [vmem:[%s12559_s5 + $0x108] sm:$0xff] }
 0x37c   : > { %v2270_v56 = vadd.f32 %v10973_v57, %v1968_v48 }
 0x37d   : > { %2959 = vmatmul.bf16.gmra.mxu3 %v2771_v44 }
 0x37e   : > { %v2553_v41 = vadd.f32 %v10988_v18, %v2270_v56  ;;  %v2774_v56 = vor.u32 %v2772_v32, %v2770_v42  ;;  %v3445_v42 = vld [vmem:[%s12559_s5 + $0x120] sm:$0xff] }
 0x37f   : > { %3611 = vperm.xlu1 %9062, %v3440_v50  }
 0x380   : > { %v2920_v20 = vpop.f32.mrf.mxu3  ;;  %v2488_v57 = vpop.f32.mrf.mxu2  ;;  %3606 = vperm.xlu0 %9061, %v3439_v5  }
 0x381   : > { %v11082_v39 = vadd.f32 %v2920_v20, %v2553_v41  ;;  %v1895_v26 = vpop.f32.mrf.mxu0  ;;  %v3432_v20 = vld [vmem:[%s12559_s5 + $0xb8] sm:$0xff] }
 0x382   : > { %v11085_v18 = vadd.f32 %v1895_v26, %v10198_v16  ;;  %v3446_v26 = vld [vmem:[%s12559_s5 + $0x128] sm:$0xff] }
 0x383   : > { %v11087_v21 = vpop.f32.mrf.mxu1  ;;  %3556 = vperm.xlu2 %9063, %v3429_v52  }
 0x384   : > { %13040 = vst [vmem:[#allocation66_spill] sm:$0xff] %v11087_v21 }
 0x387   : > { %3626 = vperm.xlu1 %9062, %v3443_v3   ;;  %v3031_v3 = vrot.slane %v10179_v14, 1 }
 0x388   : > { %v11099_v48 = vpop.f32.mrf.mxu3  ;;  %v11101_v16 = vpop.f32.mrf.mxu2  ;;  %3621 = vperm.xlu0 %9061, %v3442_v30   ;;  %v3032_v30 = vrot.slane %v10210_v11, 1 }
 0x389   : > { %13041 = vst [vmem:[#allocation102_spill] sm:$0xff] %v11101_v16  ;;  %v1898_v44 = vpop.f32.mrf.mxu0 }
 0x38a   : > { %v1970_v41 = vadd.f32 %v1898_v44, %v10217_v37  ;;  %v3435_v44 = vld [vmem:[%s12559_s5 + $0xd0] sm:$0xff]  ;;  %v3033_v11 = vsel %vm1042_vm1, %v3031_v3, %v3032_v30 }
 0x38b   : > { %1937 = vmatmul.bf16.gmra.mxu0 %v1746_v60  ;;  %v2210_v50 = vpop.f32.mrf.mxu1  ;;  %3571 = vperm.xlu2 %9063, %v3432_v20   ;;  %v3451_v3 = vld [vmem:[%s12559_s5 + $0x150] sm:$0xff] }
 0x38c   : > { %v2272_v62 = vadd.f32 %v11022_v46, %v1970_v41  ;;  %v3448_v41 = vld [vmem:[%s12559_s5 + $0x138] sm:$0xff] }
 0x38d   : > { %2964 = vmatmul.bf16.gmra.mxu3 %v2774_v56  ;;  %v3449_v56 = vld [vmem:[%s12559_s5 + $0x140] sm:$0xff] }
 0x38e   : > { %v2555_v5 = vadd.f32 %v11038_v13, %v2272_v62 }
 0x38f   : > { %3641 = vperm.xlu1 %9062, %v3446_v26  }
 0x390   : > { %v2925_v37 = vpop.f32.mrf.mxu3  ;;  %v2493_v46 = vpop.f32.mrf.mxu2  ;;  %3636 = vperm.xlu0 %9061, %v3445_v42  }
 0x391   : > { %v11115_v60 = vadd.f32 %v2925_v37, %v2555_v5  ;;  %v1900_v32 = vpop.f32.mrf.mxu0  ;;  %v3438_v37 = vld [vmem:[%s12559_s5 + $0xe8] sm:$0xff] }
 0x392   : > { %v11118_v13 = vadd.f32 %v1900_v32, %v10227_v35  ;;  %v3452_v32 = vld [vmem:[%s12559_s5 + $0x158] sm:$0xff] }
 0x393   : > { %v11120_v52 = vpop.f32.mrf.mxu1  ;;  %3586 = vperm.xlu2 %9063, %v3435_v44  }
 0x394   : > { %13042 = vst [vmem:[#allocation67_spill] sm:$0xff] %v11120_v52 }
 0x397   : > { %3656 = vperm.xlu1 %9062, %v3449_v56  }
 0x398   : > { %v11133_v35 = vpop.f32.mrf.mxu3  ;;  %v11135_v62 = vpop.f32.mrf.mxu2  ;;  %3651 = vperm.xlu0 %9061, %v3448_v41  }
 0x399   : > { %13043 = vst [vmem:[#allocation33_spill] sm:$0xff] %v11133_v35  ;;  %v1903_v14 = vpop.f32.mrf.mxu0 }
 0x39a   : > { %13044 = vst [vmem:[#allocation35_spill] sm:$0xff] %v11135_v62  ;;  %v1972_v5 = vadd.f32 %v1903_v14, %v10243_v58 }
 0x39b   : > { %3155 = vmatmul.bf16.vlgmr.msrb.gmra.mxu0 %v3033_v11  ;;  %v2215_v26 = vpop.f32.mrf.mxu1  ;;  %3601 = vperm.xlu2 %9063, %v3438_v37   ;;  %v8751_v11 = vld [vmem:[%s12557_s3 + $0x50] sm:$0xff] }
 0x39c   : > { %v2274_v20 = vadd.f32 %v2205_v49, %v1972_v5  ;;  %v13048_v5 = vld [vmem:[#allocation86_spill] sm:$0xff]  ;;  %4229 = vmatpush.bf16.msra.mxu1 %v8751_v11  ;;  %v3444_v11 = vld [vmem:[%s12559_s5 + $0x118] sm:$0xff] }
 0x39e   : > { %v2557_v42 = vadd.f32 %v2488_v57, %v2274_v20  ;;  %v8743_v57 = vld [vmem:[%s12557_s3 + $0x10] sm:$0xff]  ;;  %v3034_v20 = vrot.slane %v13048_v5, 1 }
 0x39f   : > { %3671 = vperm.xlu1 %9062, %v3452_v32   ;;  %4406 = vmatpush.bf16.msra.mxu2 %v8743_v57 }
 0x3a0   : > { %v2930_v44 = vpop.f32.mrf.mxu3  ;;  %v2498_v56 = vpop.f32.mrf.mxu2  ;;  %3666 = vperm.xlu0 %9061, %v3451_v3   ;;  %v3035_v3 = vsel %vm1042_vm1, %v3032_v30, %v3034_v20  ;;  %v13055_v30 = vld [vmem:[#allocation45_spill] sm:$0xff] }
 0x3a1   : > { %v11148_v58 = vadd.f32 %v2930_v44, %v2557_v42  ;;  %v1905_v49 = vpop.f32.mrf.mxu0  ;;  %v3441_v42 = vld [vmem:[%s12559_s5 + $0x100] sm:$0xff]  ;;  %v13051_v44 = vld [vmem:[#allocation11_spill] sm:$0xff]  ;;  %v3036_v16 = vrot.slane %v13055_v30, 1 }
 0x3a2   : > { %v11154_v41 = vadd.f32 %v1905_v49, %v10257_v1 }
 0x3a3   : > { %13045 = vst [vmem:[#allocation68_spill] sm:$0xff] %v11148_v58  ;;  %v11156_v14 = vpop.f32.mrf.mxu1  ;;  %3616 = vperm.xlu2 %9063, %v3441_v42  }
 0x3a4   : > { %13046 = vst [vmem:[#allocation69_spill] sm:$0xff] %v11154_v41 }
 0x3a5   : > { %13047 = vst [vmem:[#allocation70_spill] sm:$0xff] %v11156_v14 }
 0x3a8   : > { %v11165_v37 = vpop.f32.mrf.mxu3  ;;  %v11167_v32 = vpop.f32.mrf.mxu2 }
 0x3a9   : > { %13049 = vst [vmem:[#allocation71_spill] sm:$0xff] %v11165_v37  ;;  %v1908_v1 = vpop.f32.mrf.mxu0 }
 0x3aa   : > { %13050 = vst [vmem:[#allocation36_spill] sm:$0xff] %v11167_v32  ;;  %v1974_v49 = vadd.f32 %v1908_v1, %v13051_v44  ;;  %v13053_v32 = vld [vmem:[#allocation15_spill] sm:$0xff] }
 0x3ab   : > { %3160 = vmatmul.bf16.gmra.mxu0 %v3035_v3  ;;  %3631 = vperm.xlu2 %9063, %v3444_v11  }
 0x3ac   : > { %v2276_v57 = vadd.f32 %v2210_v50, %v1974_v49  ;;  %v2220_v14 = vpop.f32.mrf.mxu1  ;;  %v3447_v50 = vld [vmem:[%s12559_s5 + $0x130] sm:$0xff] }
 0x3ad   : > { %v13059_v49 = vld [vmem:[#allocation50_spill] sm:$0xff] }
 0x3ae   : > { %v2559_v62 = vadd.f32 %v2493_v46, %v2276_v57 }
 0x3b0   : > { %v2935_v5 = vpop.f32.mrf.mxu3  ;;  %v2503_v42 = vpop.f32.mrf.mxu2 }
 0x3b1   : > { %v11174_v52 = vadd.f32 %v2935_v5, %v2559_v62  ;;  %v1910_v37 = vpop.f32.mrf.mxu0  ;;  %v3037_v62 = vsel %vm1042_vm1, %v3034_v20, %v3036_v16  ;;  %v3450_v5 = vld [vmem:[%s12559_s5 + $0x148] sm:$0xff]  ;;  %v13063_v20 = vld [vmem:[#allocation48_spill] sm:$0xff] }
 0x3b2   : > { %v11177_v58 = vadd.f32 %v1910_v37, %v13053_v32 }
 0x3b3   : > { %13052 = vst [vmem:[#allocation39_spill] sm:$0xff] %v11174_v52  ;;  %3646 = vperm.xlu2 %9063, %v3447_v50  }
 0x3b4   : > { %13054 = vst [vmem:[#allocation38_spill] sm:$0xff] %v11177_v58  ;;  %v11180_v1 = vpop.f32.mrf.mxu1  ;;  %v3038_v58 = vrot.slane %v13063_v20, 1 }
 0x3b5   : > { %13056 = vst [vmem:[#allocation72_spill] sm:$0xff] %v11180_v1 }
 0x3b8   : > { %v11185_v46 = vpop.f32.mrf.mxu3  ;;  %v11187_v3 = vpop.f32.mrf.mxu2 }
 0x3b9   : > { %13057 = vst [vmem:[#allocation73_spill] sm:$0xff] %v11185_v46  ;;  %v1913_v44 = vpop.f32.mrf.mxu0 }
 0x3ba   : > { %13058 = vst [vmem:[#allocation74_spill] sm:$0xff] %v11187_v3  ;;  %v1976_v57 = vadd.f32 %v1913_v44, %v13059_v49  ;;  %v13061_v3 = vld [vmem:[#allocation89_spill] sm:$0xff] }
 0x3bb   : > { %3165 = vmatmul.bf16.gmra.mxu0 %v3037_v62  ;;  %3661 = vperm.xlu2 %9063, %v3450_v5  }
 0x3bc   : > { %v2278_v37 = vadd.f32 %v2215_v26, %v1976_v57  ;;  %v2225_v32 = vpop.f32.mrf.mxu1  ;;  %v3453_v26 = vld [vmem:[%s12559_s5 + $0x160] sm:$0xff]  ;;  %v3039_v57 = vsel %vm1042_vm1, %v3036_v16, %v3038_v58  ;;  %v8750_v16 = vld [vmem:[%s12557_s3 + $0x48] sm:$0xff] }
 0x3bd   : > { %4230 = vmatpush.bf16.msra.mxu1 %v8750_v16 }
 0x3be   : > { %v2561_v11 = vadd.f32 %v2498_v56, %v2278_v37  ;;  %v13067_v37 = vld [vmem:[#allocation16_spill] sm:$0xff] }
 0x3c0   : > { %v2940_v30 = vpop.f32.mrf.mxu3  ;;  %v2508_v50 = vpop.f32.mrf.mxu2 }
 0x3c1   : > { %v11194_v1 = vadd.f32 %v2940_v30, %v2561_v11  ;;  %v1915_v46 = vpop.f32.mrf.mxu0  ;;  %v8742_v30 = vld [vmem:[%s12557_s3 + $0x8] sm:$0xff] }
 0x3c2   : > { %v11197_v52 = vadd.f32 %v1915_v46, %v13061_v3  ;;  %4407 = vmatpush.bf16.msra.mxu2 %v8742_v30 }
 0x3c3   : > { %13060 = vst [vmem:[#allocation75_spill] sm:$0xff] %v11194_v1  ;;  %3676 = vperm.xlu2 %9063, %v3453_v26  }
 0x3c4   : > { %13062 = vst [vmem:[#allocation40_spill] sm:$0xff] %v11197_v52  ;;  %v11200_v44 = vpop.f32.mrf.mxu1  ;;  %v13077_v52 = vld [vmem:[#allocation98_spill] sm:$0xff] }
 0x3c5   : > { %13064 = vst [vmem:[#allocation42_spill] sm:$0xff] %v11200_v44 }
 0x3c8   : > { %v11205_v56 = vpop.f32.mrf.mxu3  ;;  %v11207_v62 = vpop.f32.mrf.mxu2 }
 0x3c9   : > { %13065 = vst [vmem:[#allocation41_spill] sm:$0xff] %v11205_v56  ;;  %v1918_v49 = vpop.f32.mrf.mxu0 }
 0x3ca   : > { %13066 = vst [vmem:[#allocation76_spill] sm:$0xff] %v11207_v62  ;;  %v1978_v11 = vadd.f32 %v1918_v49, %v13067_v37  ;;  %v13069_v62 = vld [vmem:[#allocation20_spill] sm:$0xff] }
 0x3cb   : > { %3170 = vmatmul.bf16.gmra.mxu0 %v3039_v57 }
 0x3cc   : > { %v2280_v46 = vadd.f32 %v2220_v14, %v1978_v11  ;;  %v2230_v3 = vpop.f32.mrf.mxu1  ;;  %v13071_v14 = vld [vmem:[#allocation51_spill] sm:$0xff] }
 0x3ce   : > { %v2563_v5 = vadd.f32 %v2503_v42, %v2280_v46  ;;  %v3040_v42 = vrot.slane %v13071_v14, 1 }
 0x3d0   : > { %v2945_v20 = vpop.f32.mrf.mxu3  ;;  %v2513_v44 = vpop.f32.mrf.mxu2  ;;  %v3041_v46 = vsel %vm1042_vm1, %v3038_v58, %v3040_v42  ;;  %v8764_v58 = vld [vmem:[%s12557_s3 + $0xb8] sm:$0xff] }
 0x3d1   : > { %v11214_v26 = vadd.f32 %v2945_v20, %v2563_v5  ;;  %v1920_v56 = vpop.f32.mrf.mxu0  ;;  %v13075_v5 = vld [vmem:[#allocation53_spill] sm:$0xff]  ;;  %4640 = vmatpush.bf16.msrb.mxu3 %v8764_v58 }
 0x3d2   : > { %v11217_v1 = vadd.f32 %v1920_v56, %v13069_v62 }
 0x3d3   : > { %13068 = vst [vmem:[#allocation77_spill] sm:$0xff] %v11214_v26 }
 0x3d4   : > { %13070 = vst [vmem:[#allocation78_spill] sm:$0xff] %v11217_v1  ;;  %v11223_v49 = vpop.f32.mrf.mxu1 }
 0x3d5   : > { %13072 = vst [vmem:[#allocation43_spill] sm:$0xff] %v11223_v49 }
 0x3d8   : > { %v11225_v57 = vpop.f32.mrf.mxu3  ;;  %v11227_v37 = vpop.f32.mrf.mxu2 }
 0x3d9   : > { %13073 = vst [vmem:[#allocation46_spill] sm:$0xff] %v11225_v57  ;;  %v1923_v11 = vpop.f32.mrf.mxu0  ;;  %v13079_v57 = vld [vmem:[#allocation52_spill] sm:$0xff] }
 0x3da   : > { %13074 = vst [vmem:[#allocation44_spill] sm:$0xff] %v11227_v37  ;;  %v1980_v30 = vadd.f32 %v1923_v11, %v13075_v5  ;;  %v3042_v21 = vrot.slane %v13079_v57, 1 }
 0x3db   : > { %3175 = vmatmul.bf16.gmra.mxu0 %v3041_v46  ;;  %v13083_v46 = vld [vmem:[#allocation92_spill] sm:$0xff] }
 0x3dc   : > { %v2282_v56 = vadd.f32 %v2225_v32, %v1980_v30  ;;  %v2235_v62 = vpop.f32.mrf.mxu1 }
 0x3de   : > { %v2565_v20 = vadd.f32 %v2508_v50, %v2282_v56 }
 0x3e0   : > { %v2950_v26 = vpop.f32.mrf.mxu3  ;;  %v2518_v1 = vpop.f32.mrf.mxu2 }
 0x3e1   : > { %v11231_v16 = vadd.f32 %v2950_v26, %v2565_v20  ;;  %v1925_v14 = vpop.f32.mrf.mxu0  ;;  %v3043_v26 = vsel %vm1042_vm1, %v3040_v42, %v3042_v21 }
 0x3e2   : > { %v11234_v49 = vadd.f32 %v1925_v14, %v13077_v52 }
 0x3e3   : > { %13076 = vst [vmem:[#allocation79_spill] sm:$0xff] %v11231_v16  ;;  %v13084_v16 = vld [vmem:[#allocation55_spill] sm:$0xff] }
 0x3e4   : > { %13078 = vst [vmem:[#allocation81_spill] sm:$0xff] %v11234_v49  ;;  %v11237_v37 = vpop.f32.mrf.mxu1 }
 0x3e5   : > { %13080 = vst [vmem:[#allocation47_spill] sm:$0xff] %v11237_v37 }
 0x3e8   : > { %v11242_v32 = vpop.f32.mrf.mxu3  ;;  %v11244_v11 = vpop.f32.mrf.mxu2 }
 0x3e9   : > { %13081 = vst [vmem:[#allocation3_spill] sm:$0xff] %v11242_v32  ;;  %v1928_v50 = vpop.f32.mrf.mxu0  ;;  %v13085_v32 = vld [vmem:[#allocation54_spill] sm:$0xff] }
 0x3ea   : > { %13082 = vst [vmem:[#allocation49_spill] sm:$0xff] %v11244_v11  ;;  %v1982_v5 = vadd.f32 %v1928_v50, %v13083_v46  ;;  %v3044_v11 = vrot.slane %v13085_v32, 1  ;;  %v13086_v50 = vld [vmem:[#allocation25_spill] sm:$0xff] }
 0x3eb   : > { %3180 = vmatmul.bf16.gmra.mxu0 %v3043_v26 }
 0x3ec   : > { %v2284_v52 = vadd.f32 %v2230_v3, %v1982_v5  ;;  %v2240_v30 = vpop.f32.mrf.mxu1  ;;  %v3045_v3 = vsel %vm1042_vm1, %v3042_v21, %v3044_v11  ;;  %v13088_v21 = vld [vmem:[#allocation21_spill] sm:$0xff] }
 0x3ee   : > { %v2567_v57 = vadd.f32 %v2513_v44, %v2284_v52 }
 0x3f0   : > { %v2955_v56 = vpop.f32.mrf.mxu3  ;;  %v2523_v20 = vpop.f32.mrf.mxu2 }
 0x3f1   : > { %v11248_v14 = vadd.f32 %v2955_v56, %v2567_v57  ;;  %v1930_v37 = vpop.f32.mrf.mxu0  ;;  %v13087_v57 = vld [vmem:[#allocation56_spill] sm:$0xff] }
 0x3f2   : > { %v11251_v49 = vadd.f32 %v1930_v37, %v13084_v16  ;;  %v8741_v37 = vld [vmem:[%s12557_s3] sm:$0xff] }
 0x3f3   : > { %v8749_v16 = vld [vmem:[%s12557_s3 + $0x40] sm:$0xff]  ;;  %4408 = vmatpush.bf16.msra.mxu2 %v8741_v37 }
 0x3f4   : > { %v2242_v58 = vpop.f32.mrf.mxu1  ;;  %4231 = vmatpush.bf16.msra.mxu1 %v8749_v16 }
 0x3f8   : > { %v11254_v41 = vpop.f32.mrf.mxu3  ;;  %v2525_v42 = vpop.f32.mrf.mxu2 }
 0x3f9   : > { %v1933_v35 = vpop.f32.mrf.mxu0  ;;  %v13089_v42 = vld [vmem:[#allocation57_spill] sm:$0xff] }
 0x3fa   : > { %v1984_v26 = vadd.f32 %v1933_v35, %v13086_v50  ;;  %v3046_v35 = vrot.slane %v13088_v21, 1 }
 0x3fb   : > { %3185 = vmatmul.bf16.gmra.mxu0 %v3045_v3 }
 0x3fc   : > { %v2286_v44 = vadd.f32 %v2235_v62, %v1984_v26  ;;  %v3047_v58 = vsel %vm1042_vm1, %v3044_v11, %v3046_v35  ;;  %v8763_v26 = vld [vmem:[%s12557_s3 + $0xb0] sm:$0xff]  ;;  %v8761_v11 = vld [vmem:[%s12557_s3 + $0xa0] sm:$0xff] }
 0x3fd   : > { %4641 = vmatpush.bf16.msrb.mxu3 %v8763_v26 }
 0x3fe   : > { %v2569_v46 = vadd.f32 %v2518_v1, %v2286_v44 }
 0x400   : > { %v2960_v5 = vpop.f32.mrf.mxu3 }
 0x401   : > { %v11264_v32 = vadd.f32 %v2960_v5, %v2569_v46  ;;  %v1935_v52 = vpop.f32.mrf.mxu0  ;;  %v8762_v5 = vld [vmem:[%s12557_s3 + $0xa8] sm:$0xff] }
 0x402   : > { %v11267_v56 = vadd.f32 %v1935_v52, %v13087_v57  ;;  %4642 = vmatpush.bf16.msrb.mxu3 %v8762_v5  ;;  %v3050_v5 = vrot.slane %v10504_v45, 1  ;;  %v8799_v45 = vld [vmem:[%s12557_s3 + $0x138] sm:$0xff] }
 0x403   : > { %5485 = vmatpush.bf16.msrb.mxu2 %v8799_v45 }
 0x406   : > { %4643 = vmatpush.bf16.msrb.mxu3 %v8761_v11 }
 0x408   : > { %v11270_v1 = vpop.f32.mrf.mxu3 }
 0x409   : > { %v1938_v62 = vpop.f32.mrf.mxu0 }
 0x40a   : > { %v1986_v3 = vadd.f32 %v1938_v62, %v13089_v42  ;;  %v3457_v42 = vpop.permute.xlu0 %3456 }
 0x40b   : > { %3190 = vmatmul.bf16.gmra.mxu0 %v3047_v58  ;;  %v11294_v58 = vld [vmem:[%s12556_s2] ss:$0 sm:$0xff] }
 0x40c   : > { %v2288_v50 = vadd.f32 %v2240_v30, %v1986_v3  ;;  %v3048_v30 = vrot.slane %v10472_v0, 1  ;;  %v8759_v0 = vld [vmem:[%s12557_s3 + $0x90] sm:$0xff] }
 0x40e   : > { %v2571_v44 = vadd.f32 %v2523_v20, %v2288_v50  ;;  %v8760_v20 = vld [vmem:[%s12557_s3 + $0x98] sm:$0xff]  ;;  %v3049_v21 = vsel %vm1042_vm1, %v3046_v35, %v3048_v30  ;;  %v8758_v35 = vld [vmem:[%s12557_s3 + $0x88] sm:$0xff] }
 0x40f   : > { %4644 = vmatpush.bf16.msrb.mxu3 %v8760_v20 }
 0x410   : > { %v2965_v46 = vpop.f32.mrf.mxu3 }
 0x411   : > { %v11280_v37 = vadd.f32 %v2965_v46, %v2571_v44  ;;  %v1940_v16 = vpop.f32.mrf.mxu0  ;;  %v8757_v46 = vld [vmem:[%s12557_s3 + $0x80] sm:$0xff] }
 0x412   : > { %v3462_v11 = vpop.permute.xlu0 %3461 }
 0x413   : > { %13090 = vst [vmem:[#allocation82_spill] sm:$0xff] %v11280_v37  ;;  %4645 = vmatpush.bf16.msrb.mxu3 %v8759_v0 }
 0x417   : > { %4646 = vmatpush.bf16.msrb.mxu3 %v8758_v35 }
 0x418   : > { %v2967_v52 = vpop.f32.mrf.mxu3 }
 0x419   : > { %v3156_v57 = vpop.f32.mrf.mxu0 }
 0x41a   : > { %v3270_v62 = vadd.f32 %v3156_v57, %v10515_v53 }
 0x41b   : > { %3195 = vmatmul.bf16.gmra.mxu0 %v3049_v21  ;;  %4647 = vmatpush.bf16.msrb.mxu3 %v8757_v46  ;;  %v3051_v21 = vsel %vm1042_vm1, %v3048_v30, %v3050_v5 }
 0x41c   : > { %v3319_v3 = vadd.f32 %v11294_v58, %v3270_v62 }
 0x41e   : > { %v3364_v26 = vmax.f32 %v3319_v3, 0.0  ;;  %v3467_v3 = vpop.permute.xlu1 %3466 }
 0x420   : > { %v3679_v20 = vmul.f32 %v3457_v42, %v3364_v26  ;;  %v8791_v42 = vld [vmem:[%s12557_s3 + $0xf8] sm:$0xff] }
 0x421   : > { %v3158_v50 = vpop.f32.mrf.mxu0  ;;  %5059 = vmatpush.bf16.msrb.mxu1 %v8791_v42 }
 0x422   : > { %v3271_v53 = vadd.f32 %v3158_v50, %v10530_v34  ;;  %v13091_v34 = vld [vmem:[#allocation58_spill] sm:$0xff] }
 0x424   : > { %v3320_v44 = vadd.f32 %v11294_v58, %v3271_v53 }
 0x426   : > { %v3365_v16 = vmax.f32 %v3320_v44, 0.0  ;;  %v3052_v44 = vrot.slane %v10541_v7, 1 }
 0x428   : > { %v3680_v52 = vmul.f32 %v3462_v11, %v3365_v16  ;;  %v3472_v16 = vpop.permute.xlu1 %3471 }
 0x429   : > { %v3161_v57 = vpop.f32.mrf.mxu0 }
 0x42a   : > { %v8882_v62 = vpack.c.bf16 %v3680_v52, %v3679_v20  ;;  %v3272_v0 = vadd.f32 %v3161_v57, %v13091_v34  ;;  %v3053_v57 = vsel %vm1042_vm1, %v3050_v5, %v3052_v44  ;;  %v13092_v34 = vld [vmem:[#allocation95_spill] sm:$0xff] }
 0x42b   : > { %3200 = vmatmul.bf16.gmra.mxu0 %v3051_v21 }
 0x42c   : > { %8883 = vst [vmem:[#allocation2] sm:$0xff] %v8882_v62   ;;  %4409 = vmatmul.bf16.vlgmr.msra.gmra.mxu2 %v8882_v62  ;;  %v3321_v35 = vadd.f32 %v11294_v58, %v3272_v0 }
 0x42e   : > { %v3366_v53 = vmax.f32 %v3321_v35, 0.0  ;;  %v3995_v35 = vshll.u32 %v8882_v62, 16 }
 0x430   : > { %v3681_v11 = vmul.f32 %v3467_v3, %v3366_v53  ;;  %v3997_v3 = vrot.slane %v3995_v35, 1 }
 0x431   : > { %v3163_v50 = vpop.f32.mrf.mxu0 }
 0x432   : > { %v3273_v30 = vadd.f32 %v3163_v50, %v10575_v51  ;;  %v3477_v51 = vpop.permute.xlu2 %3476 }
 0x433   : > { %v9021_v45 = vld [vmem:[#allocation2] sm:$0xf0]  ;;  %v9022_v42 = vld [vmem:[#allocation2] sm:$0xe] }
 0x434   : > { %v3322_v26 = vadd.f32 %v11294_v58, %v3273_v30  ;;  %v9023_v7 = vor.u32 %v9022_v42, %v9021_v45 }
 0x436   : > { %v3367_v46 = vmax.f32 %v3322_v26, 0.0 }
 0x438   : > { %v3682_v20 = vmul.f32 %v3472_v16, %v3367_v46  ;;  %v3054_v16 = vrot.slane %v10583_v63, 1 }
 0x439   : > { %v3166_v52 = vpop.f32.mrf.mxu0 }
 0x43a   : > { %v8887_v21 = vpack.c.bf16 %v3682_v20, %v3681_v11  ;;  %v3274_v0 = vadd.f32 %v3166_v52, %v13092_v34  ;;  %v3993_v11 = vshrl.u32 %v8882_v62, 16  ;;  %v4531_v20 = vrot.slane %v9023_v7, 1  ;;  %v3482_v34 = vpop.permute.xlu2 %3481 }
 0x43b   : > { %3205 = vmatmul.bf16.gmra.mxu0 %v3053_v57 }
 0x43c   : > { %9000 = vst [vmem:[#allocation2 + $0x8] sm:$0xff] %v8887_v21   ;;  %v3323_v50 = vadd.f32 %v11294_v58, %v3274_v0  ;;  %v3998_v37 = vor.u32 %v3997_v3, %v3993_v11 }
 0x43e   : > { %v3368_v46 = vmax.f32 %v3323_v50, 0.0 }
 0x440   : > { %v3683_v42 = vmul.f32 %v3477_v51, %v3368_v46 }
 0x441   : > { %v3168_v30 = vpop.f32.mrf.mxu0 }
 0x442   : > { %v3275_v26 = vadd.f32 %v3168_v30, %v10612_v61  ;;  %v3055_v30 = vsel %vm1042_vm1, %v3052_v44, %v3054_v16  ;;  %v13093_v44 = vld [vmem:[#allocation59_spill] sm:$0xff] }
 0x443   : > { %v8722_v53 = vld [vmem:[#allocation2 + $0x8] sm:$0xff] }
 0x444   : > { %v3324_v5 = vadd.f32 %v11294_v58, %v3275_v26  ;;  %4414 = vmatmul.bf16.gmra.mxu2 %v8722_v53  ;;  %v4532_v52 = vrot.slane %v8722_v53, 1  ;;  %v4000_v57 = vshll.u32 %v8722_v53, 16 }
 0x446   : > { %v3369_v21 = vmax.f32 %v3324_v5, 0.0  ;;  %v4533_v0 = vsel %vm1042_vm1, %v4531_v20, %v4532_v52  ;;  %v4002_v45 = vrot.slane %v4000_v57, 1  ;;  %v3056_v57 = vrot.slane %v13093_v44, 1 }
 0x447   : > { %4648 = vmatmul.bf16.vlgmr.msrb.gmra.mxu3 %v4533_v0  ;;  %v3487_v0 = vpop.permute.xlu0 %3486 }
 0x448   : > { %v3684_v61 = vmul.f32 %v3482_v34, %v3369_v21  ;;  %v4003_v50 = vsel %vm452_vm0, %v3998_v37, %v4002_v45  ;;  %v4004_v37 = vshrl.u32 %v8722_v53, 16  ;;  %v3492_v34 = vpop.permute.xlu1 %3491  ;;  %v13094_v53 = vld [vmem:[#allocation26_spill] sm:$0xff] }
 0x449   : > { %v3171_v35 = vpop.f32.mrf.mxu0  ;;  %4232 = vmatmul.bf16.vlgmr.msra.gmra.mxu1 %v4003_v50 }
 0x44a   : > { %v8892_v63 = vpack.c.bf16 %v3684_v61, %v3683_v42  ;;  %v3276_v62 = vadd.f32 %v3171_v35, %v10633_v47  ;;  %v4006_v42 = vor.u32 %v4004_v37, %v4002_v45  ;;  %v8790_v45 = vld [vmem:[%s12557_s3 + $0xf0] sm:$0xff] }
 0x44b   : > { %3210 = vmatmul.bf16.gmra.mxu0 %v3055_v30  ;;  %5060 = vmatpush.bf16.msrb.mxu1 %v8790_v45 }
 0x44c   : > { %9001 = vst [vmem:[#allocation2 + $0x10] sm:$0xff] %v8892_v63   ;;  %v3325_v7 = vadd.f32 %v11294_v58, %v3276_v62  ;;  %v3057_v63 = vsel %vm1042_vm1, %v3054_v16, %v3056_v57 }
 0x44e   : > { %v3370_v51 = vmax.f32 %v3325_v7, 0.0 }
 0x450   : > { %v3685_v35 = vmul.f32 %v3487_v0, %v3370_v51 }
 0x451   : > { %v3173_v26 = vpop.f32.mrf.mxu0 }
 0x452   : > { %v3277_v3 = vadd.f32 %v3173_v26, %v10649_v33 }
 0x453   : > { %v8723_v5 = vld [vmem:[#allocation2 + $0x10] sm:$0xff] }
 0x454   : > { %v3326_v46 = vadd.f32 %v11294_v58, %v3277_v3  ;;  %4419 = vmatmul.bf16.gmra.mxu2 %v8723_v5  ;;  %v4534_v11 = vrot.slane %v8723_v5, 1  ;;  %v4008_v20 = vshll.u32 %v8723_v5, 16  ;;  %v4012_v44 = vshrl.u32 %v8723_v5, 16  ;;  %v13095_v5 = vld [vmem:[#allocation30_spill] sm:$0xff] }
 0x456   : > { %v3371_v21 = vmax.f32 %v3326_v46, 0.0  ;;  %v4535_v47 = vsel %vm1042_vm1, %v4532_v52, %v4534_v11  ;;  %v4010_v61 = vrot.slane %v4008_v20, 1  ;;  %v8798_v52 = vld [vmem:[%s12557_s3 + $0x130] sm:$0xff] }
 0x457   : > { %4653 = vmatmul.bf16.gmra.mxu3 %v4535_v47  ;;  %5486 = vmatpush.bf16.msrb.mxu2 %v8798_v52  ;;  %v3502_v47 = vpop.permute.xlu0 %3501 }
 0x458   : > { %v3686_v50 = vmul.f32 %v3492_v34, %v3371_v21  ;;  %v4011_v30 = vsel %vm452_vm0, %v4006_v42, %v4010_v61  ;;  %v3058_v34 = vrot.slane %v10660_v10, 1  ;;  %v3497_v42 = vpop.permute.xlu2 %3496 }
 0x459   : > { %v3176_v33 = vpop.f32.mrf.mxu0  ;;  %4237 = vmatmul.bf16.gmra.mxu1 %v4011_v30 }
 0x45a   : > { %v8897_v62 = vpack.c.bf16 %v3686_v50, %v3685_v35  ;;  %v3278_v7 = vadd.f32 %v3176_v33, %v13094_v53  ;;  %v4014_v50 = vor.u32 %v4012_v44, %v4010_v61  ;;  %v3059_v53 = vsel %vm1042_vm1, %v3056_v57, %v3058_v34 }
 0x45b   : > { %3215 = vmatmul.bf16.gmra.mxu0 %v3057_v63  ;;  %v3060_v57 = vrot.slane %v10703_v8, 1 }
 0x45c   : > { %9002 = vst [vmem:[#allocation2 + $0x18] sm:$0xff] %v8897_v62   ;;  %v3327_v26 = vadd.f32 %v11294_v58, %v3278_v7 }
 0x45e   : > { %v3372_v46 = vmax.f32 %v3327_v26, 0.0 }
 0x460   : > { %v3687_v30 = vmul.f32 %v3497_v42, %v3372_v46 }
 0x461   : > { %v3178_v3 = vpop.f32.mrf.mxu0 }
 0x462   : > { %v3279_v16 = vadd.f32 %v3178_v3, %v10695_v24 }
 0x463   : > { %v8724_v51 = vld [vmem:[#allocation2 + $0x18] sm:$0xff] }
 0x464   : > { %v3328_v37 = vadd.f32 %v11294_v58, %v3279_v16  ;;  %4424 = vmatmul.bf16.gmra.mxu2 %v8724_v51  ;;  %v4536_v20 = vrot.slane %v8724_v51, 1  ;;  %v4016_v21 = vshll.u32 %v8724_v51, 16  ;;  %v4020_v46 = vshrl.u32 %v8724_v51, 16 }
 0x466   : > { %v3373_v0 = vmax.f32 %v3328_v37, 0.0  ;;  %v4537_v35 = vsel %vm1042_vm1, %v4534_v11, %v4536_v20  ;;  %v4018_v33 = vrot.slane %v4016_v21, 1  ;;  %v3507_v21 = vpop.permute.xlu1 %3506 }
 0x467   : > { %4658 = vmatmul.bf16.gmra.mxu3 %v4537_v35 }
 0x468   : > { %v3688_v63 = vmul.f32 %v3502_v47, %v3373_v0  ;;  %v4019_v62 = vsel %vm452_vm0, %v4014_v50, %v4018_v33  ;;  %v3512_v0 = vpop.permute.xlu2 %3511  ;;  %v4022_v42 = vor.u32 %v4020_v46, %v4018_v33  ;;  %v8789_v33 = vld [vmem:[%s12557_s3 + $0xe8] sm:$0xff] }
 0x469   : > { %v3181_v24 = vpop.f32.mrf.mxu0  ;;  %4242 = vmatmul.bf16.gmra.mxu1 %v4019_v62 }
 0x46a   : > { %v8902_v7 = vpack.c.bf16 %v3688_v63, %v3687_v30  ;;  %v3280_v10 = vadd.f32 %v3181_v24, %v13095_v5  ;;  %v3061_v24 = vsel %vm1042_vm1, %v3058_v34, %v3060_v57  ;;  %5061 = vmatpush.bf16.msrb.mxu1 %v8789_v33 }
 0x46b   : > { %3220 = vmatmul.bf16.gmra.mxu0 %v3059_v53 }
 0x46c   : > { %9003 = vst [vmem:[#allocation2 + $0x20] sm:$0xff] %v8902_v7   ;;  %v3329_v52 = vadd.f32 %v11294_v58, %v3280_v10 }
 0x46e   : > { %v3374_v26 = vmax.f32 %v3329_v52, 0.0  ;;  %v3522_v46 = vpop.permute.xlu1 %3521 }
 0x470   : > { %v3689_v50 = vmul.f32 %v3507_v21, %v3374_v26 }
 0x471   : > { %v3183_v45 = vpop.f32.mrf.mxu0 }
 0x472   : > { %v3281_v11 = vadd.f32 %v3183_v45, %v10732_v6 }
 0x473   : > { %v8725_v61 = vld [vmem:[#allocation2 + $0x20] sm:$0xff] }
 0x474   : > { %v3330_v3 = vadd.f32 %v11294_v58, %v3281_v11  ;;  %4429 = vmatmul.bf16.gmra.mxu2 %v8725_v61  ;;  %v4538_v16 = vrot.slane %v8725_v61, 1  ;;  %v4024_v37 = vshll.u32 %v8725_v61, 16  ;;  %v4028_v52 = vshrl.u32 %v8725_v61, 16  ;;  %v13096_v11 = vld [vmem:[#allocation60_spill] sm:$0xff]  ;;  %v13097_v61 = vld [vmem:[#allocation61_spill] sm:$0xff] }
 0x475   : > { %v3062_v26 = vrot.slane %v13096_v11, 1 }
 0x476   : > { %v3375_v44 = vmax.f32 %v3330_v3, 0.0  ;;  %v4539_v47 = vsel %vm1042_vm1, %v4536_v20, %v4538_v16  ;;  %v4026_v35 = vrot.slane %v4024_v37, 1  ;;  %v8797_v20 = vld [vmem:[%s12557_s3 + $0x128] sm:$0xff]  ;;  %v3517_v37 = vpop.permute.xlu0 %3516 }
 0x477   : > { %4663 = vmatmul.bf16.gmra.mxu3 %v4539_v47  ;;  %5487 = vmatpush.bf16.msrb.mxu2 %v8797_v20 }
 0x478   : > { %v3690_v30 = vmul.f32 %v3512_v0, %v3375_v44  ;;  %v4027_v63 = vsel %vm452_vm0, %v4022_v42, %v4026_v35  ;;  %v4030_v21 = vor.u32 %v4028_v52, %v4026_v35 }
 0x479   : > { %v3186_v6 = vpop.f32.mrf.mxu0  ;;  %4247 = vmatmul.bf16.gmra.mxu1 %v4027_v63 }
 0x47a   : > { %v8907_v62 = vpack.c.bf16 %v3690_v30, %v3689_v50  ;;  %v3282_v8 = vadd.f32 %v3186_v6, %v10753_v22  ;;  %v3063_v30 = vsel %vm1042_vm1, %v3060_v57, %v3062_v26  ;;  %v3064_v57 = vrot.slane %v10783_v9, 1 }
 0x47b   : > { %3225 = vmatmul.bf16.gmra.mxu0 %v3061_v24 }
 0x47c   : > { %9004 = vst [vmem:[#allocation2 + $0x28] sm:$0xff] %v8907_v62   ;;  %v3331_v51 = vadd.f32 %v11294_v58, %v3282_v8 }
 0x47e   : > { %v3376_v5 = vmax.f32 %v3331_v51, 0.0 }
 0x481   : > { %v3188_v53 = vpop.f32.mrf.mxu0 }
 0x482   : > { %v3283_v7 = vadd.f32 %v3188_v53, %v10772_v59  ;;  %v3691_v59 = vmul.f32 %v3517_v37, %v3376_v5  ;;  %v3532_v5 = vpop.permute.xlu0 %3531 }
 0x483   : > { %v8726_v34 = vld [vmem:[#allocation2 + $0x28] sm:$0xff] }
 0x484   : > { %v3332_v22 = vadd.f32 %v11294_v58, %v3283_v7  ;;  %4434 = vmatmul.bf16.gmra.mxu2 %v8726_v34  ;;  %v4540_v10 = vrot.slane %v8726_v34, 1  ;;  %v4032_v45 = vshll.u32 %v8726_v34, 16  ;;  %v4036_v33 = vshrl.u32 %v8726_v34, 16 }
 0x486   : > { %v3377_v3 = vmax.f32 %v3332_v22, 0.0  ;;  %v4541_v44 = vsel %vm1042_vm1, %v4538_v16, %v4540_v10  ;;  %v4034_v0 = vrot.slane %v4032_v45, 1  ;;  %v3527_v22 = vpop.permute.xlu2 %3526 }
 0x487   : > { %4668 = vmatmul.bf16.gmra.mxu3 %v4541_v44  ;;  %v3065_v44 = vsel %vm1042_vm1, %v3062_v26, %v3064_v57  ;;  %v3066_v26 = vrot.slane %v10823_v2, 1 }
 0x488   : > { %v3692_v47 = vmul.f32 %v3522_v46, %v3377_v3  ;;  %v4035_v50 = vsel %vm452_vm0, %v4030_v21, %v4034_v0  ;;  %v4038_v45 = vor.u32 %v4036_v33, %v4034_v0 }
 0x489   : > { %v3191_v42 = vpop.f32.mrf.mxu0  ;;  %4252 = vmatmul.bf16.gmra.mxu1 %v4035_v50 }
 0x48a   : > { %v8912_v6 = vpack.c.bf16 %v3692_v47, %v3691_v59  ;;  %v3284_v63 = vadd.f32 %v3191_v42, %v13097_v61 }
 0x48b   : > { %3230 = vmatmul.bf16.gmra.mxu0 %v3063_v30 }
 0x48c   : > { %9005 = vst [vmem:[#allocation2 + $0x30] sm:$0xff] %v8912_v6   ;;  %v3333_v24 = vadd.f32 %v11294_v58, %v3284_v63  ;;  %v3537_v63 = vpop.permute.xlu1 %3536 }
 0x48e   : > { %v3378_v8 = vmax.f32 %v3333_v24, 0.0  ;;  %v3542_v24 = vpop.permute.xlu2 %3541 }
 0x490   : > { %v3693_v3 = vmul.f32 %v3527_v22, %v3378_v8 }
 0x491   : > { %v3193_v62 = vpop.f32.mrf.mxu0 }
 0x492   : > { %v3285_v16 = vadd.f32 %v3193_v62, %v10815_v12 }
 0x493   : > { %v8727_v35 = vld [vmem:[#allocation2 + $0x30] sm:$0xff] }
 0x494   : > { %v3334_v51 = vadd.f32 %v11294_v58, %v3285_v16  ;;  %4439 = vmatmul.bf16.gmra.mxu2 %v8727_v35  ;;  %v4542_v20 = vrot.slane %v8727_v35, 1  ;;  %v4040_v53 = vshll.u32 %v8727_v35, 16  ;;  %v4044_v30 = vshrl.u32 %v8727_v35, 16  ;;  %v8796_v35 = vld [vmem:[%s12557_s3 + $0x120] sm:$0xff] }
 0x495   : > { %5488 = vmatpush.bf16.msrb.mxu2 %v8796_v35 }
 0x496   : > { %v3379_v7 = vmax.f32 %v3334_v51, 0.0  ;;  %v4543_v52 = vsel %vm1042_vm1, %v4540_v10, %v4542_v20  ;;  %v4042_v11 = vrot.slane %v4040_v53, 1  ;;  %v3067_v53 = vsel %vm1042_vm1, %v3064_v57, %v3066_v26 }
 0x497   : > { %4673 = vmatmul.bf16.gmra.mxu3 %v4543_v52 }
 0x498   : > { %v3694_v46 = vmul.f32 %v3532_v5, %v3379_v7  ;;  %v4043_v37 = vsel %vm452_vm0, %v4038_v45, %v4042_v11  ;;  %v4046_v62 = vor.u32 %v4044_v30, %v4042_v11 }
 0x499   : > { %v3196_v12 = vpop.f32.mrf.mxu0  ;;  %4257 = vmatmul.bf16.gmra.mxu1 %v4043_v37 }
 0x49a   : > { %v8917_v21 = vpack.c.bf16 %v3694_v46, %v3693_v3  ;;  %v3286_v9 = vadd.f32 %v3196_v12, %v10842_v17  ;;  %v3068_v12 = vrot.slane %v13019_v38, 1 }
 0x49b   : > { %3235 = vmatmul.bf16.gmra.mxu0 %v3065_v44 }
 0x49c   : > { %9006 = vst [vmem:[#allocation2 + $0x38] sm:$0xff] %v8917_v21   ;;  %v3335_v34 = vadd.f32 %v11294_v58, %v3286_v9  ;;  %v3552_v21 = vpop.permute.xlu1 %3551  ;;  %v3547_v9 = vpop.permute.xlu0 %3546 }
 0x49e   : > { %v3380_v47 = vmax.f32 %v3335_v34, 0.0 }
 0x4a0   : > { %v3695_v8 = vmul.f32 %v3537_v63, %v3380_v47 }
 0x4a1   : > { %v3198_v59 = vpop.f32.mrf.mxu0 }
 0x4a2   : > { %v3287_v10 = vadd.f32 %v3198_v59, %v10862_v40 }
 0x4a3   : > { %v8728_v0 = vld [vmem:[#allocation2 + $0x38] sm:$0xff] }
 0x4a4   : > { %v3336_v42 = vadd.f32 %v11294_v58, %v3287_v10  ;;  %4444 = vmatmul.bf16.gmra.mxu2 %v8728_v0  ;;  %v4544_v50 = vrot.slane %v8728_v0, 1  ;;  %v4048_v6 = vshll.u32 %v8728_v0, 16  ;;  %v4052_v3 = vshrl.u32 %v8728_v0, 16 }
 0x4a6   : > { %v3381_v61 = vmax.f32 %v3336_v42, 0.0  ;;  %v4545_v17 = vsel %vm1042_vm1, %v4542_v20, %v4544_v50  ;;  %v4050_v16 = vrot.slane %v4048_v6, 1  ;;  %v8788_v20 = vld [vmem:[%s12557_s3 + $0xe0] sm:$0xff]  ;;  %v3069_v6 = vsel %vm1042_vm1, %v3066_v26, %v3068_v12 }
 0x4a7   : > { %4678 = vmatmul.bf16.gmra.mxu3 %v4545_v17  ;;  %5062 = vmatpush.bf16.msrb.mxu1 %v8788_v20  ;;  %v13098_v20 = vld [vmem:[#allocation62_spill] sm:$0xff] }
 0x4a8   : > { %v3696_v51 = vmul.f32 %v3542_v24, %v3381_v61  ;;  %v4051_v33 = vsel %vm452_vm0, %v4046_v62, %v4050_v16  ;;  %v4054_v59 = vor.u32 %v4052_v3, %v4050_v16 }
 0x4a9   : > { %v3201_v40 = vpop.f32.mrf.mxu0  ;;  %4262 = vmatmul.bf16.gmra.mxu1 %v4051_v33 }
 0x4aa   : > { %v8922_v7 = vpack.c.bf16 %v3696_v51, %v3695_v8  ;;  %v3288_v2 = vadd.f32 %v3201_v40, %v10882_v29  ;;  %v3562_v40 = vpop.permute.xlu0 %3561 }
 0x4ab   : > { %3240 = vmatmul.bf16.gmra.mxu0 %v3067_v53  ;;  %v3557_v53 = vpop.permute.xlu2 %3556 }
 0x4ac   : > { %9007 = vst [vmem:[#allocation2 + $0x40] sm:$0xff] %v8922_v7   ;;  %v3337_v5 = vadd.f32 %v11294_v58, %v3288_v2 }
 0x4ae   : > { %v3382_v45 = vmax.f32 %v3337_v5, 0.0  ;;  %v2267_v5 = vadd.f32 %v13098_v20, %v10997_v36 }
 0x4af   : > { %v4410_v44 = vpop.f32.mrf.mxu2 }
 0x4b0   : > { %v3697_v47 = vmul.f32 %v3547_v9, %v3382_v45 }
 0x4b1   : > { %v3203_v22 = vpop.f32.mrf.mxu0 }
 0x4b2   : > { %v3289_v57 = vadd.f32 %v3203_v22, %v10910_v31 }
 0x4b3   : > { %v8729_v52 = vld [vmem:[#allocation2 + $0x40] sm:$0xff] }
 0x4b4   : > { %v3338_v29 = vadd.f32 %v11294_v58, %v3289_v57  ;;  %4449 = vmatmul.bf16.gmra.mxu2 %v8729_v52  ;;  %v4546_v11 = vrot.slane %v8729_v52, 1  ;;  %v4056_v46 = vshll.u32 %v8729_v52, 16  ;;  %v4060_v8 = vshrl.u32 %v8729_v52, 16 }
 0x4b6   : > { %v3383_v37 = vmax.f32 %v3338_v29, 0.0  ;;  %v4547_v34 = vsel %vm1042_vm1, %v4544_v50, %v4546_v11  ;;  %v4058_v10 = vrot.slane %v4056_v46, 1 }
 0x4b7   : > { %4683 = vmatmul.bf16.gmra.mxu3 %v4547_v34  ;;  %v4412_v63 = vpop.f32.mrf.mxu2  ;;  %v13100_v34 = vld [vmem:[#allocation32_spill] sm:$0xff] }
 0x4b8   : > { %v3698_v31 = vmul.f32 %v3552_v21, %v3383_v37  ;;  %v4059_v30 = vsel %vm452_vm0, %v4054_v59, %v4058_v10  ;;  %v4062_v2 = vor.u32 %v4060_v8, %v4058_v10  ;;  %v13099_v21 = vld [vmem:[#allocation99_spill] sm:$0xff] }
 0x4b9   : > { %v3206_v42 = vpop.f32.mrf.mxu0  ;;  %4267 = vmatmul.bf16.gmra.mxu1 %v4059_v30  ;;  %v2550_v9 = vadd.f32 %v13099_v21, %v2267_v5  ;;  %v8795_v30 = vld [vmem:[%s12557_s3 + $0x118] sm:$0xff] }
 0x4ba   : > { %v8927_v0 = vpack.c.bf16 %v3698_v31, %v3697_v47  ;;  %v3290_v38 = vadd.f32 %v3206_v42, %v10940_v54  ;;  %v3070_v54 = vrot.slane %v10920_v4, 1  ;;  %5489 = vmatpush.bf16.msrb.mxu2 %v8795_v30 }
 0x4bb   : > { %3245 = vmatmul.bf16.gmra.mxu0 %v3069_v6  ;;  %v8787_v6 = vld [vmem:[%s12557_s3 + $0xd8] sm:$0xff] }
 0x4bc   : > { %9008 = vst [vmem:[#allocation2 + $0x48] sm:$0xff] %v8927_v0   ;;  %v3339_v61 = vadd.f32 %v11294_v58, %v3290_v38  ;;  %v3071_v46 = vsel %vm1042_vm1, %v3068_v12, %v3070_v54  ;;  %v2992_v12 = vadd.f32 %v11014_v23, %v2550_v9  ;;  %v11442_v0 = vld [vmem:[%s12557_s3 + $0x1b0] sm:$0xff]  ;;  %5063 = vmatpush.bf16.msrb.mxu1 %v8787_v6 }
 0x4be   : > { %v3384_v62 = vmax.f32 %v3339_v61, 0.0 }
 0x4c0   : > { %v3699_v22 = vmul.f32 %v3557_v53, %v3384_v62 }
 0x4c1   : > { %v3208_v50 = vpop.f32.mrf.mxu0 }
 0x4c2   : > { %v3291_v24 = vadd.f32 %v3208_v50, %v10964_v25 }
 0x4c3   : > { %v11407_v17 = vld [vmem:[#allocation2 + $0x48] sm:$0xff] }
 0x4c4   : > { %v3340_v16 = vadd.f32 %v11294_v58, %v3291_v24  ;;  %4454 = vmatmul.bf16.gmra.mxu2 %v11407_v17  ;;  %v4548_v26 = vrot.slane %v11407_v17, 1  ;;  %v4064_v51 = vshll.u32 %v11407_v17, 16 }
 0x4c6   : > { %v3385_v33 = vmax.f32 %v3340_v16, 0.0  ;;  %v4233_v7 = vpop.f32.mrf.mxu1  ;;  %v4549_v25 = vsel %vm1042_vm1, %v4546_v11, %v4548_v26  ;;  %v4066_v35 = vrot.slane %v4064_v51, 1  ;;  %v11453_v16 = vld [vmem:[%s12557_s3 + $0x1a8] sm:$0xff]  ;;  %v4068_v51 = vshrl.u32 %v11407_v17, 16 }
 0x4c7   : > { %v4411_v45 = vadd.f32 %v4410_v44, %v4233_v7  ;;  %v4415_v29 = vpop.f32.mrf.mxu2  ;;  %4688 = vmatmul.bf16.gmra.mxu3 %v4549_v25  ;;  %v11428_v44 = vld [vmem:[%s12557_s3 + $0x1b8] sm:$0xff]  ;;  %v3567_v7 = vpop.permute.xlu1 %3566 }
 0x4c8   : > { %v3700_v57 = vmul.f32 %v3562_v40, %v3385_v33  ;;  %v4067_v3 = vsel %vm452_vm0, %v4062_v2, %v4066_v35  ;;  %6138 = vmatpush.bf16.msra.mxu0 %v11428_v44  ;;  %v11460_v33 = vld [vmem:[%s9201_s20 + $0xbc] sm:$0xff]   ;;  %v3572_v2 = vpop.permute.xlu2 %3571 }
 0x4c9   : > { %v3211_v52 = vpop.f32.mrf.mxu0  ;;  %4272 = vmatmul.bf16.gmra.mxu1 %v4067_v3  ;;  %v3072_v53 = vrot.slane %v11460_v33, 1 }
 0x4ca   : > { %v8932_v37 = vpack.c.bf16 %v3700_v57, %v3699_v22  ;;  %v4649_v11 = vpop.f32.mrf.mxu3  ;;  %v3292_v36 = vadd.f32 %v3211_v52, %v13100_v34  ;;  %v4070_v22 = vor.u32 %v4068_v51, %v4066_v35 }
 0x4cb   : > { %3250 = vmatmul.bf16.gmra.mxu0 %v3071_v46  ;;  %v11423_v59 = vadd.f32 %v4649_v11, %v4411_v45  ;;  %v13101_v45 = vld [vmem:[#allocation63_spill] sm:$0xff]  ;;  %v11470_v11 = vld [vmem:[%s12557_s3 + $0x1a0] sm:$0xff]  ;;  %v3073_v35 = vsel %vm1042_vm1, %v3070_v54, %v3072_v53 }
 0x4cc   : > { %9009 = vst [vmem:[#allocation2 + $0x50] sm:$0xff] %v8932_v37   ;;  %v3341_v47 = vadd.f32 %v11294_v58, %v3292_v36  ;;  %6139 = vmatpush.bf16.msra.mxu0 %v11442_v0  ;;  %v2269_v52 = vadd.f32 %v13101_v45, %v11043_v28 }
 0x4ce   : > { %v4235_v10 = vpop.f32.mrf.mxu1  ;;  %v3386_v50 = vmax.f32 %v3341_v47, 0.0 }
 0x4cf   : > { %v4413_v31 = vadd.f32 %v4412_v63, %v4235_v10  ;;  %v4417_v42 = vpop.f32.mrf.mxu2 }
 0x4d0   : > { %6140 = vmatpush.bf16.msra.mxu0 %v11453_v16  ;;  %v3701_v17 = vmul.f32 %v3567_v7, %v3386_v50 }
 0x4d1   : > { %v3213_v38 = vpop.f32.mrf.mxu0 }
 0x4d2   : > { %v3293_v23 = vadd.f32 %v3213_v38, %v2992_v12  ;;  %v4651_v61 = vpop.f32.mrf.mxu3  ;;  %v11486_v12 = vld [vmem:[%s12557_s3 + $0x198] sm:$0xff] }
 0x4d3   : > { %v11444_v63 = vld [vmem:[#allocation2 + $0x50] sm:$0xff]  ;;  %v11448_v62 = vadd.f32 %v4651_v61, %v4413_v31 }
 0x4d4   : > { %v3342_v24 = vadd.f32 %v11294_v58, %v3293_v23  ;;  %4459 = vmatmul.bf16.gmra.mxu2 %v11444_v63  ;;  %v4550_v8 = vrot.slane %v11444_v63, 1  ;;  %v4072_v40 = vshll.u32 %v11444_v63, 16  ;;  %6141 = vmatpush.bf16.msra.mxu0 %v11470_v11 }
 0x4d6   : > { %v3387_v25 = vmax.f32 %v3342_v24, 0.0  ;;  %v4238_v20 = vpop.f32.mrf.mxu1  ;;  %v4551_v5 = vsel %vm1042_vm1, %v4548_v26, %v4550_v8  ;;  %v4074_v57 = vrot.slane %v4072_v40, 1  ;;  %v4076_v40 = vshrl.u32 %v11444_v63, 16 }
 0x4d7   : > { %v4416_v46 = vadd.f32 %v4415_v29, %v4238_v20  ;;  %v4420_v37 = vpop.f32.mrf.mxu2  ;;  %4693 = vmatmul.bf16.gmra.mxu3 %v4551_v5  ;;  %v13102_v29 = vld [vmem:[#allocation31_spill] sm:$0xff]  ;;  %v3577_v5 = vpop.permute.xlu0 %3576 }
 0x4d8   : > { %v3702_v3 = vmul.f32 %v3572_v2, %v3387_v25  ;;  %v4075_v26 = vsel %vm452_vm0, %v4070_v22, %v4074_v57  ;;  %v2552_v34 = vadd.f32 %v13102_v29, %v2269_v52  ;;  %6142 = vmatpush.bf16.msra.mxu0 %v11486_v12  ;;  %v3074_v25 = vrot.slane %v11027_v15, 1  ;;  %v3582_v2 = vpop.permute.xlu1 %3581 }
 0x4d9   : > { %v3216_v21 = vpop.f32.mrf.mxu0  ;;  %4277 = vmatmul.bf16.gmra.mxu1 %v4075_v26  ;;  %v4078_v52 = vor.u32 %v4076_v40, %v4074_v57 }
 0x4da   : > { %v8937_v28 = vpack.c.bf16 %v3702_v3, %v3701_v17  ;;  %v4654_v9 = vpop.f32.mrf.mxu3  ;;  %v3294_v36 = vadd.f32 %v3216_v21, %v11040_v19  ;;  %v2994_v54 = vadd.f32 %v11064_v55, %v2552_v34  ;;  %v11494_v19 = vld [vmem:[%s12557_s3 + $0x190] sm:$0xff]  ;;  %v11503_v55 = vld [vmem:[%s12557_s3 + $0x188] sm:$0xff]  ;;  %v13103_v3 = vld [vmem:[#allocation64_spill] sm:$0xff]  ;;  %v3075_v57 = vsel %vm1042_vm1, %v3072_v53, %v3074_v25 }
 0x4db   : > { %3255 = vmatmul.bf16.gmra.mxu0 %v3073_v35  ;;  %v11481_v10 = vadd.f32 %v4654_v9, %v4416_v46  ;;  %v2271_v46 = vadd.f32 %v13103_v3, %v11085_v18 }
 0x4dc   : > { %9010 = vst [vmem:[#allocation2 + $0x58] sm:$0xff] %v8937_v28   ;;  %v3343_v47 = vadd.f32 %v11294_v58, %v3294_v36  ;;  %6143 = vmatpush.bf16.msra.mxu0 %v11494_v19  ;;  %v11514_v28 = vld [vmem:[%s12557_s3 + $0x180] sm:$0xff] }
 0x4de   : > { %v4240_v4 = vpop.f32.mrf.mxu1  ;;  %v3388_v50 = vmax.f32 %v3343_v47, 0.0 }
 0x4df   : > { %v4418_v31 = vadd.f32 %v4417_v42, %v4240_v4  ;;  %v4422_v30 = vpop.f32.mrf.mxu2 }
 0x4e0   : > { %6144 = vmatpush.bf16.msra.mxu0 %v11503_v55  ;;  %v3703_v21 = vmul.f32 %v3577_v5, %v3388_v50  ;;  %v3592_v5 = vpop.permute.xlu0 %3591 }
 0x4e1   : > { %v3218_v6 = vpop.f32.mrf.mxu0 }
 0x4e2   : > { %v3295_v38 = vadd.f32 %v3218_v6, %v2994_v54  ;;  %v4656_v23 = vpop.f32.mrf.mxu3 }
 0x4e3   : > { %v8732_v61 = vld [vmem:[#allocation2 + $0x58] sm:$0xff]  ;;  %v11498_v51 = vadd.f32 %v4656_v23, %v4418_v31 }
 0x4e4   : > { %v3344_v24 = vadd.f32 %v11294_v58, %v3295_v38  ;;  %4464 = vmatmul.bf16.gmra.mxu2 %v8732_v61  ;;  %v4552_v42 = vrot.slane %v8732_v61, 1  ;;  %v4080_v7 = vshll.u32 %v8732_v61, 16  ;;  %6145 = vmatpush.bf16.msra.mxu0 %v11514_v28 }
 0x4e6   : > { %v3389_v20 = vmax.f32 %v3344_v24, 0.0  ;;  %v4243_v22 = vpop.f32.mrf.mxu1  ;;  %v4553_v45 = vsel %vm1042_vm1, %v4550_v8, %v4552_v42  ;;  %v4082_v17 = vrot.slane %v4080_v7, 1 }
 0x4e7   : > { %v4421_v35 = vadd.f32 %v4420_v37, %v4243_v22  ;;  %v4425_v63 = vpop.f32.mrf.mxu2  ;;  %4698 = vmatmul.bf16.gmra.mxu3 %v4553_v45  ;;  %v13104_v37 = vld [vmem:[#allocation65_spill] sm:$0xff] }
 0x4e8   : > { %v3704_v26 = vmul.f32 %v3582_v2, %v3389_v20  ;;  %v4083_v8 = vsel %vm452_vm0, %v4078_v52, %v4082_v17  ;;  %v2554_v34 = vadd.f32 %v13104_v37, %v2271_v46  ;;  %v4084_v2 = vshrl.u32 %v8732_v61, 16 }
 0x4e9   : > { %v3221_v9 = vpop.f32.mrf.mxu0  ;;  %4282 = vmatmul.bf16.gmra.mxu1 %v4083_v8  ;;  %v2273_v46 = vadd.f32 %v11050_v27, %v11118_v13  ;;  %v8794_v13 = vld [vmem:[%s12557_s3 + $0x110] sm:$0xff] }
 0x4ea   : > { %v8942_v18 = vpack.c.bf16 %v3704_v26, %v3703_v21  ;;  %v4659_v29 = vpop.f32.mrf.mxu3  ;;  %v3296_v36 = vadd.f32 %v3221_v9, %v11082_v39  ;;  %v2996_v47 = vadd.f32 %v11099_v48, %v2554_v34  ;;  %v3587_v48 = vpop.permute.xlu2 %3586  ;;  %v4086_v52 = vor.u32 %v4084_v2, %v4082_v17  ;;  %v8786_v17 = vld [vmem:[%s12557_s3 + $0xd0] sm:$0xff]  ;;  %5490 = vmatpush.bf16.msrb.mxu2 %v8794_v13 }
 0x4eb   : > { %3260 = vmatmul.bf16.gmra.mxu0 %v3075_v57  ;;  %v11525_v4 = vadd.f32 %v4659_v29, %v4421_v35  ;;  %v2556_v29 = vadd.f32 %v11066_v43, %v2273_v46  ;;  %5064 = vmatpush.bf16.msrb.mxu1 %v8786_v17  ;;  %v13105_v43 = vld [vmem:[#allocation33_spill] sm:$0xff]  ;;  %v13110_v17 = vld [vmem:[#allocation71_spill] sm:$0xff] }
 0x4ec   : > { %9011 = vst [vmem:[#allocation2 + $0x60] sm:$0xff] %v8942_v18   ;;  %v3345_v33 = vadd.f32 %v11294_v58, %v3296_v36 }
 0x4ed   : > { %v2998_v37 = vadd.f32 %v13105_v43, %v2556_v29 }
 0x4ee   : > { %v4245_v54 = vpop.f32.mrf.mxu1  ;;  %v3390_v24 = vmax.f32 %v3345_v33, 0.0 }
 0x4ef   : > { %v4423_v31 = vadd.f32 %v4422_v30, %v4245_v54  ;;  %v4427_v53 = vpop.f32.mrf.mxu2 }
 0x4f0   : > { %v3705_v21 = vmul.f32 %v3587_v48, %v3390_v24 }
 0x4f1   : > { %v3223_v6 = vpop.f32.mrf.mxu0 }
 0x4f2   : > { %v3297_v38 = vadd.f32 %v3223_v6, %v2996_v47  ;;  %v4661_v23 = vpop.f32.mrf.mxu3 }
 0x4f3   : > { %v8733_v50 = vld [vmem:[#allocation2 + $0x60] sm:$0xff]  ;;  %v11530_v7 = vadd.f32 %v4661_v23, %v4423_v31 }
 0x4f4   : > { %v3346_v40 = vadd.f32 %v11294_v58, %v3297_v38  ;;  %4469 = vmatmul.bf16.gmra.mxu2 %v8733_v50  ;;  %v4554_v39 = vrot.slane %v8733_v50, 1  ;;  %v4088_v20 = vshll.u32 %v8733_v50, 16  ;;  %v4092_v23 = vshrl.u32 %v8733_v50, 16 }
 0x4f6   : > { %v3391_v22 = vmax.f32 %v3346_v40, 0.0  ;;  %v4248_v45 = vpop.f32.mrf.mxu1  ;;  %v4555_v30 = vsel %vm1042_vm1, %v4552_v42, %v4554_v39  ;;  %v4090_v3 = vrot.slane %v4088_v20, 1  ;;  %v3597_v40 = vpop.permute.xlu1 %3596 }
 0x4f7   : > { %v4426_v35 = vadd.f32 %v4425_v63, %v4248_v45  ;;  %v4430_v9 = vpop.f32.mrf.mxu2  ;;  %4703 = vmatmul.bf16.gmra.mxu3 %v4555_v30  ;;  %v3602_v20 = vpop.permute.xlu2 %3601  ;;  %v13106_v45 = vld [vmem:[#allocation69_spill] sm:$0xff]  ;;  %v13107_v30 = vld [vmem:[#allocation66_spill] sm:$0xff] }
 0x4f8   : > { %v3706_v26 = vmul.f32 %v3592_v5, %v3391_v22  ;;  %v4091_v61 = vsel %vm452_vm0, %v4086_v52, %v4090_v3  ;;  %v4094_v22 = vor.u32 %v4092_v23, %v4090_v3  ;;  %v2275_v52 = vadd.f32 %v13107_v30, %v13106_v45 }
 0x4f9   : > { %v3226_v8 = vpop.f32.mrf.mxu0  ;;  %4287 = vmatmul.bf16.gmra.mxu1 %v4091_v61  ;;  %v8808_v61 = vld [vmem:[#allocation2 + $0x14] sm:$0xff] }
 0x4fa   : > { %v8947_v57 = vpack.c.bf16 %v3706_v26, %v3705_v21  ;;  %v4664_v18 = vpop.f32.mrf.mxu3  ;;  %v3298_v42 = vadd.f32 %v3226_v8, %v11115_v60 }
 0x4fb   : > { %3265 = vmatmul.bf16.gmra.mxu0 %v3074_v25  ;;  %v11540_v27 = vadd.f32 %v4664_v18, %v4426_v35  ;;  %v13108_v18 = vld [vmem:[#allocation102_spill] sm:$0xff] }
 0x4fc   : > { %9012 = vst [vmem:[#allocation2 + $0x68] sm:$0xff] %v8947_v57   ;;  %v3347_v60 = vadd.f32 %v11294_v58, %v3298_v42  ;;  %v2558_v29 = vadd.f32 %v13108_v18, %v2275_v52  ;;  %v13111_v52 = vld [vmem:[#allocation38_spill] sm:$0xff]  ;;  %v8809_v18 = vld [vmem:[#allocation2 + $0x1c] sm:$0xff] }
 0x4fe   : > { %v4250_v63 = vpop.f32.mrf.mxu1  ;;  %v3392_v33 = vmax.f32 %v3347_v60, 0.0 }
 0x4ff   : > { %v4428_v34 = vadd.f32 %v4427_v53, %v4250_v63  ;;  %v4432_v15 = vpop.f32.mrf.mxu2  ;;  %v11565_v63 = vld [vmem:[%s12556_s2] ss:$0 sm:$0xff] }
 0x500   : > { %v3707_v46 = vmul.f32 %v3597_v40, %v3392_v33 }
 0x501   : > { %v3228_v25 = vpop.f32.mrf.mxu0 }
 0x502   : > { %v3299_v36 = vadd.f32 %v3228_v25, %v2998_v37  ;;  %v4666_v54 = vpop.f32.mrf.mxu3 }
 0x503   : > { %v8734_v47 = vld [vmem:[#allocation2 + $0x68] sm:$0xff]  ;;  %v11551_v6 = vadd.f32 %v4666_v54, %v4428_v34 }
 0x504   : > { %v3348_v31 = vadd.f32 %v11294_v58, %v3299_v36  ;;  %4474 = vmatmul.bf16.gmra.mxu2 %v8734_v47  ;;  %v4556_v38 = vrot.slane %v8734_v47, 1  ;;  %v4096_v24 = vshll.u32 %v8734_v47, 16  ;;  %v4100_v40 = vshrl.u32 %v8734_v47, 16 }
 0x506   : > { %v3393_v2 = vmax.f32 %v3348_v31, 0.0  ;;  %v4253_v5 = vpop.f32.mrf.mxu1  ;;  %v4557_v53 = vsel %vm1042_vm1, %v4554_v39, %v4556_v38  ;;  %v4098_v48 = vrot.slane %v4096_v24, 1  ;;  %v13109_v39 = vld [vmem:[#allocation68_spill] sm:$0xff] }
 0x507   : > { %v4431_v58 = vadd.f32 %v4430_v9, %v4253_v5  ;;  %v4435_v26 = vpop.f32.mrf.mxu2  ;;  %4708 = vmatmul.bf16.gmra.mxu3 %v4557_v53  ;;  %v3000_v9 = vadd.f32 %v13110_v17, %v2558_v29  ;;  %v3607_v53 = vpop.permute.xlu0 %3606 }
 0x508   : > { %v3708_v21 = vmul.f32 %v3602_v20, %v3393_v2  ;;  %v4099_v50 = vsel %vm452_vm0, %v4094_v22, %v4098_v48  ;;  %v3612_v20 = vpop.permute.xlu1 %3611  ;;  %v4102_v45 = vor.u32 %v4100_v40, %v4098_v48 }
 0x509   : > { %v3231_v35 = vpop.f32.mrf.mxu0  ;;  %4292 = vmatmul.bf16.gmra.mxu1 %v4099_v50 }
 0x50a   : > { %v8952_v8 = vpack.c.bf16 %v3708_v21, %v3707_v46  ;;  %v4669_v57 = vpop.f32.mrf.mxu3  ;;  %v3300_v3 = vadd.f32 %v3231_v35, %v13109_v39  ;;  %v13112_v46 = vld [vmem:[#allocation67_spill] sm:$0xff] }
 0x50b   : > { %v11559_v42 = vadd.f32 %v4669_v57, %v4431_v58  ;;  %6146 = vmatmul.bf16.vlgmr.msra.gmra.mxu0 %v8808_v61  ;;  %v2277_v21 = vadd.f32 %v13112_v46, %v13111_v52  ;;  %v13113_v39 = vld [vmem:[#allocation35_spill] sm:$0xff]  ;;  %v3617_v46 = vpop.permute.xlu2 %3616 }
 0x50c   : > { %9013 = vst [vmem:[#allocation2 + $0x70] sm:$0xff] %v8952_v8   ;;  %v3349_v43 = vadd.f32 %v11565_v63, %v3300_v3 }
 0x50d   : > { %v2560_v3 = vadd.f32 %v13113_v39, %v2277_v21 }
 0x50e   : > { %v4255_v13 = vpop.f32.mrf.mxu1  ;;  %v3394_v33 = vmax.f32 %v3349_v43, 0.0 }
 0x50f   : > { %v4433_v37 = vadd.f32 %v4432_v15, %v4255_v13  ;;  %v4437_v60 = vpop.f32.mrf.mxu2 }
 0x510   : > { %v3709_v58 = vmul.f32 %v3607_v53, %v3394_v33 }
 0x511   : > { %v3233_v34 = vpop.f32.mrf.mxu0 }
 0x512   : > { %v3301_v25 = vadd.f32 %v3233_v34, %v3000_v9  ;;  %v4671_v36 = vpop.f32.mrf.mxu3  ;;  %v13115_v9 = vld [vmem:[#allocation73_spill] sm:$0xff] }
 0x513   : > { %v8735_v54 = vld [vmem:[#allocation2 + $0x70] sm:$0xff]  ;;  %v11569_v23 = vadd.f32 %v4671_v36, %v4433_v37  ;;  %v8785_v36 = vld [vmem:[%s12557_s3 + $0xc8] sm:$0xff] }
 0x514   : > { %v3350_v31 = vadd.f32 %v11565_v63, %v3301_v25  ;;  %4479 = vmatmul.bf16.gmra.mxu2 %v8735_v54  ;;  %v4558_v24 = vrot.slane %v8735_v54, 1  ;;  %v4104_v2 = vshll.u32 %v8735_v54, 16  ;;  %v8793_v25 = vld [vmem:[%s12557_s3 + $0x108] sm:$0xff]  ;;  %5065 = vmatpush.bf16.msrb.mxu1 %v8785_v36 }
 0x515   : > { %5491 = vmatpush.bf16.msrb.mxu2 %v8793_v25  ;;  %v13120_v36 = vld [vmem:[#allocation41_spill] sm:$0xff] }
 0x516   : > { %v3395_v5 = vmax.f32 %v3350_v31, 0.0  ;;  %v4258_v22 = vpop.f32.mrf.mxu1  ;;  %v4559_v15 = vsel %vm1042_vm1, %v4556_v38, %v4558_v24  ;;  %v4106_v30 = vrot.slane %v4104_v2, 1  ;;  %v13114_v38 = vld [vmem:[#allocation39_spill] sm:$0xff] }
 0x517   : > { %v4436_v50 = vadd.f32 %v4435_v26, %v4258_v22  ;;  %v4440_v8 = vpop.f32.mrf.mxu2  ;;  %4713 = vmatmul.bf16.gmra.mxu3 %v4559_v15  ;;  %v3002_v26 = vadd.f32 %v13115_v9, %v2560_v3  ;;  %v4108_v22 = vshrl.u32 %v8735_v54, 16 }
 0x518   : > { %v3710_v35 = vmul.f32 %v3612_v20, %v3395_v5  ;;  %v4107_v47 = vsel %vm452_vm0, %v4102_v45, %v4106_v30  ;;  %v3622_v45 = vpop.permute.xlu0 %3621 }
 0x519   : > { %v3236_v61 = vpop.f32.mrf.mxu0  ;;  %4297 = vmatmul.bf16.gmra.mxu1 %v4107_v47  ;;  %v13117_v47 = vld [vmem:[#allocation70_spill] sm:$0xff] }
 0x51a   : > { %v8957_v57 = vpack.c.bf16 %v3710_v35, %v3709_v58  ;;  %v4674_v29 = vpop.f32.mrf.mxu3  ;;  %v3302_v48 = vadd.f32 %v3236_v61, %v13114_v38  ;;  %v4110_v35 = vor.u32 %v4108_v22, %v4106_v30  ;;  %v13116_v61 = vld [vmem:[#allocation40_spill] sm:$0xff] }
 0x51b   : > { %v11577_v13 = vadd.f32 %v4674_v29, %v4436_v50  ;;  %6151 = vmatmul.bf16.gmra.mxu0 %v8809_v18 }
 0x51c   : > { %9014 = vst [vmem:[#allocation2 + $0x78] sm:$0xff] %v8957_v57   ;;  %v3351_v43 = vadd.f32 %v11565_v63, %v3302_v48  ;;  %v2279_v57 = vadd.f32 %v13117_v47, %v13116_v61  ;;  %v3627_v61 = vpop.permute.xlu1 %3626 }
 0x51e   : > { %v4260_v17 = vpop.f32.mrf.mxu1  ;;  %v3396_v20 = vmax.f32 %v3351_v43, 0.0 }
 0x51f   : > { %v4438_v37 = vadd.f32 %v4437_v60, %v4260_v17  ;;  %v4442_v34 = vpop.f32.mrf.mxu2  ;;  %v8810_v17 = vld [vmem:[#allocation2 + $0x24] sm:$0xff] }
 0x520   : > { %v3711_v18 = vmul.f32 %v3617_v46, %v3396_v20 }
 0x521   : > { %v3238_v33 = vpop.f32.mrf.mxu0 }
 0x522   : > { %v3303_v31 = vadd.f32 %v3238_v33, %v3002_v26  ;;  %v4676_v40 = vpop.f32.mrf.mxu3  ;;  %v13118_v26 = vld [vmem:[#allocation36_spill] sm:$0xff] }
 0x523   : > { %v8736_v2 = vld [vmem:[#allocation2 + $0x78] sm:$0xff]  ;;  %v11588_v53 = vadd.f32 %v4676_v40, %v4438_v37  ;;  %v2562_v43 = vadd.f32 %v13118_v26, %v2279_v57  ;;  %v3632_v57 = vpop.permute.xlu2 %3631 }
 0x524   : > { %v3352_v5 = vadd.f32 %v11565_v63, %v3303_v31  ;;  %4484 = vmatmul.bf16.gmra.mxu2 %v8736_v2  ;;  %v4560_v60 = vrot.slane %v8736_v2, 1  ;;  %v4112_v15 = vshll.u32 %v8736_v2, 16 }
 0x526   : > { %v3397_v52 = vmax.f32 %v3352_v5, 0.0  ;;  %v4263_v21 = vpop.f32.mrf.mxu1  ;;  %v4561_v58 = vsel %vm1042_vm1, %v4558_v24, %v4560_v60  ;;  %v4114_v50 = vrot.slane %v4112_v15, 1  ;;  %v13119_v24 = vld [vmem:[#allocation75_spill] sm:$0xff] }
 0x527   : > { %v4441_v39 = vadd.f32 %v4440_v8, %v4263_v21  ;;  %v4445_v3 = vpop.f32.mrf.mxu2  ;;  %4718 = vmatmul.bf16.gmra.mxu3 %v4561_v58  ;;  %v3004_v8 = vadd.f32 %v13120_v36, %v2562_v43  ;;  %v4116_v58 = vshrl.u32 %v8736_v2, 16 }
 0x528   : > { %v3712_v29 = vmul.f32 %v3622_v45, %v3397_v52  ;;  %v4115_v54 = vsel %vm452_vm0, %v4110_v35, %v4114_v50 }
 0x529   : > { %v3241_v38 = vpop.f32.mrf.mxu0  ;;  %4302 = vmatmul.bf16.gmra.mxu1 %v4115_v54  ;;  %v13122_v54 = vld [vmem:[#allocation72_spill] sm:$0xff] }
 0x52a   : > { %v8962_v48 = vpack.c.bf16 %v3712_v29, %v3711_v18  ;;  %v4679_v9 = vpop.f32.mrf.mxu3  ;;  %v3304_v30 = vadd.f32 %v3241_v38, %v13119_v24  ;;  %v4118_v29 = vor.u32 %v4116_v58, %v4114_v50  ;;  %v13121_v38 = vld [vmem:[#allocation78_spill] sm:$0xff] }
 0x52b   : > { %v11596_v37 = vadd.f32 %v4679_v9, %v4441_v39  ;;  %6156 = vmatmul.bf16.gmra.mxu0 %v8810_v17 }
 0x52c   : > { %9015 = vst [vmem:[#allocation2 + $0x80] sm:$0xff] %v8962_v48   ;;  %v3353_v33 = vadd.f32 %v11565_v63, %v3304_v30  ;;  %v2281_v48 = vadd.f32 %v13122_v54, %v13121_v38 }
 0x52e   : > { %v4265_v25 = vpop.f32.mrf.mxu1  ;;  %v3398_v45 = vmax.f32 %v3353_v33, 0.0 }
 0x52f   : > { %v4443_v31 = vadd.f32 %v4442_v34, %v4265_v25  ;;  %v4447_v40 = vpop.f32.mrf.mxu2  ;;  %v8811_v25 = vld [vmem:[#allocation2 + $0x2c] sm:$0xff] }
 0x530   : > { %v3713_v17 = vmul.f32 %v3627_v61, %v3398_v45 }
 0x531   : > { %v3243_v20 = vpop.f32.mrf.mxu0 }
 0x532   : > { %v3305_v5 = vadd.f32 %v3243_v20, %v3004_v8  ;;  %v4681_v22 = vpop.f32.mrf.mxu3  ;;  %v13123_v8 = vld [vmem:[#allocation74_spill] sm:$0xff] }
 0x533   : > { %v8737_v15 = vld [vmem:[#allocation2 + $0x80] sm:$0xff]  ;;  %v11601_v46 = vadd.f32 %v4681_v22, %v4443_v31  ;;  %v2564_v33 = vadd.f32 %v13123_v8, %v2281_v48  ;;  %v3642_v48 = vpop.permute.xlu1 %3641 }
 0x534   : > { %v3354_v52 = vadd.f32 %v11565_v63, %v3305_v5  ;;  %4489 = vmatmul.bf16.gmra.mxu2 %v8737_v15  ;;  %v4562_v21 = vrot.slane %v8737_v15, 1  ;;  %v4120_v35 = vshll.u32 %v8737_v15, 16  ;;  %v13125_v5 = vld [vmem:[#allocation46_spill] sm:$0xff]  ;;  %v4124_v38 = vshrl.u32 %v8737_v15, 16 }
 0x536   : > { %v3399_v47 = vmax.f32 %v3354_v52, 0.0  ;;  %v4268_v18 = vpop.f32.mrf.mxu1  ;;  %v4563_v34 = vsel %vm1042_vm1, %v4560_v60, %v4562_v21  ;;  %v4122_v39 = vrot.slane %v4120_v35, 1  ;;  %v13124_v60 = vld [vmem:[#allocation77_spill] sm:$0xff] }
 0x537   : > { %v4446_v26 = vadd.f32 %v4445_v3, %v4268_v18  ;;  %v4450_v43 = vpop.f32.mrf.mxu2  ;;  %4723 = vmatmul.bf16.gmra.mxu3 %v4563_v34  ;;  %v3006_v3 = vadd.f32 %v13125_v5, %v2564_v33 }
 0x538   : > { %v3714_v9 = vmul.f32 %v3632_v57, %v3399_v47  ;;  %v4123_v2 = vsel %vm452_vm0, %v4118_v29, %v4122_v39 }
 0x539   : > { %v3246_v24 = vpop.f32.mrf.mxu0  ;;  %4307 = vmatmul.bf16.gmra.mxu1 %v4123_v2 }
 0x53a   : > { %v8967_v30 = vpack.c.bf16 %v3714_v9, %v3713_v17  ;;  %v4684_v36 = vpop.f32.mrf.mxu3  ;;  %v3306_v50 = vadd.f32 %v3246_v24, %v13124_v60  ;;  %v3637_v17 = vpop.permute.xlu0 %3636  ;;  %v4126_v24 = vor.u32 %v4124_v38, %v4122_v39  ;;  %v13128_v39 = vld [vmem:[#allocation76_spill] sm:$0xff]  ;;  %v8806_v38 = vld [vmem:[%s12557_s3 + $0x170] sm:$0xff] }
 0x53b   : > { %v11609_v31 = vadd.f32 %v4684_v36, %v4446_v26  ;;  %6161 = vmatmul.bf16.gmra.mxu0 %v8811_v25  ;;  %v13127_v25 = vld [vmem:[#allocation42_spill] sm:$0xff] }
 0x53c   : > { %9016 = vst [vmem:[#allocation2 + $0x88] sm:$0xff] %v8967_v30   ;;  %v3355_v22 = vadd.f32 %v11565_v63, %v3306_v50  ;;  %v13126_v30 = vld [vmem:[#allocation81_spill] sm:$0xff] }
 0x53d   : > { %v2283_v36 = vadd.f32 %v13127_v25, %v13126_v30 }
 0x53e   : > { %v4270_v20 = vpop.f32.mrf.mxu1  ;;  %v3400_v57 = vmax.f32 %v3355_v22, 0.0 }
 0x53f   : > { %v4448_v45 = vadd.f32 %v4447_v40, %v4270_v20  ;;  %v4452_v52 = vpop.f32.mrf.mxu2 }
 0x540   : > { %v3715_v8 = vmul.f32 %v3637_v17, %v3400_v57  ;;  %v8784_v57 = vld [vmem:[%s12557_s3 + $0xc0] sm:$0xff] }
 0x541   : > { %v3248_v58 = vpop.f32.mrf.mxu0  ;;  %5066 = vmatpush.bf16.msrb.mxu1 %v8784_v57 }
 0x542   : > { %v3307_v35 = vadd.f32 %v3248_v58, %v3006_v3  ;;  %v4686_v61 = vpop.f32.mrf.mxu3  ;;  %v8812_v3 = vld [vmem:[#allocation2 + $0x34] sm:$0xff] }
 0x543   : > { %v11613_v47 = vld [vmem:[#allocation2 + $0x88] sm:$0xff]  ;;  %v11616_v34 = vadd.f32 %v4686_v61, %v4448_v45  ;;  %v2566_v45 = vadd.f32 %v13128_v39, %v2283_v36  ;;  %v13129_v58 = vld [vmem:[#allocation79_spill] sm:$0xff] }
 0x544   : > { %v3356_v18 = vadd.f32 %v11565_v63, %v3307_v35  ;;  %4494 = vmatmul.bf16.gmra.mxu2 %v11613_v47  ;;  %v4564_v29 = vrot.slane %v11613_v47, 1  ;;  %v4128_v54 = vshll.u32 %v11613_v47, 16  ;;  %v8805_v36 = vld [vmem:[%s12557_s3 + $0x168] sm:$0xff] }
 0x546   : > { %v3401_v40 = vmax.f32 %v3356_v18, 0.0  ;;  %v4273_v9 = vpop.f32.mrf.mxu1  ;;  %v4565_v26 = vsel %vm1042_vm1, %v4562_v21, %v4564_v29  ;;  %v4130_v2 = vrot.slane %v4128_v54, 1  ;;  %v8807_v21 = vld [vmem:[%s12557_s3 + $0x178] sm:$0xff] }
 0x547   : > { %v4451_v60 = vadd.f32 %v4450_v43, %v4273_v9  ;;  %v4455_v50 = vpop.f32.mrf.mxu2  ;;  %4728 = vmatmul.bf16.gmra.mxu3 %v4565_v26  ;;  %v8792_v43 = vld [vmem:[%s12557_s3 + $0x100] sm:$0xff]  ;;  %v13130_v54 = vld [vmem:[#allocation3_spill] sm:$0xff] }
 0x548   : > { %v3716_v33 = vmul.f32 %v3642_v48, %v3401_v40  ;;  %v4131_v15 = vsel %vm452_vm0, %v4126_v24, %v4130_v2  ;;  %5764 = vmatpush.bf16.msra.mxu3 %v8807_v21  ;;  %5492 = vmatpush.bf16.msrb.mxu2 %v8792_v43  ;;  %v3008_v48 = vadd.f32 %v13130_v54, %v2566_v45  ;;  %v13131_v43 = vld [vmem:[#allocation43_spill] sm:$0xff] }
 0x549   : > { %v3251_v20 = vpop.f32.mrf.mxu0  ;;  %4312 = vmatmul.bf16.gmra.mxu1 %v4131_v15 }
 0x54a   : > { %v8972_v5 = vpack.c.bf16 %v3716_v33, %v3715_v8  ;;  %v4689_v22 = vpop.f32.mrf.mxu3  ;;  %v3308_v35 = vadd.f32 %v3251_v20, %v13129_v58  ;;  %v4132_v20 = vshrl.u32 %v11613_v47, 16  ;;  %v2285_v47 = vadd.f32 %v13131_v43, %v11251_v49 }
 0x54b   : > { %v11630_v61 = vadd.f32 %v4689_v22, %v4451_v60  ;;  %6166 = vmatmul.bf16.gmra.mxu0 %v8812_v3  ;;  %v3647_v22 = vpop.permute.xlu2 %3646 }
 0x54c   : > { %9017 = vst [vmem:[#allocation2 + $0x90] sm:$0xff] %v8972_v5   ;;  %v3357_v40 = vadd.f32 %v11565_v63, %v3308_v35  ;;  %5765 = vmatpush.bf16.msra.mxu3 %v8806_v38  ;;  %v3652_v5 = vpop.permute.xlu0 %3651  ;;  %v4134_v45 = vor.u32 %v4132_v20, %v4130_v2  ;;  %v8804_v35 = vld [vmem:[%s12557_s3 + $0x160] sm:$0xff]  ;;  %v8802_v20 = vld [vmem:[%s12557_s3 + $0x150] sm:$0xff] }
 0x54e   : > { %v4275_v18 = vpop.f32.mrf.mxu1  ;;  %v3402_v8 = vmax.f32 %v3357_v40, 0.0 }
 0x54f   : > { %v4453_v17 = vadd.f32 %v4452_v52, %v4275_v18  ;;  %v4457_v9 = vpop.f32.mrf.mxu2 }
 0x550   : > { %5766 = vmatpush.bf16.msra.mxu3 %v8805_v36  ;;  %v3717_v57 = vmul.f32 %v3647_v22, %v3402_v8  ;;  %v4789_v8 = vld [vmem:[#allocation2 + $0x8] sm:$0xc] }
 0x551   : > { %v3253_v26 = vpop.f32.mrf.mxu0 }
 0x552   : > { %v3309_v24 = vadd.f32 %v3253_v26, %v3008_v48  ;;  %v4691_v30 = vpop.f32.mrf.mxu3  ;;  %v8803_v26 = vld [vmem:[%s12557_s3 + $0x158] sm:$0xff] }
 0x553   : > { %v11643_v25 = vld [vmem:[#allocation2 + $0x90] sm:$0xff]  ;;  %v11649_v60 = vadd.f32 %v4691_v30, %v4453_v17 }
 0x554   : > { %v3358_v33 = vadd.f32 %v11565_v63, %v3309_v24  ;;  %4499 = vmatmul.bf16.gmra.mxu2 %v11643_v25  ;;  %v4566_v52 = vrot.slane %v11643_v25, 1  ;;  %v4136_v15 = vshll.u32 %v11643_v25, 16  ;;  %5767 = vmatpush.bf16.msra.mxu3 %v8804_v35  ;;  %v13132_v24 = vld [vmem:[#allocation44_spill] sm:$0xff] }
 0x555   : > { %v2568_v30 = vadd.f32 %v13132_v24, %v2285_v47  ;;  %v11681_v47 = vld [vmem:[#allocation2 + $0x10] sm:$0xff] }
 0x556   : > { %v3403_v3 = vmax.f32 %v3358_v33, 0.0  ;;  %v4278_v21 = vpop.f32.mrf.mxu1  ;;  %v4567_v39 = vsel %vm1042_vm1, %v4564_v29, %v4566_v52  ;;  %v4138_v58 = vrot.slane %v4136_v15, 1  ;;  %v8813_v29 = vld [vmem:[#allocation2 + $0x3c] sm:$0xff]  ;;  %v11671_v33 = vld [vmem:[#allocation2 + $0xc] sm:$0xf] }
 0x557   : > { %v4456_v38 = vadd.f32 %v4455_v50, %v4278_v21  ;;  %v4460_v54 = vpop.f32.mrf.mxu2  ;;  %4733 = vmatmul.bf16.gmra.mxu3 %v4567_v39  ;;  %v3010_v15 = vadd.f32 %v11254_v41, %v2568_v30  ;;  %v4888_v39 = vunpack.c.l.b16 %v4789_v8  ;;  %v3662_v30 = vpop.permute.xlu2 %3661 }
 0x558   : > { %v3718_v18 = vmul.f32 %v3652_v5, %v3403_v3  ;;  %v4139_v40 = vsel %vm452_vm0, %v4134_v45, %v4138_v58  ;;  %5768 = vmatpush.bf16.msra.mxu3 %v8803_v26  ;;  %v4889_v45 = vunpack.c.l.b16 %v11671_v33  ;;  %v4951_v33 = vrot.slane %v11681_v47, 2 }
 0x559   : > { %v3256_v48 = vpop.f32.mrf.mxu0  ;;  %4317 = vmatmul.bf16.gmra.mxu1 %v4139_v40 }
 0x55a   : > { %v8977_v17 = vpack.c.bf16 %v3718_v18, %v3717_v57  ;;  %v4694_v2 = vpop.f32.mrf.mxu3  ;;  %v3310_v49 = vadd.f32 %v3256_v48, %v11248_v14  ;;  %v8801_v57 = vld [vmem:[%s12557_s3 + $0x148] sm:$0xff]  ;;  %v4140_v48 = vshrl.u32 %v11643_v25, 16  ;;  %v11697_v24 = vpack.c.b16 %v4889_v45, %v4888_v39 }
 0x55b   : > { %v11669_v50 = vadd.f32 %v4694_v2, %v4456_v38  ;;  %6171 = vmatmul.bf16.gmra.mxu0 %v8813_v29  ;;  %v3657_v2 = vpop.permute.xlu1 %3656  ;;  %v5241_v39 = vshll.u32 %v11681_v47, 16 }
 0x55c   : > { %9018 = vst [vmem:[#allocation2 + $0x98] sm:$0xff] %v8977_v17   ;;  %v3359_v5 = vadd.f32 %v11565_v63, %v3310_v49  ;;  %5769 = vmatpush.bf16.msra.mxu3 %v8802_v20  ;;  %v13133_v17 = vld [vmem:[#allocation47_spill] sm:$0xff]  ;;  %v4142_v8 = vor.u32 %v4140_v48, %v4138_v58 }
 0x55d   : > { %v2287_v29 = vadd.f32 %v13133_v17, %v11267_v56  ;;  %v8800_v56 = vld [vmem:[%s12557_s3 + $0x140] sm:$0xff] }
 0x55e   : > { %v4280_v36 = vpop.f32.mrf.mxu1  ;;  %v3404_v41 = vmax.f32 %v3359_v5, 0.0 }
 0x55f   : > { %v4458_v3 = vadd.f32 %v4457_v9, %v4280_v36  ;;  %v4462_v22 = vpop.f32.mrf.mxu2 }
 0x560   : > { %5770 = vmatpush.bf16.msra.mxu3 %v8801_v57  ;;  %v3719_v5 = vmul.f32 %v3657_v2, %v3404_v41  ;;  %v8814_v57 = vld [vmem:[#allocation2 + $0x44] sm:$0xff]  ;;  %v5230_v41 = vshrl.u32 %v11697_v24, 16 }
 0x561   : > { %v3258_v21 = vpop.f32.mrf.mxu0 }
 0x562   : > { %v3311_v14 = vadd.f32 %v3258_v21, %v3010_v15  ;;  %v4696_v35 = vpop.f32.mrf.mxu3  ;;  %v5238_v15 = vshrl.u32 %v11681_v47, 16 }
 0x563   : > { %v11679_v43 = vld [vmem:[#allocation2 + $0x98] sm:$0xff]  ;;  %v11687_v9 = vadd.f32 %v4696_v35, %v4458_v3 }
 0x564   : > { %v3360_v18 = vadd.f32 %v11565_v63, %v3311_v14  ;;  %4504 = vmatmul.bf16.gmra.mxu2 %v11679_v43  ;;  %v4568_v38 = vrot.slane %v11679_v43, 1  ;;  %v4144_v40 = vshll.u32 %v11679_v43, 16  ;;  %5771 = vmatpush.bf16.msra.mxu3 %v8800_v56 }
 0x566   : > { %v3405_v26 = vmax.f32 %v3360_v18, 0.0  ;;  %v4283_v49 = vpop.f32.mrf.mxu1  ;;  %v4569_v36 = vsel %vm1042_vm1, %v4566_v52, %v4568_v38  ;;  %v11704_v20 = vrot.slane %v4144_v40, 1  ;;  %v8870_v52 = vld [vmem:[%s12557_s3 + $0x238] sm:$0xff]  ;;  %v13134_v40 = vld [vmem:[#allocation49_spill] sm:$0xff] }
 0x567   : > { %v4461_v21 = vadd.f32 %v4460_v54, %v4283_v49  ;;  %v4465_v14 = vpop.f32.mrf.mxu2  ;;  %4738 = vmatmul.bf16.gmra.mxu3 %v4569_v36  ;;  %v5233_v54 = vshll.u32 %v11697_v24, 16  ;;  %6959 = vmatpush.bf16.msra.mxu2 %v8870_v52  ;;  %v2570_v17 = vadd.f32 %v13134_v40, %v2287_v29  ;;  %v8862_v49 = vld [vmem:[%s12557_s3 + $0x1f8] sm:$0xff]  ;;  %v5232_v36 = vrot.slane %v5230_v41, 2  ;;  %v3667_v41 = vpop.permute.xlu0 %3666 }
 0x568   : > { %v3720_v3 = vmul.f32 %v3662_v30, %v3405_v26  ;;  %v4147_v25 = vsel %vm452_vm0, %v4142_v8, %v11704_v20  ;;  %9042 = vmatpush.bf16.msrb.mxu3 %v11428_v44  ;;  %v5240_v26 = vrot.slane %v5238_v15, 2  ;;  %v5243_v30 = vrot.slane %v5241_v39, 3  ;;  %6680 = vmatpush.bf16.msra.mxu1 %v8862_v49 }
 0x569   : > { %v3261_v35 = vpop.f32.mrf.mxu0  ;;  %4322 = vmatmul.bf16.gmra.mxu1 %v4147_v25  ;;  %v5235_v8 = vrot.slane %v5233_v54, 3  ;;  %v3012_v29 = vadd.f32 %v11270_v1, %v2570_v17  ;;  %v4148_v17 = vshrl.u32 %v11679_v43, 16 }
 0x56a   : > { %v8982_v58 = vpack.c.bf16 %v3720_v3, %v3719_v5  ;;  %v3312_v18 = vadd.f32 %v3261_v35, %v11264_v32  ;;  %v4699_v48 = vpop.f32.mrf.mxu3  ;;  %v11729_v3 = vor.u32 %v5243_v30, %v5240_v26 }
 0x56b   : > { %v11721_v2 = vadd.f32 %v4699_v48, %v4461_v21  ;;  %6176 = vmatmul.bf16.gmra.mxu0 %v8814_v57  ;;  %v5236_v39 = vor.u32 %v5235_v8, %v5232_v36 }
 0x56c   : > { %9019 = vst [vmem:[#allocation2 + $0xa0] sm:$0xff] %v8982_v58   ;;  %9043 = vmatpush.bf16.msrb.mxu3 %v11442_v0  ;;  %v3361_v32 = vadd.f32 %v11565_v63, %v3312_v18  ;;  %v11732_v58 = vld [vmem:[#allocation2 + $0x18] sm:$0xff] }
 0x56d   : > { %v5245_v1 = vsel %vm1651_vm3, %v5236_v39, %v11729_v3  ;;  %v5247_v26 = vshrl.u32 %v11732_v58, 16  ;;  %v5250_v30 = vshll.u32 %v11732_v58, 16 }
 0x56e   : > { %v4285_v44 = vpop.f32.mrf.mxu1  ;;  %v3406_v35 = vmax.f32 %v3361_v32, 0.0 }
 0x56f   : > { %v4463_v56 = vadd.f32 %v4462_v22, %v4285_v44  ;;  %v4467_v5 = vpop.f32.mrf.mxu2 }
 0x570   : > { %9044 = vmatpush.bf16.msrb.mxu3 %v11453_v16  ;;  %v3672_v16 = vpop.permute.xlu1 %3671  ;;  %v3721_v48 = vmul.f32 %v3667_v41, %v3406_v35  ;;  %v8815_v35 = vld [vmem:[#allocation2 + $0x4c] sm:$0xff]  ;;  %v5634_v41 = vld [vmem:[#allocation2 + $0x8] sm:$0x8] }
 0x571   : > { %v3263_v15 = vpop.f32.mrf.mxu0 }
 0x572   : > { %v3313_v21 = vadd.f32 %v3263_v15, %v3012_v29  ;;  %v4701_v25 = vpop.f32.mrf.mxu3 }
 0x573   : > { %v3871_v52 = vld [vmem:[#allocation2 + $0xa0] sm:$0x1]  ;;  %v11735_v57 = vadd.f32 %v4701_v25, %v4463_v56  ;;  %v4150_v56 = vor.u32 %v4148_v17, %v11704_v20 }
 0x574   : > { %v3362_v0 = vadd.f32 %v11565_v63, %v3313_v21  ;;  %v3970_v22 = vunpack.c.l.b16 %v3871_v52  ;;  %5493 = vmatmul.bf16.vlgmr.msrb.gmra.mxu2 %v5245_v1  ;;  %9045 = vmatpush.bf16.msrb.mxu3 %v11470_v11  ;;  %v13135_v21 = vld [vmem:[#allocation82_spill] sm:$0xff] }
 0x576   : > { %v3407_v54 = vmax.f32 %v3362_v0, 0.0  ;;  %v3991_v18 = vpack.c.b16 %v3970_v22, %v3970_v22  ;;  %v4288_v40 = vpop.f32.mrf.mxu1  ;;  %v5252_v22 = vrot.slane %v5250_v30, 3 }
 0x577   : > { %v4466_v36 = vadd.f32 %v4465_v14, %v4288_v40  ;;  %v4470_v8 = vpop.f32.mrf.mxu2  ;;  %v5249_v14 = vrot.slane %v5247_v26, 2 }
 0x578   : > { %v3722_v49 = vmul.f32 %v3672_v16, %v3407_v54  ;;  %v4570_v32 = vrot.slane %v3991_v18, 1  ;;  %v4152_v44 = vshll.u32 %v3991_v18, 16  ;;  %9046 = vmatpush.bf16.msrb.mxu3 %v11486_v12  ;;  %v5653_v12 = vunpack.c.l.b16 %v5634_v41  ;;  %v11779_v41 = vld [vmem:[#allocation2 + $0x28] sm:$0xff] }
 0x579   : > { %v3266_v29 = vpop.f32.mrf.mxu0  ;;  %v5253_v40 = vor.u32 %v5252_v22, %v5249_v14 }
 0x57a   : > { %v8987_v15 = vpack.c.bf16 %v3722_v49, %v3721_v48  ;;  %v3314_v11 = vadd.f32 %v3266_v29, %v13135_v21  ;;  %v4571_v39 = vsel %vm1042_vm1, %v4568_v38, %v4570_v32  ;;  %v4154_v25 = vrot.slane %v4152_v44, 1  ;;  %v4704_v52 = vpop.f32.mrf.mxu3  ;;  %v3677_v38 = vpop.permute.xlu2 %3676 }
 0x57b   : > { %4743 = vmatmul.bf16.gmra.mxu3 %v4571_v39  ;;  %v11750_v1 = vadd.f32 %v4704_v52, %v4466_v36  ;;  %6181 = vmatmul.bf16.gmra.mxu0 %v8815_v35  ;;  %v5654_v30 = vpack.c.b16 %v4889_v45, %v5653_v12  ;;  %v11761_v36 = vld [vmem:[#allocation2 + $0x20] sm:$0xff]  ;;  %v4950_v21 = vrot.slane %v11697_v24, 2 }
 0x57c   : > { %9020 = vst [vmem:[#allocation2 + $0xa8] sm:$0xff] %v8987_v15   ;;  %v3363_v0 = vadd.f32 %v11565_v63, %v3314_v11  ;;  %v4155_v20 = vsel %vm452_vm0, %v4150_v56, %v4154_v25  ;;  %9047 = vmatpush.bf16.msrb.mxu3 %v11494_v19  ;;  %v5254_v19 = vsel %vm1651_vm3, %v11729_v3, %v5253_v40  ;;  %v5256_v45 = vshrl.u32 %v11761_v36, 16  ;;  %v8816_v3 = vld [vmem:[#allocation2 + $0x54] sm:$0xff] }
 0x57d   : > { %4327 = vmatmul.bf16.gmra.mxu1 %v4155_v20  ;;  %v5655_v44 = vrot.slane %v5654_v30, 3  ;;  %v5259_v56 = vshll.u32 %v11761_v36, 16 }
 0x57e   : > { %v3408_v43 = vmax.f32 %v3363_v0, 0.0  ;;  %v4290_v54 = vpop.f32.mrf.mxu1  ;;  %v8869_v0 = vld [vmem:[%s12557_s3 + $0x230] sm:$0xff] }
 0x57f   : > { %v4468_v16 = vadd.f32 %v4467_v5, %v4290_v54  ;;  %v4472_v48 = vpop.f32.mrf.mxu2  ;;  %v5656_v5 = vrot.slane %v11681_v47, 3  ;;  %v5261_v35 = vrot.slane %v5259_v56, 3  ;;  %6960 = vmatpush.bf16.msra.mxu2 %v8869_v0  ;;  %v8818_v0 = vld [vmem:[#allocation2 + $0x64] sm:$0xff] }
 0x580   : > { %v3723_v18 = vmul.f32 %v3677_v38, %v3408_v43  ;;  %9048 = vmatpush.bf16.msrb.mxu3 %v11503_v55  ;;  %v8861_v43 = vld [vmem:[%s12557_s3 + $0x1f0] sm:$0xff]  ;;  %v5658_v38 = vrot.slane %v11732_v58, 3 }
 0x581   : > { %v3268_v17 = vpop.f32.mrf.mxu0  ;;  %v5657_v15 = vsel %vm2004_vm4, %v5655_v44, %v5656_v5  ;;  %6681 = vmatpush.bf16.msra.mxu1 %v8861_v43 }
 0x582   : > { %v3768_v63 = vpack.c.bf16 %v3723_v18, %v3723_v18  ;;  %v4706_v26 = vpop.f32.mrf.mxu3  ;;  %v5268_v17 = vshll.u32 %v11779_v41, 16 }
 0x583   : > { %v11757_v49 = vadd.f32 %v4706_v26, %v4468_v16  ;;  %v4953_v16 = vrot.slane %v11732_v58, 2 }
 0x584   : > { %3813 = vst [vmem:[#allocation2 + $0xb0] sm:$0xf] %v3768_v63  ;;  %5498 = vmatmul.bf16.gmra.mxu2 %v5254_v19  ;;  %9049 = vmatpush.bf16.msrb.mxu3 %v11514_v28  ;;  %v4952_v28 = vsel %vm1349_vm2, %v4950_v21, %v4951_v33  ;;  %v8817_v63 = vld [vmem:[#allocation2 + $0x5c] sm:$0xff]  ;;  %v5270_v44 = vrot.slane %v5268_v17, 3  ;;  %v5660_v21 = vrot.slane %v11761_v36, 3 }
 0x585   : > { %v4954_v19 = vsel %vm1349_vm2, %v4951_v33, %v4953_v16 }
 0x586   : > { %v4293_v32 = vpop.f32.mrf.mxu1 }
 0x587   : > { %v4471_v55 = vadd.f32 %v4470_v8, %v4293_v32  ;;  %v4475_v29 = vpop.f32.mrf.mxu2  ;;  %v5258_v8 = vrot.slane %v5256_v45, 2 }
 0x589   : > { %v5262_v14 = vor.u32 %v5261_v35, %v5258_v8  ;;  %v4955_v8 = vrot.slane %v11761_v36, 2 }
 0x58a   : > { %v4709_v11 = vpop.f32.mrf.mxu3 }
 0x58b   : > { %5772 = vmatmul.bf16.vlgmr.msra.gmra.mxu3 %v5657_v15  ;;  %v11770_v39 = vadd.f32 %v4709_v11, %v4471_v55  ;;  %6186 = vmatmul.bf16.gmra.mxu0 %v8816_v3  ;;  %v5263_v22 = vsel %vm1651_vm3, %v5253_v40, %v5262_v14  ;;  %v5659_v40 = vsel %vm2004_vm4, %v5656_v5, %v5658_v38  ;;  %v11795_v3 = vld [vmem:[#allocation2 + $0x30] sm:$0xff] }
 0x58c   : > { %v5274_v35 = vshrl.u32 %v11795_v3, 16 }
 0x58d   : > { %5067 = vmatmul.bf16.vlgmr.msrb.gmra.mxu1 %v4952_v28 }
 0x58e   : > { %v4295_v47 = vpop.f32.mrf.mxu1  ;;  %v5276_v43 = vrot.slane %v5274_v35, 2 }
 0x58f   : > { %v4473_v25 = vadd.f32 %v4472_v48, %v4295_v47  ;;  %v4477_v52 = vpop.f32.mrf.mxu2  ;;  %v5265_v48 = vshrl.u32 %v11779_v41, 16  ;;  %v5277_v47 = vshll.u32 %v11795_v3, 16 }
 0x591   : > { %v5267_v32 = vrot.slane %v5265_v48, 2 }
 0x592   : > { %v4711_v20 = vpop.f32.mrf.mxu3 }
 0x593   : > { %v11776_v24 = vadd.f32 %v4711_v20, %v4473_v25  ;;  %v5271_v45 = vor.u32 %v5270_v44, %v5267_v32  ;;  %v11801_v25 = vpop.f32.mrf.mxu0 }
 0x594   : > { %5503 = vmatmul.bf16.gmra.mxu2 %v5263_v22  ;;  %13136 = vst [vmem:[#allocation83_spill] sm:$0xff] %v11801_v25  ;;  %v4956_v22 = vsel %vm1349_vm2, %v4953_v16, %v4955_v8 }
 0x595   : > { %v5272_v5 = vsel %vm1651_vm3, %v5262_v14, %v5271_v45 }
 0x596   : > { %v4298_v54 = vpop.f32.mrf.mxu1 }
 0x597   : > { %v4476_v12 = vadd.f32 %v4475_v29, %v4298_v54  ;;  %v4480_v18 = vpop.f32.mrf.mxu2  ;;  %v5279_v54 = vrot.slane %v5277_v47, 3  ;;  %v8860_v47 = vld [vmem:[%s12557_s3 + $0x1e8] sm:$0xff] }
 0x598   : > { %6682 = vmatpush.bf16.msra.mxu1 %v8860_v47 }
 0x599   : > { %v5280_v48 = vor.u32 %v5279_v54, %v5276_v43 }
 0x59a   : > { %v4714_v26 = vpop.f32.mrf.mxu3 }
 0x59b   : > { %5777 = vmatmul.bf16.gmra.mxu3 %v5659_v40  ;;  %v11789_v30 = vadd.f32 %v4714_v26, %v4476_v12  ;;  %6191 = vmatmul.bf16.gmra.mxu0 %v8817_v63  ;;  %v11807_v40 = vpop.f32.mrf.mxu0  ;;  %v11812_v26 = vld [vmem:[#allocation2 + $0x38] sm:$0xff] }
 0x59c   : > { %13137 = vst [vmem:[#allocation4_spill] sm:$0xff] %v11807_v40 }
 0x59d   : > { %5072 = vmatmul.bf16.gmra.mxu1 %v4954_v19  ;;  %v5662_v19 = vrot.slane %v11779_v41, 3 }
 0x59e   : > { %v4300_v55 = vpop.f32.mrf.mxu1 }
 0x59f   : > { %v4478_v29 = vadd.f32 %v4477_v52, %v4300_v55  ;;  %v4482_v58 = vpop.f32.mrf.mxu2  ;;  %v5661_v52 = vsel %vm2004_vm4, %v5658_v38, %v5660_v21  ;;  %v5281_v38 = vsel %vm1651_vm3, %v5271_v45, %v5280_v48  ;;  %v4957_v55 = vrot.slane %v11779_v41, 2 }
 0x5a0   : > { %v5663_v45 = vsel %vm2004_vm4, %v5660_v21, %v5662_v19 }
 0x5a2   : > { %v4716_v56 = vpop.f32.mrf.mxu3 }
 0x5a3   : > { %v11792_v15 = vadd.f32 %v4716_v56, %v4478_v29  ;;  %v5283_v29 = vshrl.u32 %v11812_v26, 16  ;;  %v8868_v56 = vld [vmem:[%s12557_s3 + $0x228] sm:$0xff] }
 0x5a4   : > { %5508 = vmatmul.bf16.gmra.mxu2 %v5272_v5  ;;  %v8819_v5 = vld [vmem:[#allocation2 + $0x6c] sm:$0xff] }
 0x5a5   : > { %6961 = vmatpush.bf16.msra.mxu2 %v8868_v56  ;;  %v5285_v41 = vrot.slane %v5283_v29, 2  ;;  %v4959_v29 = vrot.slane %v11795_v3, 2 }
 0x5a6   : > { %v4303_v11 = vpop.f32.mrf.mxu1 }
 0x5a7   : > { %v4481_v28 = vadd.f32 %v4480_v18, %v4303_v11  ;;  %v4485_v33 = vpop.f32.mrf.mxu2 }
 0x5aa   : > { %v4719_v14 = vpop.f32.mrf.mxu3 }
 0x5ab   : > { %5782 = vmatmul.bf16.gmra.mxu3 %v5661_v52  ;;  %v11804_v20 = vadd.f32 %v4719_v14, %v4481_v28  ;;  %6196 = vmatmul.bf16.gmra.mxu0 %v8818_v0  ;;  %v11828_v52 = vpop.f32.mrf.mxu0 }
 0x5ac   : > { %13138 = vst [vmem:[#allocation6_spill] sm:$0xff] %v11828_v52 }
 0x5ad   : > { %5077 = vmatmul.bf16.gmra.mxu1 %v4956_v22 }
 0x5ae   : > { %v4305_v36 = vpop.f32.mrf.mxu1 }
 0x5af   : > { %v4483_v12 = vadd.f32 %v4482_v58, %v4305_v36  ;;  %v4487_v18 = vpop.f32.mrf.mxu2  ;;  %v5286_v58 = vshll.u32 %v11812_v26, 16 }
 0x5b1   : > { %v5288_v35 = vrot.slane %v5286_v58, 3 }
 0x5b2   : > { %v4721_v17 = vpop.f32.mrf.mxu3 }
 0x5b3   : > { %v11809_v63 = vadd.f32 %v4721_v17, %v4483_v12  ;;  %v5289_v22 = vor.u32 %v5288_v35, %v5285_v41  ;;  %v5664_v12 = vrot.slane %v11795_v3, 3 }
 0x5b4   : > { %5513 = vmatmul.bf16.gmra.mxu2 %v5281_v38  ;;  %v11836_v38 = vpop.f32.mrf.mxu0 }
 0x5b5   : > { %v5290_v36 = vsel %vm1651_vm3, %v5280_v48, %v5289_v22  ;;  %13139 = vst [vmem:[#allocation5_spill] sm:$0xff] %v11836_v38  ;;  %v5665_v56 = vsel %vm2004_vm4, %v5662_v19, %v5664_v12 }
 0x5b6   : > { %v4308_v16 = vpop.f32.mrf.mxu1 }
 0x5b7   : > { %v4486_v32 = vadd.f32 %v4485_v33, %v4308_v16  ;;  %v4490_v44 = vpop.f32.mrf.mxu2  ;;  %v4958_v33 = vsel %vm1349_vm2, %v4955_v8, %v4957_v55  ;;  %v11833_v8 = vld [vmem:[#allocation2 + $0x40] sm:$0xff] }
 0x5b8   : > { %v5295_v58 = vshll.u32 %v11833_v8, 16 }
 0x5ba   : > { %v4724_v11 = vpop.f32.mrf.mxu3  ;;  %v5297_v41 = vrot.slane %v5295_v58, 3  ;;  %v4961_v58 = vrot.slane %v11812_v26, 2 }
 0x5bb   : > { %5787 = vmatmul.bf16.gmra.mxu3 %v5663_v45  ;;  %v11822_v28 = vadd.f32 %v4724_v11, %v4486_v32  ;;  %6201 = vmatmul.bf16.gmra.mxu0 %v8819_v5  ;;  %v8820_v45 = vld [vmem:[#allocation2 + $0x74] sm:$0xff]  ;;  %v4960_v11 = vsel %vm1349_vm2, %v4957_v55, %v4959_v29 }
 0x5bd   : > { %5082 = vmatmul.bf16.gmra.mxu1 %v4958_v33 }
 0x5be   : > { %v4310_v0 = vpop.f32.mrf.mxu1 }
 0x5bf   : > { %v4488_v21 = vadd.f32 %v4487_v18, %v4310_v0  ;;  %v4492_v14 = vpop.f32.mrf.mxu2  ;;  %v5292_v18 = vshrl.u32 %v11833_v8, 16  ;;  %v11845_v0 = vpop.f32.mrf.mxu0 }
 0x5c0   : > { %13140 = vst [vmem:[#allocation84_spill] sm:$0xff] %v11845_v0 }
 0x5c1   : > { %v5294_v33 = vrot.slane %v5292_v18, 2 }
 0x5c2   : > { %v4726_v43 = vpop.f32.mrf.mxu3 }
 0x5c3   : > { %v11830_v54 = vadd.f32 %v4726_v43, %v4488_v21  ;;  %v5298_v47 = vor.u32 %v5297_v41, %v5294_v33  ;;  %v4962_v41 = vsel %vm1349_vm2, %v4959_v29, %v4961_v58 }
 0x5c4   : > { %5518 = vmatmul.bf16.gmra.mxu2 %v5290_v36  ;;  %v11850_v36 = vld [vmem:[#allocation2 + $0x48] sm:$0xff] }
 0x5c5   : > { %v5299_v19 = vsel %vm1651_vm3, %v5289_v22, %v5298_v47 }
 0x5c6   : > { %v4313_v17 = vpop.f32.mrf.mxu1 }
 0x5c7   : > { %v4491_v16 = vadd.f32 %v4490_v44, %v4313_v17  ;;  %v4495_v32 = vpop.f32.mrf.mxu2  ;;  %v5666_v17 = vrot.slane %v11812_v26, 3  ;;  %v11857_v22 = vpop.f32.mrf.mxu0 }
 0x5c8   : > { %13141 = vst [vmem:[#allocation85_spill] sm:$0xff] %v11857_v22 }
 0x5ca   : > { %v4729_v48 = vpop.f32.mrf.mxu3 }
 0x5cb   : > { %5792 = vmatmul.bf16.gmra.mxu3 %v5665_v56  ;;  %v11842_v5 = vadd.f32 %v4729_v48, %v4491_v16  ;;  %6206 = vmatmul.bf16.gmra.mxu0 %v8820_v45  ;;  %v5304_v56 = vshll.u32 %v11850_v36, 16  ;;  %v5667_v45 = vsel %vm2004_vm4, %v5664_v12, %v5666_v17  ;;  %v8821_v48 = vld [vmem:[#allocation2 + $0x7c] sm:$0xff] }
 0x5cc   : > { %v8867_v12 = vld [vmem:[%s12557_s3 + $0x220] sm:$0xff] }
 0x5cd   : > { %5087 = vmatmul.bf16.gmra.mxu1 %v4960_v11  ;;  %6962 = vmatpush.bf16.msra.mxu2 %v8867_v12 }
 0x5ce   : > { %v4315_v44 = vpop.f32.mrf.mxu1 }
 0x5cf   : > { %v4493_v35 = vadd.f32 %v4492_v14, %v4315_v44  ;;  %v4497_v3 = vpop.f32.mrf.mxu2  ;;  %v5301_v14 = vshrl.u32 %v11850_v36, 16  ;;  %v5306_v44 = vrot.slane %v5304_v56, 3  ;;  %v5668_v56 = vrot.slane %v11833_v8, 3 }
 0x5d2   : > { %v4731_v21 = vpop.f32.mrf.mxu3 }
 0x5d3   : > { %v11847_v43 = vadd.f32 %v4731_v21, %v4493_v35 }
 0x5d4   : > { %5523 = vmatmul.bf16.gmra.mxu2 %v5299_v19 }
 0x5d6   : > { %v4318_v55 = vpop.f32.mrf.mxu1 }
 0x5d7   : > { %v4496_v16 = vadd.f32 %v4495_v32, %v4318_v55  ;;  %v4500_v18 = vpop.f32.mrf.mxu2  ;;  %v5303_v32 = vrot.slane %v5301_v14, 2  ;;  %v11871_v14 = vld [vmem:[#allocation2 + $0x50] sm:$0xff] }
 0x5d9   : > { %v5307_v19 = vor.u32 %v5306_v44, %v5303_v32  ;;  %v4963_v32 = vrot.slane %v11833_v8, 2  ;;  %v5310_v44 = vshrl.u32 %v11871_v14, 16 }
 0x5da   : > { %v4734_v11 = vpop.f32.mrf.mxu3 }
 0x5db   : > { %5797 = vmatmul.bf16.gmra.mxu3 %v5667_v45  ;;  %v11859_v33 = vadd.f32 %v4734_v11, %v4496_v16  ;;  %6211 = vmatmul.bf16.gmra.mxu0 %v8821_v48  ;;  %v8859_v16 = vld [vmem:[%s12557_s3 + $0x1e0] sm:$0xff]  ;;  %v5308_v29 = vsel %vm1651_vm3, %v5298_v47, %v5307_v19 }
 0x5dc   : > { %6683 = vmatpush.bf16.msra.mxu1 %v8859_v16  ;;  %v8822_v47 = vld [vmem:[#allocation2 + $0x84] sm:$0xff]  ;;  %v4964_v16 = vsel %vm1349_vm2, %v4961_v58, %v4963_v32 }
 0x5dd   : > { %5092 = vmatmul.bf16.gmra.mxu1 %v4962_v41 }
 0x5de   : > { %v4320_v26 = vpop.f32.mrf.mxu1 }
 0x5df   : > { %v4498_v35 = vadd.f32 %v4497_v3, %v4320_v26  ;;  %v4502_v21 = vpop.f32.mrf.mxu2  ;;  %v11873_v3 = vpop.f32.mrf.mxu0  ;;  %v5313_v26 = vshll.u32 %v11871_v14, 16 }
 0x5e0   : > { %13142 = vst [vmem:[#allocation7_spill] sm:$0xff] %v11873_v3 }
 0x5e1   : > { %v5315_v3 = vrot.slane %v5313_v26, 3 }
 0x5e2   : > { %v4736_v55 = vpop.f32.mrf.mxu3 }
 0x5e3   : > { %v11868_v45 = vadd.f32 %v4736_v55, %v4498_v35  ;;  %v5669_v35 = vsel %vm2004_vm4, %v5666_v17, %v5668_v56 }
 0x5e4   : > { %5528 = vmatmul.bf16.gmra.mxu2 %v5308_v29  ;;  %v5312_v29 = vrot.slane %v5310_v44, 2  ;;  %v4965_v44 = vrot.slane %v11850_v36, 2 }
 0x5e6   : > { %v4323_v48 = vpop.f32.mrf.mxu1  ;;  %v5316_v0 = vor.u32 %v5315_v3, %v5312_v29 }
 0x5e7   : > { %v4501_v11 = vadd.f32 %v4500_v18, %v4323_v48  ;;  %v4505_v41 = vpop.f32.mrf.mxu2  ;;  %v11883_v48 = vpop.f32.mrf.mxu0 }
 0x5e8   : > { %13143 = vst [vmem:[#allocation9_spill] sm:$0xff] %v11883_v48  ;;  %v5317_v17 = vsel %vm1651_vm3, %v5307_v19, %v5316_v0  ;;  %v4966_v19 = vsel %vm1349_vm2, %v4963_v32, %v4965_v44  ;;  %v5672_v32 = vrot.slane %v11871_v14, 3 }
 0x5ea   : > { %v4739_v12 = vpop.f32.mrf.mxu3 }
 0x5eb   : > { %5802 = vmatmul.bf16.gmra.mxu3 %v5669_v35  ;;  %v11880_v55 = vadd.f32 %v4739_v12, %v4501_v11  ;;  %6216 = vmatmul.bf16.gmra.mxu0 %v8822_v47  ;;  %v11888_v35 = vld [vmem:[#allocation2 + $0x58] sm:$0xff]  ;;  %v5670_v11 = vrot.slane %v11850_v36, 3  ;;  %v8823_v12 = vld [vmem:[#allocation2 + $0x8c] sm:$0xff] }
 0x5ec   : > { %v5319_v26 = vshrl.u32 %v11888_v35, 16  ;;  %v5322_v47 = vshll.u32 %v11888_v35, 16 }
 0x5ed   : > { %5097 = vmatmul.bf16.gmra.mxu1 %v4964_v16 }
 0x5ee   : > { %v4325_v18 = vpop.f32.mrf.mxu1  ;;  %v5321_v29 = vrot.slane %v5319_v26, 2 }
 0x5ef   : > { %v4503_v8 = vadd.f32 %v4502_v21, %v4325_v18  ;;  %v4507_v22 = vpop.f32.mrf.mxu2  ;;  %v11894_v21 = vpop.f32.mrf.mxu0  ;;  %v5324_v18 = vrot.slane %v5322_v47, 3 }
 0x5f0   : > { %13145 = vst [vmem:[#allocation87_spill] sm:$0xff] %v11894_v21 }
 0x5f1   : > { %v5325_v48 = vor.u32 %v5324_v18, %v5321_v29 }
 0x5f2   : > { %v4741_v38 = vpop.f32.mrf.mxu3 }
 0x5f3   : > { %v11885_v52 = vadd.f32 %v4741_v38, %v4503_v8  ;;  %v5671_v38 = vsel %vm2004_vm4, %v5668_v56, %v5670_v11  ;;  %v5326_v56 = vsel %vm1651_vm3, %v5316_v0, %v5325_v48 }
 0x5f4   : > { %5533 = vmatmul.bf16.gmra.mxu2 %v5317_v17 }
 0x5f5   : > { %13144 = vst [vmem:[#allocation8_spill] sm:$0xff] %v11885_v52  ;;  %v11903_v52 = vld [vmem:[#allocation2 + $0x60] sm:$0xff] }
 0x5f7   : > { %v5494_v58 = vpop.f32.mrf.mxu2  ;;  %v11900_v21 = vpop.f32.mrf.mxu0 }
 0x5f8   : > { %13146 = vst [vmem:[#allocation88_spill] sm:$0xff] %v11900_v21 }
 0x5fa   : > { %v4328_v3 = vpop.f32.mrf.mxu1 }
 0x5fb   : > { %v4506_v16 = vadd.f32 %v4505_v41, %v4328_v3  ;;  %5807 = vmatmul.bf16.gmra.mxu3 %v5671_v38  ;;  %6221 = vmatmul.bf16.gmra.mxu0 %v8823_v12  ;;  %v4967_v3 = vrot.slane %v11871_v14, 2  ;;  %v5328_v38 = vshrl.u32 %v11903_v52, 16  ;;  %v5331_v12 = vshll.u32 %v11903_v52, 16 }
 0x5fd   : > { %5102 = vmatmul.bf16.gmra.mxu1 %v4966_v19  ;;  %v5330_v14 = vrot.slane %v5328_v38, 2  ;;  %v5333_v29 = vrot.slane %v5331_v12, 3  ;;  %v11926_v38 = vld [vmem:[#allocation2 + $0x68] sm:$0xff] }
 0x5fe   : > { %v4744_v8 = vpop.f32.mrf.mxu3 }
 0x5ff   : > { %v11898_v36 = vadd.f32 %v4744_v8, %v4506_v16  ;;  %v5496_v17 = vpop.f32.mrf.mxu2  ;;  %v8824_v16 = vld [vmem:[#allocation2 + $0x94] sm:$0xff] }
 0x600   : > { %v8858_v8 = vld [vmem:[%s12557_s3 + $0x1d8] sm:$0xff] }
 0x601   : > { %6684 = vmatpush.bf16.msra.mxu1 %v8858_v8  ;;  %v4969_v8 = vrot.slane %v11888_v35, 2 }
 0x602   : > { %v4330_v40 = vpop.f32.mrf.mxu1 }
 0x603   : > { %v4508_v25 = vadd.f32 %v4507_v22, %v4330_v40  ;;  %v8866_v40 = vld [vmem:[%s12557_s3 + $0x218] sm:$0xff]  ;;  %v5673_v22 = vsel %vm2004_vm4, %v5670_v11, %v5672_v32 }
 0x604   : > { %5538 = vmatmul.bf16.gmra.mxu2 %v5326_v56  ;;  %v11920_v56 = vpop.f32.mrf.mxu0 }
 0x605   : > { %6963 = vmatpush.bf16.msra.mxu2 %v8866_v40  ;;  %13147 = vst [vmem:[#allocation10_spill] sm:$0xff] %v11920_v56 }
 0x606   : > { %v4746_v41 = vpop.f32.mrf.mxu3 }
 0x607   : > { %v11906_v26 = vadd.f32 %v4746_v41, %v4508_v25  ;;  %v5499_v47 = vpop.f32.mrf.mxu2  ;;  %v4968_v25 = vsel %vm1349_vm2, %v4965_v44, %v4967_v3 }
 0x60a   : > { %v5068_v0 = vpop.f32.mrf.mxu1 }
 0x60b   : > { %v5168_v19 = vadd.f32 %v5068_v0, %v11423_v59  ;;  %5812 = vmatmul.bf16.gmra.mxu3 %v5673_v22  ;;  %6226 = vmatmul.bf16.gmra.mxu0 %v8824_v16  ;;  %v5334_v0 = vor.u32 %v5333_v29, %v5330_v14  ;;  %v5674_v16 = vrot.slane %v11888_v35, 3  ;;  %v5337_v14 = vshrl.u32 %v11926_v38, 16 }
 0x60d   : > { %5107 = vmatmul.bf16.gmra.mxu1 %v4968_v25  ;;  %v5594_v18 = vadd.f32 %v5494_v58, %v5168_v19  ;;  %v5335_v44 = vsel %vm1651_vm3, %v5325_v48, %v5334_v0  ;;  %v11931_v25 = vpop.f32.mrf.mxu0  ;;  %v5675_v48 = vsel %vm2004_vm4, %v5672_v32, %v5674_v16 }
 0x60e   : > { %v5773_v41 = vpop.f32.mrf.mxu3  ;;  %13149 = vst [vmem:[#allocation12_spill] sm:$0xff] %v11931_v25 }
 0x60f   : > { %v11922_v11 = vadd.f32 %v5773_v41, %v5594_v18  ;;  %v5501_v59 = vpop.f32.mrf.mxu2  ;;  %v8825_v41 = vld [vmem:[#allocation2 + $0x9c] sm:$0xff] }
 0x612   : > { %v5070_v40 = vpop.f32.mrf.mxu1 }
 0x613   : > { %v5169_v22 = vadd.f32 %v5070_v40, %v11448_v62  ;;  %v5340_v62 = vshll.u32 %v11926_v38, 16  ;;  %v4970_v40 = vsel %vm1349_vm2, %v4967_v3, %v4969_v8 }
 0x614   : > { %5543 = vmatmul.bf16.gmra.mxu2 %v5335_v44 }
 0x615   : > { %v5595_v58 = vadd.f32 %v5496_v17, %v5169_v22  ;;  %v5339_v22 = vrot.slane %v5337_v14, 2  ;;  %v5342_v44 = vrot.slane %v5340_v62, 3  ;;  %v11941_v21 = vpop.f32.mrf.mxu0  ;;  %v5676_v62 = vrot.slane %v11903_v52, 3 }
 0x616   : > { %v5775_v12 = vpop.f32.mrf.mxu3  ;;  %13150 = vst [vmem:[#allocation90_spill] sm:$0xff] %v11941_v21 }
 0x617   : > { %v11929_v19 = vadd.f32 %v5775_v12, %v5595_v58  ;;  %v5504_v18 = vpop.f32.mrf.mxu2  ;;  %v5343_v56 = vor.u32 %v5342_v44, %v5339_v22 }
 0x619   : > { %13148 = vst [vmem:[#allocation13_spill] sm:$0xff] %v11929_v19 }
 0x61a   : > { %v5073_v29 = vpop.f32.mrf.mxu1 }
 0x61b   : > { %v5170_v17 = vadd.f32 %v5073_v29, %v11481_v10  ;;  %5817 = vmatmul.bf16.gmra.mxu3 %v5675_v48  ;;  %6231 = vmatmul.bf16.gmra.mxu0 %v8825_v41  ;;  %v5344_v10 = vsel %vm1651_vm3, %v5334_v0, %v5343_v56  ;;  %v11945_v29 = vld [vmem:[#allocation2 + $0x70] sm:$0xff]  ;;  %v4971_v41 = vrot.slane %v11903_v52, 2  ;;  %v8826_v0 = vld [vmem:[#allocation2 + $0xa4] sm:$0xff] }
 0x61d   : > { %5112 = vmatmul.bf16.gmra.mxu1 %v4970_v40  ;;  %v5596_v58 = vadd.f32 %v5499_v47, %v5170_v17  ;;  %v5346_v17 = vshrl.u32 %v11945_v29, 16  ;;  %v5349_v40 = vshll.u32 %v11945_v29, 16  ;;  %v4972_v44 = vsel %vm1349_vm2, %v4969_v8, %v4971_v41  ;;  %v8857_v8 = vld [vmem:[%s12557_s3 + $0x1d0] sm:$0xff] }
 0x61e   : > { %v5778_v12 = vpop.f32.mrf.mxu3  ;;  %6685 = vmatpush.bf16.msra.mxu1 %v8857_v8 }
 0x61f   : > { %v11939_v35 = vadd.f32 %v5778_v12, %v5596_v58  ;;  %v5506_v25 = vpop.f32.mrf.mxu2  ;;  %v5348_v58 = vrot.slane %v5346_v17, 2  ;;  %v5351_v12 = vrot.slane %v5349_v40, 3 }
 0x622   : > { %v5075_v19 = vpop.f32.mrf.mxu1 }
 0x623   : > { %v5171_v32 = vadd.f32 %v5075_v19, %v11498_v51  ;;  %v5677_v51 = vsel %vm2004_vm4, %v5674_v16, %v5676_v62  ;;  %v8865_v16 = vld [vmem:[%s12557_s3 + $0x210] sm:$0xff] }
 0x624   : > { %5548 = vmatmul.bf16.gmra.mxu2 %v5344_v10 }
 0x625   : > { %v5597_v3 = vadd.f32 %v5501_v59, %v5171_v32  ;;  %v11955_v59 = vpop.f32.mrf.mxu0  ;;  %6964 = vmatpush.bf16.msra.mxu2 %v8865_v16 }
 0x626   : > { %v5780_v14 = vpop.f32.mrf.mxu3  ;;  %13151 = vst [vmem:[#allocation91_spill] sm:$0xff] %v11955_v59 }
 0x627   : > { %v11948_v47 = vadd.f32 %v5780_v14, %v5597_v3  ;;  %v5509_v48 = vpop.f32.mrf.mxu2  ;;  %v5352_v14 = vor.u32 %v5351_v12, %v5348_v58 }
 0x629   : > { %v5353_v17 = vsel %vm1651_vm3, %v5343_v56, %v5352_v14 }
 0x62a   : > { %v5078_v22 = vpop.f32.mrf.mxu1 }
 0x62b   : > { %v5172_v19 = vadd.f32 %v5078_v22, %v11525_v4  ;;  %5822 = vmatmul.bf16.gmra.mxu3 %v5677_v51  ;;  %6236 = vmatmul.bf16.gmra.mxu0 %v8826_v0  ;;  %v5678_v0 = vrot.slane %v11926_v38, 3 }
 0x62d   : > { %5117 = vmatmul.bf16.gmra.mxu1 %v4972_v44  ;;  %v5598_v52 = vadd.f32 %v5504_v18, %v5172_v19  ;;  %v11968_v18 = vld [vmem:[#allocation2 + $0x78] sm:$0xff]  ;;  %v5679_v56 = vsel %vm2004_vm4, %v5676_v62, %v5678_v0  ;;  %v11983_v62 = vld [vmem:[#allocation2 + $0x80] sm:$0xff] }
 0x62e   : > { %v5783_v32 = vpop.f32.mrf.mxu3  ;;  %v5355_v58 = vshrl.u32 %v11968_v18, 16  ;;  %v5358_v12 = vshll.u32 %v11968_v18, 16 }
 0x62f   : > { %v11958_v10 = vadd.f32 %v5783_v32, %v5598_v52  ;;  %v5511_v3 = vpop.f32.mrf.mxu2 }
 0x630   : > { %v5357_v16 = vrot.slane %v5355_v58, 2 }
 0x632   : > { %v5080_v4 = vpop.f32.mrf.mxu1 }
 0x633   : > { %v5173_v22 = vadd.f32 %v5080_v4, %v11530_v7  ;;  %v4973_v7 = vrot.slane %v11926_v38, 2  ;;  %v5360_v4 = vrot.slane %v5358_v12, 3  ;;  %v4975_v12 = vrot.slane %v11945_v29, 2 }
 0x634   : > { %5553 = vmatmul.bf16.gmra.mxu2 %v5353_v17 }
 0x635   : > { %v5599_v40 = vadd.f32 %v5506_v25, %v5173_v22  ;;  %v4974_v25 = vsel %vm1349_vm2, %v4971_v41, %v4973_v7  ;;  %v5680_v41 = vrot.slane %v11945_v29, 3 }
 0x636   : > { %v5785_v51 = vpop.f32.mrf.mxu3 }
 0x637   : > { %v11971_v19 = vadd.f32 %v5785_v51, %v5599_v40  ;;  %v5514_v44 = vpop.f32.mrf.mxu2  ;;  %v5361_v40 = vor.u32 %v5360_v4, %v5357_v16 }
 0x639   : > { %v5362_v21 = vsel %vm1651_vm3, %v5352_v14, %v5361_v40 }
 0x63a   : > { %v5083_v52 = vpop.f32.mrf.mxu1 }
 0x63b   : > { %v5174_v32 = vadd.f32 %v5083_v52, %v11540_v27  ;;  %5827 = vmatmul.bf16.gmra.mxu3 %v5679_v56  ;;  %v5364_v56 = vshrl.u32 %v11983_v62, 16 }
 0x63d   : > { %5122 = vmatmul.bf16.gmra.mxu1 %v4974_v25  ;;  %v5600_v22 = vadd.f32 %v5509_v48, %v5174_v32  ;;  %v5367_v32 = vshll.u32 %v11983_v62, 16 }
 0x63e   : > { %v5788_v8 = vpop.f32.mrf.mxu3 }
 0x63f   : > { %v11979_v17 = vadd.f32 %v5788_v8, %v5600_v22  ;;  %v5516_v38 = vpop.f32.mrf.mxu2 }
 0x642   : > { %v5085_v51 = vpop.f32.mrf.mxu1 }
 0x643   : > { %v5175_v59 = vadd.f32 %v5085_v51, %v11551_v6  ;;  %v5681_v6 = vsel %vm2004_vm4, %v5678_v0, %v5680_v41  ;;  %v11998_v0 = vld [vmem:[#allocation2 + $0x88] sm:$0xff] }
 0x644   : > { %5558 = vmatmul.bf16.gmra.mxu2 %v5362_v21  ;;  %v4976_v21 = vsel %vm1349_vm2, %v4973_v7, %v4975_v12  ;;  %v5682_v7 = vrot.slane %v11968_v18, 3 }
 0x645   : > { %v5601_v27 = vadd.f32 %v5511_v3, %v5175_v59  ;;  %v5366_v59 = vrot.slane %v5364_v56, 2  ;;  %v5369_v3 = vrot.slane %v5367_v32, 3  ;;  %v4977_v32 = vrot.slane %v11968_v18, 2 }
 0x646   : > { %v5790_v52 = vpop.f32.mrf.mxu3 }
 0x647   : > { %v11986_v58 = vadd.f32 %v5790_v52, %v5601_v27  ;;  %v5519_v48 = vpop.f32.mrf.mxu2  ;;  %v5370_v8 = vor.u32 %v5369_v3, %v5366_v59  ;;  %v4978_v59 = vsel %vm1349_vm2, %v4975_v12, %v4977_v32  ;;  %v12019_v12 = vld [vmem:[#allocation2 + $0x90] sm:$0xff] }
 0x649   : > { %v5371_v52 = vsel %vm1651_vm3, %v5361_v40, %v5370_v8 }
 0x64a   : > { %v5088_v25 = vpop.f32.mrf.mxu1 }
 0x64b   : > { %v5176_v14 = vadd.f32 %v5088_v25, %v11559_v42  ;;  %5832 = vmatmul.bf16.gmra.mxu3 %v5681_v6  ;;  %v5373_v6 = vshrl.u32 %v11998_v0, 16 }
 0x64d   : > { %5127 = vmatmul.bf16.gmra.mxu1 %v4976_v21  ;;  %v5602_v16 = vadd.f32 %v5514_v44, %v5176_v14  ;;  %v5376_v14 = vshll.u32 %v11998_v0, 16  ;;  %v5683_v21 = vsel %vm2004_vm4, %v5680_v41, %v5682_v7  ;;  %v5375_v3 = vrot.slane %v5373_v6, 2 }
 0x64e   : > { %v5793_v4 = vpop.f32.mrf.mxu3 }
 0x64f   : > { %v11994_v22 = vadd.f32 %v5793_v4, %v5602_v16  ;;  %v5521_v29 = vpop.f32.mrf.mxu2  ;;  %v5378_v16 = vrot.slane %v5376_v14, 3  ;;  %v8856_v4 = vld [vmem:[%s12557_s3 + $0x1c8] sm:$0xff]  ;;  %v5684_v14 = vrot.slane %v11983_v62, 3 }
 0x650   : > { %6686 = vmatpush.bf16.msra.mxu1 %v8856_v4 }
 0x651   : > { %v5379_v41 = vor.u32 %v5378_v16, %v5375_v3 }
 0x652   : > { %v5090_v51 = vpop.f32.mrf.mxu1 }
 0x653   : > { %v5177_v27 = vadd.f32 %v5090_v51, %v11569_v23  ;;  %v8864_v23 = vld [vmem:[%s12557_s3 + $0x208] sm:$0xff] }
 0x654   : > { %5563 = vmatmul.bf16.gmra.mxu2 %v5371_v52 }
 0x655   : > { %v5603_v42 = vadd.f32 %v5516_v38, %v5177_v27  ;;  %6965 = vmatpush.bf16.msra.mxu2 %v8864_v23 }
 0x656   : > { %v5795_v25 = vpop.f32.mrf.mxu3 }
 0x657   : > { %v12001_v56 = vadd.f32 %v5795_v25, %v5603_v42  ;;  %v5524_v44 = vpop.f32.mrf.mxu2  ;;  %v5380_v25 = vsel %vm1651_vm3, %v5370_v8, %v5379_v41 }
 0x65a   : > { %v5093_v40 = vpop.f32.mrf.mxu1 }
 0x65b   : > { %v5178_v38 = vadd.f32 %v5093_v40, %v11577_v13  ;;  %5837 = vmatmul.bf16.gmra.mxu3 %v5683_v21  ;;  %v4979_v21 = vrot.slane %v11983_v62, 2 }
 0x65d   : > { %5132 = vmatmul.bf16.gmra.mxu1 %v4978_v59  ;;  %v5604_v18 = vadd.f32 %v5519_v48, %v5178_v38  ;;  %v5382_v38 = vshrl.u32 %v12019_v12, 16  ;;  %v5385_v59 = vshll.u32 %v12019_v12, 16 }
 0x65e   : > { %v5798_v51 = vpop.f32.mrf.mxu3 }
 0x65f   : > { %v12015_v27 = vadd.f32 %v5798_v51, %v5604_v18  ;;  %v5526_v52 = vpop.f32.mrf.mxu2  ;;  %v5384_v16 = vrot.slane %v5382_v38, 2  ;;  %v5387_v18 = vrot.slane %v5385_v59, 3  ;;  %v4981_v59 = vrot.slane %v11998_v0, 2 }
 0x662   : > { %v5095_v42 = vpop.f32.mrf.mxu1 }
 0x663   : > { %v5179_v13 = vadd.f32 %v5095_v42, %v11588_v53  ;;  %v5685_v53 = vsel %vm2004_vm4, %v5682_v7, %v5684_v14  ;;  %v12034_v7 = vld [vmem:[#allocation2 + $0x98] sm:$0xff] }
 0x664   : > { %5568 = vmatmul.bf16.gmra.mxu2 %v5380_v25 }
 0x665   : > { %v5605_v6 = vadd.f32 %v5521_v29, %v5179_v13  ;;  %v4980_v29 = vsel %vm1349_vm2, %v4977_v32, %v4979_v21  ;;  %v5388_v13 = vor.u32 %v5387_v18, %v5384_v16  ;;  %v5686_v32 = vrot.slane %v11998_v0, 3 }
 0x666   : > { %v5800_v48 = vpop.f32.mrf.mxu3 }
 0x667   : > { %v12022_v23 = vadd.f32 %v5800_v48, %v5605_v6  ;;  %v5529_v40 = vpop.f32.mrf.mxu2  ;;  %v5389_v48 = vsel %vm1651_vm3, %v5379_v41, %v5388_v13 }
 0x66a   : > { %v5098_v3 = vpop.f32.mrf.mxu1 }
 0x66b   : > { %v5180_v8 = vadd.f32 %v5098_v3, %v11596_v37  ;;  %5842 = vmatmul.bf16.gmra.mxu3 %v5685_v53  ;;  %v5391_v53 = vshrl.u32 %v12034_v7, 16 }
 0x66d   : > { %5137 = vmatmul.bf16.gmra.mxu1 %v4980_v29  ;;  %v5606_v4 = vadd.f32 %v5524_v44, %v5180_v8  ;;  %v5394_v8 = vshll.u32 %v12034_v7, 16  ;;  %v5393_v16 = vrot.slane %v5391_v53, 2 }
 0x66e   : > { %v5803_v51 = vpop.f32.mrf.mxu3 }
 0x66f   : > { %v12030_v42 = vadd.f32 %v5803_v51, %v5606_v4  ;;  %v5531_v62 = vpop.f32.mrf.mxu2  ;;  %v5396_v18 = vrot.slane %v5394_v8, 3  ;;  %v5688_v8 = vrot.slane %v12019_v12, 3 }
 0x672   : > { %v5100_v25 = vpop.f32.mrf.mxu1 }
 0x673   : > { %v5181_v6 = vadd.f32 %v5100_v25, %v11601_v46  ;;  %v5687_v46 = vsel %vm2004_vm4, %v5684_v14, %v5686_v32 }
 0x674   : > { %5573 = vmatmul.bf16.gmra.mxu2 %v5389_v48  ;;  %v8863_v48 = vld [vmem:[%s12557_s3 + $0x200] sm:$0xff] }
 0x675   : > { %v5607_v37 = vadd.f32 %v5526_v52, %v5181_v6  ;;  %v4982_v52 = vsel %vm1349_vm2, %v4979_v21, %v4981_v59  ;;  %v5397_v6 = vor.u32 %v5396_v18, %v5393_v16  ;;  %6966 = vmatpush.bf16.msra.mxu2 %v8863_v48 }
 0x676   : > { %v5805_v3 = vpop.f32.mrf.mxu3 }
 0x677   : > { %v12037_v38 = vadd.f32 %v5805_v3, %v5607_v37  ;;  %v5534_v44 = vpop.f32.mrf.mxu2  ;;  %v5398_v21 = vsel %vm1651_vm3, %v5388_v13, %v5397_v6  ;;  %v5689_v13 = vsel %vm2004_vm4, %v5686_v32, %v5688_v8 }
 0x67a   : > { %v5103_v29 = vpop.f32.mrf.mxu1 }
 0x67b   : > { %v5182_v41 = vadd.f32 %v5103_v29, %v11609_v31  ;;  %5847 = vmatmul.bf16.gmra.mxu3 %v5687_v46  ;;  %v8855_v31 = vld [vmem:[%s12557_s3 + $0x1c0] sm:$0xff] }
 0x67c   : > { %6687 = vmatpush.bf16.msra.mxu1 %v8855_v31 }
 0x67d   : > { %5142 = vmatmul.bf16.gmra.mxu1 %v4982_v52  ;;  %v5608_v4 = vadd.f32 %v5529_v40, %v5182_v41  ;;  %v12055_v40 = vld [vmem:[#allocation2 + $0xa0] sm:$0xff] }
 0x67e   : > { %v5808_v51 = vpop.f32.mrf.mxu3  ;;  %v5400_v41 = vshrl.u32 %v12055_v40, 16  ;;  %v5403_v52 = vshll.u32 %v12055_v40, 16 }
 0x67f   : > { %v12045_v25 = vadd.f32 %v5808_v51, %v5608_v4  ;;  %v5536_v0 = vpop.f32.mrf.mxu2 }
 0x680   : > { %v5402_v4 = vrot.slane %v5400_v41, 2  ;;  %v5405_v51 = vrot.slane %v5403_v52, 3  ;;  %v5690_v41 = vrot.slane %v12034_v7, 3 }
 0x682   : > { %v5105_v37 = vpop.f32.mrf.mxu1 }
 0x683   : > { %v5183_v14 = vadd.f32 %v5105_v37, %v11616_v34  ;;  %v4983_v34 = vrot.slane %v12019_v12, 2  ;;  %v5208_v37 = vld [vmem:[#allocation2 + $0xa8] sm:$0x7] }
 0x684   : > { %5578 = vmatmul.bf16.gmra.mxu2 %v5398_v21  ;;  %v5406_v21 = vor.u32 %v5405_v51, %v5402_v4  ;;  %v5691_v51 = vsel %vm2004_vm4, %v5688_v8, %v5690_v41  ;;  %v6288_v8 = vld [vmem:[#allocation2 + $0x14] sm:$0xff]  }
 0x685   : > { %v5609_v3 = vadd.f32 %v5531_v62, %v5183_v14  ;;  %v4984_v62 = vsel %vm1349_vm2, %v4981_v59, %v4983_v34 }
 0x686   : > { %v5810_v53 = vpop.f32.mrf.mxu3  ;;  %v5407_v32 = vsel %vm1651_vm3, %v5397_v6, %v5406_v21 }
 0x687   : > { %v12058_v29 = vadd.f32 %v5810_v53, %v5609_v3  ;;  %v5539_v46 = vpop.f32.mrf.mxu2  ;;  %v5227_v3 = vunpack.c.l.b16 %v5208_v37 }
 0x689   : > { %13152 = vst [vmem:[#allocation14_spill] sm:$0xff] %v12058_v29 }
 0x68a   : > { %v5108_v16 = vpop.f32.mrf.mxu1 }
 0x68b   : > { %v5184_v18 = vadd.f32 %v5108_v16, %v11630_v61  ;;  %5852 = vmatmul.bf16.gmra.mxu3 %v5689_v13  ;;  %v5228_v61 = vpack.c.b16 %v5227_v3, %v5227_v3  ;;  %v4985_v13 = vrot.slane %v12034_v7, 2 }
 0x68d   : > { %5147 = vmatmul.bf16.gmra.mxu1 %v4984_v62  ;;  %v5610_v48 = vadd.f32 %v5534_v44, %v5184_v18  ;;  %v5409_v18 = vshrl.u32 %v5228_v61, 16  ;;  %v5412_v62 = vshll.u32 %v5228_v61, 16  ;;  %v4986_v6 = vsel %vm1349_vm2, %v4983_v34, %v4985_v13 }
 0x68e   : > { %v5813_v14 = vpop.f32.mrf.mxu3 }
 0x68f   : > { %v12066_v31 = vadd.f32 %v5813_v14, %v5610_v48  ;;  %v5541_v12 = vpop.f32.mrf.mxu2  ;;  %v5411_v48 = vrot.slane %v5409_v18, 2  ;;  %v9118_v18 = vld [vmem:[#allocation2 + $0x14] sm:$0xe] }
 0x692   : > { %v5110_v53 = vpop.f32.mrf.mxu1 }
 0x693   : > { %v5185_v29 = vadd.f32 %v5110_v53, %v11649_v60 }
 0x694   : > { %5583 = vmatmul.bf16.gmra.mxu2 %v5407_v32 }
 0x695   : > { %v5611_v16 = vadd.f32 %v5536_v0, %v5185_v29  ;;  %v5414_v0 = vrot.slane %v5412_v62, 3 }
 0x696   : > { %v5815_v59 = vpop.f32.mrf.mxu3 }
 0x697   : > { %v12071_v52 = vadd.f32 %v5815_v59, %v5611_v16  ;;  %v5544_v44 = vpop.f32.mrf.mxu2  ;;  %v5415_v14 = vor.u32 %v5414_v0, %v5411_v48  ;;  %v9117_v16 = vld [vmem:[#allocation2 + $0x14] sm:$0xf0]  ;;  %v4987_v59 = vrot.slane %v12055_v40, 2 }
 0x699   : > { %v5416_v53 = vsel %vm1651_vm3, %v5406_v21, %v5415_v14  ;;  %v8836_v21 = vld [vmem:[#allocation2 + $0x1c] sm:$0xff] }
 0x69a   : > { %v5113_v4 = vpop.f32.mrf.mxu1  ;;  %v6851_v48 = vrot.slane %v8836_v21, 1 }
 0x69b   : > { %v5186_v60 = vadd.f32 %v5113_v4, %v11669_v50  ;;  %5857 = vmatmul.bf16.gmra.mxu3 %v5691_v51  ;;  %v5692_v50 = vrot.slane %v12055_v40, 3  ;;  %v4829_v51 = vld [vmem:[#allocation2 + $0xa8] sm:$0x3] }
 0x69c   : > { %v4928_v0 = vunpack.c.l.b16 %v4829_v51 }
 0x69d   : > { %5152 = vmatmul.bf16.gmra.mxu1 %v4986_v6  ;;  %v12077_v29 = vadd.f32 %v5539_v46, %v5186_v60  ;;  %v5693_v62 = vsel %vm2004_vm4, %v5690_v41, %v5692_v50  ;;  %v9119_v60 = vor.u32 %v9118_v18, %v9117_v16 }
 0x69f   : > { %v5546_v37 = vpop.f32.mrf.mxu2  ;;  %v6850_v40 = vrot.slane %v9119_v60, 1  ;;  %v6451_v60 = vshll.u32 %v6288_v8, 16 }
 0x6a1   : > { %v6852_v41 = vsel %vm1042_vm1, %v6850_v40, %v6851_v48 }
 0x6a2   : > { %v5115_v3 = vpop.f32.mrf.mxu1 }
 0x6a3   : > { %v5187_v7 = vadd.f32 %v5115_v3, %v11687_v9  ;;  %v4988_v9 = vsel %vm1349_vm2, %v4985_v13, %v4987_v59  ;;  %v5694_v13 = vrot.slane %v5228_v61, 3 }
 0x6a4   : > { %5588 = vmatmul.bf16.gmra.mxu2 %v5416_v53 }
 0x6a5   : > { %v12081_v32 = vadd.f32 %v5541_v12, %v5187_v7  ;;  %v4949_v7 = vpack.c.b16 %v4928_v0, %v4928_v0 }
 0x6a7   : > { %v5549_v34 = vpop.f32.mrf.mxu2 }
 0x6aa   : > { %v5118_v46 = vpop.f32.mrf.mxu1 }
 0x6ab   : > { %v5188_v4 = vadd.f32 %v5118_v46, %v11721_v2  ;;  %5862 = vmatmul.bf16.gmra.mxu3 %v5693_v62  ;;  %v4989_v46 = vrot.slane %v4949_v7, 2  ;;  %v5695_v62 = vsel %vm2004_vm4, %v5692_v50, %v5694_v13 }
 0x6ad   : > { %5157 = vmatmul.bf16.gmra.mxu1 %v4988_v9  ;;  %v12088_v12 = vadd.f32 %v5544_v44, %v5188_v4  ;;  %v4990_v18 = vsel %vm1349_vm2, %v4987_v59, %v4989_v46  ;;  %v8837_v4 = vld [vmem:[#allocation2 + $0x24] sm:$0xff] }
 0x6ae   : > { %v6853_v51 = vrot.slane %v8837_v4, 1 }
 0x6af   : > { %v5551_v6 = vpop.f32.mrf.mxu2 }
 0x6b0   : > { %v6854_v0 = vsel %vm1042_vm1, %v6851_v48, %v6853_v51 }
 0x6b2   : > { %v5120_v14 = vpop.f32.mrf.mxu1 }
 0x6b3   : > { %v5189_v3 = vadd.f32 %v5120_v14, %v11735_v57  ;;  %v6456_v14 = vshll.u32 %v8836_v21, 16 }
 0x6b4   : > { %6967 = vmatmul.bf16.vlgmr.msra.gmra.mxu2 %v6852_v41  ;;  %v8827_v41 = vld [vmem:[#allocation2 + $0xac] sm:$0xff] }
 0x6b5   : > { %v12092_v2 = vadd.f32 %v5546_v37, %v5189_v3  ;;  %v6449_v3 = vshrl.u32 %v6288_v8, 16  ;;  %v6458_v59 = vrot.slane %v6456_v14, 1 }
 0x6b7   : > { %v5554_v53 = vpop.f32.mrf.mxu2 }
 0x6ba   : > { %v5123_v44 = vpop.f32.mrf.mxu1 }
 0x6bb   : > { %v5190_v16 = vadd.f32 %v5123_v44, %v11750_v1  ;;  %5867 = vmatmul.bf16.gmra.mxu3 %v5695_v62  ;;  %v6453_v1 = vrot.slane %v6451_v60, 1  ;;  %v8838_v44 = vld [vmem:[#allocation2 + $0x2c] sm:$0xff] }
 0x6bd   : > { %5162 = vmatmul.bf16.gmra.mxu1 %v4990_v18  ;;  %v12097_v57 = vadd.f32 %v5549_v34, %v5190_v16  ;;  %v6454_v34 = vor.u32 %v6453_v1, %v6449_v3  ;;  %v6464_v18 = vshll.u32 %v8837_v4, 16  ;;  %v8839_v3 = vld [vmem:[#allocation2 + $0x34] sm:$0xff] }
 0x6bf   : > { %v5556_v9 = vpop.f32.mrf.mxu2  ;;  %v6459_v46 = vsel %vm452_vm0, %v6454_v34, %v6458_v59 }
 0x6c2   : > { %v5125_v37 = vpop.f32.mrf.mxu1 }
 0x6c3   : > { %v5191_v61 = vadd.f32 %v5125_v37, %v11757_v49 }
 0x6c4   : > { %6972 = vmatmul.bf16.gmra.mxu2 %v6854_v0 }
 0x6c5   : > { %v12101_v40 = vadd.f32 %v5551_v6, %v5191_v61  ;;  %v6855_v6 = vrot.slane %v8838_v44, 1  ;;  %v6466_v61 = vrot.slane %v6464_v18, 1  ;;  %v8840_v18 = vld [vmem:[#allocation2 + $0x3c] sm:$0xff] }
 0x6c7   : > { %v5559_v50 = vpop.f32.mrf.mxu2  ;;  %v6856_v8 = vsel %vm1042_vm1, %v6853_v51, %v6855_v6 }
 0x6ca   : > { %v5128_v7 = vpop.f32.mrf.mxu1 }
 0x6cb   : > { %v5192_v13 = vadd.f32 %v5128_v7, %v11770_v39  ;;  %6241 = vmatmul.bf16.vlgmr.msrb.gmra.mxu3 %v8827_v41  ;;  %v6460_v39 = vshrl.u32 %v8836_v21, 16  ;;  %v6857_v7 = vrot.slane %v8839_v3, 1 }
 0x6cd   : > { %6688 = vmatmul.bf16.vlgmr.msra.gmra.mxu1 %v6459_v46  ;;  %v12105_v49 = vadd.f32 %v5554_v53, %v5192_v13  ;;  %v6462_v14 = vor.u32 %v6460_v39, %v6458_v59  ;;  %v6858_v34 = vsel %vm1042_vm1, %v6855_v6, %v6857_v7  ;;  %v6472_v13 = vshll.u32 %v8838_v44, 16 }
 0x6ce   : > { %v6468_v46 = vshrl.u32 %v8837_v4, 16 }
 0x6cf   : > { %v5561_v48 = vpop.f32.mrf.mxu2  ;;  %v6467_v53 = vsel %vm452_vm0, %v6462_v14, %v6466_v61 }
 0x6d2   : > { %v5130_v62 = vpop.f32.mrf.mxu1 }
 0x6d3   : > { %v5193_v16 = vadd.f32 %v5130_v62, %v11776_v24 }
 0x6d4   : > { %6977 = vmatmul.bf16.gmra.mxu2 %v6856_v8 }
 0x6d5   : > { %v12109_v37 = vadd.f32 %v5556_v9, %v5193_v16  ;;  %v6470_v16 = vor.u32 %v6468_v46, %v6466_v61 }
 0x6d7   : > { %v5564_v60 = vpop.f32.mrf.mxu2 }
 0x6da   : > { %v5133_v0 = vpop.f32.mrf.mxu1 }
 0x6db   : > { %v5194_v1 = vadd.f32 %v5133_v0, %v11789_v30  ;;  %v6474_v30 = vrot.slane %v6472_v13, 1  ;;  %v6859_v0 = vrot.slane %v8840_v18, 1  ;;  %v8841_v13 = vld [vmem:[#allocation2 + $0x44] sm:$0xff] }
 0x6dd   : > { %6693 = vmatmul.bf16.gmra.mxu1 %v6467_v53  ;;  %v12113_v41 = vadd.f32 %v5559_v50, %v5194_v1  ;;  %v6475_v50 = vsel %vm452_vm0, %v6470_v16, %v6474_v30  ;;  %v6860_v14 = vsel %vm1042_vm1, %v6857_v7, %v6859_v0  ;;  %v6480_v1 = vshll.u32 %v8839_v3, 16 }
 0x6de   : > { %v6476_v53 = vshrl.u32 %v8838_v44, 16 }
 0x6df   : > { %v5566_v24 = vpop.f32.mrf.mxu2 }
 0x6e2   : > { %v5135_v51 = vpop.f32.mrf.mxu1 }
 0x6e3   : > { %v5195_v9 = vadd.f32 %v5135_v51, %v11792_v15 }
 0x6e4   : > { %6982 = vmatmul.bf16.gmra.mxu2 %v6858_v34 }
 0x6e5   : > { %v12117_v21 = vadd.f32 %v5561_v48, %v5195_v9  ;;  %v6478_v9 = vor.u32 %v6476_v53, %v6474_v30 }
 0x6e7   : > { %v5569_v59 = vpop.f32.mrf.mxu2 }
 0x6ea   : > { %v5138_v62 = vpop.f32.mrf.mxu1 }
 0x6eb   : > { %v5196_v8 = vadd.f32 %v5138_v62, %v11804_v20  ;;  %v6482_v20 = vrot.slane %v6480_v1, 1  ;;  %v6861_v62 = vrot.slane %v8841_v13, 1  ;;  %v8842_v1 = vld [vmem:[#allocation2 + $0x4c] sm:$0xff] }
 0x6ed   : > { %6698 = vmatmul.bf16.gmra.mxu1 %v6475_v50  ;;  %v12121_v39 = vadd.f32 %v5564_v60, %v5196_v8  ;;  %v6483_v60 = vsel %vm452_vm0, %v6478_v9, %v6482_v20  ;;  %v6862_v16 = vsel %vm1042_vm1, %v6859_v0, %v6861_v62  ;;  %v6488_v8 = vshll.u32 %v8840_v18, 16 }
 0x6ee   : > { %v6484_v50 = vshrl.u32 %v8839_v3, 16 }
 0x6ef   : > { %v5571_v15 = vpop.f32.mrf.mxu2 }
 0x6f2   : > { %v5140_v6 = vpop.f32.mrf.mxu1 }
 0x6f3   : > { %v5197_v48 = vadd.f32 %v5140_v6, %v11809_v63 }
 0x6f4   : > { %6987 = vmatmul.bf16.gmra.mxu2 %v6860_v14 }
 0x6f5   : > { %v12125_v4 = vadd.f32 %v5566_v24, %v5197_v48  ;;  %v6486_v48 = vor.u32 %v6484_v50, %v6482_v20 }
 0x6f7   : > { %v5574_v61 = vpop.f32.mrf.mxu2 }
 0x6fa   : > { %v5143_v51 = vpop.f32.mrf.mxu1 }
 0x6fb   : > { %v5198_v34 = vadd.f32 %v5143_v51, %v11822_v28  ;;  %v6490_v28 = vrot.slane %v6488_v8, 1  ;;  %v6863_v51 = vrot.slane %v8842_v1, 1  ;;  %v8843_v8 = vld [vmem:[#allocation2 + $0x54] sm:$0xff] }
 0x6fd   : > { %6703 = vmatmul.bf16.gmra.mxu1 %v6483_v60  ;;  %v12129_v46 = vadd.f32 %v5569_v59, %v5198_v34  ;;  %v6491_v59 = vsel %vm452_vm0, %v6486_v48, %v6490_v28  ;;  %v6864_v9 = vsel %vm1042_vm1, %v6861_v62, %v6863_v51  ;;  %v6496_v34 = vshll.u32 %v8841_v13, 16 }
 0x6fe   : > { %v6492_v60 = vshrl.u32 %v8840_v18, 16 }
 0x6ff   : > { %v5576_v63 = vpop.f32.mrf.mxu2 }
 0x702   : > { %v5145_v7 = vpop.f32.mrf.mxu1 }
 0x703   : > { %v5199_v24 = vadd.f32 %v5145_v7, %v11830_v54 }
 0x704   : > { %6992 = vmatmul.bf16.gmra.mxu2 %v6862_v16 }
 0x705   : > { %v12133_v44 = vadd.f32 %v5571_v15, %v5199_v24  ;;  %v6494_v24 = vor.u32 %v6492_v60, %v6490_v28 }
 0x707   : > { %v5579_v30 = vpop.f32.mrf.mxu2 }
 0x70a   : > { %v5148_v6 = vpop.f32.mrf.mxu1 }
 0x70b   : > { %v5200_v14 = vadd.f32 %v5148_v6, %v11842_v5  ;;  %v6498_v5 = vrot.slane %v6496_v34, 1  ;;  %v6865_v6 = vrot.slane %v8843_v8, 1  ;;  %v12153_v34 = vld [vmem:[#allocation2 + $0x5c] sm:$0xff] }
 0x70d   : > { %6708 = vmatmul.bf16.gmra.mxu1 %v6491_v59  ;;  %v12137_v53 = vadd.f32 %v5574_v61, %v5200_v14  ;;  %v6499_v61 = vsel %vm452_vm0, %v6494_v24, %v6498_v5  ;;  %v6866_v48 = vsel %vm1042_vm1, %v6863_v51, %v6865_v6  ;;  %v6504_v14 = vshll.u32 %v8842_v1, 16 }
 0x70e   : > { %v6500_v59 = vshrl.u32 %v8841_v13, 16  ;;  %v6867_v51 = vrot.slane %v12153_v34, 1 }
 0x70f   : > { %v5581_v54 = vpop.f32.mrf.mxu2 }
 0x710   : > { %v6868_v13 = vsel %vm1042_vm1, %v6865_v6, %v6867_v51 }
 0x712   : > { %v5150_v0 = vpop.f32.mrf.mxu1 }
 0x713   : > { %v5201_v15 = vadd.f32 %v5150_v0, %v11847_v43 }
 0x714   : > { %6997 = vmatmul.bf16.gmra.mxu2 %v6864_v9 }
 0x715   : > { %v12141_v3 = vadd.f32 %v5576_v63, %v5201_v15  ;;  %v6502_v15 = vor.u32 %v6500_v59, %v6498_v5  ;;  %v6508_v5 = vshrl.u32 %v8842_v1, 16  ;;  %v12164_v59 = vld [vmem:[#allocation2 + $0x64] sm:$0xff] }
 0x717   : > { %v5584_v20 = vpop.f32.mrf.mxu2 }
 0x71a   : > { %v5153_v7 = vpop.f32.mrf.mxu1 }
 0x71b   : > { %v5202_v16 = vadd.f32 %v5153_v7, %v11859_v33  ;;  %v6506_v33 = vrot.slane %v6504_v14, 1  ;;  %v13153_v7 = vld [vmem:[#allocation8_spill] sm:$0xff] }
 0x71d   : > { %6713 = vmatmul.bf16.gmra.mxu1 %v6499_v61  ;;  %v12145_v50 = vadd.f32 %v5579_v30, %v5202_v16  ;;  %v6507_v30 = vsel %vm452_vm0, %v6502_v15, %v6506_v33  ;;  %v6512_v16 = vshll.u32 %v8843_v8, 16 }
 0x71f   : > { %v5586_v43 = vpop.f32.mrf.mxu2 }
 0x722   : > { %v5155_v62 = vpop.f32.mrf.mxu1 }
 0x723   : > { %v5203_v63 = vadd.f32 %v5155_v62, %v11868_v45  ;;  %v6514_v62 = vrot.slane %v6512_v16, 1 }
 0x724   : > { %7002 = vmatmul.bf16.gmra.mxu2 %v6866_v48  ;;  %v6510_v48 = vor.u32 %v6508_v5, %v6506_v33  ;;  %v6520_v33 = vshll.u32 %v12153_v34, 16  ;;  %v13155_v5 = vld [vmem:[#allocation83_spill] sm:$0xff] }
 0x725   : > { %v12149_v18 = vadd.f32 %v5581_v54, %v5203_v63 }
 0x726   : > { %v6515_v14 = vsel %vm452_vm0, %v6510_v48, %v6514_v62  ;;  %v6522_v16 = vrot.slane %v6520_v33, 1 }
 0x727   : > { %v5589_v28 = vpop.f32.mrf.mxu2 }
 0x72a   : > { %v5158_v0 = vpop.f32.mrf.mxu1 }
 0x72b   : > { %v5204_v9 = vadd.f32 %v5158_v0, %v11880_v55 }
 0x72d   : > { %6718 = vmatmul.bf16.gmra.mxu1 %v6507_v30  ;;  %v12155_v60 = vadd.f32 %v5584_v20, %v5204_v9 }
 0x72f   : > { %v5591_v45 = vpop.f32.mrf.mxu2 }
 0x732   : > { %v5160_v54 = vpop.f32.mrf.mxu1 }
 0x733   : > { %v5205_v24 = vadd.f32 %v5160_v54, %v13153_v7  ;;  %v9072_v7 = vld [vmem:[%s9201_s20 + $0x18] sm:$0xf] }
 0x734   : > { %7007 = vmatmul.bf16.gmra.mxu2 %v6868_v13  ;;  %v6516_v13 = vshrl.u32 %v8843_v8, 16 }
 0x735   : > { %v12160_v61 = vadd.f32 %v5586_v43, %v5205_v24  ;;  %v6869_v43 = vrot.slane %v12164_v59, 1  ;;  %v7109_v24 = vunpack.c.l.bf16 %v9072_v7 }
 0x737   : > { %v6968_v55 = vpop.f32.mrf.mxu2  ;;  %v6870_v9 = vsel %vm1042_vm1, %v6867_v51, %v6869_v43  ;;  %v7236_v51 = vrot.slane %v7109_v24, 2  ;;  %v13156_v24 = vld [vmem:[#allocation13_spill] sm:$0xff] }
 0x73a   : > { %v5163_v63 = vpop.f32.mrf.mxu1 }
 0x73b   : > { %v5206_v20 = vadd.f32 %v5163_v63, %v11898_v36  ;;  %v9071_v36 = vld [vmem:[%s9201_s20 + $0x14] sm:$0xf]  ;;  %v6247_v63 = vadd.f32 %v13155_v5, %v11922_v11  ;;  %v9073_v11 = vld [vmem:[%s9201_s20 + $0x1c] sm:$0xf] }
 0x73c   : > { %v7108_v54 = vunpack.c.l.bf16 %v9071_v36  ;;  %v7110_v33 = vunpack.c.l.bf16 %v9073_v11 }
 0x73d   : > { %6723 = vmatmul.bf16.gmra.mxu1 %v6515_v14  ;;  %v12166_v0 = vadd.f32 %v5589_v28, %v5206_v20  ;;  %v6518_v20 = vor.u32 %v6516_v13, %v6514_v62 }
 0x73e   : > { %v7235_v48 = vrot.slane %v7108_v54, 2 }
 0x73f   : > { %v6970_v6 = vpop.f32.mrf.mxu2 }
 0x742   : > { %v5165_v15 = vpop.f32.mrf.mxu1 }
 0x743   : > { %v5207_v1 = vadd.f32 %v5165_v15, %v11906_v26  ;;  %v6523_v15 = vsel %vm452_vm0, %v6518_v20, %v6522_v16  ;;  %v6528_v20 = vshll.u32 %v12164_v59, 16 }
 0x744   : > { %7012 = vmatmul.bf16.gmra.mxu2 %v6870_v9  ;;  %v7237_v9 = vsel %vm1349_vm2, %v7235_v48, %v7236_v51 }
 0x745   : > { %v12172_v30 = vadd.f32 %v5591_v45, %v5207_v1  ;;  %v12181_v45 = vld [vmem:[%s12558_s4] ss:$0 sm:$0xff]  ;;  %v12185_v1 = vld [vmem:[#allocation2 + $0x6c] sm:$0xff] }
 0x746   : > { %v6871_v54 = vrot.slane %v12185_v1, 1 }
 0x747   : > { %13154 = vst [vmem:[#allocation18_spill] sm:$0xff] %v12172_v30  ;;  %v6973_v28 = vpop.f32.mrf.mxu2 }
 0x748   : > { %v6872_v48 = vsel %vm1042_vm1, %v6869_v43, %v6871_v54 }
 0x74a   : > { %v6689_v26 = vpop.f32.mrf.mxu1 }
 0x74b   : > { %v6789_v14 = vadd.f32 %v6689_v26, %v6247_v63  ;;  %v7238_v63 = vrot.slane %v7110_v33, 2  ;;  %v6530_v33 = vrot.slane %v6528_v20, 1 }
 0x74d   : > { %v7068_v8 = vadd.f32 %v6968_v55, %v6789_v14  ;;  %6728 = vmatmul.bf16.gmra.mxu1 %v6523_v15  ;;  %v13157_v55 = vld [vmem:[#allocation4_spill] sm:$0xff]  ;;  %v7239_v15 = vsel %vm1349_vm2, %v7236_v51, %v7238_v63 }
 0x74e   : > { %v6248_v13 = vadd.f32 %v13157_v55, %v13156_v24  ;;  %v6524_v24 = vshrl.u32 %v12153_v34, 16  ;;  %v13158_v55 = vld [vmem:[#allocation6_spill] sm:$0xff]  ;;  %v9075_v34 = vld [vmem:[%s9201_s20 + $0x24] sm:$0xf] }
 0x74f   : > { %v7153_v62 = vadd.f32 %v12181_v45, %v7068_v8  ;;  %v6975_v36 = vpop.f32.mrf.mxu2  ;;  %v9074_v8 = vld [vmem:[%s9201_s20 + $0x20] sm:$0xf]  ;;  %v6249_v43 = vadd.f32 %v13158_v55, %v11939_v35  ;;  %v7112_v20 = vunpack.c.l.bf16 %v9075_v34 }
 0x750   : > { %v7111_v11 = vunpack.c.l.bf16 %v9074_v8  ;;  %v6526_v30 = vor.u32 %v6524_v24, %v6522_v16 }
 0x751   : > { %v7356_v7 = vadd.f32 %v7237_v9, %v7153_v62 }
 0x752   : > { %v6691_v5 = vpop.f32.mrf.mxu1  ;;  %v6531_v51 = vsel %vm452_vm0, %v6526_v30, %v6530_v33  ;;  %v7242_v30 = vrot.slane %v7112_v20, 2  ;;  %v13160_v20 = vld [vmem:[#allocation84_spill] sm:$0xff] }
 0x753   : > { %7396 = vst [vmem:[%s12193_s11] sm:$0xff] %v7356_v7  ;;  %v6790_v26 = vadd.f32 %v6691_v5, %v6248_v13  ;;  %v7240_v5 = vrot.slane %v7111_v11, 2  ;;  %v13159_v11 = vld [vmem:[#allocation5_spill] sm:$0xff] }
 0x754   : > { %7017 = vmatmul.bf16.gmra.mxu2 %v6872_v48 }
 0x755   : > { %v7069_v14 = vadd.f32 %v6970_v6, %v6790_v26  ;;  %v12209_v26 = vld [vmem:[#allocation2 + $0x74] sm:$0xff] }
 0x756   : > { %v6873_v8 = vrot.slane %v12209_v26, 1 }
 0x757   : > { %v7154_v9 = vadd.f32 %v12181_v45, %v7069_v14  ;;  %v6978_v62 = vpop.f32.mrf.mxu2  ;;  %v7241_v14 = vsel %vm1349_vm2, %v7238_v63, %v7240_v5  ;;  %v6536_v63 = vshll.u32 %v12185_v1, 16 }
 0x759   : > { %v7357_v7 = vadd.f32 %v7239_v15, %v7154_v9  ;;  %v6250_v9 = vadd.f32 %v13159_v11, %v11948_v47  ;;  %v6532_v47 = vshrl.u32 %v12164_v59, 16  ;;  %v9077_v59 = vld [vmem:[%s9201_s20 + $0x2c] sm:$0xf] }
 0x75a   : > { %v6694_v13 = vpop.f32.mrf.mxu1 }
 0x75b   : > { %7397 = vst [vmem:[%s12193_s11 + $0x8] sm:$0xff] %v7357_v7  ;;  %v6791_v6 = vadd.f32 %v6694_v13, %v6249_v43  ;;  %v7243_v43 = vsel %vm1349_vm2, %v7240_v5, %v7242_v30  ;;  %v9076_v13 = vld [vmem:[%s9201_s20 + $0x28] sm:$0xf]  ;;  %v6534_v11 = vor.u32 %v6532_v47, %v6530_v33 }
 0x75d   : > { %v7070_v48 = vadd.f32 %v6973_v28, %v6791_v6  ;;  %6733 = vmatmul.bf16.gmra.mxu1 %v6531_v51  ;;  %v6874_v28 = vsel %vm1042_vm1, %v6871_v54, %v6873_v8  ;;  %v7113_v6 = vunpack.c.l.bf16 %v9076_v13  ;;  %v6251_v54 = vadd.f32 %v13160_v20, %v11958_v10 }
 0x75f   : > { %v7155_v15 = vadd.f32 %v12181_v45, %v7070_v48  ;;  %v6980_v35 = vpop.f32.mrf.mxu2 }
 0x761   : > { %v7358_v16 = vadd.f32 %v7241_v14, %v7155_v15  ;;  %v6538_v14 = vrot.slane %v6536_v63, 1 }
 0x762   : > { %v6696_v24 = vpop.f32.mrf.mxu1 }
 0x763   : > { %7398 = vst [vmem:[%s12193_s11 + $0x10] sm:$0xff] %v7358_v16  ;;  %v6792_v7 = vadd.f32 %v6696_v24, %v6250_v9  ;;  %v7244_v16 = vrot.slane %v7113_v6, 2  ;;  %v6539_v5 = vsel %vm452_vm0, %v6534_v11, %v6538_v14  ;;  %v12228_v9 = vld [vmem:[#allocation2 + $0x7c] sm:$0xff] }
 0x764   : > { %7022 = vmatmul.bf16.gmra.mxu2 %v6874_v28  ;;  %v7114_v28 = vunpack.c.l.bf16 %v9077_v59 }
 0x765   : > { %v7071_v55 = vadd.f32 %v6975_v36, %v6792_v7  ;;  %v7245_v7 = vsel %vm1349_vm2, %v7242_v30, %v7244_v16  ;;  %v6544_v30 = vshll.u32 %v12209_v26, 16 }
 0x767   : > { %v7156_v51 = vadd.f32 %v12181_v45, %v7071_v55  ;;  %v6983_v48 = vpop.f32.mrf.mxu2  ;;  %v6875_v55 = vrot.slane %v12228_v9, 1 }
 0x769   : > { %v7359_v34 = vadd.f32 %v7243_v43, %v7156_v51  ;;  %v13161_v43 = vld [vmem:[#allocation85_spill] sm:$0xff]  ;;  %v7246_v51 = vrot.slane %v7114_v28, 2 }
 0x76a   : > { %v6699_v15 = vpop.f32.mrf.mxu1  ;;  %v6252_v13 = vadd.f32 %v13161_v43, %v11971_v19  ;;  %v6540_v19 = vshrl.u32 %v12185_v1, 16  ;;  %v9079_v1 = vld [vmem:[%s9201_s20 + $0x34] sm:$0xf] }
 0x76b   : > { %7399 = vst [vmem:[%s12193_s11 + $0x18] sm:$0xff] %v7359_v34  ;;  %v6793_v36 = vadd.f32 %v6699_v15, %v6251_v54  ;;  %v7247_v20 = vsel %vm1349_vm2, %v7244_v16, %v7246_v51  ;;  %v9078_v54 = vld [vmem:[%s9201_s20 + $0x30] sm:$0xf] }
 0x76c   : > { %v7115_v15 = vunpack.c.l.bf16 %v9078_v54 }
 0x76d   : > { %v7072_v24 = vadd.f32 %v6978_v62, %v6793_v36  ;;  %6738 = vmatmul.bf16.gmra.mxu1 %v6539_v5  ;;  %v6876_v62 = vsel %vm1042_vm1, %v6873_v8, %v6875_v55  ;;  %v6546_v5 = vrot.slane %v6544_v30, 1  ;;  %v13163_v30 = vld [vmem:[#allocation9_spill] sm:$0xff] }
 0x76e   : > { %v7248_v28 = vrot.slane %v7115_v15, 2 }
 0x76f   : > { %v7157_v63 = vadd.f32 %v12181_v45, %v7072_v24  ;;  %v6985_v10 = vpop.f32.mrf.mxu2 }
 0x771   : > { %v7360_v33 = vadd.f32 %v7245_v7, %v7157_v63  ;;  %v13162_v7 = vld [vmem:[#allocation7_spill] sm:$0xff]  ;;  %v6542_v63 = vor.u32 %v6540_v19, %v6538_v14 }
 0x772   : > { %v6701_v6 = vpop.f32.mrf.mxu1  ;;  %v6253_v8 = vadd.f32 %v13162_v7, %v11979_v17 }
 0x773   : > { %7400 = vst [vmem:[%s12193_s11 + $0x20] sm:$0xff] %v7360_v33  ;;  %v6794_v47 = vadd.f32 %v6701_v6, %v6252_v13  ;;  %v6547_v16 = vsel %vm452_vm0, %v6542_v63, %v6546_v5  ;;  %v12247_v33 = vld [vmem:[#allocation2 + $0x84] sm:$0xff]  ;;  %v7249_v13 = vsel %vm1349_vm2, %v7246_v51, %v7248_v28  ;;  %v7116_v6 = vunpack.c.l.bf16 %v9079_v1 }
 0x774   : > { %7027 = vmatmul.bf16.gmra.mxu2 %v6876_v62  ;;  %v6877_v62 = vrot.slane %v12247_v33, 1  ;;  %v6552_v51 = vshll.u32 %v12228_v9, 16 }
 0x775   : > { %v7073_v34 = vadd.f32 %v6980_v35, %v6794_v47  ;;  %v7250_v54 = vrot.slane %v7116_v6, 2 }
 0x776   : > { %v6554_v63 = vrot.slane %v6552_v51, 1 }
 0x777   : > { %v7158_v11 = vadd.f32 %v12181_v45, %v7073_v34  ;;  %v6988_v36 = vpop.f32.mrf.mxu2  ;;  %v6254_v34 = vadd.f32 %v13163_v30, %v11986_v58  ;;  %v7251_v19 = vsel %vm1349_vm2, %v7248_v28, %v7250_v54  ;;  %v6548_v58 = vshrl.u32 %v12209_v26, 16  ;;  %v9081_v30 = vld [vmem:[%s9201_s20 + $0x3c] sm:$0xf] }
 0x779   : > { %v7361_v24 = vadd.f32 %v7247_v20, %v7158_v11  ;;  %v6550_v1 = vor.u32 %v6548_v58, %v6546_v5 }
 0x77a   : > { %v6704_v59 = vpop.f32.mrf.mxu1 }
 0x77b   : > { %7401 = vst [vmem:[%s12193_s11 + $0x28] sm:$0xff] %v7361_v24  ;;  %v6795_v35 = vadd.f32 %v6704_v59, %v6253_v8  ;;  %v9080_v24 = vld [vmem:[%s9201_s20 + $0x38] sm:$0xf]  ;;  %v6555_v6 = vsel %vm452_vm0, %v6550_v1, %v6554_v63  ;;  %v6556_v1 = vshrl.u32 %v12228_v9, 16 }
 0x77c   : > { %v7117_v7 = vunpack.c.l.bf16 %v9080_v24 }
 0x77d   : > { %v7074_v43 = vadd.f32 %v6983_v48, %v6795_v35  ;;  %6743 = vmatmul.bf16.gmra.mxu1 %v6547_v16  ;;  %v6878_v48 = vsel %vm1042_vm1, %v6875_v55, %v6877_v62  ;;  %v12262_v35 = vpop.f32.mrf.mxu0  ;;  %v13164_v55 = vld [vmem:[#allocation87_spill] sm:$0xff] }
 0x77f   : > { %v7159_v47 = vadd.f32 %v12181_v45, %v7074_v43  ;;  %v6990_v17 = vpop.f32.mrf.mxu2  ;;  %v6255_v43 = vadd.f32 %v13164_v55, %v11994_v22 }
 0x781   : > { %v7362_v14 = vadd.f32 %v7249_v13, %v7159_v47  ;;  %v12268_v47 = vld [vmem:[#allocation2 + $0x8c] sm:$0xff] }
 0x782   : > { %v6706_v20 = vpop.f32.mrf.mxu1 }
 0x783   : > { %7402 = vst [vmem:[%s12193_s11 + $0x30] sm:$0xff] %v7362_v14  ;;  %v6796_v15 = vadd.f32 %v6706_v20, %v6254_v34  ;;  %v7118_v34 = vunpack.c.l.bf16 %v9081_v30  ;;  %v6558_v30 = vor.u32 %v6556_v1, %v6554_v63 }
 0x784   : > { %7032 = vmatmul.bf16.gmra.mxu2 %v6878_v48  ;;  %v13165_v48 = vld [vmem:[#allocation88_spill] sm:$0xff] }
 0x785   : > { %v7075_v11 = vadd.f32 %v6985_v10, %v6796_v15  ;;  %v7252_v10 = vrot.slane %v7117_v7, 2  ;;  %v6879_v15 = vrot.slane %v12268_v47, 1  ;;  %v6256_v51 = vadd.f32 %v13165_v48, %v12001_v56  ;;  %v12276_v24 = vpop.f32.mrf.mxu0  ;;  %v12284_v56 = vpop.f32.mrf.mxu3 }
 0x786   : > { %v6560_v7 = vshll.u32 %v12247_v33, 16 }
 0x787   : > { %v7160_v8 = vadd.f32 %v12181_v45, %v7075_v11  ;;  %v6993_v59 = vpop.f32.mrf.mxu2  ;;  %v7253_v26 = vsel %vm1349_vm2, %v7250_v54, %v7252_v10  ;;  %v6880_v54 = vsel %vm1042_vm1, %v6877_v62, %v6879_v15  ;;  %v13166_v62 = vld [vmem:[#allocation10_spill] sm:$0xff] }
 0x789   : > { %v7363_v16 = vadd.f32 %v7251_v19, %v7160_v8  ;;  %v7254_v19 = vrot.slane %v7118_v34, 2 }
 0x78a   : > { %v6709_v13 = vpop.f32.mrf.mxu1 }
 0x78b   : > { %7403 = vst [vmem:[%s12193_s11 + $0x38] sm:$0xff] %v7363_v16  ;;  %v6797_v28 = vadd.f32 %v6709_v13, %v6255_v43  ;;  %v7255_v58 = vsel %vm1349_vm2, %v7252_v10, %v7254_v19  ;;  %v9082_v16 = vld [vmem:[%s9201_s20 + $0x40] sm:$0xf] }
 0x78c   : > { %v7119_v55 = vunpack.c.l.bf16 %v9082_v16 }
 0x78d   : > { %v7076_v14 = vadd.f32 %v6988_v36, %v6797_v28  ;;  %6748 = vmatmul.bf16.gmra.mxu1 %v6555_v6  ;;  %v6562_v28 = vrot.slane %v6560_v7, 1  ;;  %v13167_v7 = vld [vmem:[#allocation12_spill] sm:$0xff] }
 0x78f   : > { %v7161_v20 = vadd.f32 %v12181_v45, %v7076_v14  ;;  %v6995_v22 = vpop.f32.mrf.mxu2  ;;  %v6257_v14 = vadd.f32 %v13166_v62, %v12015_v27  ;;  %v6563_v34 = vsel %vm452_vm0, %v6558_v30, %v6562_v28  ;;  %v9084_v62 = vld [vmem:[%s9201_s20 + $0x48] sm:$0xf] }
 0x791   : > { %v7364_v5 = vadd.f32 %v7253_v26, %v7161_v20  ;;  %v12291_v20 = vld [vmem:[#allocation2 + $0x94] sm:$0xff] }
 0x792   : > { %v6711_v11 = vpop.f32.mrf.mxu1  ;;  %v6881_v63 = vrot.slane %v12291_v20, 1 }
 0x793   : > { %7404 = vst [vmem:[%s12193_s11 + $0x40] sm:$0xff] %v7364_v5  ;;  %v6798_v36 = vadd.f32 %v6711_v11, %v6256_v51  ;;  %v12293_v5 = vpop.f32.mrf.mxu0  ;;  %v9083_v51 = vld [vmem:[%s9201_s20 + $0x44] sm:$0xf] }
 0x794   : > { %7037 = vmatmul.bf16.gmra.mxu2 %v6880_v54  ;;  %v7120_v11 = vunpack.c.l.bf16 %v9083_v51 }
 0x795   : > { %v7077_v8 = vadd.f32 %v6990_v17, %v6798_v36  ;;  %v7256_v17 = vrot.slane %v7119_v55, 2 }
 0x796   : > { %v7258_v55 = vrot.slane %v7120_v11, 2 }
 0x797   : > { %v7162_v43 = vadd.f32 %v12181_v45, %v7077_v8  ;;  %v6998_v13 = vpop.f32.mrf.mxu2  ;;  %v7257_v9 = vsel %vm1349_vm2, %v7254_v19, %v7256_v17  ;;  %v6258_v8 = vadd.f32 %v13167_v7, %v12022_v23  ;;  %v6882_v19 = vsel %vm1042_vm1, %v6879_v15, %v6881_v63  ;;  %v13168_v15 = vld [vmem:[#allocation90_spill] sm:$0xff]  ;;  %v12318_v7 = vld [vmem:[#allocation2 + $0x9c] sm:$0xff] }
 0x799   : > { %v7365_v6 = vadd.f32 %v7255_v58, %v7162_v43  ;;  %v12301_v58 = vpop.f32.mrf.mxu3  ;;  %v6568_v43 = vshll.u32 %v12268_v47, 16 }
 0x79a   : > { %v6714_v26 = vpop.f32.mrf.mxu1 }
 0x79b   : > { %7405 = vst [vmem:[%s12193_s11 + $0x48] sm:$0xff] %v7365_v6  ;;  %v6799_v10 = vadd.f32 %v6714_v26, %v6257_v14  ;;  %v7259_v6 = vsel %vm1349_vm2, %v7256_v17, %v7258_v55  ;;  %v7121_v14 = vunpack.c.l.bf16 %v9084_v62  ;;  %v12308_v26 = vpop.f32.mrf.mxu0 }
 0x79d   : > { %v7078_v48 = vadd.f32 %v6993_v59, %v6799_v10  ;;  %6753 = vmatmul.bf16.gmra.mxu1 %v6563_v34  ;;  %v6564_v10 = vshrl.u32 %v12247_v33, 16  ;;  %v6570_v34 = vrot.slane %v6568_v43, 1 }
 0x79f   : > { %v7163_v27 = vadd.f32 %v12181_v45, %v7078_v48  ;;  %v7000_v36 = vpop.f32.mrf.mxu2  ;;  %v6566_v11 = vor.u32 %v6564_v10, %v6562_v28  ;;  %v6883_v28 = vrot.slane %v12318_v7, 1  ;;  %v6576_v10 = vshll.u32 %v12291_v20, 16 }
 0x7a1   : > { %v7366_v54 = vadd.f32 %v7257_v9, %v7163_v27  ;;  %v6259_v9 = vadd.f32 %v13168_v15, %v12030_v42  ;;  %v12315_v27 = vpop.f32.mrf.mxu3 }
 0x7a2   : > { %v6716_v16 = vpop.f32.mrf.mxu1 }
 0x7a3   : > { %7406 = vst [vmem:[%s12193_s11 + $0x50] sm:$0xff] %v7366_v54  ;;  %v6800_v59 = vadd.f32 %v6716_v16, %v6258_v8  ;;  %v6571_v54 = vsel %vm452_vm0, %v6566_v11, %v6570_v34  ;;  %v9085_v16 = vld [vmem:[%s9201_s20 + $0x4c] sm:$0xf]  ;;  %v12324_v43 = vpop.f32.mrf.mxu0 }
 0x7a4   : > { %7042 = vmatmul.bf16.gmra.mxu2 %v6882_v19 }
 0x7a5   : > { %v7079_v1 = vadd.f32 %v6995_v22, %v6800_v59  ;;  %v7260_v22 = vrot.slane %v7121_v14, 2  ;;  %v7122_v59 = vunpack.c.l.bf16 %v9085_v16 }
 0x7a7   : > { %v7164_v23 = vadd.f32 %v12181_v45, %v7079_v1  ;;  %v7003_v30 = vpop.f32.mrf.mxu2  ;;  %v7261_v33 = vsel %vm1349_vm2, %v7258_v55, %v7260_v22  ;;  %v6884_v55 = vsel %vm1042_vm1, %v6881_v63, %v6883_v28  ;;  %v6261_v63 = vadd.f32 %v12262_v35, %v12045_v25 }
 0x7a9   : > { %v7367_v48 = vadd.f32 %v7259_v6, %v7164_v23  ;;  %v13169_v6 = vld [vmem:[#allocation91_spill] sm:$0xff]  ;;  %v7262_v23 = vrot.slane %v7122_v59, 2  ;;  %v12331_v15 = vpop.f32.mrf.mxu3 }
 0x7aa   : > { %v6719_v51 = vpop.f32.mrf.mxu1  ;;  %v6260_v62 = vadd.f32 %v13169_v6, %v12037_v38  ;;  %v12343_v6 = vld [vmem:[#allocation2 + $0xa4] sm:$0xff] }
 0x7ab   : > { %7407 = vst [vmem:[%s12193_s11 + $0x58] sm:$0xff] %v7367_v48  ;;  %v6801_v17 = vadd.f32 %v6719_v51, %v6259_v9  ;;  %v7263_v9 = vsel %vm1349_vm2, %v7260_v22, %v7262_v23  ;;  %v9086_v51 = vld [vmem:[%s9201_s20 + $0x50] sm:$0xf] }
 0x7ac   : > { %v7123_v11 = vunpack.c.l.bf16 %v9086_v51 }
 0x7ad   : > { %v7080_v8 = vadd.f32 %v6998_v13, %v6801_v17  ;;  %6758 = vmatmul.bf16.gmra.mxu1 %v6571_v54  ;;  %v6572_v54 = vshrl.u32 %v12268_v47, 16 }
 0x7ae   : > { %v7264_v16 = vrot.slane %v7123_v11, 2 }
 0x7af   : > { %v7165_v42 = vadd.f32 %v12181_v45, %v7080_v8  ;;  %v7005_v19 = vpop.f32.mrf.mxu2  ;;  %v6578_v8 = vrot.slane %v6576_v10, 1  ;;  %v6574_v59 = vor.u32 %v6572_v54, %v6570_v34 }
 0x7b0   : > { %v7265_v47 = vsel %vm1349_vm2, %v7262_v23, %v7264_v16 }
 0x7b1   : > { %v7368_v1 = vadd.f32 %v7261_v33, %v7165_v42  ;;  %v12339_v42 = vpop.f32.mrf.mxu0  ;;  %v12348_v35 = vpop.f32.mrf.mxu3 }
 0x7b2   : > { %v6721_v14 = vpop.f32.mrf.mxu1 }
 0x7b3   : > { %7408 = vst [vmem:[%s12193_s11 + $0x60] sm:$0xff] %v7368_v1  ;;  %v6802_v13 = vadd.f32 %v6721_v14, %v6260_v62  ;;  %v6579_v1 = vsel %vm452_vm0, %v6574_v59, %v6578_v8  ;;  %v9087_v14 = vld [vmem:[%s9201_s20 + $0x54] sm:$0xf] }
 0x7b4   : > { %7047 = vmatmul.bf16.gmra.mxu2 %v6884_v55  ;;  %v6885_v55 = vrot.slane %v12343_v6, 1 }
 0x7b5   : > { %v7081_v48 = vadd.f32 %v7000_v36, %v6802_v13  ;;  %v7124_v13 = vunpack.c.l.bf16 %v9087_v14 }
 0x7b6   : > { %v6886_v23 = vsel %vm1042_vm1, %v6883_v28, %v6885_v55  ;;  %v6263_v28 = vadd.f32 %v12293_v5, %v12066_v31 }
 0x7b7   : > { %v7166_v17 = vadd.f32 %v12181_v45, %v7081_v48  ;;  %v7008_v38 = vpop.f32.mrf.mxu2  ;;  %v13170_v48 = vld [vmem:[#allocation14_spill] sm:$0xff]  ;;  %v7266_v11 = vrot.slane %v7124_v13, 2 }
 0x7b9   : > { %v7369_v33 = vadd.f32 %v7263_v9, %v7166_v17  ;;  %v6262_v9 = vadd.f32 %v12276_v24, %v13170_v48  ;;  %v6584_v17 = vshll.u32 %v12318_v7, 16  ;;  %v12356_v54 = vpop.f32.mrf.mxu0  ;;  %v12364_v14 = vpop.f32.mrf.mxu3  ;;  %v12368_v48 = vld [vmem:[#allocation2 + $0xac] sm:$0xff] }
 0x7ba   : > { %v6724_v36 = vpop.f32.mrf.mxu1 }
 0x7bb   : > { %7409 = vst [vmem:[%s12193_s11 + $0x68] sm:$0xff] %v7369_v33  ;;  %v6803_v22 = vadd.f32 %v6724_v36, %v6261_v63  ;;  %v7267_v63 = vsel %vm1349_vm2, %v7264_v16, %v7266_v11  ;;  %v9088_v36 = vld [vmem:[%s9201_s20 + $0x58] sm:$0xf] }
 0x7bc   : > { %v7125_v59 = vunpack.c.l.bf16 %v9088_v36 }
 0x7bd   : > { %v7082_v62 = vadd.f32 %v7003_v30, %v6803_v22  ;;  %6763 = vmatmul.bf16.gmra.mxu1 %v6579_v1  ;;  %v6580_v1 = vshrl.u32 %v12291_v20, 16 }
 0x7bf   : > { %v7167_v25 = vadd.f32 %v12181_v45, %v7082_v62  ;;  %v7010_v34 = vpop.f32.mrf.mxu2  ;;  %v6586_v62 = vrot.slane %v6584_v17, 1 }
 0x7c1   : > { %v7370_v10 = vadd.f32 %v7265_v47, %v7167_v25  ;;  %v6582_v25 = vor.u32 %v6580_v1, %v6578_v8  ;;  %v6887_v8 = vrot.slane %v12368_v48, 1  ;;  %v5891_v1 = vadd.f32 %v12284_v56, %v12077_v29 }
 0x7c2   : > { %v6726_v51 = vpop.f32.mrf.mxu1 }
 0x7c3   : > { %7410 = vst [vmem:[%s12193_s11 + $0x70] sm:$0xff] %v7370_v10  ;;  %v6804_v30 = vadd.f32 %v6726_v51, %v6262_v9  ;;  %v6587_v10 = vsel %vm452_vm0, %v6582_v25, %v6586_v62  ;;  %v9089_v51 = vld [vmem:[%s9201_s20 + $0x5c] sm:$0xf]  ;;  %v6265_v29 = vadd.f32 %v12324_v43, %v5891_v1  ;;  %v9091_v43 = vld [vmem:[%s9201_s20 + $0x64] sm:$0xf] }
 0x7c4   : > { %7052 = vmatmul.bf16.gmra.mxu2 %v6886_v23  ;;  %v12372_v23 = vpop.f32.mrf.mxu0 }
 0x7c5   : > { %v7083_v33 = vadd.f32 %v7005_v19, %v6804_v30  ;;  %v7268_v19 = vrot.slane %v7125_v59, 2  ;;  %v7126_v30 = vunpack.c.l.bf16 %v9089_v51  ;;  %v12379_v59 = vpop.f32.mrf.mxu3 }
 0x7c7   : > { %v7168_v22 = vadd.f32 %v12181_v45, %v7083_v33  ;;  %v7013_v24 = vpop.f32.mrf.mxu2  ;;  %v7269_v20 = vsel %vm1349_vm2, %v7266_v11, %v7268_v19  ;;  %v6264_v33 = vadd.f32 %v12308_v26, %v12071_v52  ;;  %v7270_v36 = vrot.slane %v7126_v30, 2  ;;  %v9090_v52 = vld [vmem:[%s9201_s20 + $0x60] sm:$0xf] }
 0x7c8   : > { %v6888_v11 = vsel %vm1042_vm1, %v6885_v55, %v6887_v8  ;;  %v7127_v26 = vunpack.c.l.bf16 %v9090_v52 }
 0x7c9   : > { %v7371_v47 = vadd.f32 %v7267_v63, %v7168_v22  ;;  %v6592_v22 = vshll.u32 %v12343_v6, 16 }
 0x7ca   : > { %v6729_v13 = vpop.f32.mrf.mxu1 }
 0x7cb   : > { %7411 = vst [vmem:[%s12193_s11 + $0x78] sm:$0xff] %v7371_v47  ;;  %v6805_v16 = vadd.f32 %v6729_v13, %v6263_v28  ;;  %v6327_v28 = vld [vmem:[#allocation2 + $0xb4] sm:$0x1]  ;;  %v7271_v13 = vsel %vm1349_vm2, %v7268_v19, %v7270_v36 }
 0x7cc   : > { %v6426_v55 = vunpack.c.l.b16 %v6327_v28 }
 0x7cd   : > { %v7084_v9 = vadd.f32 %v7008_v38, %v6805_v16  ;;  %6768 = vmatmul.bf16.gmra.mxu1 %v6587_v10  ;;  %v6588_v10 = vshrl.u32 %v12318_v7, 16  ;;  %v5892_v7 = vadd.f32 %v12301_v58, %v12081_v32 }
 0x7cf   : > { %v7169_v31 = vadd.f32 %v12181_v45, %v7084_v9  ;;  %v7015_v5 = vpop.f32.mrf.mxu2  ;;  %v6594_v9 = vrot.slane %v6592_v22, 1  ;;  %v6590_v30 = vor.u32 %v6588_v10, %v6586_v62  ;;  %v6266_v28 = vadd.f32 %v12339_v42, %v5892_v7 }
 0x7d1   : > { %v7372_v17 = vadd.f32 %v7269_v20, %v7169_v31  ;;  %v12389_v20 = vpop.f32.mrf.mxu0  ;;  %v6595_v31 = vsel %vm452_vm0, %v6590_v30, %v6594_v9 }
 0x7d2   : > { %v6731_v63 = vpop.f32.mrf.mxu1 }
 0x7d3   : > { %7412 = vst [vmem:[%s12193_s11 + $0x80] sm:$0xff] %v7372_v17  ;;  %v6806_v38 = vadd.f32 %v6731_v63, %v6264_v33  ;;  %v12394_v17 = vpack.c.b16 %v6426_v55, %v6426_v55  ;;  %v12398_v63 = vpop.f32.mrf.mxu3  ;;  %v9092_v55 = vld [vmem:[%s9201_s20 + $0x68] sm:$0xf] }
 0x7d4   : > { %7057 = vmatmul.bf16.gmra.mxu2 %v6888_v11  ;;  %v7128_v11 = vunpack.c.l.bf16 %v9091_v43  ;;  %v7129_v42 = vunpack.c.l.bf16 %v9092_v55 }
 0x7d5   : > { %v7085_v47 = vadd.f32 %v7010_v34, %v6806_v38  ;;  %v7272_v34 = vrot.slane %v7127_v26, 2  ;;  %v6889_v1 = vrot.slane %v12394_v17, 1  ;;  %v5893_v26 = vadd.f32 %v12315_v27, %v12088_v12 }
 0x7d6   : > { %v7274_v52 = vrot.slane %v7128_v11, 2  ;;  %v7276_v27 = vrot.slane %v7129_v42, 2  ;;  %v9093_v11 = vld [vmem:[%s9201_s20 + $0x6c] sm:$0xf] }
 0x7d7   : > { %v7170_v25 = vadd.f32 %v12181_v45, %v7085_v47  ;;  %v7018_v16 = vpop.f32.mrf.mxu2  ;;  %v7273_v38 = vsel %vm1349_vm2, %v7270_v36, %v7272_v34  ;;  %v6600_v36 = vshll.u32 %v12368_v48, 16 }
 0x7d8   : > { %v7275_v10 = vsel %vm1349_vm2, %v7272_v34, %v7274_v52 }
 0x7d9   : > { %v7373_v51 = vadd.f32 %v7271_v13, %v7170_v25  ;;  %v12405_v32 = vpop.f32.mrf.mxu0  ;;  %v6602_v30 = vrot.slane %v6600_v36, 1  ;;  %v9094_v36 = vld [vmem:[%s9201_s20 + $0x70] sm:$0xf] }
 0x7da   : > { %v6734_v56 = vpop.f32.mrf.mxu1 }
 0x7db   : > { %7413 = vst [vmem:[%s12193_s11 + $0x88] sm:$0xff] %v7373_v51  ;;  %v6807_v19 = vadd.f32 %v6734_v56, %v6265_v29  ;;  %v12415_v29 = vpop.f32.mrf.mxu3 }
 0x7dd   : > { %v7086_v33 = vadd.f32 %v7013_v24, %v6807_v19  ;;  %6773 = vmatmul.bf16.gmra.mxu1 %v6595_v31  ;;  %v6890_v24 = vsel %vm1042_vm1, %v6887_v8, %v6889_v1  ;;  %v6596_v8 = vshrl.u32 %v12343_v6, 16  ;;  %v6267_v31 = vadd.f32 %v12356_v54, %v5893_v26 }
 0x7de   : > { %v7277_v6 = vsel %vm1349_vm2, %v7274_v52, %v7276_v27  ;;  %v7131_v26 = vunpack.c.l.bf16 %v9094_v36  ;;  %v9097_v36 = vld [vmem:[%s9201_s20 + $0x7c] sm:$0xf] }
 0x7df   : > { %v7171_v62 = vadd.f32 %v12181_v45, %v7086_v33  ;;  %v7020_v22 = vpop.f32.mrf.mxu2 }
 0x7e1   : > { %v7374_v47 = vadd.f32 %v7273_v38, %v7171_v62  ;;  %v6207_v33 = vpop.f32.mrf.mxu0  ;;  %v5894_v38 = vadd.f32 %v12331_v15, %v12092_v2  ;;  %v7130_v62 = vunpack.c.l.bf16 %v9093_v11  ;;  %v6608_v2 = vshll.u32 %v12394_v17, 16 }
 0x7e2   : > { %v6736_v13 = vpop.f32.mrf.mxu1  ;;  %v5895_v15 = vadd.f32 %v12348_v35, %v12097_v57 }
 0x7e3   : > { %7414 = vst [vmem:[%s12193_s11 + $0x90] sm:$0xff] %v7374_v47  ;;  %v6808_v58 = vadd.f32 %v6736_v13, %v6266_v28  ;;  %v6268_v47 = vadd.f32 %v12372_v23, %v5894_v38  ;;  %v12427_v28 = vpop.f32.mrf.mxu3 }
 0x7e4   : > { %7062 = vmatmul.bf16.gmra.mxu2 %v6890_v24  ;;  %v6269_v17 = vadd.f32 %v12389_v20, %v5895_v15 }
 0x7e5   : > { %v7087_v25 = vadd.f32 %v7015_v5, %v6808_v58  ;;  %v6598_v5 = vor.u32 %v6596_v8, %v6594_v9  ;;  %v7278_v58 = vrot.slane %v7130_v62, 2 }
 0x7e7   : > { %v7172_v51 = vadd.f32 %v12181_v45, %v7087_v25  ;;  %v7023_v56 = vpop.f32.mrf.mxu2  ;;  %v6603_v34 = vsel %vm452_vm0, %v6598_v5, %v6602_v30  ;;  %v7279_v52 = vsel %vm1349_vm2, %v7276_v27, %v7278_v58  ;;  %v6604_v25 = vshrl.u32 %v12368_v48, 16  ;;  %v9095_v27 = vld [vmem:[%s9201_s20 + $0x74] sm:$0xf] }
 0x7e8   : > { %v5896_v48 = vadd.f32 %v12364_v14, %v12101_v40  ;;  %v7132_v5 = vunpack.c.l.bf16 %v9095_v27  ;;  %v5897_v40 = vadd.f32 %v12379_v59, %v12105_v49  ;;  %v5898_v49 = vadd.f32 %v12398_v63, %v12109_v37 }
 0x7e9   : > { %v7375_v19 = vadd.f32 %v7275_v10, %v7172_v51  ;;  %v6209_v23 = vpop.f32.mrf.mxu0  ;;  %v6606_v42 = vor.u32 %v6604_v25, %v6602_v30  ;;  %v6610_v51 = vrot.slane %v6608_v2, 1  ;;  %v5899_v37 = vadd.f32 %v12415_v29, %v12113_v41 }
 0x7ea   : > { %v6739_v12 = vpop.f32.mrf.mxu1  ;;  %v7282_v11 = vrot.slane %v7132_v5, 2  ;;  %v5900_v41 = vadd.f32 %v12427_v28, %v12117_v21 }
 0x7eb   : > { %7415 = vst [vmem:[%s12193_s11 + $0x98] sm:$0xff] %v7375_v19  ;;  %v6809_v7 = vadd.f32 %v6739_v12, %v6267_v31  ;;  %v7280_v31 = vrot.slane %v7131_v26, 2  ;;  %v12439_v35 = vpop.f32.mrf.mxu3  ;;  %v7134_v26 = vunpack.c.l.bf16 %v9097_v36 }
 0x7ec   : > { %v5901_v21 = vadd.f32 %v12439_v35, %v12121_v39 }
 0x7ed   : > { %v7088_v43 = vadd.f32 %v7018_v16, %v6809_v7  ;;  %6778 = vmatmul.bf16.gmra.mxu1 %v6603_v34  ;;  %v7281_v30 = vsel %vm1349_vm2, %v7278_v58, %v7280_v31 }
 0x7ef   : > { %v7173_v54 = vadd.f32 %v12181_v45, %v7088_v43  ;;  %v7025_v1 = vpop.f32.mrf.mxu2  ;;  %v6270_v43 = vadd.f32 %v12405_v32, %v5896_v48 }
 0x7f1   : > { %v7376_v9 = vadd.f32 %v7277_v6, %v7173_v54  ;;  %v6212_v34 = vpop.f32.mrf.mxu0  ;;  %v7283_v54 = vsel %vm1349_vm2, %v7280_v31, %v7282_v11 }
 0x7f2   : > { %v6741_v13 = vpop.f32.mrf.mxu1 }
 0x7f3   : > { %7416 = vst [vmem:[%s12193_s11 + $0xa0] sm:$0xff] %v7376_v9  ;;  %v6810_v24 = vadd.f32 %v6741_v13, %v6268_v47  ;;  %v9096_v9 = vld [vmem:[%s9201_s20 + $0x78] sm:$0xf] }
 0x7f4   : > { %v7133_v47 = vunpack.c.l.bf16 %v9096_v9 }
 0x7f5   : > { %v7089_v16 = vadd.f32 %v7020_v22, %v6810_v24  ;;  %v6611_v22 = vsel %vm452_vm0, %v6606_v42, %v6610_v51  ;;  %v6271_v24 = vadd.f32 %v6207_v33, %v5897_v40  ;;  %v6272_v51 = vadd.f32 %v6209_v23, %v5898_v49 }
 0x7f6   : > { %v7284_v15 = vrot.slane %v7133_v47, 2  ;;  %v6273_v23 = vadd.f32 %v6212_v34, %v5899_v37 }
 0x7f7   : > { %v7174_v10 = vadd.f32 %v12181_v45, %v7089_v16  ;;  %v7028_v55 = vpop.f32.mrf.mxu2 }
 0x7f9   : > { %v7377_v8 = vadd.f32 %v7279_v52, %v7174_v10  ;;  %v6214_v16 = vpop.f32.mrf.mxu0 }
 0x7fa   : > { %v6744_v19 = vpop.f32.mrf.mxu1 }
 0x7fb   : > { %7417 = vst [vmem:[%s12193_s11 + $0xa8] sm:$0xff] %v7377_v8  ;;  %v6811_v57 = vadd.f32 %v6744_v19, %v6269_v17  ;;  %v7286_v17 = vrot.slane %v7134_v26, 2 }
 0x7fd   : > { %v7090_v12 = vadd.f32 %v7023_v56, %v6811_v57  ;;  %6783 = vmatmul.bf16.gmra.mxu1 %v6611_v22  ;;  %v12451_v56 = vpop.f32.mrf.mxu3  ;;  %v9098_v57 = vld [vmem:[%s9201_s20 + $0x80] sm:$0xf] }
 0x7fe   : > { %v7135_v22 = vunpack.c.l.bf16 %v9098_v57  ;;  %v5902_v39 = vadd.f32 %v12451_v56, %v12125_v4 }
 0x7ff   : > { %v7175_v20 = vadd.f32 %v12181_v45, %v7090_v12  ;;  %v7030_v7 = vpop.f32.mrf.mxu2 }
 0x801   : > { %v7378_v38 = vadd.f32 %v7281_v30, %v7175_v20  ;;  %v6217_v31 = vpop.f32.mrf.mxu0  ;;  %v7288_v20 = vrot.slane %v7135_v22, 2  ;;  %v9102_v22 = vld [vmem:[%s9201_s20 + $0x90] sm:$0xf] }
 0x802   : > { %v6746_v6 = vpop.f32.mrf.mxu1 }
 0x803   : > { %7418 = vst [vmem:[%s12193_s11 + $0xb0] sm:$0xff] %v7378_v38  ;;  %v6812_v62 = vadd.f32 %v6746_v6, %v6270_v43  ;;  %v9099_v43 = vld [vmem:[%s9201_s20 + $0x84] sm:$0xf] }
 0x804   : > { %v7136_v6 = vunpack.c.l.bf16 %v9099_v43 }
 0x805   : > { %v7091_v14 = vadd.f32 %v7025_v1, %v6812_v62  ;;  %v7285_v1 = vsel %vm1349_vm2, %v7282_v11, %v7284_v15  ;;  %v12462_v10 = vpop.f32.mrf.mxu3 }
 0x806   : > { %v7290_v9 = vrot.slane %v7136_v6, 2  ;;  %v5903_v4 = vadd.f32 %v12462_v10, %v12129_v46  ;;  %v9103_v6 = vld [vmem:[%s9201_s20 + $0x94] sm:$0xf] }
 0x807   : > { %v7176_v13 = vadd.f32 %v12181_v45, %v7091_v14  ;;  %v7033_v58 = vpop.f32.mrf.mxu2  ;;  %v6274_v14 = vadd.f32 %v6214_v16, %v5900_v41  ;;  %v6275_v16 = vadd.f32 %v6217_v31, %v5901_v21 }
 0x809   : > { %v7379_v32 = vadd.f32 %v7283_v54, %v7176_v13  ;;  %v6219_v11 = vpop.f32.mrf.mxu0 }
 0x80a   : > { %v6749_v2 = vpop.f32.mrf.mxu1 }
 0x80b   : > { %7419 = vst [vmem:[%s12193_s11 + $0xb8] sm:$0xff] %v7379_v32  ;;  %v6813_v52 = vadd.f32 %v6749_v2, %v6271_v24  ;;  %v9100_v32 = vld [vmem:[%s9201_s20 + $0x88] sm:$0xf] }
 0x80c   : > { %v7137_v24 = vunpack.c.l.bf16 %v9100_v32 }
 0x80d   : > { %v7092_v59 = vadd.f32 %v7028_v55, %v6813_v52  ;;  %v7287_v55 = vsel %vm1349_vm2, %v7284_v15, %v7286_v17  ;;  %v12470_v27 = vpop.f32.mrf.mxu3 }
 0x80e   : > { %v5904_v46 = vadd.f32 %v12470_v27, %v12133_v44 }
 0x80f   : > { %v7177_v25 = vadd.f32 %v12181_v45, %v7092_v59  ;;  %v7035_v33 = vpop.f32.mrf.mxu2 }
 0x811   : > { %v7380_v42 = vadd.f32 %v7285_v1, %v7177_v25  ;;  %v6222_v15 = vpop.f32.mrf.mxu0  ;;  %v7292_v1 = vrot.slane %v7137_v24, 2 }
 0x812   : > { %v6751_v8 = vpop.f32.mrf.mxu1 }
 0x813   : > { %7420 = vst [vmem:[%s12193_s11 + $0xc0] sm:$0xff] %v7380_v42  ;;  %v6814_v19 = vadd.f32 %v6751_v8, %v6272_v51  ;;  %v7293_v25 = vsel %vm1349_vm2, %v7290_v9, %v7292_v1 }
 0x815   : > { %v7093_v63 = vadd.f32 %v7030_v7, %v6814_v19  ;;  %v7289_v7 = vsel %vm1349_vm2, %v7286_v17, %v7288_v20  ;;  %v5853_v13 = vpop.f32.mrf.mxu3  ;;  %v6276_v17 = vadd.f32 %v6219_v11, %v5902_v39  ;;  %v7140_v11 = vunpack.c.l.bf16 %v9103_v6  ;;  %v9105_v39 = vld [vmem:[%s9201_s20 + $0x9c] sm:$0xf] }
 0x816   : > { %v5905_v21 = vadd.f32 %v5853_v13, %v12137_v53 }
 0x817   : > { %v7178_v48 = vadd.f32 %v12181_v45, %v7093_v63  ;;  %v7038_v12 = vpop.f32.mrf.mxu2 }
 0x819   : > { %v7381_v30 = vadd.f32 %v7287_v55, %v7178_v48  ;;  %v6224_v37 = vpop.f32.mrf.mxu0  ;;  %v7139_v48 = vunpack.c.l.bf16 %v9102_v22 }
 0x81a   : > { %v6754_v5 = vpop.f32.mrf.mxu1 }
 0x81b   : > { %7421 = vst [vmem:[%s12193_s11 + $0xc8] sm:$0xff] %v7381_v30  ;;  %v6815_v38 = vadd.f32 %v6754_v5, %v6273_v23  ;;  %v6277_v5 = vadd.f32 %v6222_v15, %v5903_v4 }
 0x81d   : > { %v7094_v29 = vadd.f32 %v7033_v58, %v6815_v38  ;;  %v7291_v58 = vsel %vm1349_vm2, %v7288_v20, %v7290_v9  ;;  %v5855_v26 = vpop.f32.mrf.mxu3  ;;  %v7296_v38 = vrot.slane %v7139_v48, 2  ;;  %v7298_v9 = vrot.slane %v7140_v11, 2 }
 0x81e   : > { %v5906_v53 = vadd.f32 %v5855_v26, %v12141_v3 }
 0x81f   : > { %v7179_v62 = vadd.f32 %v12181_v45, %v7094_v29  ;;  %v7040_v34 = vpop.f32.mrf.mxu2  ;;  %v7299_v27 = vsel %vm1349_vm2, %v7296_v38, %v7298_v9 }
 0x821   : > { %v7382_v40 = vadd.f32 %v7289_v7, %v7179_v62  ;;  %v6227_v29 = vpop.f32.mrf.mxu0 }
 0x822   : > { %v6756_v54 = vpop.f32.mrf.mxu1 }
 0x823   : > { %7422 = vst [vmem:[%s12193_s11 + $0xd0] sm:$0xff] %v7382_v40  ;;  %v6816_v47 = vadd.f32 %v6756_v54, %v6274_v14  ;;  %v6278_v40 = vadd.f32 %v6224_v37, %v5904_v46 }
 0x825   : > { %v7095_v28 = vadd.f32 %v7035_v33, %v6816_v47  ;;  %v9101_v33 = vld [vmem:[%s9201_s20 + $0x8c] sm:$0xf]  ;;  %v5858_v30 = vpop.f32.mrf.mxu3 }
 0x826   : > { %v7138_v42 = vunpack.c.l.bf16 %v9101_v33 }
 0x827   : > { %v7180_v2 = vadd.f32 %v12181_v45, %v7095_v28  ;;  %v7043_v49 = vpop.f32.mrf.mxu2  ;;  %v9104_v28 = vld [vmem:[%s9201_s20 + $0x98] sm:$0xf] }
 0x828   : > { %v7294_v31 = vrot.slane %v7138_v42, 2 }
 0x829   : > { %v7383_v52 = vadd.f32 %v7291_v58, %v7180_v2  ;;  %v7141_v58 = vunpack.c.l.bf16 %v9104_v28  ;;  %v6229_v32 = vpop.f32.mrf.mxu0 }
 0x82a   : > { %v6759_v59 = vpop.f32.mrf.mxu1  ;;  %v7295_v57 = vsel %vm1349_vm2, %v7292_v1, %v7294_v31  ;;  %v7297_v43 = vsel %vm1349_vm2, %v7294_v31, %v7296_v38 }
 0x82b   : > { %7423 = vst [vmem:[%s12193_s11 + $0xd8] sm:$0xff] %v7383_v52  ;;  %v6817_v36 = vadd.f32 %v6759_v59, %v6275_v16  ;;  %v6279_v52 = vadd.f32 %v6227_v29, %v5905_v21 }
 0x82d   : > { %v7096_v35 = vadd.f32 %v7038_v12, %v6817_v36  ;;  %v5860_v14 = vpop.f32.mrf.mxu3 }
 0x82f   : > { %v7181_v51 = vadd.f32 %v12181_v45, %v7096_v35  ;;  %v7045_v55 = vpop.f32.mrf.mxu2  ;;  %v7142_v35 = vunpack.c.l.bf16 %v9105_v39 }
 0x831   : > { %v7384_v8 = vadd.f32 %v7293_v25, %v7181_v51  ;;  %v6232_v33 = vpop.f32.mrf.mxu0  ;;  %v6280_v51 = vadd.f32 %v6229_v32, %v5906_v53  ;;  %v7302_v3 = vrot.slane %v7142_v35, 2 }
 0x832   : > { %v6761_v19 = vpop.f32.mrf.mxu1 }
 0x833   : > { %7424 = vst [vmem:[%s12193_s11 + $0xe0] sm:$0xff] %v7384_v8  ;;  %v6818_v63 = vadd.f32 %v6761_v19, %v6276_v17  ;;  %v5907_v19 = vadd.f32 %v5858_v30, %v12145_v50  ;;  %v5908_v50 = vadd.f32 %v5860_v14, %v12149_v18 }
 0x835   : > { %v7097_v56 = vadd.f32 %v7040_v34, %v6818_v63  ;;  %v5863_v1 = vpop.f32.mrf.mxu3  ;;  %v6281_v22 = vadd.f32 %v6232_v33, %v5907_v19 }
 0x837   : > { %v7182_v12 = vadd.f32 %v12181_v45, %v7097_v56  ;;  %v7048_v7 = vpop.f32.mrf.mxu2 }
 0x839   : > { %v7385_v23 = vadd.f32 %v7295_v57, %v7182_v12 }
 0x83a   : > { %v6764_v20 = vpop.f32.mrf.mxu1 }
 0x83b   : > { %7425 = vst [vmem:[%s12193_s11 + $0xe8] sm:$0xff] %v7385_v23  ;;  %v6819_v41 = vadd.f32 %v6764_v20, %v6277_v5  ;;  %v6234_v5 = vpop.f32.mrf.mxu0 }
 0x83d   : > { %v7098_v10 = vadd.f32 %v7043_v49, %v6819_v41  ;;  %v7300_v49 = vrot.slane %v7141_v58, 2  ;;  %v5865_v37 = vpop.f32.mrf.mxu3  ;;  %v9108_v41 = vld [vmem:[%s9201_s20 + $0xa4] sm:$0xf] }
 0x83e   : > { %v7144_v29 = vunpack.c.l.bf16 %v9108_v41 }
 0x83f   : > { %v7183_v62 = vadd.f32 %v12181_v45, %v7098_v10  ;;  %v7050_v2 = vpop.f32.mrf.mxu2  ;;  %v7301_v36 = vsel %vm1349_vm2, %v7298_v9, %v7300_v49  ;;  %v7303_v63 = vsel %vm1349_vm2, %v7300_v49, %v7302_v3  ;;  %v9109_v9 = vld [vmem:[%s9201_s20 + $0xa8] sm:$0xf] }
 0x840   : > { %v7306_v11 = vrot.slane %v7144_v29, 2 }
 0x841   : > { %v7386_v34 = vadd.f32 %v7297_v43, %v7183_v62  ;;  %v6282_v43 = vadd.f32 %v6234_v5, %v5908_v50 }
 0x842   : > { %v6766_v54 = vpop.f32.mrf.mxu1 }
 0x843   : > { %7426 = vst [vmem:[%s12193_s11 + $0xf0] sm:$0xff] %v7386_v34  ;;  %v6820_v47 = vadd.f32 %v6766_v54, %v6278_v40  ;;  %v5909_v34 = vadd.f32 %v5863_v1, %v12155_v60  ;;  %v6237_v18 = vpop.f32.mrf.mxu0  ;;  %v5910_v60 = vadd.f32 %v5865_v37, %v12160_v61  ;;  %v9111_v61 = vld [vmem:[%s9201_s20 + $0xb0] sm:$0xf] }
 0x845   : > { %v7099_v44 = vadd.f32 %v7045_v55, %v6820_v47  ;;  %v9107_v55 = vld [vmem:[%s9201_s20 + $0xa0] sm:$0xf]  ;;  %v5868_v10 = vpop.f32.mrf.mxu3  ;;  %v7145_v47 = vunpack.c.l.bf16 %v9109_v9 }
 0x846   : > { %v7143_v4 = vunpack.c.l.bf16 %v9107_v55 }
 0x847   : > { %v7184_v24 = vadd.f32 %v12181_v45, %v7099_v44  ;;  %v12514_v45 = vld [vmem:[%s12558_s4] ss:$0 sm:$0xff]  ;;  %v7053_v8 = vpop.f32.mrf.mxu2  ;;  %v7308_v32 = vrot.slane %v7145_v47, 2 }
 0x848   : > { %v7304_v12 = vrot.slane %v7143_v4, 2 }
 0x849   : > { %v7387_v15 = vadd.f32 %v7299_v27, %v7184_v24  ;;  %v6283_v27 = vadd.f32 %v6237_v18, %v5909_v34 }
 0x84a   : > { %v6769_v16 = vpop.f32.mrf.mxu1  ;;  %v7305_v38 = vsel %vm1349_vm2, %v7302_v3, %v7304_v12  ;;  %v7307_v54 = vsel %vm1349_vm2, %v7304_v12, %v7306_v11 }
 0x84b   : > { %7427 = vst [vmem:[%s12193_s11 + $0xf8] sm:$0xff] %v7387_v15  ;;  %v6821_v59 = vadd.f32 %v6769_v16, %v6279_v52  ;;  %v7309_v15 = vsel %vm1349_vm2, %v7306_v11, %v7308_v32  ;;  %v9110_v52 = vld [vmem:[%s9201_s20 + $0xac] sm:$0xf] }
 0x84c   : > { %v7146_v16 = vunpack.c.l.bf16 %v9110_v52 }
 0x84d   : > { %v7100_v13 = vadd.f32 %v7048_v7, %v6821_v59  ;;  %v5870_v28 = vpop.f32.mrf.mxu3  ;;  %v6239_v59 = vpop.f32.mrf.mxu0 }
 0x84e   : > { %v7310_v39 = vrot.slane %v7146_v16, 2 }
 0x84f   : > { %v7185_v25 = vadd.f32 %v12514_v45, %v7100_v13  ;;  %v7055_v20 = vpop.f32.mrf.mxu2  ;;  %v6284_v13 = vadd.f32 %v6239_v59, %v5910_v60 }
 0x851   : > { %v7388_v42 = vadd.f32 %v7301_v36, %v7185_v25 }
 0x852   : > { %v6771_v17 = vpop.f32.mrf.mxu1 }
 0x853   : > { %7428 = vst [vmem:[%s12193_s11 + $0x100] sm:$0xff] %v7388_v42  ;;  %v6822_v26 = vadd.f32 %v6771_v17, %v6280_v51  ;;  %v7147_v42 = vunpack.c.l.bf16 %v9111_v61  ;;  %v7311_v51 = vsel %vm1349_vm2, %v7308_v32, %v7310_v39 }
 0x855   : > { %v7101_v31 = vadd.f32 %v7050_v2, %v6822_v26  ;;  %v6242_v25 = vpop.f32.mrf.mxu3  ;;  %v7312_v19 = vrot.slane %v7147_v42, 2 }
 0x857   : > { %v7186_v56 = vadd.f32 %v12514_v45, %v7101_v31  ;;  %v7058_v14 = vpop.f32.mrf.mxu2 }
 0x859   : > { %v7389_v57 = vadd.f32 %v7303_v63, %v7186_v56  ;;  %v7313_v56 = vsel %vm1349_vm2, %v7310_v39, %v7312_v19 }
 0x85a   : > { %v6774_v48 = vpop.f32.mrf.mxu1 }
 0x85b   : > { %7429 = vst [vmem:[%s12193_s11 + $0x108] sm:$0xff] %v7389_v57  ;;  %v6823_v23 = vadd.f32 %v6774_v48, %v6281_v22  ;;  %v9112_v57 = vld [vmem:[%s9201_s20 + $0xb4] sm:$0xf] }
 0x85c   : > { %v7148_v22 = vunpack.c.l.bf16 %v9112_v57  ;;  %v13171_v48 = vld [vmem:[#allocation18_spill] sm:$0xff] }
 0x85d   : > { %v7102_v30 = vadd.f32 %v7053_v8, %v6823_v23  ;;  %v5911_v8 = vadd.f32 %v5868_v10, %v12166_v0  ;;  %v6244_v4 = vpop.f32.mrf.mxu3  ;;  %v5912_v12 = vadd.f32 %v5870_v28, %v13171_v48 }
 0x85e   : > { %v7314_v50 = vrot.slane %v7148_v22, 2 }
 0x85f   : > { %v7187_v46 = vadd.f32 %v12514_v45, %v7102_v30  ;;  %v7060_v1 = vpop.f32.mrf.mxu2  ;;  %v6285_v3 = vadd.f32 %v6242_v25, %v5911_v8  ;;  %v6286_v23 = vadd.f32 %v6244_v4, %v5912_v12 }
 0x860   : > { %v7315_v29 = vsel %vm1349_vm2, %v7312_v19, %v7314_v50 }
 0x861   : > { %v7390_v7 = vadd.f32 %v7305_v38, %v7187_v46 }
 0x862   : > { %v6776_v6 = vpop.f32.mrf.mxu1 }
 0x863   : > { %7430 = vst [vmem:[%s12193_s11 + $0x110] sm:$0xff] %v7390_v7  ;;  %v6824_v62 = vadd.f32 %v6776_v6, %v6282_v43 }
 0x865   : > { %v7103_v40 = vadd.f32 %v7055_v20, %v6824_v62 }
 0x867   : > { %v7188_v21 = vadd.f32 %v12514_v45, %v7103_v40  ;;  %v7063_v31 = vpop.f32.mrf.mxu2 }
 0x869   : > { %v7391_v44 = vadd.f32 %v7307_v54, %v7188_v21 }
 0x86a   : > { %v6779_v58 = vpop.f32.mrf.mxu1 }
 0x86b   : > { %7431 = vst [vmem:[%s12193_s11 + $0x118] sm:$0xff] %v7391_v44  ;;  %v6825_v24 = vadd.f32 %v6779_v58, %v6283_v27 }
 0x86d   : > { %v7104_v2 = vadd.f32 %v7058_v14, %v6825_v24 }
 0x86f   : > { %v7189_v49 = vadd.f32 %v12514_v45, %v7104_v2  ;;  %v7065_v38 = vpop.f32.mrf.mxu2 }
 0x871   : > { %v7392_v53 = vadd.f32 %v7309_v15, %v7189_v49 }
 0x872   : > { %v6781_v36 = vpop.f32.mrf.mxu1 }
 0x873   : > { %7432 = vst [vmem:[%s12193_s11 + $0x120] sm:$0xff] %v7392_v53  ;;  %v6826_v35 = vadd.f32 %v6781_v36, %v6284_v13 }
 0x875   : > { %v7105_v33 = vadd.f32 %v7060_v1, %v6826_v35 }
 0x877   : > { %v7190_v17 = vadd.f32 %v12514_v45, %v7105_v33 }
 0x879   : > { %v7393_v26 = vadd.f32 %v7311_v51, %v7190_v17 }
 0x87a   : > { %v6784_v37 = vpop.f32.mrf.mxu1 }
 0x87b   : > { %7433 = vst [vmem:[%s12193_s11 + $0x128] sm:$0xff] %v7393_v26  ;;  %v6827_v63 = vadd.f32 %v6784_v37, %v6285_v3 }
 0x87d   : > { %v7106_v55 = vadd.f32 %v7063_v31, %v6827_v63 }
 0x87f   : > { %v7191_v0 = vadd.f32 %v12514_v45, %v7106_v55 }
 0x881   : > { %v7394_v5 = vadd.f32 %v7313_v56, %v7191_v0 }
 0x882   : > { %v6786_v20 = vpop.f32.mrf.mxu1 }
 0x883   : > { %7434 = vst [vmem:[%s12193_s11 + $0x130] sm:$0xff] %v7394_v5  ;;  %v6828_v30 = vadd.f32 %v6786_v20, %v6286_v23 }
 0x885   : > { %v7107_v41 = vadd.f32 %v7065_v38, %v6828_v30 }
 0x887   : > { %v7192_v46 = vadd.f32 %v12514_v45, %v7107_v41 }
 0x889   : > { %v7395_v10 = vadd.f32 %v7315_v29, %v7192_v46 }
 0x88b   : > { %7435 = vst [vmem:[%s12193_s11 + $0x138] sm:$0xff] %v7395_v10 }
 0x88c PF: > { %s16_s21 = sadd.s32 1, %s9122_s21  }
 0x88d   : > { %p13_p4 = scmp.ge.s32.totalorder %s16_s21, 4  }
 0x88f   :  { %15 = sbr.rel (!%p13_p4) target bundleno = 1 (0x1), region = 90 }

</bundles_post_ra>
